<compile_context>
chip_gen: v5e
topology: v5e:2x2
jax: 0.10.0
libtpu: 0.0.40
codegen_flags: <defaults>
</compile_context>

<pallas_src>
import jax
import jax.numpy as jnp
import numpy as np
from jax.experimental import pallas as pl
from jax.experimental.pallas import tpu as pltpu

KS = 5    # conv kernel size
ST = 2    # conv stride
EPS = 1e-5


def _conv_out(n):
    return (n - KS) // ST + 1


# ----------------------------- fused Pallas kernel -------------------------- #

def _make_fused_kernel(N, C1, H1, W1, C2, H2, W2, C3, H3, W3, A):
    """All shape parameters are static Python ints."""

    def gather_patches(src_ref, p_ref, cin, h, w, ho, wo):
        # src_ref: (N*h*w, cin)           NHWC-flattened activation (VMEM)
        # p_ref:   (N*ho*wo, KS*KS*cin)   im2col patches (VMEM), (kh, kw, c) order
        # Every index below is a trace-time constant -> static strided slices.
        for n in range(N):
            for r in range(ho):
                dst0 = (n * ho + r) * wo
                for i in range(KS):
                    src0 = n * h * w + (ST * r + i) * w
                    for j in range(KS):
                        t = i * KS + j
                        piece = src_ref[pl.ds(src0 + j, wo, stride=ST), :]
                        p_ref[pl.ds(dst0, wo), pl.ds(t * cin, cin)] = piece

    def conv_gemm(p_ref, w_ref, s_ref, dst_ref):
        # bias + eval-mode BN are pre-folded into w_ref / s_ref
        y = jnp.dot(p_ref[...], w_ref[...], preferred_element_type=jnp.float32)
        dst_ref[...] = jnp.maximum(y + s_ref[...], 0.0)

    def kernel(p1_ref, w1_ref, s1_ref, w2_ref, s2_ref, w3_ref, s3_ref,
               hw_ref, hb_ref, o_ref, a1, p2, a2, p3, a3):
        # conv1: patches arrive pre-extracted (see wrapper), GEMM in VMEM.
        conv_gemm(p1_ref, w1_ref, s1_ref, a1)
        # conv2: im2col entirely in VMEM, then GEMM.
        gather_patches(a1, p2, C1, H1, W1, H2, W2)
        conv_gemm(p2, w2_ref, s2_ref, a2)
        # conv3
        gather_patches(a2, p3, C2, H2, W2, H3, W3)
        conv_gemm(p3, w3_ref, s3_ref, a3)
        # linear head.  a3 rows are ordered (n, h, w); head weights were
        # permuted to that order at parameter-preparation time.  Bias is the
        # accumulator's initial value (saves a separate epilogue add).
        S3 = H3 * W3
        out = jnp.broadcast_to(hb_ref[...], (N, A)).astype(jnp.float32)
        for sp in range(S3):
            act = a3[pl.ds(sp, N, stride=S3), :]        # (N, C3)
            wsl = hw_ref[pl.ds(sp * C3, C3), :]         # (C3, A)
            out = out + jnp.dot(act, wsl, preferred_element_type=jnp.float32)
        o_ref[...] = out

    return kernel


# ------------------------------ JAX wrapper ---------------------------------- #

@jax.jit
def dqn_forward(x_nchw, fp):
    N, C0, H0, W0 = x_nchw.shape
    H1, W1 = _conv_out(H0), _conv_out(W0)
    H2, W2 = _conv_out(H1), _conv_out(W1)
    H3, W3 = _conv_out(H2), _conv_out(W2)
    C1, C2, C3 = fp["w1"].shape[1], fp["w2"].shape[1], fp["w3"].shape[1]
    A = fp["hb"].shape[1]
    KK = KS * KS

    # Layer-1 im2col as a single XLA op: a one-hot patch-extraction conv whose
    # output feature order (kh, kw, cin) matches the folded GEMM weights.
    x_nhwc = jnp.transpose(x_nchw, (0, 2, 3, 1))
    patches = jax.lax.conv_general_dilated(
        x_nhwc, fp["extract"], window_strides=(ST, ST), padding="VALID",
        dimension_numbers=("NHWC", "HWIO", "NHWC"))       # (N, H1, W1, KK*C0)
    p1 = patches.reshape(N * H1 * W1, KK * C0)

    kernel = _make_fused_kernel(N, C1, H1, W1, C2, H2, W2, C3, H3, W3, A)
    operands = (p1, fp["w1"], fp["s1"], fp["w2"], fp["s2"],
                fp["w3"], fp["s3"], fp["hw"], fp["hb"])

    return pl.pallas_call(
        kernel,
        grid=(1,),
        in_specs=[pl.BlockSpec(op.shape, lambda i: (0, 0)) for op in operands],
        out_specs=pl.BlockSpec((N, A), lambda i: (0, 0)),
        out_shape=jax.ShapeDtypeStruct((N, A), jnp.float32),
        scratch_shapes=[
            pltpu.VMEM((N * H1 * W1, C1), jnp.float32),        # a1
            pltpu.VMEM((N * H2 * W2, KK * C1), jnp.float32),   # p2
            pltpu.VMEM((N * H2 * W2, C2), jnp.float32),        # a2
            pltpu.VMEM((N * H3 * W3, KK * C2), jnp.float32),   # p3
            pltpu.VMEM((N * H3 * W3, C3), jnp.float32),        # a3
        ],
        compiler_params=pltpu.CompilerParams(
            dimension_semantics=("arbitrary",)),
    )(*operands)


# ------------------------- one-time parameter folding ------------------------ #

def prepare_params(params):
    """Fold bias + eval-mode BN into the GEMM weights, permute head weights to
    the NHWC flatten order, and build the layer-1 patch-extraction kernel."""

    def fold(w, b, gamma, beta, mean, var):
        cout, cin, kh, kw = w.shape
        scale = gamma / jnp.sqrt(var + EPS)                             # (cout,)
        w2d = jnp.transpose(w, (2, 3, 1, 0)).reshape(kh * kw * cin, cout)
        w2d = w2d * scale[None, :]
        shift = (b * scale + beta - mean * scale).reshape(1, cout)
        return w2d, shift

    w1, s1 = fold(*params["l1"])
    w2, s2 = fold(*params["l2"])
    w3, s3 = fold(*params["l3"])

    # Head: PyTorch flattens NCHW as (c, h, w); the kernel's activations are
    # flattened (h, w, c), so permute the head columns once here.
    head_w, head_b = params["head_w"], params["head_b"]
    A, F = head_w.shape
    C3 = params["l3"][0].shape[0]
    S3 = F // C3
    hw = jnp.transpose(head_w.reshape(A, C3, S3), (2, 1, 0)).reshape(S3 * C3, A)
    hb = head_b.reshape(1, A)

    # One-hot HWIO kernel: patches[..., (i*kw + j)*cin + c] = x[..., 2h+i, 2w+j, c]
    cin, kh, kw = params["l1"][0].shape[1:]
    e = np.zeros((kh, kw, cin, kh * kw * cin), np.float32)
    for i in range(kh):
        for j in range(kw):
            for c in range(cin):
                e[i, j, c, (i * kw + j) * cin + c] = 1.0

    return {"w1": w1, "s1": s1, "w2": w2, "s2": s2, "w3": w3, "s3": s3,
            "hw": hw, "hb": hb, "extract": jnp.asarray(e)}


# --------------------------- pure-JAX reference ------------------------------ #

def _conv_bn_relu_ref(x, w, b, gamma, beta, mean, var, eps=EPS):
    y = jax.lax.conv_general_dilated(
        x, w, window_strides=(ST, ST), padding="VALID",
        dimension_numbers=("NCHW", "OIHW", "NCHW"))
    y = y + b.reshape(1, -1, 1, 1)
    scale = gamma / jnp.sqrt(var + eps)
    shift = beta - mean * scale
    y = y * scale.reshape(1, -1, 1, 1) + shift.reshape(1, -1, 1, 1)
    return jnp.maximum(y, 0.0)


def dqn_forward_ref(x_nchw, params):
    x = _conv_bn_relu_ref(x_nchw, *params["l1"])
    x = _conv_bn_relu_ref(x, *params["l2"])
    x = _conv_bn_relu_ref(x, *params["l3"])
    x = x.reshape(x.shape[0], -1)
    return x @ params["head_w"].T + params["head_b"]


# --------------------------------- params ------------------------------------ #

def init_params(key):
    ks = jax.random.split(key, 8)

    def conv_layer(kw_key, kb_key, cin, cout, k=KS):
        w = 0.1 * jax.random.normal(kw_key, (cout, cin, k, k), jnp.float32)
        b = 0.1 * jax.random.normal(kb_key, (cout,), jnp.float32)
        # BatchNorm2d fresh-init buffers (eval mode): gamma=1, beta=0, mean=0, var=1
        gamma = jnp.ones((cout,), jnp.float32)
        beta = jnp.zeros((cout,), jnp.float32)
        mean = jnp.zeros((cout,), jnp.float32)
        var = jnp.ones((cout,), jnp.float32)
        return (w, b, gamma, beta, mean, var)

    return {
        "l1": conv_layer(ks[0], ks[1], 3, 16),
        "l2": conv_layer(ks[2], ks[3], 16, 32),
        "l3": conv_layer(ks[4], ks[5], 32, 32),
        "head_w": 0.1 * jax.random.normal(ks[6], (2, 96), jnp.float32),
        "head_b": 0.1 * jax.random.normal(ks[7], (2,), jnp.float32),
    }


# ---------------------------------- main -------------------------------------- #

if __name__ == "__main__":
    key = jax.random.PRNGKey(0)
    pkey, xkey = jax.random.split(key)
    params = init_params(pkey)
    fparams = prepare_params(params)      # one-time host-side fold / permute

    # Spatial size chosen so that three (k=5, s=2) VALID convs give 32*1*3 = 96
    # features, matching nn.Linear(96, 2).
    x = jax.random.normal(xkey, (2, 3, 30, 46), jnp.float32)  # NCHW

    out = jax.block_until_ready(dqn_forward(x, fparams))
    assert out.shape == (2, 2), out.shape

    ref = jax.block_until_ready(dqn_forward_ref(x, params))
    np.testing.assert_allclose(np.asarray(out), np.asarray(ref),
                               rtol=1e-4, atol=1e-4)
    print("KERNEL_OK")
</pallas_src>

<mosaic_0001>
module attributes {stable_mosaic.version = 11 : i64} {
  func.func @kernel(%arg0: i32, %arg1: memref<546x75xf32, #tpu.memory_space<vmem>>, %arg2: memref<75x16xf32, #tpu.memory_space<vmem>>, %arg3: memref<1x16xf32, #tpu.memory_space<vmem>>, %arg4: memref<400x32xf32, #tpu.memory_space<vmem>>, %arg5: memref<1x32xf32, #tpu.memory_space<vmem>>, %arg6: memref<800x32xf32, #tpu.memory_space<vmem>>, %arg7: memref<1x32xf32, #tpu.memory_space<vmem>>, %arg8: memref<96x2xf32, #tpu.memory_space<vmem>>, %arg9: memref<1x2xf32, #tpu.memory_space<vmem>>, %arg10: memref<2x2xf32, #tpu.memory_space<vmem>>, %arg11: memref<546x16xf32, #tpu.memory_space<vmem>>, %arg12: memref<90x400xf32, #tpu.memory_space<vmem>>, %arg13: memref<90x32xf32, #tpu.memory_space<vmem>>, %arg14: memref<6x800xf32, #tpu.memory_space<vmem>>, %arg15: memref<6x32xf32, #tpu.memory_space<vmem>>) attributes {dimension_semantics = [#tpu.dimension_semantics<arbitrary>], iteration_bounds = array<i64: 1>, scalar_prefetch = 0 : i64, scratch_operands = 5 : i64, tpu.core_type = #tpu.core_type<tc>, window_params = [{pipeline_mode = #tpu.pipeline_mode<synchronous>, transform_indices = @transform_0, window_bounds = array<i64: 546, 75>}, {pipeline_mode = #tpu.pipeline_mode<synchronous>, transform_indices = @transform_1, window_bounds = array<i64: 75, 16>}, {pipeline_mode = #tpu.pipeline_mode<synchronous>, transform_indices = @transform_2, window_bounds = array<i64: 1, 16>}, {pipeline_mode = #tpu.pipeline_mode<synchronous>, transform_indices = @transform_3, window_bounds = array<i64: 400, 32>}, {pipeline_mode = #tpu.pipeline_mode<synchronous>, transform_indices = @transform_4, window_bounds = array<i64: 1, 32>}, {pipeline_mode = #tpu.pipeline_mode<synchronous>, transform_indices = @transform_5, window_bounds = array<i64: 800, 32>}, {pipeline_mode = #tpu.pipeline_mode<synchronous>, transform_indices = @transform_6, window_bounds = array<i64: 1, 32>}, {pipeline_mode = #tpu.pipeline_mode<synchronous>, transform_indices = @transform_7, window_bounds = array<i64: 96, 2>}, {pipeline_mode = #tpu.pipeline_mode<synchronous>, transform_indices = @transform_8, window_bounds = array<i64: 1, 2>}, {pipeline_mode = #tpu.pipeline_mode<synchronous>, transform_indices = @transform_9, window_bounds = array<i64: 2, 2>}]} {
    %c0 = arith.constant 0 : index
    %c0_0 = arith.constant 0 : index
    %0 = vector.load %arg1[%c0, %c0_0] : memref<546x75xf32, #tpu.memory_space<vmem>>, vector<546x75xf32>
    %c0_1 = arith.constant 0 : index
    %c0_2 = arith.constant 0 : index
    %1 = vector.load %arg2[%c0_1, %c0_2] : memref<75x16xf32, #tpu.memory_space<vmem>>, vector<75x16xf32>
    %cst = arith.constant dense<0.000000e+00> : vector<546x16xf32>
    %2 = tpu.matmul %0, %1, %cst {dimension_numbers = #tpu.dot_dimension_numbers<[1], [0], [0], [1], [0, 0, 1, 1], [], []>} : vector<546x75xf32>, vector<75x16xf32>, vector<546x16xf32> -> vector<546x16xf32>
    %c0_3 = arith.constant 0 : index
    %c0_4 = arith.constant 0 : index
    %3 = vector.load %arg3[%c0_3, %c0_4] : memref<1x16xf32, #tpu.memory_space<vmem>>, vector<1x16xf32>
    %4 = vector.broadcast %3 : vector<1x16xf32> to vector<546x16xf32>
    %5 = arith.addf %2, %4 : vector<546x16xf32>
    %cst_5 = arith.constant 0.000000e+00 : f32
    %6 = vector.broadcast %cst_5 : f32 to vector<546x16xf32>
    %7 = arith.maximumf %5, %6 : vector<546x16xf32>
    %c0_6 = arith.constant 0 : index
    %c0_7 = arith.constant 0 : index
    %8 = vector.load %arg11[%c0_6, %c0_7] : memref<546x16xf32, #tpu.memory_space<vmem>>, vector<546x16xf32>
    tpu.vector_store %arg11[%c0_6, %c0_7], %7 {strides = array<i32>} : memref<546x16xf32, #tpu.memory_space<vmem>>, vector<546x16xf32>,
    %c0_8 = arith.constant 0 : index
    %c0_9 = arith.constant 0 : index
    %9 = tpu.strided_load %arg11[%c0_8, %c0_9] {strides = array<i32: 2, 1>} : memref<546x16xf32, #tpu.memory_space<vmem>>, vector<9x16xf32>
    %c0_10 = arith.constant 0 : index
    %c0_11 = arith.constant 0 : index
    %10 = vector.load %arg12[%c0_10, %c0_11] : memref<90x400xf32, #tpu.memory_space<vmem>>, vector<9x16xf32>
    tpu.vector_store %arg12[%c0_10, %c0_11], %9 {strides = array<i32>} : memref<90x400xf32, #tpu.memory_space<vmem>>, vector<9x16xf32>,
    %c1 = arith.constant 1 : index
    %c0_12 = arith.constant 0 : index
    %11 = tpu.strided_load %arg11[%c1, %c0_12] {strides = array<i32: 2, 1>} : memref<546x16xf32, #tpu.memory_space<vmem>>, vector<9x16xf32>
    %c0_13 = arith.constant 0 : index
    %c16 = arith.constant 16 : index
    %12 = vector.load %arg12[%c0_13, %c16] : memref<90x400xf32, #tpu.memory_space<vmem>>, vector<9x16xf32>
    tpu.vector_store %arg12[%c0_13, %c16], %11 {strides = array<i32>} : memref<90x400xf32, #tpu.memory_space<vmem>>, vector<9x16xf32>,
    %c2 = arith.constant 2 : index
    %c0_14 = arith.constant 0 : index
    %13 = tpu.strided_load %arg11[%c2, %c0_14] {strides = array<i32: 2, 1>} : memref<546x16xf32, #tpu.memory_space<vmem>>, vector<9x16xf32>
    %c0_15 = arith.constant 0 : index
    %c32 = arith.constant 32 : index
    %14 = vector.load %arg12[%c0_15, %c32] : memref<90x400xf32, #tpu.memory_space<vmem>>, vector<9x16xf32>
    tpu.vector_store %arg12[%c0_15, %c32], %13 {strides = array<i32>} : memref<90x400xf32, #tpu.memory_space<vmem>>, vector<9x16xf32>,
    %c3 = arith.constant 3 : index
    %c0_16 = arith.constant 0 : index
    %15 = tpu.strided_load %arg11[%c3, %c0_16] {strides = array<i32: 2, 1>} : memref<546x16xf32, #tpu.memory_space<vmem>>, vector<9x16xf32>
    %c0_17 = arith.constant 0 : index
    %c48 = arith.constant 48 : index
    %16 = vector.load %arg12[%c0_17, %c48] : memref<90x400xf32, #tpu.memory_space<vmem>>, vector<9x16xf32>
    tpu.vector_store %arg12[%c0_17, %c48], %15 {strides = array<i32>} : memref<90x400xf32, #tpu.memory_space<vmem>>, vector<9x16xf32>,
    %c4 = arith.constant 4 : index
    %c0_18 = arith.constant 0 : index
    %17 = tpu.strided_load %arg11[%c4, %c0_18] {strides = array<i32: 2, 1>} : memref<546x16xf32, #tpu.memory_space<vmem>>, vector<9x16xf32>
    %c0_19 = arith.constant 0 : index
    %c64 = arith.constant 64 : index
    %18 = vector.load %arg12[%c0_19, %c64] : memref<90x400xf32, #tpu.memory_space<vmem>>, vector<9x16xf32>
    tpu.vector_store %arg12[%c0_19, %c64], %17 {strides = array<i32>} : memref<90x400xf32, #tpu.memory_space<vmem>>, vector<9x16xf32>,
    %c21 = arith.constant 21 : index
    %c0_20 = arith.constant 0 : index
    %19 = tpu.strided_load %arg11[%c21, %c0_20] {strides = array<i32: 2, 1>} : memref<546x16xf32, #tpu.memory_space<vmem>>, vector<9x16xf32>
    %c0_21 = arith.constant 0 : index
    %c80 = arith.constant 80 : index
    %20 = vector.load %arg12[%c0_21, %c80] : memref<90x400xf32, #tpu.memory_space<vmem>>, vector<9x16xf32>
    tpu.vector_store %arg12[%c0_21, %c80], %19 {strides = array<i32>} : memref<90x400xf32, #tpu.memory_space<vmem>>, vector<9x16xf32>,
    %c22 = arith.constant 22 : index
    %c0_22 = arith.constant 0 : index
    %21 = tpu.strided_load %arg11[%c22, %c0_22] {strides = array<i32: 2, 1>} : memref<546x16xf32, #tpu.memory_space<vmem>>, vector<9x16xf32>
    %c0_23 = arith.constant 0 : index
    %c96 = arith.constant 96 : index
    %22 = vector.load %arg12[%c0_23, %c96] : memref<90x400xf32, #tpu.memory_space<vmem>>, vector<9x16xf32>
    tpu.vector_store %arg12[%c0_23, %c96], %21 {strides = array<i32>} : memref<90x400xf32, #tpu.memory_space<vmem>>, vector<9x16xf32>,
    %c23 = arith.constant 23 : index
    %c0_24 = arith.constant 0 : index
    %23 = tpu.strided_load %arg11[%c23, %c0_24] {strides = array<i32: 2, 1>} : memref<546x16xf32, #tpu.memory_space<vmem>>, vector<9x16xf32>
    %c0_25 = arith.constant 0 : index
    %c112 = arith.constant 112 : index
    %24 = vector.load %arg12[%c0_25, %c112] : memref<90x400xf32, #tpu.memory_space<vmem>>, vector<9x16xf32>
    tpu.vector_store %arg12[%c0_25, %c112], %23 {strides = array<i32>} : memref<90x400xf32, #tpu.memory_space<vmem>>, vector<9x16xf32>,
    %c24 = arith.constant 24 : index
    %c0_26 = arith.constant 0 : index
    %25 = tpu.strided_load %arg11[%c24, %c0_26] {strides = array<i32: 2, 1>} : memref<546x16xf32, #tpu.memory_space<vmem>>, vector<9x16xf32>
    %c0_27 = arith.constant 0 : index
    %c128 = arith.constant 128 : index
    %26 = vector.load %arg12[%c0_27, %c128] : memref<90x400xf32, #tpu.memory_space<vmem>>, vector<9x16xf32>
    tpu.vector_store %arg12[%c0_27, %c128], %25 {strides = array<i32>} : memref<90x400xf32, #tpu.memory_space<vmem>>, vector<9x16xf32>,
    %c25 = arith.constant 25 : index
    %c0_28 = arith.constant 0 : index
    %27 = tpu.strided_load %arg11[%c25, %c0_28] {strides = array<i32: 2, 1>} : memref<546x16xf32, #tpu.memory_space<vmem>>, vector<9x16xf32>
    %c0_29 = arith.constant 0 : index
    %c144 = arith.constant 144 : index
    %28 = vector.load %arg12[%c0_29, %c144] : memref<90x400xf32, #tpu.memory_space<vmem>>, vector<9x16xf32>
    tpu.vector_store %arg12[%c0_29, %c144], %27 {strides = array<i32>} : memref<90x400xf32, #tpu.memory_space<vmem>>, vector<9x16xf32>,
    %c42 = arith.constant 42 : index
    %c0_30 = arith.constant 0 : index
    %29 = tpu.strided_load %arg11[%c42, %c0_30] {strides = array<i32: 2, 1>} : memref<546x16xf32, #tpu.memory_space<vmem>>, vector<9x16xf32>
    %c0_31 = arith.constant 0 : index
    %c160 = arith.constant 160 : index
    %30 = vector.load %arg12[%c0_31, %c160] : memref<90x400xf32, #tpu.memory_space<vmem>>, vector<9x16xf32>
    tpu.vector_store %arg12[%c0_31, %c160], %29 {strides = array<i32>} : memref<90x400xf32, #tpu.memory_space<vmem>>, vector<9x16xf32>,
    %c43 = arith.constant 43 : index
    %c0_32 = arith.constant 0 : index
    %31 = tpu.strided_load %arg11[%c43, %c0_32] {strides = array<i32: 2, 1>} : memref<546x16xf32, #tpu.memory_space<vmem>>, vector<9x16xf32>
    %c0_33 = arith.constant 0 : index
    %c176 = arith.constant 176 : index
    %32 = vector.load %arg12[%c0_33, %c176] : memref<90x400xf32, #tpu.memory_space<vmem>>, vector<9x16xf32>
    tpu.vector_store %arg12[%c0_33, %c176], %31 {strides = array<i32>} : memref<90x400xf32, #tpu.memory_space<vmem>>, vector<9x16xf32>,
    %c44 = arith.constant 44 : index
    %c0_34 = arith.constant 0 : index
    %33 = tpu.strided_load %arg11[%c44, %c0_34] {strides = array<i32: 2, 1>} : memref<546x16xf32, #tpu.memory_space<vmem>>, vector<9x16xf32>
    %c0_35 = arith.constant 0 : index
    %c192 = arith.constant 192 : index
    %34 = vector.load %arg12[%c0_35, %c192] : memref<90x400xf32, #tpu.memory_space<vmem>>, vector<9x16xf32>
    tpu.vector_store %arg12[%c0_35, %c192], %33 {strides = array<i32>} : memref<90x400xf32, #tpu.memory_space<vmem>>, vector<9x16xf32>,
    %c45 = arith.constant 45 : index
    %c0_36 = arith.constant 0 : index
    %35 = tpu.strided_load %arg11[%c45, %c0_36] {strides = array<i32: 2, 1>} : memref<546x16xf32, #tpu.memory_space<vmem>>, vector<9x16xf32>
    %c0_37 = arith.constant 0 : index
    %c208 = arith.constant 208 : index
    %36 = vector.load %arg12[%c0_37, %c208] : memref<90x400xf32, #tpu.memory_space<vmem>>, vector<9x16xf32>
    tpu.vector_store %arg12[%c0_37, %c208], %35 {strides = array<i32>} : memref<90x400xf32, #tpu.memory_space<vmem>>, vector<9x16xf32>,
    %c46 = arith.constant 46 : index
    %c0_38 = arith.constant 0 : index
    %37 = tpu.strided_load %arg11[%c46, %c0_38] {strides = array<i32: 2, 1>} : memref<546x16xf32, #tpu.memory_space<vmem>>, vector<9x16xf32>
    %c0_39 = arith.constant 0 : index
    %c224 = arith.constant 224 : index
    %38 = vector.load %arg12[%c0_39, %c224] : memref<90x400xf32, #tpu.memory_space<vmem>>, vector<9x16xf32>
    tpu.vector_store %arg12[%c0_39, %c224], %37 {strides = array<i32>} : memref<90x400xf32, #tpu.memory_space<vmem>>, vector<9x16xf32>,
    %c63 = arith.constant 63 : index
    %c0_40 = arith.constant 0 : index
    %39 = tpu.strided_load %arg11[%c63, %c0_40] {strides = array<i32: 2, 1>} : memref<546x16xf32, #tpu.memory_space<vmem>>, vector<9x16xf32>
    %c0_41 = arith.constant 0 : index
    %c240 = arith.constant 240 : index
    %40 = vector.load %arg12[%c0_41, %c240] : memref<90x400xf32, #tpu.memory_space<vmem>>, vector<9x16xf32>
    tpu.vector_store %arg12[%c0_41, %c240], %39 {strides = array<i32>} : memref<90x400xf32, #tpu.memory_space<vmem>>, vector<9x16xf32>,
    %c64_42 = arith.constant 64 : index
    %c0_43 = arith.constant 0 : index
    %41 = tpu.strided_load %arg11[%c64_42, %c0_43] {strides = array<i32: 2, 1>} : memref<546x16xf32, #tpu.memory_space<vmem>>, vector<9x16xf32>
    %c0_44 = arith.constant 0 : index
    %c256 = arith.constant 256 : index
    %42 = vector.load %arg12[%c0_44, %c256] : memref<90x400xf32, #tpu.memory_space<vmem>>, vector<9x16xf32>
    tpu.vector_store %arg12[%c0_44, %c256], %41 {strides = array<i32>} : memref<90x400xf32, #tpu.memory_space<vmem>>, vector<9x16xf32>,
    %c65 = arith.constant 65 : index
    %c0_45 = arith.constant 0 : index
    %43 = tpu.strided_load %arg11[%c65, %c0_45] {strides = array<i32: 2, 1>} : memref<546x16xf32, #tpu.memory_space<vmem>>, vector<9x16xf32>
    %c0_46 = arith.constant 0 : index
    %c272 = arith.constant 272 : index
    %44 = vector.load %arg12[%c0_46, %c272] : memref<90x400xf32, #tpu.memory_space<vmem>>, vector<9x16xf32>
    tpu.vector_store %arg12[%c0_46, %c272], %43 {strides = array<i32>} : memref<90x400xf32, #tpu.memory_space<vmem>>, vector<9x16xf32>,
    %c66 = arith.constant 66 : index
    %c0_47 = arith.constant 0 : index
    %45 = tpu.strided_load %arg11[%c66, %c0_47] {strides = array<i32: 2, 1>} : memref<546x16xf32, #tpu.memory_space<vmem>>, vector<9x16xf32>
    %c0_48 = arith.constant 0 : index
    %c288 = arith.constant 288 : index
    %46 = vector.load %arg12[%c0_48, %c288] : memref<90x400xf32, #tpu.memory_space<vmem>>, vector<9x16xf32>
    tpu.vector_store %arg12[%c0_48, %c288], %45 {strides = array<i32>} : memref<90x400xf32, #tpu.memory_space<vmem>>, vector<9x16xf32>,
    %c67 = arith.constant 67 : index
    %c0_49 = arith.constant 0 : index
    %47 = tpu.strided_load %arg11[%c67, %c0_49] {strides = array<i32: 2, 1>} : memref<546x16xf32, #tpu.memory_space<vmem>>, vector<9x16xf32>
    %c0_50 = arith.constant 0 : index
    %c304 = arith.constant 304 : index
    %48 = vector.load %arg12[%c0_50, %c304] : memref<90x400xf32, #tpu.memory_space<vmem>>, vector<9x16xf32>
    tpu.vector_store %arg12[%c0_50, %c304], %47 {strides = array<i32>} : memref<90x400xf32, #tpu.memory_space<vmem>>, vector<9x16xf32>,
    %c84 = arith.constant 84 : index
    %c0_51 = arith.constant 0 : index
    %49 = tpu.strided_load %arg11[%c84, %c0_51] {strides = array<i32: 2, 1>} : memref<546x16xf32, #tpu.memory_space<vmem>>, vector<9x16xf32>
    %c0_52 = arith.constant 0 : index
    %c320 = arith.constant 320 : index
    %50 = vector.load %arg12[%c0_52, %c320] : memref<90x400xf32, #tpu.memory_space<vmem>>, vector<9x16xf32>
    tpu.vector_store %arg12[%c0_52, %c320], %49 {strides = array<i32>} : memref<90x400xf32, #tpu.memory_space<vmem>>, vector<9x16xf32>,
    %c85 = arith.constant 85 : index
    %c0_53 = arith.constant 0 : index
    %51 = tpu.strided_load %arg11[%c85, %c0_53] {strides = array<i32: 2, 1>} : memref<546x16xf32, #tpu.memory_space<vmem>>, vector<9x16xf32>
    %c0_54 = arith.constant 0 : index
    %c336 = arith.constant 336 : index
    %52 = vector.load %arg12[%c0_54, %c336] : memref<90x400xf32, #tpu.memory_space<vmem>>, vector<9x16xf32>
    tpu.vector_store %arg12[%c0_54, %c336], %51 {strides = array<i32>} : memref<90x400xf32, #tpu.memory_space<vmem>>, vector<9x16xf32>,
    %c86 = arith.constant 86 : index
    %c0_55 = arith.constant 0 : index
    %53 = tpu.strided_load %arg11[%c86, %c0_55] {strides = array<i32: 2, 1>} : memref<546x16xf32, #tpu.memory_space<vmem>>, vector<9x16xf32>
    %c0_56 = arith.constant 0 : index
    %c352 = arith.constant 352 : index
    %54 = vector.load %arg12[%c0_56, %c352] : memref<90x400xf32, #tpu.memory_space<vmem>>, vector<9x16xf32>
    tpu.vector_store %arg12[%c0_56, %c352], %53 {strides = array<i32>} : memref<90x400xf32, #tpu.memory_space<vmem>>, vector<9x16xf32>,
    %c87 = arith.constant 87 : index
    %c0_57 = arith.constant 0 : index
    %55 = tpu.strided_load %arg11[%c87, %c0_57] {strides = array<i32: 2, 1>} : memref<546x16xf32, #tpu.memory_space<vmem>>, vector<9x16xf32>
    %c0_58 = arith.constant 0 : index
    %c368 = arith.constant 368 : index
    %56 = vector.load %arg12[%c0_58, %c368] : memref<90x400xf32, #tpu.memory_space<vmem>>, vector<9x16xf32>
    tpu.vector_store %arg12[%c0_58, %c368], %55 {strides = array<i32>} : memref<90x400xf32, #tpu.memory_space<vmem>>, vector<9x16xf32>,
    %c88 = arith.constant 88 : index
    %c0_59 = arith.constant 0 : index
    %57 = tpu.strided_load %arg11[%c88, %c0_59] {strides = array<i32: 2, 1>} : memref<546x16xf32, #tpu.memory_space<vmem>>, vector<9x16xf32>
    %c0_60 = arith.constant 0 : index
    %c384 = arith.constant 384 : index
    %58 = vector.load %arg12[%c0_60, %c384] : memref<90x400xf32, #tpu.memory_space<vmem>>, vector<9x16xf32>
    tpu.vector_store %arg12[%c0_60, %c384], %57 {strides = array<i32>} : memref<90x400xf32, #tpu.memory_space<vmem>>, vector<9x16xf32>,
    %c42_61 = arith.constant 42 : index
    %c0_62 = arith.constant 0 : index
    %59 = tpu.strided_load %arg11[%c42_61, %c0_62] {strides = array<i32: 2, 1>} : memref<546x16xf32, #tpu.memory_space<vmem>>, vector<9x16xf32>
    %c9 = arith.constant 9 : index
    %c0_63 = arith.constant 0 : index
    %60 = vector.load %arg12[%c9, %c0_63] : memref<90x400xf32, #tpu.memory_space<vmem>>, vector<9x16xf32>
    tpu.vector_store %arg12[%c9, %c0_63], %59 {strides = array<i32>} : memref<90x400xf32, #tpu.memory_space<vmem>>, vector<9x16xf32>,
    %c43_64 = arith.constant 43 : index
    %c0_65 = arith.constant 0 : index
    %61 = tpu.strided_load %arg11[%c43_64, %c0_65] {strides = array<i32: 2, 1>} : memref<546x16xf32, #tpu.memory_space<vmem>>, vector<9x16xf32>
    %c9_66 = arith.constant 9 : index
    %c16_67 = arith.constant 16 : index
    %62 = vector.load %arg12[%c9_66, %c16_67] : memref<90x400xf32, #tpu.memory_space<vmem>>, vector<9x16xf32>
    tpu.vector_store %arg12[%c9_66, %c16_67], %61 {strides = array<i32>} : memref<90x400xf32, #tpu.memory_space<vmem>>, vector<9x16xf32>,
    %c44_68 = arith.constant 44 : index
    %c0_69 = arith.constant 0 : index
    %63 = tpu.strided_load %arg11[%c44_68, %c0_69] {strides = array<i32: 2, 1>} : memref<546x16xf32, #tpu.memory_space<vmem>>, vector<9x16xf32>
    %c9_70 = arith.constant 9 : index
    %c32_71 = arith.constant 32 : index
    %64 = vector.load %arg12[%c9_70, %c32_71] : memref<90x400xf32, #tpu.memory_space<vmem>>, vector<9x16xf32>
    tpu.vector_store %arg12[%c9_70, %c32_71], %63 {strides = array<i32>} : memref<90x400xf32, #tpu.memory_space<vmem>>, vector<9x16xf32>,
    %c45_72 = arith.constant 45 : index
    %c0_73 = arith.constant 0 : index
    %65 = tpu.strided_load %arg11[%c45_72, %c0_73] {strides = array<i32: 2, 1>} : memref<546x16xf32, #tpu.memory_space<vmem>>, vector<9x16xf32>
    %c9_74 = arith.constant 9 : index
    %c48_75 = arith.constant 48 : index
    %66 = vector.load %arg12[%c9_74, %c48_75] : memref<90x400xf32, #tpu.memory_space<vmem>>, vector<9x16xf32>
    tpu.vector_store %arg12[%c9_74, %c48_75], %65 {strides = array<i32>} : memref<90x400xf32, #tpu.memory_space<vmem>>, vector<9x16xf32>,
    %c46_76 = arith.constant 46 : index
    %c0_77 = arith.constant 0 : index
    %67 = tpu.strided_load %arg11[%c46_76, %c0_77] {strides = array<i32: 2, 1>} : memref<546x16xf32, #tpu.memory_space<vmem>>, vector<9x16xf32>
    %c9_78 = arith.constant 9 : index
    %c64_79 = arith.constant 64 : index
    %68 = vector.load %arg12[%c9_78, %c64_79] : memref<90x400xf32, #tpu.memory_space<vmem>>, vector<9x16xf32>
    tpu.vector_store %arg12[%c9_78, %c64_79], %67 {strides = array<i32>} : memref<90x400xf32, #tpu.memory_space<vmem>>, vector<9x16xf32>,
    %c63_80 = arith.constant 63 : index
    %c0_81 = arith.constant 0 : index
    %69 = tpu.strided_load %arg11[%c63_80, %c0_81] {strides = array<i32: 2, 1>} : memref<546x16xf32, #tpu.memory_space<vmem>>, vector<9x16xf32>
    %c9_82 = arith.constant 9 : index
    %c80_83 = arith.constant 80 : index
    %70 = vector.load %arg12[%c9_82, %c80_83] : memref<90x400xf32, #tpu.memory_space<vmem>>, vector<9x16xf32>
    tpu.vector_store %arg12[%c9_82, %c80_83], %69 {strides = array<i32>} : memref<90x400xf32, #tpu.memory_space<vmem>>, vector<9x16xf32>,
    %c64_84 = arith.constant 64 : index
    %c0_85 = arith.constant 0 : index
    %71 = tpu.strided_load %arg11[%c64_84, %c0_85] {strides = array<i32: 2, 1>} : memref<546x16xf32, #tpu.memory_space<vmem>>, vector<9x16xf32>
    %c9_86 = arith.constant 9 : index
    %c96_87 = arith.constant 96 : index
    %72 = vector.load %arg12[%c9_86, %c96_87] : memref<90x400xf32, #tpu.memory_space<vmem>>, vector<9x16xf32>
    tpu.vector_store %arg12[%c9_86, %c96_87], %71 {strides = array<i32>} : memref<90x400xf32, #tpu.memory_space<vmem>>, vector<9x16xf32>,
    %c65_88 = arith.constant 65 : index
    %c0_89 = arith.constant 0 : index
    %73 = tpu.strided_load %arg11[%c65_88, %c0_89] {strides = array<i32: 2, 1>} : memref<546x16xf32, #tpu.memory_space<vmem>>, vector<9x16xf32>
    %c9_90 = arith.constant 9 : index
    %c112_91 = arith.constant 112 : index
    %74 = vector.load %arg12[%c9_90, %c112_91] : memref<90x400xf32, #tpu.memory_space<vmem>>, vector<9x16xf32>
    tpu.vector_store %arg12[%c9_90, %c112_91], %73 {strides = array<i32>} : memref<90x400xf32, #tpu.memory_space<vmem>>, vector<9x16xf32>,
    %c66_92 = arith.constant 66 : index
    %c0_93 = arith.constant 0 : index
    %75 = tpu.strided_load %arg11[%c66_92, %c0_93] {strides = array<i32: 2, 1>} : memref<546x16xf32, #tpu.memory_space<vmem>>, vector<9x16xf32>
    %c9_94 = arith.constant 9 : index
    %c128_95 = arith.constant 128 : index
    %76 = vector.load %arg12[%c9_94, %c128_95] : memref<90x400xf32, #tpu.memory_space<vmem>>, vector<9x16xf32>
    tpu.vector_store %arg12[%c9_94, %c128_95], %75 {strides = array<i32>} : memref<90x400xf32, #tpu.memory_space<vmem>>, vector<9x16xf32>,
    %c67_96 = arith.constant 67 : index
    %c0_97 = arith.constant 0 : index
    %77 = tpu.strided_load %arg11[%c67_96, %c0_97] {strides = array<i32: 2, 1>} : memref<546x16xf32, #tpu.memory_space<vmem>>, vector<9x16xf32>
    %c9_98 = arith.constant 9 : index
    %c144_99 = arith.constant 144 : index
    %78 = vector.load %arg12[%c9_98, %c144_99] : memref<90x400xf32, #tpu.memory_space<vmem>>, vector<9x16xf32>
    tpu.vector_store %arg12[%c9_98, %c144_99], %77 {strides = array<i32>} : memref<90x400xf32, #tpu.memory_space<vmem>>, vector<9x16xf32>,
    %c84_100 = arith.constant 84 : index
    %c0_101 = arith.constant 0 : index
    %79 = tpu.strided_load %arg11[%c84_100, %c0_101] {strides = array<i32: 2, 1>} : memref<546x16xf32, #tpu.memory_space<vmem>>, vector<9x16xf32>
    %c9_102 = arith.constant 9 : index
    %c160_103 = arith.constant 160 : index
    %80 = vector.load %arg12[%c9_102, %c160_103] : memref<90x400xf32, #tpu.memory_space<vmem>>, vector<9x16xf32>
    tpu.vector_store %arg12[%c9_102, %c160_103], %79 {strides = array<i32>} : memref<90x400xf32, #tpu.memory_space<vmem>>, vector<9x16xf32>,
    %c85_104 = arith.constant 85 : index
    %c0_105 = arith.constant 0 : index
    %81 = tpu.strided_load %arg11[%c85_104, %c0_105] {strides = array<i32: 2, 1>} : memref<546x16xf32, #tpu.memory_space<vmem>>, vector<9x16xf32>
    %c9_106 = arith.constant 9 : index
    %c176_107 = arith.constant 176 : index
    %82 = vector.load %arg12[%c9_106, %c176_107] : memref<90x400xf32, #tpu.memory_space<vmem>>, vector<9x16xf32>
    tpu.vector_store %arg12[%c9_106, %c176_107], %81 {strides = array<i32>} : memref<90x400xf32, #tpu.memory_space<vmem>>, vector<9x16xf32>,
    %c86_108 = arith.constant 86 : index
    %c0_109 = arith.constant 0 : index
    %83 = tpu.strided_load %arg11[%c86_108, %c0_109] {strides = array<i32: 2, 1>} : memref<546x16xf32, #tpu.memory_space<vmem>>, vector<9x16xf32>
    %c9_110 = arith.constant 9 : index
    %c192_111 = arith.constant 192 : index
    %84 = vector.load %arg12[%c9_110, %c192_111] : memref<90x400xf32, #tpu.memory_space<vmem>>, vector<9x16xf32>
    tpu.vector_store %arg12[%c9_110, %c192_111], %83 {strides = array<i32>} : memref<90x400xf32, #tpu.memory_space<vmem>>, vector<9x16xf32>,
    %c87_112 = arith.constant 87 : index
    %c0_113 = arith.constant 0 : index
    %85 = tpu.strided_load %arg11[%c87_112, %c0_113] {strides = array<i32: 2, 1>} : memref<546x16xf32, #tpu.memory_space<vmem>>, vector<9x16xf32>
    %c9_114 = arith.constant 9 : index
    %c208_115 = arith.constant 208 : index
    %86 = vector.load %arg12[%c9_114, %c208_115] : memref<90x400xf32, #tpu.memory_space<vmem>>, vector<9x16xf32>
    tpu.vector_store %arg12[%c9_114, %c208_115], %85 {strides = array<i32>} : memref<90x400xf32, #tpu.memory_space<vmem>>, vector<9x16xf32>,
    %c88_116 = arith.constant 88 : index
    %c0_117 = arith.constant 0 : index
    %87 = tpu.strided_load %arg11[%c88_116, %c0_117] {strides = array<i32: 2, 1>} : memref<546x16xf32, #tpu.memory_space<vmem>>, vector<9x16xf32>
    %c9_118 = arith.constant 9 : index
    %c224_119 = arith.constant 224 : index
    %88 = vector.load %arg12[%c9_118, %c224_119] : memref<90x400xf32, #tpu.memory_space<vmem>>, vector<9x16xf32>
    tpu.vector_store %arg12[%c9_118, %c224_119], %87 {strides = array<i32>} : memref<90x400xf32, #tpu.memory_space<vmem>>, vector<9x16xf32>,
    %c105 = arith.constant 105 : index
    %c0_120 = arith.constant 0 : index
    %89 = tpu.strided_load %arg11[%c105, %c0_120] {strides = array<i32: 2, 1>} : memref<546x16xf32, #tpu.memory_space<vmem>>, vector<9x16xf32>
    %c9_121 = arith.constant 9 : index
    %c240_122 = arith.constant 240 : index
    %90 = vector.load %arg12[%c9_121, %c240_122] : memref<90x400xf32, #tpu.memory_space<vmem>>, vector<9x16xf32>
    tpu.vector_store %arg12[%c9_121, %c240_122], %89 {strides = array<i32>} : memref<90x400xf32, #tpu.memory_space<vmem>>, vector<9x16xf32>,
    %c106 = arith.constant 106 : index
    %c0_123 = arith.constant 0 : index
    %91 = tpu.strided_load %arg11[%c106, %c0_123] {strides = array<i32: 2, 1>} : memref<546x16xf32, #tpu.memory_space<vmem>>, vector<9x16xf32>
    %c9_124 = arith.constant 9 : index
    %c256_125 = arith.constant 256 : index
    %92 = vector.load %arg12[%c9_124, %c256_125] : memref<90x400xf32, #tpu.memory_space<vmem>>, vector<9x16xf32>
    tpu.vector_store %arg12[%c9_124, %c256_125], %91 {strides = array<i32>} : memref<90x400xf32, #tpu.memory_space<vmem>>, vector<9x16xf32>,
    %c107 = arith.constant 107 : index
    %c0_126 = arith.constant 0 : index
    %93 = tpu.strided_load %arg11[%c107, %c0_126] {strides = array<i32: 2, 1>} : memref<546x16xf32, #tpu.memory_space<vmem>>, vector<9x16xf32>
    %c9_127 = arith.constant 9 : index
    %c272_128 = arith.constant 272 : index
    %94 = vector.load %arg12[%c9_127, %c272_128] : memref<90x400xf32, #tpu.memory_space<vmem>>, vector<9x16xf32>
    tpu.vector_store %arg12[%c9_127, %c272_128], %93 {strides = array<i32>} : memref<90x400xf32, #tpu.memory_space<vmem>>, vector<9x16xf32>,
    %c108 = arith.constant 108 : index
    %c0_129 = arith.constant 0 : index
    %95 = tpu.strided_load %arg11[%c108, %c0_129] {strides = array<i32: 2, 1>} : memref<546x16xf32, #tpu.memory_space<vmem>>, vector<9x16xf32>
    %c9_130 = arith.constant 9 : index
    %c288_131 = arith.constant 288 : index
    %96 = vector.load %arg12[%c9_130, %c288_131] : memref<90x400xf32, #tpu.memory_space<vmem>>, vector<9x16xf32>
    tpu.vector_store %arg12[%c9_130, %c288_131], %95 {strides = array<i32>} : memref<90x400xf32, #tpu.memory_space<vmem>>, vector<9x16xf32>,
    %c109 = arith.constant 109 : index
    %c0_132 = arith.constant 0 : index
    %97 = tpu.strided_load %arg11[%c109, %c0_132] {strides = array<i32: 2, 1>} : memref<546x16xf32, #tpu.memory_space<vmem>>, vector<9x16xf32>
    %c9_133 = arith.constant 9 : index
    %c304_134 = arith.constant 304 : index
    %98 = vector.load %arg12[%c9_133, %c304_134] : memref<90x400xf32, #tpu.memory_space<vmem>>, vector<9x16xf32>
    tpu.vector_store %arg12[%c9_133, %c304_134], %97 {strides = array<i32>} : memref<90x400xf32, #tpu.memory_space<vmem>>, vector<9x16xf32>,
    %c126 = arith.constant 126 : index
    %c0_135 = arith.constant 0 : index
    %99 = tpu.strided_load %arg11[%c126, %c0_135] {strides = array<i32: 2, 1>} : memref<546x16xf32, #tpu.memory_space<vmem>>, vector<9x16xf32>
    %c9_136 = arith.constant 9 : index
    %c320_137 = arith.constant 320 : index
    %100 = vector.load %arg12[%c9_136, %c320_137] : memref<90x400xf32, #tpu.memory_space<vmem>>, vector<9x16xf32>
    tpu.vector_store %arg12[%c9_136, %c320_137], %99 {strides = array<i32>} : memref<90x400xf32, #tpu.memory_space<vmem>>, vector<9x16xf32>,
    %c127 = arith.constant 127 : index
    %c0_138 = arith.constant 0 : index
    %101 = tpu.strided_load %arg11[%c127, %c0_138] {strides = array<i32: 2, 1>} : memref<546x16xf32, #tpu.memory_space<vmem>>, vector<9x16xf32>
    %c9_139 = arith.constant 9 : index
    %c336_140 = arith.constant 336 : index
    %102 = vector.load %arg12[%c9_139, %c336_140] : memref<90x400xf32, #tpu.memory_space<vmem>>, vector<9x16xf32>
    tpu.vector_store %arg12[%c9_139, %c336_140], %101 {strides = array<i32>} : memref<90x400xf32, #tpu.memory_space<vmem>>, vector<9x16xf32>,
    %c128_141 = arith.constant 128 : index
    %c0_142 = arith.constant 0 : index
    %103 = tpu.strided_load %arg11[%c128_141, %c0_142] {strides = array<i32: 2, 1>} : memref<546x16xf32, #tpu.memory_space<vmem>>, vector<9x16xf32>
    %c9_143 = arith.constant 9 : index
    %c352_144 = arith.constant 352 : index
    %104 = vector.load %arg12[%c9_143, %c352_144] : memref<90x400xf32, #tpu.memory_space<vmem>>, vector<9x16xf32>
    tpu.vector_store %arg12[%c9_143, %c352_144], %103 {strides = array<i32>} : memref<90x400xf32, #tpu.memory_space<vmem>>, vector<9x16xf32>,
    %c129 = arith.constant 129 : index
    %c0_145 = arith.constant 0 : index
    %105 = tpu.strided_load %arg11[%c129, %c0_145] {strides = array<i32: 2, 1>} : memref<546x16xf32, #tpu.memory_space<vmem>>, vector<9x16xf32>
    %c9_146 = arith.constant 9 : index
    %c368_147 = arith.constant 368 : index
    %106 = vector.load %arg12[%c9_146, %c368_147] : memref<90x400xf32, #tpu.memory_space<vmem>>, vector<9x16xf32>
    tpu.vector_store %arg12[%c9_146, %c368_147], %105 {strides = array<i32>} : memref<90x400xf32, #tpu.memory_space<vmem>>, vector<9x16xf32>,
    %c130 = arith.constant 130 : index
    %c0_148 = arith.constant 0 : index
    %107 = tpu.strided_load %arg11[%c130, %c0_148] {strides = array<i32: 2, 1>} : memref<546x16xf32, #tpu.memory_space<vmem>>, vector<9x16xf32>
    %c9_149 = arith.constant 9 : index
    %c384_150 = arith.constant 384 : index
    %108 = vector.load %arg12[%c9_149, %c384_150] : memref<90x400xf32, #tpu.memory_space<vmem>>, vector<9x16xf32>
    tpu.vector_store %arg12[%c9_149, %c384_150], %107 {strides = array<i32>} : memref<90x400xf32, #tpu.memory_space<vmem>>, vector<9x16xf32>,
    %c84_151 = arith.constant 84 : index
    %c0_152 = arith.constant 0 : index
    %109 = tpu.strided_load %arg11[%c84_151, %c0_152] {strides = array<i32: 2, 1>} : memref<546x16xf32, #tpu.memory_space<vmem>>, vector<9x16xf32>
    %c18 = arith.constant 18 : index
    %c0_153 = arith.constant 0 : index
    %110 = vector.load %arg12[%c18, %c0_153] : memref<90x400xf32, #tpu.memory_space<vmem>>, vector<9x16xf32>
    tpu.vector_store %arg12[%c18, %c0_153], %109 {strides = array<i32>} : memref<90x400xf32, #tpu.memory_space<vmem>>, vector<9x16xf32>,
    %c85_154 = arith.constant 85 : index
    %c0_155 = arith.constant 0 : index
    %111 = tpu.strided_load %arg11[%c85_154, %c0_155] {strides = array<i32: 2, 1>} : memref<546x16xf32, #tpu.memory_space<vmem>>, vector<9x16xf32>
    %c18_156 = arith.constant 18 : index
    %c16_157 = arith.constant 16 : index
    %112 = vector.load %arg12[%c18_156, %c16_157] : memref<90x400xf32, #tpu.memory_space<vmem>>, vector<9x16xf32>
    tpu.vector_store %arg12[%c18_156, %c16_157], %111 {strides = array<i32>} : memref<90x400xf32, #tpu.memory_space<vmem>>, vector<9x16xf32>,
    %c86_158 = arith.constant 86 : index
    %c0_159 = arith.constant 0 : index
    %113 = tpu.strided_load %arg11[%c86_158, %c0_159] {strides = array<i32: 2, 1>} : memref<546x16xf32, #tpu.memory_space<vmem>>, vector<9x16xf32>
    %c18_160 = arith.constant 18 : index
    %c32_161 = arith.constant 32 : index
    %114 = vector.load %arg12[%c18_160, %c32_161] : memref<90x400xf32, #tpu.memory_space<vmem>>, vector<9x16xf32>
    tpu.vector_store %arg12[%c18_160, %c32_161], %113 {strides = array<i32>} : memref<90x400xf32, #tpu.memory_space<vmem>>, vector<9x16xf32>,
    %c87_162 = arith.constant 87 : index
    %c0_163 = arith.constant 0 : index
    %115 = tpu.strided_load %arg11[%c87_162, %c0_163] {strides = array<i32: 2, 1>} : memref<546x16xf32, #tpu.memory_space<vmem>>, vector<9x16xf32>
    %c18_164 = arith.constant 18 : index
    %c48_165 = arith.constant 48 : index
    %116 = vector.load %arg12[%c18_164, %c48_165] : memref<90x400xf32, #tpu.memory_space<vmem>>, vector<9x16xf32>
    tpu.vector_store %arg12[%c18_164, %c48_165], %115 {strides = array<i32>} : memref<90x400xf32, #tpu.memory_space<vmem>>, vector<9x16xf32>,
    %c88_166 = arith.constant 88 : index
    %c0_167 = arith.constant 0 : index
    %117 = tpu.strided_load %arg11[%c88_166, %c0_167] {strides = array<i32: 2, 1>} : memref<546x16xf32, #tpu.memory_space<vmem>>, vector<9x16xf32>
    %c18_168 = arith.constant 18 : index
    %c64_169 = arith.constant 64 : index
    %118 = vector.load %arg12[%c18_168, %c64_169] : memref<90x400xf32, #tpu.memory_space<vmem>>, vector<9x16xf32>
    tpu.vector_store %arg12[%c18_168, %c64_169], %117 {strides = array<i32>} : memref<90x400xf32, #tpu.memory_space<vmem>>, vector<9x16xf32>,
    %c105_170 = arith.constant 105 : index
    %c0_171 = arith.constant 0 : index
    %119 = tpu.strided_load %arg11[%c105_170, %c0_171] {strides = array<i32: 2, 1>} : memref<546x16xf32, #tpu.memory_space<vmem>>, vector<9x16xf32>
    %c18_172 = arith.constant 18 : index
    %c80_173 = arith.constant 80 : index
    %120 = vector.load %arg12[%c18_172, %c80_173] : memref<90x400xf32, #tpu.memory_space<vmem>>, vector<9x16xf32>
    tpu.vector_store %arg12[%c18_172, %c80_173], %119 {strides = array<i32>} : memref<90x400xf32, #tpu.memory_space<vmem>>, vector<9x16xf32>,
    %c106_174 = arith.constant 106 : index
    %c0_175 = arith.constant 0 : index
    %121 = tpu.strided_load %arg11[%c106_174, %c0_175] {strides = array<i32: 2, 1>} : memref<546x16xf32, #tpu.memory_space<vmem>>, vector<9x16xf32>
    %c18_176 = arith.constant 18 : index
    %c96_177 = arith.constant 96 : index
    %122 = vector.load %arg12[%c18_176, %c96_177] : memref<90x400xf32, #tpu.memory_space<vmem>>, vector<9x16xf32>
    tpu.vector_store %arg12[%c18_176, %c96_177], %121 {strides = array<i32>} : memref<90x400xf32, #tpu.memory_space<vmem>>, vector<9x16xf32>,
    %c107_178 = arith.constant 107 : index
    %c0_179 = arith.constant 0 : index
    %123 = tpu.strided_load %arg11[%c107_178, %c0_179] {strides = array<i32: 2, 1>} : memref<546x16xf32, #tpu.memory_space<vmem>>, vector<9x16xf32>
    %c18_180 = arith.constant 18 : index
    %c112_181 = arith.constant 112 : index
    %124 = vector.load %arg12[%c18_180, %c112_181] : memref<90x400xf32, #tpu.memory_space<vmem>>, vector<9x16xf32>
    tpu.vector_store %arg12[%c18_180, %c112_181], %123 {strides = array<i32>} : memref<90x400xf32, #tpu.memory_space<vmem>>, vector<9x16xf32>,
    %c108_182 = arith.constant 108 : index
    %c0_183 = arith.constant 0 : index
    %125 = tpu.strided_load %arg11[%c108_182, %c0_183] {strides = array<i32: 2, 1>} : memref<546x16xf32, #tpu.memory_space<vmem>>, vector<9x16xf32>
    %c18_184 = arith.constant 18 : index
    %c128_185 = arith.constant 128 : index
    %126 = vector.load %arg12[%c18_184, %c128_185] : memref<90x400xf32, #tpu.memory_space<vmem>>, vector<9x16xf32>
    tpu.vector_store %arg12[%c18_184, %c128_185], %125 {strides = array<i32>} : memref<90x400xf32, #tpu.memory_space<vmem>>, vector<9x16xf32>,
    %c109_186 = arith.constant 109 : index
    %c0_187 = arith.constant 0 : index
    %127 = tpu.strided_load %arg11[%c109_186, %c0_187] {strides = array<i32: 2, 1>} : memref<546x16xf32, #tpu.memory_space<vmem>>, vector<9x16xf32>
    %c18_188 = arith.constant 18 : index
    %c144_189 = arith.constant 144 : index
    %128 = vector.load %arg12[%c18_188, %c144_189] : memref<90x400xf32, #tpu.memory_space<vmem>>, vector<9x16xf32>
    tpu.vector_store %arg12[%c18_188, %c144_189], %127 {strides = array<i32>} : memref<90x400xf32, #tpu.memory_space<vmem>>, vector<9x16xf32>,
    %c126_190 = arith.constant 126 : index
    %c0_191 = arith.constant 0 : index
    %129 = tpu.strided_load %arg11[%c126_190, %c0_191] {strides = array<i32: 2, 1>} : memref<546x16xf32, #tpu.memory_space<vmem>>, vector<9x16xf32>
    %c18_192 = arith.constant 18 : index
    %c160_193 = arith.constant 160 : index
    %130 = vector.load %arg12[%c18_192, %c160_193] : memref<90x400xf32, #tpu.memory_space<vmem>>, vector<9x16xf32>
    tpu.vector_store %arg12[%c18_192, %c160_193], %129 {strides = array<i32>} : memref<90x400xf32, #tpu.memory_space<vmem>>, vector<9x16xf32>,
    %c127_194 = arith.constant 127 : index
    %c0_195 = arith.constant 0 : index
    %131 = tpu.strided_load %arg11[%c127_194, %c0_195] {strides = array<i32: 2, 1>} : memref<546x16xf32, #tpu.memory_space<vmem>>, vector<9x16xf32>
    %c18_196 = arith.constant 18 : index
    %c176_197 = arith.constant 176 : index
    %132 = vector.load %arg12[%c18_196, %c176_197] : memref<90x400xf32, #tpu.memory_space<vmem>>, vector<9x16xf32>
    tpu.vector_store %arg12[%c18_196, %c176_197], %131 {strides = array<i32>} : memref<90x400xf32, #tpu.memory_space<vmem>>, vector<9x16xf32>,
    %c128_198 = arith.constant 128 : index
    %c0_199 = arith.constant 0 : index
    %133 = tpu.strided_load %arg11[%c128_198, %c0_199] {strides = array<i32: 2, 1>} : memref<546x16xf32, #tpu.memory_space<vmem>>, vector<9x16xf32>
    %c18_200 = arith.constant 18 : index
    %c192_201 = arith.constant 192 : index
    %134 = vector.load %arg12[%c18_200, %c192_201] : memref<90x400xf32, #tpu.memory_space<vmem>>, vector<9x16xf32>
    tpu.vector_store %arg12[%c18_200, %c192_201], %133 {strides = array<i32>} : memref<90x400xf32, #tpu.memory_space<vmem>>, vector<9x16xf32>,
    %c129_202 = arith.constant 129 : index
    %c0_203 = arith.constant 0 : index
    %135 = tpu.strided_load %arg11[%c129_202, %c0_203] {strides = array<i32: 2, 1>} : memref<546x16xf32, #tpu.memory_space<vmem>>, vector<9x16xf32>
    %c18_204 = arith.constant 18 : index
    %c208_205 = arith.constant 208 : index
    %136 = vector.load %arg12[%c18_204, %c208_205] : memref<90x400xf32, #tpu.memory_space<vmem>>, vector<9x16xf32>
    tpu.vector_store %arg12[%c18_204, %c208_205], %135 {strides = array<i32>} : memref<90x400xf32, #tpu.memory_space<vmem>>, vector<9x16xf32>,
    %c130_206 = arith.constant 130 : index
    %c0_207 = arith.constant 0 : index
    %137 = tpu.strided_load %arg11[%c130_206, %c0_207] {strides = array<i32: 2, 1>} : memref<546x16xf32, #tpu.memory_space<vmem>>, vector<9x16xf32>
    %c18_208 = arith.constant 18 : index
    %c224_209 = arith.constant 224 : index
    %138 = vector.load %arg12[%c18_208, %c224_209] : memref<90x400xf32, #tpu.memory_space<vmem>>, vector<9x16xf32>
    tpu.vector_store %arg12[%c18_208, %c224_209], %137 {strides = array<i32>} : memref<90x400xf32, #tpu.memory_space<vmem>>, vector<9x16xf32>,
    %c147 = arith.constant 147 : index
    %c0_210 = arith.constant 0 : index
    %139 = tpu.strided_load %arg11[%c147, %c0_210] {strides = array<i32: 2, 1>} : memref<546x16xf32, #tpu.memory_space<vmem>>, vector<9x16xf32>
    %c18_211 = arith.constant 18 : index
    %c240_212 = arith.constant 240 : index
    %140 = vector.load %arg12[%c18_211, %c240_212] : memref<90x400xf32, #tpu.memory_space<vmem>>, vector<9x16xf32>
    tpu.vector_store %arg12[%c18_211, %c240_212], %139 {strides = array<i32>} : memref<90x400xf32, #tpu.memory_space<vmem>>, vector<9x16xf32>,
    %c148 = arith.constant 148 : index
    %c0_213 = arith.constant 0 : index
    %141 = tpu.strided_load %arg11[%c148, %c0_213] {strides = array<i32: 2, 1>} : memref<546x16xf32, #tpu.memory_space<vmem>>, vector<9x16xf32>
    %c18_214 = arith.constant 18 : index
    %c256_215 = arith.constant 256 : index
    %142 = vector.load %arg12[%c18_214, %c256_215] : memref<90x400xf32, #tpu.memory_space<vmem>>, vector<9x16xf32>
    tpu.vector_store %arg12[%c18_214, %c256_215], %141 {strides = array<i32>} : memref<90x400xf32, #tpu.memory_space<vmem>>, vector<9x16xf32>,
    %c149 = arith.constant 149 : index
    %c0_216 = arith.constant 0 : index
    %143 = tpu.strided_load %arg11[%c149, %c0_216] {strides = array<i32: 2, 1>} : memref<546x16xf32, #tpu.memory_space<vmem>>, vector<9x16xf32>
    %c18_217 = arith.constant 18 : index
    %c272_218 = arith.constant 272 : index
    %144 = vector.load %arg12[%c18_217, %c272_218] : memref<90x400xf32, #tpu.memory_space<vmem>>, vector<9x16xf32>
    tpu.vector_store %arg12[%c18_217, %c272_218], %143 {strides = array<i32>} : memref<90x400xf32, #tpu.memory_space<vmem>>, vector<9x16xf32>,
    %c150 = arith.constant 150 : index
    %c0_219 = arith.constant 0 : index
    %145 = tpu.strided_load %arg11[%c150, %c0_219] {strides = array<i32: 2, 1>} : memref<546x16xf32, #tpu.memory_space<vmem>>, vector<9x16xf32>
    %c18_220 = arith.constant 18 : index
    %c288_221 = arith.constant 288 : index
    %146 = vector.load %arg12[%c18_220, %c288_221] : memref<90x400xf32, #tpu.memory_space<vmem>>, vector<9x16xf32>
    tpu.vector_store %arg12[%c18_220, %c288_221], %145 {strides = array<i32>} : memref<90x400xf32, #tpu.memory_space<vmem>>, vector<9x16xf32>,
    %c151 = arith.constant 151 : index
    %c0_222 = arith.constant 0 : index
    %147 = tpu.strided_load %arg11[%c151, %c0_222] {strides = array<i32: 2, 1>} : memref<546x16xf32, #tpu.memory_space<vmem>>, vector<9x16xf32>
    %c18_223 = arith.constant 18 : index
    %c304_224 = arith.constant 304 : index
    %148 = vector.load %arg12[%c18_223, %c304_224] : memref<90x400xf32, #tpu.memory_space<vmem>>, vector<9x16xf32>
    tpu.vector_store %arg12[%c18_223, %c304_224], %147 {strides = array<i32>} : memref<90x400xf32, #tpu.memory_space<vmem>>, vector<9x16xf32>,
    %c168 = arith.constant 168 : index
    %c0_225 = arith.constant 0 : index
    %149 = tpu.strided_load %arg11[%c168, %c0_225] {strides = array<i32: 2, 1>} : memref<546x16xf32, #tpu.memory_space<vmem>>, vector<9x16xf32>
    %c18_226 = arith.constant 18 : index
    %c320_227 = arith.constant 320 : index
    %150 = vector.load %arg12[%c18_226, %c320_227] : memref<90x400xf32, #tpu.memory_space<vmem>>, vector<9x16xf32>
    tpu.vector_store %arg12[%c18_226, %c320_227], %149 {strides = array<i32>} : memref<90x400xf32, #tpu.memory_space<vmem>>, vector<9x16xf32>,
    %c169 = arith.constant 169 : index
    %c0_228 = arith.constant 0 : index
    %151 = tpu.strided_load %arg11[%c169, %c0_228] {strides = array<i32: 2, 1>} : memref<546x16xf32, #tpu.memory_space<vmem>>, vector<9x16xf32>
    %c18_229 = arith.constant 18 : index
    %c336_230 = arith.constant 336 : index
    %152 = vector.load %arg12[%c18_229, %c336_230] : memref<90x400xf32, #tpu.memory_space<vmem>>, vector<9x16xf32>
    tpu.vector_store %arg12[%c18_229, %c336_230], %151 {strides = array<i32>} : memref<90x400xf32, #tpu.memory_space<vmem>>, vector<9x16xf32>,
    %c170 = arith.constant 170 : index
    %c0_231 = arith.constant 0 : index
    %153 = tpu.strided_load %arg11[%c170, %c0_231] {strides = array<i32: 2, 1>} : memref<546x16xf32, #tpu.memory_space<vmem>>, vector<9x16xf32>
    %c18_232 = arith.constant 18 : index
    %c352_233 = arith.constant 352 : index
    %154 = vector.load %arg12[%c18_232, %c352_233] : memref<90x400xf32, #tpu.memory_space<vmem>>, vector<9x16xf32>
    tpu.vector_store %arg12[%c18_232, %c352_233], %153 {strides = array<i32>} : memref<90x400xf32, #tpu.memory_space<vmem>>, vector<9x16xf32>,
    %c171 = arith.constant 171 : index
    %c0_234 = arith.constant 0 : index
    %155 = tpu.strided_load %arg11[%c171, %c0_234] {strides = array<i32: 2, 1>} : memref<546x16xf32, #tpu.memory_space<vmem>>, vector<9x16xf32>
    %c18_235 = arith.constant 18 : index
    %c368_236 = arith.constant 368 : index
    %156 = vector.load %arg12[%c18_235, %c368_236] : memref<90x400xf32, #tpu.memory_space<vmem>>, vector<9x16xf32>
    tpu.vector_store %arg12[%c18_235, %c368_236], %155 {strides = array<i32>} : memref<90x400xf32, #tpu.memory_space<vmem>>, vector<9x16xf32>,
    %c172 = arith.constant 172 : index
    %c0_237 = arith.constant 0 : index
    %157 = tpu.strided_load %arg11[%c172, %c0_237] {strides = array<i32: 2, 1>} : memref<546x16xf32, #tpu.memory_space<vmem>>, vector<9x16xf32>
    %c18_238 = arith.constant 18 : index
    %c384_239 = arith.constant 384 : index
    %158 = vector.load %arg12[%c18_238, %c384_239] : memref<90x400xf32, #tpu.memory_space<vmem>>, vector<9x16xf32>
    tpu.vector_store %arg12[%c18_238, %c384_239], %157 {strides = array<i32>} : memref<90x400xf32, #tpu.memory_space<vmem>>, vector<9x16xf32>,
    %c126_240 = arith.constant 126 : index
    %c0_241 = arith.constant 0 : index
    %159 = tpu.strided_load %arg11[%c126_240, %c0_241] {strides = array<i32: 2, 1>} : memref<546x16xf32, #tpu.memory_space<vmem>>, vector<9x16xf32>
    %c27 = arith.constant 27 : index
    %c0_242 = arith.constant 0 : index
    %160 = vector.load %arg12[%c27, %c0_242] : memref<90x400xf32, #tpu.memory_space<vmem>>, vector<9x16xf32>
    tpu.vector_store %arg12[%c27, %c0_242], %159 {strides = array<i32>} : memref<90x400xf32, #tpu.memory_space<vmem>>, vector<9x16xf32>,
    %c127_243 = arith.constant 127 : index
    %c0_244 = arith.constant 0 : index
    %161 = tpu.strided_load %arg11[%c127_243, %c0_244] {strides = array<i32: 2, 1>} : memref<546x16xf32, #tpu.memory_space<vmem>>, vector<9x16xf32>
    %c27_245 = arith.constant 27 : index
    %c16_246 = arith.constant 16 : index
    %162 = vector.load %arg12[%c27_245, %c16_246] : memref<90x400xf32, #tpu.memory_space<vmem>>, vector<9x16xf32>
    tpu.vector_store %arg12[%c27_245, %c16_246], %161 {strides = array<i32>} : memref<90x400xf32, #tpu.memory_space<vmem>>, vector<9x16xf32>,
    %c128_247 = arith.constant 128 : index
    %c0_248 = arith.constant 0 : index
    %163 = tpu.strided_load %arg11[%c128_247, %c0_248] {strides = array<i32: 2, 1>} : memref<546x16xf32, #tpu.memory_space<vmem>>, vector<9x16xf32>
    %c27_249 = arith.constant 27 : index
    %c32_250 = arith.constant 32 : index
    %164 = vector.load %arg12[%c27_249, %c32_250] : memref<90x400xf32, #tpu.memory_space<vmem>>, vector<9x16xf32>
    tpu.vector_store %arg12[%c27_249, %c32_250], %163 {strides = array<i32>} : memref<90x400xf32, #tpu.memory_space<vmem>>, vector<9x16xf32>,
    %c129_251 = arith.constant 129 : index
    %c0_252 = arith.constant 0 : index
    %165 = tpu.strided_load %arg11[%c129_251, %c0_252] {strides = array<i32: 2, 1>} : memref<546x16xf32, #tpu.memory_space<vmem>>, vector<9x16xf32>
    %c27_253 = arith.constant 27 : index
    %c48_254 = arith.constant 48 : index
    %166 = vector.load %arg12[%c27_253, %c48_254] : memref<90x400xf32, #tpu.memory_space<vmem>>, vector<9x16xf32>
    tpu.vector_store %arg12[%c27_253, %c48_254], %165 {strides = array<i32>} : memref<90x400xf32, #tpu.memory_space<vmem>>, vector<9x16xf32>,
    %c130_255 = arith.constant 130 : index
    %c0_256 = arith.constant 0 : index
    %167 = tpu.strided_load %arg11[%c130_255, %c0_256] {strides = array<i32: 2, 1>} : memref<546x16xf32, #tpu.memory_space<vmem>>, vector<9x16xf32>
    %c27_257 = arith.constant 27 : index
    %c64_258 = arith.constant 64 : index
    %168 = vector.load %arg12[%c27_257, %c64_258] : memref<90x400xf32, #tpu.memory_space<vmem>>, vector<9x16xf32>
    tpu.vector_store %arg12[%c27_257, %c64_258], %167 {strides = array<i32>} : memref<90x400xf32, #tpu.memory_space<vmem>>, vector<9x16xf32>,
    %c147_259 = arith.constant 147 : index
    %c0_260 = arith.constant 0 : index
    %169 = tpu.strided_load %arg11[%c147_259, %c0_260] {strides = array<i32: 2, 1>} : memref<546x16xf32, #tpu.memory_space<vmem>>, vector<9x16xf32>
    %c27_261 = arith.constant 27 : index
    %c80_262 = arith.constant 80 : index
    %170 = vector.load %arg12[%c27_261, %c80_262] : memref<90x400xf32, #tpu.memory_space<vmem>>, vector<9x16xf32>
    tpu.vector_store %arg12[%c27_261, %c80_262], %169 {strides = array<i32>} : memref<90x400xf32, #tpu.memory_space<vmem>>, vector<9x16xf32>,
    %c148_263 = arith.constant 148 : index
    %c0_264 = arith.constant 0 : index
    %171 = tpu.strided_load %arg11[%c148_263, %c0_264] {strides = array<i32: 2, 1>} : memref<546x16xf32, #tpu.memory_space<vmem>>, vector<9x16xf32>
    %c27_265 = arith.constant 27 : index
    %c96_266 = arith.constant 96 : index
    %172 = vector.load %arg12[%c27_265, %c96_266] : memref<90x400xf32, #tpu.memory_space<vmem>>, vector<9x16xf32>
    tpu.vector_store %arg12[%c27_265, %c96_266], %171 {strides = array<i32>} : memref<90x400xf32, #tpu.memory_space<vmem>>, vector<9x16xf32>,
    %c149_267 = arith.constant 149 : index
    %c0_268 = arith.constant 0 : index
    %173 = tpu.strided_load %arg11[%c149_267, %c0_268] {strides = array<i32: 2, 1>} : memref<546x16xf32, #tpu.memory_space<vmem>>, vector<9x16xf32>
    %c27_269 = arith.constant 27 : index
    %c112_270 = arith.constant 112 : index
    %174 = vector.load %arg12[%c27_269, %c112_270] : memref<90x400xf32, #tpu.memory_space<vmem>>, vector<9x16xf32>
    tpu.vector_store %arg12[%c27_269, %c112_270], %173 {strides = array<i32>} : memref<90x400xf32, #tpu.memory_space<vmem>>, vector<9x16xf32>,
    %c150_271 = arith.constant 150 : index
    %c0_272 = arith.constant 0 : index
    %175 = tpu.strided_load %arg11[%c150_271, %c0_272] {strides = array<i32: 2, 1>} : memref<546x16xf32, #tpu.memory_space<vmem>>, vector<9x16xf32>
    %c27_273 = arith.constant 27 : index
    %c128_274 = arith.constant 128 : index
    %176 = vector.load %arg12[%c27_273, %c128_274] : memref<90x400xf32, #tpu.memory_space<vmem>>, vector<9x16xf32>
    tpu.vector_store %arg12[%c27_273, %c128_274], %175 {strides = array<i32>} : memref<90x400xf32, #tpu.memory_space<vmem>>, vector<9x16xf32>,
    %c151_275 = arith.constant 151 : index
    %c0_276 = arith.constant 0 : index
    %177 = tpu.strided_load %arg11[%c151_275, %c0_276] {strides = array<i32: 2, 1>} : memref<546x16xf32, #tpu.memory_space<vmem>>, vector<9x16xf32>
    %c27_277 = arith.constant 27 : index
    %c144_278 = arith.constant 144 : index
    %178 = vector.load %arg12[%c27_277, %c144_278] : memref<90x400xf32, #tpu.memory_space<vmem>>, vector<9x16xf32>
    tpu.vector_store %arg12[%c27_277, %c144_278], %177 {strides = array<i32>} : memref<90x400xf32, #tpu.memory_space<vmem>>, vector<9x16xf32>,
    %c168_279 = arith.constant 168 : index
    %c0_280 = arith.constant 0 : index
    %179 = tpu.strided_load %arg11[%c168_279, %c0_280] {strides = array<i32: 2, 1>} : memref<546x16xf32, #tpu.memory_space<vmem>>, vector<9x16xf32>
    %c27_281 = arith.constant 27 : index
    %c160_282 = arith.constant 160 : index
    %180 = vector.load %arg12[%c27_281, %c160_282] : memref<90x400xf32, #tpu.memory_space<vmem>>, vector<9x16xf32>
    tpu.vector_store %arg12[%c27_281, %c160_282], %179 {strides = array<i32>} : memref<90x400xf32, #tpu.memory_space<vmem>>, vector<9x16xf32>,
    %c169_283 = arith.constant 169 : index
    %c0_284 = arith.constant 0 : index
    %181 = tpu.strided_load %arg11[%c169_283, %c0_284] {strides = array<i32: 2, 1>} : memref<546x16xf32, #tpu.memory_space<vmem>>, vector<9x16xf32>
    %c27_285 = arith.constant 27 : index
    %c176_286 = arith.constant 176 : index
    %182 = vector.load %arg12[%c27_285, %c176_286] : memref<90x400xf32, #tpu.memory_space<vmem>>, vector<9x16xf32>
    tpu.vector_store %arg12[%c27_285, %c176_286], %181 {strides = array<i32>} : memref<90x400xf32, #tpu.memory_space<vmem>>, vector<9x16xf32>,
    %c170_287 = arith.constant 170 : index
    %c0_288 = arith.constant 0 : index
    %183 = tpu.strided_load %arg11[%c170_287, %c0_288] {strides = array<i32: 2, 1>} : memref<546x16xf32, #tpu.memory_space<vmem>>, vector<9x16xf32>
    %c27_289 = arith.constant 27 : index
    %c192_290 = arith.constant 192 : index
    %184 = vector.load %arg12[%c27_289, %c192_290] : memref<90x400xf32, #tpu.memory_space<vmem>>, vector<9x16xf32>
    tpu.vector_store %arg12[%c27_289, %c192_290], %183 {strides = array<i32>} : memref<90x400xf32, #tpu.memory_space<vmem>>, vector<9x16xf32>,
    %c171_291 = arith.constant 171 : index
    %c0_292 = arith.constant 0 : index
    %185 = tpu.strided_load %arg11[%c171_291, %c0_292] {strides = array<i32: 2, 1>} : memref<546x16xf32, #tpu.memory_space<vmem>>, vector<9x16xf32>
    %c27_293 = arith.constant 27 : index
    %c208_294 = arith.constant 208 : index
    %186 = vector.load %arg12[%c27_293, %c208_294] : memref<90x400xf32, #tpu.memory_space<vmem>>, vector<9x16xf32>
    tpu.vector_store %arg12[%c27_293, %c208_294], %185 {strides = array<i32>} : memref<90x400xf32, #tpu.memory_space<vmem>>, vector<9x16xf32>,
    %c172_295 = arith.constant 172 : index
    %c0_296 = arith.constant 0 : index
    %187 = tpu.strided_load %arg11[%c172_295, %c0_296] {strides = array<i32: 2, 1>} : memref<546x16xf32, #tpu.memory_space<vmem>>, vector<9x16xf32>
    %c27_297 = arith.constant 27 : index
    %c224_298 = arith.constant 224 : index
    %188 = vector.load %arg12[%c27_297, %c224_298] : memref<90x400xf32, #tpu.memory_space<vmem>>, vector<9x16xf32>
    tpu.vector_store %arg12[%c27_297, %c224_298], %187 {strides = array<i32>} : memref<90x400xf32, #tpu.memory_space<vmem>>, vector<9x16xf32>,
    %c189 = arith.constant 189 : index
    %c0_299 = arith.constant 0 : index
    %189 = tpu.strided_load %arg11[%c189, %c0_299] {strides = array<i32: 2, 1>} : memref<546x16xf32, #tpu.memory_space<vmem>>, vector<9x16xf32>
    %c27_300 = arith.constant 27 : index
    %c240_301 = arith.constant 240 : index
    %190 = vector.load %arg12[%c27_300, %c240_301] : memref<90x400xf32, #tpu.memory_space<vmem>>, vector<9x16xf32>
    tpu.vector_store %arg12[%c27_300, %c240_301], %189 {strides = array<i32>} : memref<90x400xf32, #tpu.memory_space<vmem>>, vector<9x16xf32>,
    %c190 = arith.constant 190 : index
    %c0_302 = arith.constant 0 : index
    %191 = tpu.strided_load %arg11[%c190, %c0_302] {strides = array<i32: 2, 1>} : memref<546x16xf32, #tpu.memory_space<vmem>>, vector<9x16xf32>
    %c27_303 = arith.constant 27 : index
    %c256_304 = arith.constant 256 : index
    %192 = vector.load %arg12[%c27_303, %c256_304] : memref<90x400xf32, #tpu.memory_space<vmem>>, vector<9x16xf32>
    tpu.vector_store %arg12[%c27_303, %c256_304], %191 {strides = array<i32>} : memref<90x400xf32, #tpu.memory_space<vmem>>, vector<9x16xf32>,
    %c191 = arith.constant 191 : index
    %c0_305 = arith.constant 0 : index
    %193 = tpu.strided_load %arg11[%c191, %c0_305] {strides = array<i32: 2, 1>} : memref<546x16xf32, #tpu.memory_space<vmem>>, vector<9x16xf32>
    %c27_306 = arith.constant 27 : index
    %c272_307 = arith.constant 272 : index
    %194 = vector.load %arg12[%c27_306, %c272_307] : memref<90x400xf32, #tpu.memory_space<vmem>>, vector<9x16xf32>
    tpu.vector_store %arg12[%c27_306, %c272_307], %193 {strides = array<i32>} : memref<90x400xf32, #tpu.memory_space<vmem>>, vector<9x16xf32>,
    %c192_308 = arith.constant 192 : index
    %c0_309 = arith.constant 0 : index
    %195 = tpu.strided_load %arg11[%c192_308, %c0_309] {strides = array<i32: 2, 1>} : memref<546x16xf32, #tpu.memory_space<vmem>>, vector<9x16xf32>
    %c27_310 = arith.constant 27 : index
    %c288_311 = arith.constant 288 : index
    %196 = vector.load %arg12[%c27_310, %c288_311] : memref<90x400xf32, #tpu.memory_space<vmem>>, vector<9x16xf32>
    tpu.vector_store %arg12[%c27_310, %c288_311], %195 {strides = array<i32>} : memref<90x400xf32, #tpu.memory_space<vmem>>, vector<9x16xf32>,
    %c193 = arith.constant 193 : index
    %c0_312 = arith.constant 0 : index
    %197 = tpu.strided_load %arg11[%c193, %c0_312] {strides = array<i32: 2, 1>} : memref<546x16xf32, #tpu.memory_space<vmem>>, vector<9x16xf32>
    %c27_313 = arith.constant 27 : index
    %c304_314 = arith.constant 304 : index
    %198 = vector.load %arg12[%c27_313, %c304_314] : memref<90x400xf32, #tpu.memory_space<vmem>>, vector<9x16xf32>
    tpu.vector_store %arg12[%c27_313, %c304_314], %197 {strides = array<i32>} : memref<90x400xf32, #tpu.memory_space<vmem>>, vector<9x16xf32>,
    %c210 = arith.constant 210 : index
    %c0_315 = arith.constant 0 : index
    %199 = tpu.strided_load %arg11[%c210, %c0_315] {strides = array<i32: 2, 1>} : memref<546x16xf32, #tpu.memory_space<vmem>>, vector<9x16xf32>
    %c27_316 = arith.constant 27 : index
    %c320_317 = arith.constant 320 : index
    %200 = vector.load %arg12[%c27_316, %c320_317] : memref<90x400xf32, #tpu.memory_space<vmem>>, vector<9x16xf32>
    tpu.vector_store %arg12[%c27_316, %c320_317], %199 {strides = array<i32>} : memref<90x400xf32, #tpu.memory_space<vmem>>, vector<9x16xf32>,
    %c211 = arith.constant 211 : index
    %c0_318 = arith.constant 0 : index
    %201 = tpu.strided_load %arg11[%c211, %c0_318] {strides = array<i32: 2, 1>} : memref<546x16xf32, #tpu.memory_space<vmem>>, vector<9x16xf32>
    %c27_319 = arith.constant 27 : index
    %c336_320 = arith.constant 336 : index
    %202 = vector.load %arg12[%c27_319, %c336_320] : memref<90x400xf32, #tpu.memory_space<vmem>>, vector<9x16xf32>
    tpu.vector_store %arg12[%c27_319, %c336_320], %201 {strides = array<i32>} : memref<90x400xf32, #tpu.memory_space<vmem>>, vector<9x16xf32>,
    %c212 = arith.constant 212 : index
    %c0_321 = arith.constant 0 : index
    %203 = tpu.strided_load %arg11[%c212, %c0_321] {strides = array<i32: 2, 1>} : memref<546x16xf32, #tpu.memory_space<vmem>>, vector<9x16xf32>
    %c27_322 = arith.constant 27 : index
    %c352_323 = arith.constant 352 : index
    %204 = vector.load %arg12[%c27_322, %c352_323] : memref<90x400xf32, #tpu.memory_space<vmem>>, vector<9x16xf32>
    tpu.vector_store %arg12[%c27_322, %c352_323], %203 {strides = array<i32>} : memref<90x400xf32, #tpu.memory_space<vmem>>, vector<9x16xf32>,
    %c213 = arith.constant 213 : index
    %c0_324 = arith.constant 0 : index
    %205 = tpu.strided_load %arg11[%c213, %c0_324] {strides = array<i32: 2, 1>} : memref<546x16xf32, #tpu.memory_space<vmem>>, vector<9x16xf32>
    %c27_325 = arith.constant 27 : index
    %c368_326 = arith.constant 368 : index
    %206 = vector.load %arg12[%c27_325, %c368_326] : memref<90x400xf32, #tpu.memory_space<vmem>>, vector<9x16xf32>
    tpu.vector_store %arg12[%c27_325, %c368_326], %205 {strides = array<i32>} : memref<90x400xf32, #tpu.memory_space<vmem>>, vector<9x16xf32>,
    %c214 = arith.constant 214 : index
    %c0_327 = arith.constant 0 : index
    %207 = tpu.strided_load %arg11[%c214, %c0_327] {strides = array<i32: 2, 1>} : memref<546x16xf32, #tpu.memory_space<vmem>>, vector<9x16xf32>
    %c27_328 = arith.constant 27 : index
    %c384_329 = arith.constant 384 : index
    %208 = vector.load %arg12[%c27_328, %c384_329] : memref<90x400xf32, #tpu.memory_space<vmem>>, vector<9x16xf32>
    tpu.vector_store %arg12[%c27_328, %c384_329], %207 {strides = array<i32>} : memref<90x400xf32, #tpu.memory_space<vmem>>, vector<9x16xf32>,
    %c168_330 = arith.constant 168 : index
    %c0_331 = arith.constant 0 : index
    %209 = tpu.strided_load %arg11[%c168_330, %c0_331] {strides = array<i32: 2, 1>} : memref<546x16xf32, #tpu.memory_space<vmem>>, vector<9x16xf32>
    %c36 = arith.constant 36 : index
    %c0_332 = arith.constant 0 : index
    %210 = vector.load %arg12[%c36, %c0_332] : memref<90x400xf32, #tpu.memory_space<vmem>>, vector<9x16xf32>
    tpu.vector_store %arg12[%c36, %c0_332], %209 {strides = array<i32>} : memref<90x400xf32, #tpu.memory_space<vmem>>, vector<9x16xf32>,
    %c169_333 = arith.constant 169 : index
    %c0_334 = arith.constant 0 : index
    %211 = tpu.strided_load %arg11[%c169_333, %c0_334] {strides = array<i32: 2, 1>} : memref<546x16xf32, #tpu.memory_space<vmem>>, vector<9x16xf32>
    %c36_335 = arith.constant 36 : index
    %c16_336 = arith.constant 16 : index
    %212 = vector.load %arg12[%c36_335, %c16_336] : memref<90x400xf32, #tpu.memory_space<vmem>>, vector<9x16xf32>
    tpu.vector_store %arg12[%c36_335, %c16_336], %211 {strides = array<i32>} : memref<90x400xf32, #tpu.memory_space<vmem>>, vector<9x16xf32>,
    %c170_337 = arith.constant 170 : index
    %c0_338 = arith.constant 0 : index
    %213 = tpu.strided_load %arg11[%c170_337, %c0_338] {strides = array<i32: 2, 1>} : memref<546x16xf32, #tpu.memory_space<vmem>>, vector<9x16xf32>
    %c36_339 = arith.constant 36 : index
    %c32_340 = arith.constant 32 : index
    %214 = vector.load %arg12[%c36_339, %c32_340] : memref<90x400xf32, #tpu.memory_space<vmem>>, vector<9x16xf32>
    tpu.vector_store %arg12[%c36_339, %c32_340], %213 {strides = array<i32>} : memref<90x400xf32, #tpu.memory_space<vmem>>, vector<9x16xf32>,
    %c171_341 = arith.constant 171 : index
    %c0_342 = arith.constant 0 : index
    %215 = tpu.strided_load %arg11[%c171_341, %c0_342] {strides = array<i32: 2, 1>} : memref<546x16xf32, #tpu.memory_space<vmem>>, vector<9x16xf32>
    %c36_343 = arith.constant 36 : index
    %c48_344 = arith.constant 48 : index
    %216 = vector.load %arg12[%c36_343, %c48_344] : memref<90x400xf32, #tpu.memory_space<vmem>>, vector<9x16xf32>
    tpu.vector_store %arg12[%c36_343, %c48_344], %215 {strides = array<i32>} : memref<90x400xf32, #tpu.memory_space<vmem>>, vector<9x16xf32>,
    %c172_345 = arith.constant 172 : index
    %c0_346 = arith.constant 0 : index
    %217 = tpu.strided_load %arg11[%c172_345, %c0_346] {strides = array<i32: 2, 1>} : memref<546x16xf32, #tpu.memory_space<vmem>>, vector<9x16xf32>
    %c36_347 = arith.constant 36 : index
    %c64_348 = arith.constant 64 : index
    %218 = vector.load %arg12[%c36_347, %c64_348] : memref<90x400xf32, #tpu.memory_space<vmem>>, vector<9x16xf32>
    tpu.vector_store %arg12[%c36_347, %c64_348], %217 {strides = array<i32>} : memref<90x400xf32, #tpu.memory_space<vmem>>, vector<9x16xf32>,
    %c189_349 = arith.constant 189 : index
    %c0_350 = arith.constant 0 : index
    %219 = tpu.strided_load %arg11[%c189_349, %c0_350] {strides = array<i32: 2, 1>} : memref<546x16xf32, #tpu.memory_space<vmem>>, vector<9x16xf32>
    %c36_351 = arith.constant 36 : index
    %c80_352 = arith.constant 80 : index
    %220 = vector.load %arg12[%c36_351, %c80_352] : memref<90x400xf32, #tpu.memory_space<vmem>>, vector<9x16xf32>
    tpu.vector_store %arg12[%c36_351, %c80_352], %219 {strides = array<i32>} : memref<90x400xf32, #tpu.memory_space<vmem>>, vector<9x16xf32>,
    %c190_353 = arith.constant 190 : index
    %c0_354 = arith.constant 0 : index
    %221 = tpu.strided_load %arg11[%c190_353, %c0_354] {strides = array<i32: 2, 1>} : memref<546x16xf32, #tpu.memory_space<vmem>>, vector<9x16xf32>
    %c36_355 = arith.constant 36 : index
    %c96_356 = arith.constant 96 : index
    %222 = vector.load %arg12[%c36_355, %c96_356] : memref<90x400xf32, #tpu.memory_space<vmem>>, vector<9x16xf32>
    tpu.vector_store %arg12[%c36_355, %c96_356], %221 {strides = array<i32>} : memref<90x400xf32, #tpu.memory_space<vmem>>, vector<9x16xf32>,
    %c191_357 = arith.constant 191 : index
    %c0_358 = arith.constant 0 : index
    %223 = tpu.strided_load %arg11[%c191_357, %c0_358] {strides = array<i32: 2, 1>} : memref<546x16xf32, #tpu.memory_space<vmem>>, vector<9x16xf32>
    %c36_359 = arith.constant 36 : index
    %c112_360 = arith.constant 112 : index
    %224 = vector.load %arg12[%c36_359, %c112_360] : memref<90x400xf32, #tpu.memory_space<vmem>>, vector<9x16xf32>
    tpu.vector_store %arg12[%c36_359, %c112_360], %223 {strides = array<i32>} : memref<90x400xf32, #tpu.memory_space<vmem>>, vector<9x16xf32>,
    %c192_361 = arith.constant 192 : index
    %c0_362 = arith.constant 0 : index
    %225 = tpu.strided_load %arg11[%c192_361, %c0_362] {strides = array<i32: 2, 1>} : memref<546x16xf32, #tpu.memory_space<vmem>>, vector<9x16xf32>
    %c36_363 = arith.constant 36 : index
    %c128_364 = arith.constant 128 : index
    %226 = vector.load %arg12[%c36_363, %c128_364] : memref<90x400xf32, #tpu.memory_space<vmem>>, vector<9x16xf32>
    tpu.vector_store %arg12[%c36_363, %c128_364], %225 {strides = array<i32>} : memref<90x400xf32, #tpu.memory_space<vmem>>, vector<9x16xf32>,
    %c193_365 = arith.constant 193 : index
    %c0_366 = arith.constant 0 : index
    %227 = tpu.strided_load %arg11[%c193_365, %c0_366] {strides = array<i32: 2, 1>} : memref<546x16xf32, #tpu.memory_space<vmem>>, vector<9x16xf32>
    %c36_367 = arith.constant 36 : index
    %c144_368 = arith.constant 144 : index
    %228 = vector.load %arg12[%c36_367, %c144_368] : memref<90x400xf32, #tpu.memory_space<vmem>>, vector<9x16xf32>
    tpu.vector_store %arg12[%c36_367, %c144_368], %227 {strides = array<i32>} : memref<90x400xf32, #tpu.memory_space<vmem>>, vector<9x16xf32>,
    %c210_369 = arith.constant 210 : index
    %c0_370 = arith.constant 0 : index
    %229 = tpu.strided_load %arg11[%c210_369, %c0_370] {strides = array<i32: 2, 1>} : memref<546x16xf32, #tpu.memory_space<vmem>>, vector<9x16xf32>
    %c36_371 = arith.constant 36 : index
    %c160_372 = arith.constant 160 : index
    %230 = vector.load %arg12[%c36_371, %c160_372] : memref<90x400xf32, #tpu.memory_space<vmem>>, vector<9x16xf32>
    tpu.vector_store %arg12[%c36_371, %c160_372], %229 {strides = array<i32>} : memref<90x400xf32, #tpu.memory_space<vmem>>, vector<9x16xf32>,
    %c211_373 = arith.constant 211 : index
    %c0_374 = arith.constant 0 : index
    %231 = tpu.strided_load %arg11[%c211_373, %c0_374] {strides = array<i32: 2, 1>} : memref<546x16xf32, #tpu.memory_space<vmem>>, vector<9x16xf32>
    %c36_375 = arith.constant 36 : index
    %c176_376 = arith.constant 176 : index
    %232 = vector.load %arg12[%c36_375, %c176_376] : memref<90x400xf32, #tpu.memory_space<vmem>>, vector<9x16xf32>
    tpu.vector_store %arg12[%c36_375, %c176_376], %231 {strides = array<i32>} : memref<90x400xf32, #tpu.memory_space<vmem>>, vector<9x16xf32>,
    %c212_377 = arith.constant 212 : index
    %c0_378 = arith.constant 0 : index
    %233 = tpu.strided_load %arg11[%c212_377, %c0_378] {strides = array<i32: 2, 1>} : memref<546x16xf32, #tpu.memory_space<vmem>>, vector<9x16xf32>
    %c36_379 = arith.constant 36 : index
    %c192_380 = arith.constant 192 : index
    %234 = vector.load %arg12[%c36_379, %c192_380] : memref<90x400xf32, #tpu.memory_space<vmem>>, vector<9x16xf32>
    tpu.vector_store %arg12[%c36_379, %c192_380], %233 {strides = array<i32>} : memref<90x400xf32, #tpu.memory_space<vmem>>, vector<9x16xf32>,
    %c213_381 = arith.constant 213 : index
    %c0_382 = arith.constant 0 : index
    %235 = tpu.strided_load %arg11[%c213_381, %c0_382] {strides = array<i32: 2, 1>} : memref<546x16xf32, #tpu.memory_space<vmem>>, vector<9x16xf32>
    %c36_383 = arith.constant 36 : index
    %c208_384 = arith.constant 208 : index
    %236 = vector.load %arg12[%c36_383, %c208_384] : memref<90x400xf32, #tpu.memory_space<vmem>>, vector<9x16xf32>
    tpu.vector_store %arg12[%c36_383, %c208_384], %235 {strides = array<i32>} : memref<90x400xf32, #tpu.memory_space<vmem>>, vector<9x16xf32>,
    %c214_385 = arith.constant 214 : index
    %c0_386 = arith.constant 0 : index
    %237 = tpu.strided_load %arg11[%c214_385, %c0_386] {strides = array<i32: 2, 1>} : memref<546x16xf32, #tpu.memory_space<vmem>>, vector<9x16xf32>
    %c36_387 = arith.constant 36 : index
    %c224_388 = arith.constant 224 : index
    %238 = vector.load %arg12[%c36_387, %c224_388] : memref<90x400xf32, #tpu.memory_space<vmem>>, vector<9x16xf32>
    tpu.vector_store %arg12[%c36_387, %c224_388], %237 {strides = array<i32>} : memref<90x400xf32, #tpu.memory_space<vmem>>, vector<9x16xf32>,
    %c231 = arith.constant 231 : index
    %c0_389 = arith.constant 0 : index
    %239 = tpu.strided_load %arg11[%c231, %c0_389] {strides = array<i32: 2, 1>} : memref<546x16xf32, #tpu.memory_space<vmem>>, vector<9x16xf32>
    %c36_390 = arith.constant 36 : index
    %c240_391 = arith.constant 240 : index
    %240 = vector.load %arg12[%c36_390, %c240_391] : memref<90x400xf32, #tpu.memory_space<vmem>>, vector<9x16xf32>
    tpu.vector_store %arg12[%c36_390, %c240_391], %239 {strides = array<i32>} : memref<90x400xf32, #tpu.memory_space<vmem>>, vector<9x16xf32>,
    %c232 = arith.constant 232 : index
    %c0_392 = arith.constant 0 : index
    %241 = tpu.strided_load %arg11[%c232, %c0_392] {strides = array<i32: 2, 1>} : memref<546x16xf32, #tpu.memory_space<vmem>>, vector<9x16xf32>
    %c36_393 = arith.constant 36 : index
    %c256_394 = arith.constant 256 : index
    %242 = vector.load %arg12[%c36_393, %c256_394] : memref<90x400xf32, #tpu.memory_space<vmem>>, vector<9x16xf32>
    tpu.vector_store %arg12[%c36_393, %c256_394], %241 {strides = array<i32>} : memref<90x400xf32, #tpu.memory_space<vmem>>, vector<9x16xf32>,
    %c233 = arith.constant 233 : index
    %c0_395 = arith.constant 0 : index
    %243 = tpu.strided_load %arg11[%c233, %c0_395] {strides = array<i32: 2, 1>} : memref<546x16xf32, #tpu.memory_space<vmem>>, vector<9x16xf32>
    %c36_396 = arith.constant 36 : index
    %c272_397 = arith.constant 272 : index
    %244 = vector.load %arg12[%c36_396, %c272_397] : memref<90x400xf32, #tpu.memory_space<vmem>>, vector<9x16xf32>
    tpu.vector_store %arg12[%c36_396, %c272_397], %243 {strides = array<i32>} : memref<90x400xf32, #tpu.memory_space<vmem>>, vector<9x16xf32>,
    %c234 = arith.constant 234 : index
    %c0_398 = arith.constant 0 : index
    %245 = tpu.strided_load %arg11[%c234, %c0_398] {strides = array<i32: 2, 1>} : memref<546x16xf32, #tpu.memory_space<vmem>>, vector<9x16xf32>
    %c36_399 = arith.constant 36 : index
    %c288_400 = arith.constant 288 : index
    %246 = vector.load %arg12[%c36_399, %c288_400] : memref<90x400xf32, #tpu.memory_space<vmem>>, vector<9x16xf32>
    tpu.vector_store %arg12[%c36_399, %c288_400], %245 {strides = array<i32>} : memref<90x400xf32, #tpu.memory_space<vmem>>, vector<9x16xf32>,
    %c235 = arith.constant 235 : index
    %c0_401 = arith.constant 0 : index
    %247 = tpu.strided_load %arg11[%c235, %c0_401] {strides = array<i32: 2, 1>} : memref<546x16xf32, #tpu.memory_space<vmem>>, vector<9x16xf32>
    %c36_402 = arith.constant 36 : index
    %c304_403 = arith.constant 304 : index
    %248 = vector.load %arg12[%c36_402, %c304_403] : memref<90x400xf32, #tpu.memory_space<vmem>>, vector<9x16xf32>
    tpu.vector_store %arg12[%c36_402, %c304_403], %247 {strides = array<i32>} : memref<90x400xf32, #tpu.memory_space<vmem>>, vector<9x16xf32>,
    %c252 = arith.constant 252 : index
    %c0_404 = arith.constant 0 : index
    %249 = tpu.strided_load %arg11[%c252, %c0_404] {strides = array<i32: 2, 1>} : memref<546x16xf32, #tpu.memory_space<vmem>>, vector<9x16xf32>
    %c36_405 = arith.constant 36 : index
    %c320_406 = arith.constant 320 : index
    %250 = vector.load %arg12[%c36_405, %c320_406] : memref<90x400xf32, #tpu.memory_space<vmem>>, vector<9x16xf32>
    tpu.vector_store %arg12[%c36_405, %c320_406], %249 {strides = array<i32>} : memref<90x400xf32, #tpu.memory_space<vmem>>, vector<9x16xf32>,
    %c253 = arith.constant 253 : index
    %c0_407 = arith.constant 0 : index
    %251 = tpu.strided_load %arg11[%c253, %c0_407] {strides = array<i32: 2, 1>} : memref<546x16xf32, #tpu.memory_space<vmem>>, vector<9x16xf32>
    %c36_408 = arith.constant 36 : index
    %c336_409 = arith.constant 336 : index
    %252 = vector.load %arg12[%c36_408, %c336_409] : memref<90x400xf32, #tpu.memory_space<vmem>>, vector<9x16xf32>
    tpu.vector_store %arg12[%c36_408, %c336_409], %251 {strides = array<i32>} : memref<90x400xf32, #tpu.memory_space<vmem>>, vector<9x16xf32>,
    %c254 = arith.constant 254 : index
    %c0_410 = arith.constant 0 : index
    %253 = tpu.strided_load %arg11[%c254, %c0_410] {strides = array<i32: 2, 1>} : memref<546x16xf32, #tpu.memory_space<vmem>>, vector<9x16xf32>
    %c36_411 = arith.constant 36 : index
    %c352_412 = arith.constant 352 : index
    %254 = vector.load %arg12[%c36_411, %c352_412] : memref<90x400xf32, #tpu.memory_space<vmem>>, vector<9x16xf32>
    tpu.vector_store %arg12[%c36_411, %c352_412], %253 {strides = array<i32>} : memref<90x400xf32, #tpu.memory_space<vmem>>, vector<9x16xf32>,
    %c255 = arith.constant 255 : index
    %c0_413 = arith.constant 0 : index
    %255 = tpu.strided_load %arg11[%c255, %c0_413] {strides = array<i32: 2, 1>} : memref<546x16xf32, #tpu.memory_space<vmem>>, vector<9x16xf32>
    %c36_414 = arith.constant 36 : index
    %c368_415 = arith.constant 368 : index
    %256 = vector.load %arg12[%c36_414, %c368_415] : memref<90x400xf32, #tpu.memory_space<vmem>>, vector<9x16xf32>
    tpu.vector_store %arg12[%c36_414, %c368_415], %255 {strides = array<i32>} : memref<90x400xf32, #tpu.memory_space<vmem>>, vector<9x16xf32>,
    %c256_416 = arith.constant 256 : index
    %c0_417 = arith.constant 0 : index
    %257 = tpu.strided_load %arg11[%c256_416, %c0_417] {strides = array<i32: 2, 1>} : memref<546x16xf32, #tpu.memory_space<vmem>>, vector<9x16xf32>
    %c36_418 = arith.constant 36 : index
    %c384_419 = arith.constant 384 : index
    %258 = vector.load %arg12[%c36_418, %c384_419] : memref<90x400xf32, #tpu.memory_space<vmem>>, vector<9x16xf32>
    tpu.vector_store %arg12[%c36_418, %c384_419], %257 {strides = array<i32>} : memref<90x400xf32, #tpu.memory_space<vmem>>, vector<9x16xf32>,
    %c273 = arith.constant 273 : index
    %c0_420 = arith.constant 0 : index
    %259 = tpu.strided_load %arg11[%c273, %c0_420] {strides = array<i32: 2, 1>} : memref<546x16xf32, #tpu.memory_space<vmem>>, vector<9x16xf32>
    %c45_421 = arith.constant 45 : index
    %c0_422 = arith.constant 0 : index
    %260 = vector.load %arg12[%c45_421, %c0_422] : memref<90x400xf32, #tpu.memory_space<vmem>>, vector<9x16xf32>
    tpu.vector_store %arg12[%c45_421, %c0_422], %259 {strides = array<i32>} : memref<90x400xf32, #tpu.memory_space<vmem>>, vector<9x16xf32>,
    %c274 = arith.constant 274 : index
    %c0_423 = arith.constant 0 : index
    %261 = tpu.strided_load %arg11[%c274, %c0_423] {strides = array<i32: 2, 1>} : memref<546x16xf32, #tpu.memory_space<vmem>>, vector<9x16xf32>
    %c45_424 = arith.constant 45 : index
    %c16_425 = arith.constant 16 : index
    %262 = vector.load %arg12[%c45_424, %c16_425] : memref<90x400xf32, #tpu.memory_space<vmem>>, vector<9x16xf32>
    tpu.vector_store %arg12[%c45_424, %c16_425], %261 {strides = array<i32>} : memref<90x400xf32, #tpu.memory_space<vmem>>, vector<9x16xf32>,
    %c275 = arith.constant 275 : index
    %c0_426 = arith.constant 0 : index
    %263 = tpu.strided_load %arg11[%c275, %c0_426] {strides = array<i32: 2, 1>} : memref<546x16xf32, #tpu.memory_space<vmem>>, vector<9x16xf32>
    %c45_427 = arith.constant 45 : index
    %c32_428 = arith.constant 32 : index
    %264 = vector.load %arg12[%c45_427, %c32_428] : memref<90x400xf32, #tpu.memory_space<vmem>>, vector<9x16xf32>
    tpu.vector_store %arg12[%c45_427, %c32_428], %263 {strides = array<i32>} : memref<90x400xf32, #tpu.memory_space<vmem>>, vector<9x16xf32>,
    %c276 = arith.constant 276 : index
    %c0_429 = arith.constant 0 : index
    %265 = tpu.strided_load %arg11[%c276, %c0_429] {strides = array<i32: 2, 1>} : memref<546x16xf32, #tpu.memory_space<vmem>>, vector<9x16xf32>
    %c45_430 = arith.constant 45 : index
    %c48_431 = arith.constant 48 : index
    %266 = vector.load %arg12[%c45_430, %c48_431] : memref<90x400xf32, #tpu.memory_space<vmem>>, vector<9x16xf32>
    tpu.vector_store %arg12[%c45_430, %c48_431], %265 {strides = array<i32>} : memref<90x400xf32, #tpu.memory_space<vmem>>, vector<9x16xf32>,
    %c277 = arith.constant 277 : index
    %c0_432 = arith.constant 0 : index
    %267 = tpu.strided_load %arg11[%c277, %c0_432] {strides = array<i32: 2, 1>} : memref<546x16xf32, #tpu.memory_space<vmem>>, vector<9x16xf32>
    %c45_433 = arith.constant 45 : index
    %c64_434 = arith.constant 64 : index
    %268 = vector.load %arg12[%c45_433, %c64_434] : memref<90x400xf32, #tpu.memory_space<vmem>>, vector<9x16xf32>
    tpu.vector_store %arg12[%c45_433, %c64_434], %267 {strides = array<i32>} : memref<90x400xf32, #tpu.memory_space<vmem>>, vector<9x16xf32>,
    %c294 = arith.constant 294 : index
    %c0_435 = arith.constant 0 : index
    %269 = tpu.strided_load %arg11[%c294, %c0_435] {strides = array<i32: 2, 1>} : memref<546x16xf32, #tpu.memory_space<vmem>>, vector<9x16xf32>
    %c45_436 = arith.constant 45 : index
    %c80_437 = arith.constant 80 : index
    %270 = vector.load %arg12[%c45_436, %c80_437] : memref<90x400xf32, #tpu.memory_space<vmem>>, vector<9x16xf32>
    tpu.vector_store %arg12[%c45_436, %c80_437], %269 {strides = array<i32>} : memref<90x400xf32, #tpu.memory_space<vmem>>, vector<9x16xf32>,
    %c295 = arith.constant 295 : index
    %c0_438 = arith.constant 0 : index
    %271 = tpu.strided_load %arg11[%c295, %c0_438] {strides = array<i32: 2, 1>} : memref<546x16xf32, #tpu.memory_space<vmem>>, vector<9x16xf32>
    %c45_439 = arith.constant 45 : index
    %c96_440 = arith.constant 96 : index
    %272 = vector.load %arg12[%c45_439, %c96_440] : memref<90x400xf32, #tpu.memory_space<vmem>>, vector<9x16xf32>
    tpu.vector_store %arg12[%c45_439, %c96_440], %271 {strides = array<i32>} : memref<90x400xf32, #tpu.memory_space<vmem>>, vector<9x16xf32>,
    %c296 = arith.constant 296 : index
    %c0_441 = arith.constant 0 : index
    %273 = tpu.strided_load %arg11[%c296, %c0_441] {strides = array<i32: 2, 1>} : memref<546x16xf32, #tpu.memory_space<vmem>>, vector<9x16xf32>
    %c45_442 = arith.constant 45 : index
    %c112_443 = arith.constant 112 : index
    %274 = vector.load %arg12[%c45_442, %c112_443] : memref<90x400xf32, #tpu.memory_space<vmem>>, vector<9x16xf32>
    tpu.vector_store %arg12[%c45_442, %c112_443], %273 {strides = array<i32>} : memref<90x400xf32, #tpu.memory_space<vmem>>, vector<9x16xf32>,
    %c297 = arith.constant 297 : index
    %c0_444 = arith.constant 0 : index
    %275 = tpu.strided_load %arg11[%c297, %c0_444] {strides = array<i32: 2, 1>} : memref<546x16xf32, #tpu.memory_space<vmem>>, vector<9x16xf32>
    %c45_445 = arith.constant 45 : index
    %c128_446 = arith.constant 128 : index
    %276 = vector.load %arg12[%c45_445, %c128_446] : memref<90x400xf32, #tpu.memory_space<vmem>>, vector<9x16xf32>
    tpu.vector_store %arg12[%c45_445, %c128_446], %275 {strides = array<i32>} : memref<90x400xf32, #tpu.memory_space<vmem>>, vector<9x16xf32>,
    %c298 = arith.constant 298 : index
    %c0_447 = arith.constant 0 : index
    %277 = tpu.strided_load %arg11[%c298, %c0_447] {strides = array<i32: 2, 1>} : memref<546x16xf32, #tpu.memory_space<vmem>>, vector<9x16xf32>
    %c45_448 = arith.constant 45 : index
    %c144_449 = arith.constant 144 : index
    %278 = vector.load %arg12[%c45_448, %c144_449] : memref<90x400xf32, #tpu.memory_space<vmem>>, vector<9x16xf32>
    tpu.vector_store %arg12[%c45_448, %c144_449], %277 {strides = array<i32>} : memref<90x400xf32, #tpu.memory_space<vmem>>, vector<9x16xf32>,
    %c315 = arith.constant 315 : index
    %c0_450 = arith.constant 0 : index
    %279 = tpu.strided_load %arg11[%c315, %c0_450] {strides = array<i32: 2, 1>} : memref<546x16xf32, #tpu.memory_space<vmem>>, vector<9x16xf32>
    %c45_451 = arith.constant 45 : index
    %c160_452 = arith.constant 160 : index
    %280 = vector.load %arg12[%c45_451, %c160_452] : memref<90x400xf32, #tpu.memory_space<vmem>>, vector<9x16xf32>
    tpu.vector_store %arg12[%c45_451, %c160_452], %279 {strides = array<i32>} : memref<90x400xf32, #tpu.memory_space<vmem>>, vector<9x16xf32>,
    %c316 = arith.constant 316 : index
    %c0_453 = arith.constant 0 : index
    %281 = tpu.strided_load %arg11[%c316, %c0_453] {strides = array<i32: 2, 1>} : memref<546x16xf32, #tpu.memory_space<vmem>>, vector<9x16xf32>
    %c45_454 = arith.constant 45 : index
    %c176_455 = arith.constant 176 : index
    %282 = vector.load %arg12[%c45_454, %c176_455] : memref<90x400xf32, #tpu.memory_space<vmem>>, vector<9x16xf32>
    tpu.vector_store %arg12[%c45_454, %c176_455], %281 {strides = array<i32>} : memref<90x400xf32, #tpu.memory_space<vmem>>, vector<9x16xf32>,
    %c317 = arith.constant 317 : index
    %c0_456 = arith.constant 0 : index
    %283 = tpu.strided_load %arg11[%c317, %c0_456] {strides = array<i32: 2, 1>} : memref<546x16xf32, #tpu.memory_space<vmem>>, vector<9x16xf32>
    %c45_457 = arith.constant 45 : index
    %c192_458 = arith.constant 192 : index
    %284 = vector.load %arg12[%c45_457, %c192_458] : memref<90x400xf32, #tpu.memory_space<vmem>>, vector<9x16xf32>
    tpu.vector_store %arg12[%c45_457, %c192_458], %283 {strides = array<i32>} : memref<90x400xf32, #tpu.memory_space<vmem>>, vector<9x16xf32>,
    %c318 = arith.constant 318 : index
    %c0_459 = arith.constant 0 : index
    %285 = tpu.strided_load %arg11[%c318, %c0_459] {strides = array<i32: 2, 1>} : memref<546x16xf32, #tpu.memory_space<vmem>>, vector<9x16xf32>
    %c45_460 = arith.constant 45 : index
    %c208_461 = arith.constant 208 : index
    %286 = vector.load %arg12[%c45_460, %c208_461] : memref<90x400xf32, #tpu.memory_space<vmem>>, vector<9x16xf32>
    tpu.vector_store %arg12[%c45_460, %c208_461], %285 {strides = array<i32>} : memref<90x400xf32, #tpu.memory_space<vmem>>, vector<9x16xf32>,
    %c319 = arith.constant 319 : index
    %c0_462 = arith.constant 0 : index
    %287 = tpu.strided_load %arg11[%c319, %c0_462] {strides = array<i32: 2, 1>} : memref<546x16xf32, #tpu.memory_space<vmem>>, vector<9x16xf32>
    %c45_463 = arith.constant 45 : index
    %c224_464 = arith.constant 224 : index
    %288 = vector.load %arg12[%c45_463, %c224_464] : memref<90x400xf32, #tpu.memory_space<vmem>>, vector<9x16xf32>
    tpu.vector_store %arg12[%c45_463, %c224_464], %287 {strides = array<i32>} : memref<90x400xf32, #tpu.memory_space<vmem>>, vector<9x16xf32>,
    %c336_465 = arith.constant 336 : index
    %c0_466 = arith.constant 0 : index
    %289 = tpu.strided_load %arg11[%c336_465, %c0_466] {strides = array<i32: 2, 1>} : memref<546x16xf32, #tpu.memory_space<vmem>>, vector<9x16xf32>
    %c45_467 = arith.constant 45 : index
    %c240_468 = arith.constant 240 : index
    %290 = vector.load %arg12[%c45_467, %c240_468] : memref<90x400xf32, #tpu.memory_space<vmem>>, vector<9x16xf32>
    tpu.vector_store %arg12[%c45_467, %c240_468], %289 {strides = array<i32>} : memref<90x400xf32, #tpu.memory_space<vmem>>, vector<9x16xf32>,
    %c337 = arith.constant 337 : index
    %c0_469 = arith.constant 0 : index
    %291 = tpu.strided_load %arg11[%c337, %c0_469] {strides = array<i32: 2, 1>} : memref<546x16xf32, #tpu.memory_space<vmem>>, vector<9x16xf32>
    %c45_470 = arith.constant 45 : index
    %c256_471 = arith.constant 256 : index
    %292 = vector.load %arg12[%c45_470, %c256_471] : memref<90x400xf32, #tpu.memory_space<vmem>>, vector<9x16xf32>
    tpu.vector_store %arg12[%c45_470, %c256_471], %291 {strides = array<i32>} : memref<90x400xf32, #tpu.memory_space<vmem>>, vector<9x16xf32>,
    %c338 = arith.constant 338 : index
    %c0_472 = arith.constant 0 : index
    %293 = tpu.strided_load %arg11[%c338, %c0_472] {strides = array<i32: 2, 1>} : memref<546x16xf32, #tpu.memory_space<vmem>>, vector<9x16xf32>
    %c45_473 = arith.constant 45 : index
    %c272_474 = arith.constant 272 : index
    %294 = vector.load %arg12[%c45_473, %c272_474] : memref<90x400xf32, #tpu.memory_space<vmem>>, vector<9x16xf32>
    tpu.vector_store %arg12[%c45_473, %c272_474], %293 {strides = array<i32>} : memref<90x400xf32, #tpu.memory_space<vmem>>, vector<9x16xf32>,
    %c339 = arith.constant 339 : index
    %c0_475 = arith.constant 0 : index
    %295 = tpu.strided_load %arg11[%c339, %c0_475] {strides = array<i32: 2, 1>} : memref<546x16xf32, #tpu.memory_space<vmem>>, vector<9x16xf32>
    %c45_476 = arith.constant 45 : index
    %c288_477 = arith.constant 288 : index
    %296 = vector.load %arg12[%c45_476, %c288_477] : memref<90x400xf32, #tpu.memory_space<vmem>>, vector<9x16xf32>
    tpu.vector_store %arg12[%c45_476, %c288_477], %295 {strides = array<i32>} : memref<90x400xf32, #tpu.memory_space<vmem>>, vector<9x16xf32>,
    %c340 = arith.constant 340 : index
    %c0_478 = arith.constant 0 : index
    %297 = tpu.strided_load %arg11[%c340, %c0_478] {strides = array<i32: 2, 1>} : memref<546x16xf32, #tpu.memory_space<vmem>>, vector<9x16xf32>
    %c45_479 = arith.constant 45 : index
    %c304_480 = arith.constant 304 : index
    %298 = vector.load %arg12[%c45_479, %c304_480] : memref<90x400xf32, #tpu.memory_space<vmem>>, vector<9x16xf32>
    tpu.vector_store %arg12[%c45_479, %c304_480], %297 {strides = array<i32>} : memref<90x400xf32, #tpu.memory_space<vmem>>, vector<9x16xf32>,
    %c357 = arith.constant 357 : index
    %c0_481 = arith.constant 0 : index
    %299 = tpu.strided_load %arg11[%c357, %c0_481] {strides = array<i32: 2, 1>} : memref<546x16xf32, #tpu.memory_space<vmem>>, vector<9x16xf32>
    %c45_482 = arith.constant 45 : index
    %c320_483 = arith.constant 320 : index
    %300 = vector.load %arg12[%c45_482, %c320_483] : memref<90x400xf32, #tpu.memory_space<vmem>>, vector<9x16xf32>
    tpu.vector_store %arg12[%c45_482, %c320_483], %299 {strides = array<i32>} : memref<90x400xf32, #tpu.memory_space<vmem>>, vector<9x16xf32>,
    %c358 = arith.constant 358 : index
    %c0_484 = arith.constant 0 : index
    %301 = tpu.strided_load %arg11[%c358, %c0_484] {strides = array<i32: 2, 1>} : memref<546x16xf32, #tpu.memory_space<vmem>>, vector<9x16xf32>
    %c45_485 = arith.constant 45 : index
    %c336_486 = arith.constant 336 : index
    %302 = vector.load %arg12[%c45_485, %c336_486] : memref<90x400xf32, #tpu.memory_space<vmem>>, vector<9x16xf32>
    tpu.vector_store %arg12[%c45_485, %c336_486], %301 {strides = array<i32>} : memref<90x400xf32, #tpu.memory_space<vmem>>, vector<9x16xf32>,
    %c359 = arith.constant 359 : index
    %c0_487 = arith.constant 0 : index
    %303 = tpu.strided_load %arg11[%c359, %c0_487] {strides = array<i32: 2, 1>} : memref<546x16xf32, #tpu.memory_space<vmem>>, vector<9x16xf32>
    %c45_488 = arith.constant 45 : index
    %c352_489 = arith.constant 352 : index
    %304 = vector.load %arg12[%c45_488, %c352_489] : memref<90x400xf32, #tpu.memory_space<vmem>>, vector<9x16xf32>
    tpu.vector_store %arg12[%c45_488, %c352_489], %303 {strides = array<i32>} : memref<90x400xf32, #tpu.memory_space<vmem>>, vector<9x16xf32>,
    %c360 = arith.constant 360 : index
    %c0_490 = arith.constant 0 : index
    %305 = tpu.strided_load %arg11[%c360, %c0_490] {strides = array<i32: 2, 1>} : memref<546x16xf32, #tpu.memory_space<vmem>>, vector<9x16xf32>
    %c45_491 = arith.constant 45 : index
    %c368_492 = arith.constant 368 : index
    %306 = vector.load %arg12[%c45_491, %c368_492] : memref<90x400xf32, #tpu.memory_space<vmem>>, vector<9x16xf32>
    tpu.vector_store %arg12[%c45_491, %c368_492], %305 {strides = array<i32>} : memref<90x400xf32, #tpu.memory_space<vmem>>, vector<9x16xf32>,
    %c361 = arith.constant 361 : index
    %c0_493 = arith.constant 0 : index
    %307 = tpu.strided_load %arg11[%c361, %c0_493] {strides = array<i32: 2, 1>} : memref<546x16xf32, #tpu.memory_space<vmem>>, vector<9x16xf32>
    %c45_494 = arith.constant 45 : index
    %c384_495 = arith.constant 384 : index
    %308 = vector.load %arg12[%c45_494, %c384_495] : memref<90x400xf32, #tpu.memory_space<vmem>>, vector<9x16xf32>
    tpu.vector_store %arg12[%c45_494, %c384_495], %307 {strides = array<i32>} : memref<90x400xf32, #tpu.memory_space<vmem>>, vector<9x16xf32>,
    %c315_496 = arith.constant 315 : index
    %c0_497 = arith.constant 0 : index
    %309 = tpu.strided_load %arg11[%c315_496, %c0_497] {strides = array<i32: 2, 1>} : memref<546x16xf32, #tpu.memory_space<vmem>>, vector<9x16xf32>
    %c54 = arith.constant 54 : index
    %c0_498 = arith.constant 0 : index
    %310 = vector.load %arg12[%c54, %c0_498] : memref<90x400xf32, #tpu.memory_space<vmem>>, vector<9x16xf32>
    tpu.vector_store %arg12[%c54, %c0_498], %309 {strides = array<i32>} : memref<90x400xf32, #tpu.memory_space<vmem>>, vector<9x16xf32>,
    %c316_499 = arith.constant 316 : index
    %c0_500 = arith.constant 0 : index
    %311 = tpu.strided_load %arg11[%c316_499, %c0_500] {strides = array<i32: 2, 1>} : memref<546x16xf32, #tpu.memory_space<vmem>>, vector<9x16xf32>
    %c54_501 = arith.constant 54 : index
    %c16_502 = arith.constant 16 : index
    %312 = vector.load %arg12[%c54_501, %c16_502] : memref<90x400xf32, #tpu.memory_space<vmem>>, vector<9x16xf32>
    tpu.vector_store %arg12[%c54_501, %c16_502], %311 {strides = array<i32>} : memref<90x400xf32, #tpu.memory_space<vmem>>, vector<9x16xf32>,
    %c317_503 = arith.constant 317 : index
    %c0_504 = arith.constant 0 : index
    %313 = tpu.strided_load %arg11[%c317_503, %c0_504] {strides = array<i32: 2, 1>} : memref<546x16xf32, #tpu.memory_space<vmem>>, vector<9x16xf32>
    %c54_505 = arith.constant 54 : index
    %c32_506 = arith.constant 32 : index
    %314 = vector.load %arg12[%c54_505, %c32_506] : memref<90x400xf32, #tpu.memory_space<vmem>>, vector<9x16xf32>
    tpu.vector_store %arg12[%c54_505, %c32_506], %313 {strides = array<i32>} : memref<90x400xf32, #tpu.memory_space<vmem>>, vector<9x16xf32>,
    %c318_507 = arith.constant 318 : index
    %c0_508 = arith.constant 0 : index
    %315 = tpu.strided_load %arg11[%c318_507, %c0_508] {strides = array<i32: 2, 1>} : memref<546x16xf32, #tpu.memory_space<vmem>>, vector<9x16xf32>
    %c54_509 = arith.constant 54 : index
    %c48_510 = arith.constant 48 : index
    %316 = vector.load %arg12[%c54_509, %c48_510] : memref<90x400xf32, #tpu.memory_space<vmem>>, vector<9x16xf32>
    tpu.vector_store %arg12[%c54_509, %c48_510], %315 {strides = array<i32>} : memref<90x400xf32, #tpu.memory_space<vmem>>, vector<9x16xf32>,
    %c319_511 = arith.constant 319 : index
    %c0_512 = arith.constant 0 : index
    %317 = tpu.strided_load %arg11[%c319_511, %c0_512] {strides = array<i32: 2, 1>} : memref<546x16xf32, #tpu.memory_space<vmem>>, vector<9x16xf32>
    %c54_513 = arith.constant 54 : index
    %c64_514 = arith.constant 64 : index
    %318 = vector.load %arg12[%c54_513, %c64_514] : memref<90x400xf32, #tpu.memory_space<vmem>>, vector<9x16xf32>
    tpu.vector_store %arg12[%c54_513, %c64_514], %317 {strides = array<i32>} : memref<90x400xf32, #tpu.memory_space<vmem>>, vector<9x16xf32>,
    %c336_515 = arith.constant 336 : index
    %c0_516 = arith.constant 0 : index
    %319 = tpu.strided_load %arg11[%c336_515, %c0_516] {strides = array<i32: 2, 1>} : memref<546x16xf32, #tpu.memory_space<vmem>>, vector<9x16xf32>
    %c54_517 = arith.constant 54 : index
    %c80_518 = arith.constant 80 : index
    %320 = vector.load %arg12[%c54_517, %c80_518] : memref<90x400xf32, #tpu.memory_space<vmem>>, vector<9x16xf32>
    tpu.vector_store %arg12[%c54_517, %c80_518], %319 {strides = array<i32>} : memref<90x400xf32, #tpu.memory_space<vmem>>, vector<9x16xf32>,
    %c337_519 = arith.constant 337 : index
    %c0_520 = arith.constant 0 : index
    %321 = tpu.strided_load %arg11[%c337_519, %c0_520] {strides = array<i32: 2, 1>} : memref<546x16xf32, #tpu.memory_space<vmem>>, vector<9x16xf32>
    %c54_521 = arith.constant 54 : index
    %c96_522 = arith.constant 96 : index
    %322 = vector.load %arg12[%c54_521, %c96_522] : memref<90x400xf32, #tpu.memory_space<vmem>>, vector<9x16xf32>
    tpu.vector_store %arg12[%c54_521, %c96_522], %321 {strides = array<i32>} : memref<90x400xf32, #tpu.memory_space<vmem>>, vector<9x16xf32>,
    %c338_523 = arith.constant 338 : index
    %c0_524 = arith.constant 0 : index
    %323 = tpu.strided_load %arg11[%c338_523, %c0_524] {strides = array<i32: 2, 1>} : memref<546x16xf32, #tpu.memory_space<vmem>>, vector<9x16xf32>
    %c54_525 = arith.constant 54 : index
    %c112_526 = arith.constant 112 : index
    %324 = vector.load %arg12[%c54_525, %c112_526] : memref<90x400xf32, #tpu.memory_space<vmem>>, vector<9x16xf32>
    tpu.vector_store %arg12[%c54_525, %c112_526], %323 {strides = array<i32>} : memref<90x400xf32, #tpu.memory_space<vmem>>, vector<9x16xf32>,
    %c339_527 = arith.constant 339 : index
    %c0_528 = arith.constant 0 : index
    %325 = tpu.strided_load %arg11[%c339_527, %c0_528] {strides = array<i32: 2, 1>} : memref<546x16xf32, #tpu.memory_space<vmem>>, vector<9x16xf32>
    %c54_529 = arith.constant 54 : index
    %c128_530 = arith.constant 128 : index
    %326 = vector.load %arg12[%c54_529, %c128_530] : memref<90x400xf32, #tpu.memory_space<vmem>>, vector<9x16xf32>
    tpu.vector_store %arg12[%c54_529, %c128_530], %325 {strides = array<i32>} : memref<90x400xf32, #tpu.memory_space<vmem>>, vector<9x16xf32>,
    %c340_531 = arith.constant 340 : index
    %c0_532 = arith.constant 0 : index
    %327 = tpu.strided_load %arg11[%c340_531, %c0_532] {strides = array<i32: 2, 1>} : memref<546x16xf32, #tpu.memory_space<vmem>>, vector<9x16xf32>
    %c54_533 = arith.constant 54 : index
    %c144_534 = arith.constant 144 : index
    %328 = vector.load %arg12[%c54_533, %c144_534] : memref<90x400xf32, #tpu.memory_space<vmem>>, vector<9x16xf32>
    tpu.vector_store %arg12[%c54_533, %c144_534], %327 {strides = array<i32>} : memref<90x400xf32, #tpu.memory_space<vmem>>, vector<9x16xf32>,
    %c357_535 = arith.constant 357 : index
    %c0_536 = arith.constant 0 : index
    %329 = tpu.strided_load %arg11[%c357_535, %c0_536] {strides = array<i32: 2, 1>} : memref<546x16xf32, #tpu.memory_space<vmem>>, vector<9x16xf32>
    %c54_537 = arith.constant 54 : index
    %c160_538 = arith.constant 160 : index
    %330 = vector.load %arg12[%c54_537, %c160_538] : memref<90x400xf32, #tpu.memory_space<vmem>>, vector<9x16xf32>
    tpu.vector_store %arg12[%c54_537, %c160_538], %329 {strides = array<i32>} : memref<90x400xf32, #tpu.memory_space<vmem>>, vector<9x16xf32>,
    %c358_539 = arith.constant 358 : index
    %c0_540 = arith.constant 0 : index
    %331 = tpu.strided_load %arg11[%c358_539, %c0_540] {strides = array<i32: 2, 1>} : memref<546x16xf32, #tpu.memory_space<vmem>>, vector<9x16xf32>
    %c54_541 = arith.constant 54 : index
    %c176_542 = arith.constant 176 : index
    %332 = vector.load %arg12[%c54_541, %c176_542] : memref<90x400xf32, #tpu.memory_space<vmem>>, vector<9x16xf32>
    tpu.vector_store %arg12[%c54_541, %c176_542], %331 {strides = array<i32>} : memref<90x400xf32, #tpu.memory_space<vmem>>, vector<9x16xf32>,
    %c359_543 = arith.constant 359 : index
    %c0_544 = arith.constant 0 : index
    %333 = tpu.strided_load %arg11[%c359_543, %c0_544] {strides = array<i32: 2, 1>} : memref<546x16xf32, #tpu.memory_space<vmem>>, vector<9x16xf32>
    %c54_545 = arith.constant 54 : index
    %c192_546 = arith.constant 192 : index
    %334 = vector.load %arg12[%c54_545, %c192_546] : memref<90x400xf32, #tpu.memory_space<vmem>>, vector<9x16xf32>
    tpu.vector_store %arg12[%c54_545, %c192_546], %333 {strides = array<i32>} : memref<90x400xf32, #tpu.memory_space<vmem>>, vector<9x16xf32>,
    %c360_547 = arith.constant 360 : index
    %c0_548 = arith.constant 0 : index
    %335 = tpu.strided_load %arg11[%c360_547, %c0_548] {strides = array<i32: 2, 1>} : memref<546x16xf32, #tpu.memory_space<vmem>>, vector<9x16xf32>
    %c54_549 = arith.constant 54 : index
    %c208_550 = arith.constant 208 : index
    %336 = vector.load %arg12[%c54_549, %c208_550] : memref<90x400xf32, #tpu.memory_space<vmem>>, vector<9x16xf32>
    tpu.vector_store %arg12[%c54_549, %c208_550], %335 {strides = array<i32>} : memref<90x400xf32, #tpu.memory_space<vmem>>, vector<9x16xf32>,
    %c361_551 = arith.constant 361 : index
    %c0_552 = arith.constant 0 : index
    %337 = tpu.strided_load %arg11[%c361_551, %c0_552] {strides = array<i32: 2, 1>} : memref<546x16xf32, #tpu.memory_space<vmem>>, vector<9x16xf32>
    %c54_553 = arith.constant 54 : index
    %c224_554 = arith.constant 224 : index
    %338 = vector.load %arg12[%c54_553, %c224_554] : memref<90x400xf32, #tpu.memory_space<vmem>>, vector<9x16xf32>
    tpu.vector_store %arg12[%c54_553, %c224_554], %337 {strides = array<i32>} : memref<90x400xf32, #tpu.memory_space<vmem>>, vector<9x16xf32>,
    %c378 = arith.constant 378 : index
    %c0_555 = arith.constant 0 : index
    %339 = tpu.strided_load %arg11[%c378, %c0_555] {strides = array<i32: 2, 1>} : memref<546x16xf32, #tpu.memory_space<vmem>>, vector<9x16xf32>
    %c54_556 = arith.constant 54 : index
    %c240_557 = arith.constant 240 : index
    %340 = vector.load %arg12[%c54_556, %c240_557] : memref<90x400xf32, #tpu.memory_space<vmem>>, vector<9x16xf32>
    tpu.vector_store %arg12[%c54_556, %c240_557], %339 {strides = array<i32>} : memref<90x400xf32, #tpu.memory_space<vmem>>, vector<9x16xf32>,
    %c379 = arith.constant 379 : index
    %c0_558 = arith.constant 0 : index
    %341 = tpu.strided_load %arg11[%c379, %c0_558] {strides = array<i32: 2, 1>} : memref<546x16xf32, #tpu.memory_space<vmem>>, vector<9x16xf32>
    %c54_559 = arith.constant 54 : index
    %c256_560 = arith.constant 256 : index
    %342 = vector.load %arg12[%c54_559, %c256_560] : memref<90x400xf32, #tpu.memory_space<vmem>>, vector<9x16xf32>
    tpu.vector_store %arg12[%c54_559, %c256_560], %341 {strides = array<i32>} : memref<90x400xf32, #tpu.memory_space<vmem>>, vector<9x16xf32>,
    %c380 = arith.constant 380 : index
    %c0_561 = arith.constant 0 : index
    %343 = tpu.strided_load %arg11[%c380, %c0_561] {strides = array<i32: 2, 1>} : memref<546x16xf32, #tpu.memory_space<vmem>>, vector<9x16xf32>
    %c54_562 = arith.constant 54 : index
    %c272_563 = arith.constant 272 : index
    %344 = vector.load %arg12[%c54_562, %c272_563] : memref<90x400xf32, #tpu.memory_space<vmem>>, vector<9x16xf32>
    tpu.vector_store %arg12[%c54_562, %c272_563], %343 {strides = array<i32>} : memref<90x400xf32, #tpu.memory_space<vmem>>, vector<9x16xf32>,
    %c381 = arith.constant 381 : index
    %c0_564 = arith.constant 0 : index
    %345 = tpu.strided_load %arg11[%c381, %c0_564] {strides = array<i32: 2, 1>} : memref<546x16xf32, #tpu.memory_space<vmem>>, vector<9x16xf32>
    %c54_565 = arith.constant 54 : index
    %c288_566 = arith.constant 288 : index
    %346 = vector.load %arg12[%c54_565, %c288_566] : memref<90x400xf32, #tpu.memory_space<vmem>>, vector<9x16xf32>
    tpu.vector_store %arg12[%c54_565, %c288_566], %345 {strides = array<i32>} : memref<90x400xf32, #tpu.memory_space<vmem>>, vector<9x16xf32>,
    %c382 = arith.constant 382 : index
    %c0_567 = arith.constant 0 : index
    %347 = tpu.strided_load %arg11[%c382, %c0_567] {strides = array<i32: 2, 1>} : memref<546x16xf32, #tpu.memory_space<vmem>>, vector<9x16xf32>
    %c54_568 = arith.constant 54 : index
    %c304_569 = arith.constant 304 : index
    %348 = vector.load %arg12[%c54_568, %c304_569] : memref<90x400xf32, #tpu.memory_space<vmem>>, vector<9x16xf32>
    tpu.vector_store %arg12[%c54_568, %c304_569], %347 {strides = array<i32>} : memref<90x400xf32, #tpu.memory_space<vmem>>, vector<9x16xf32>,
    %c399 = arith.constant 399 : index
    %c0_570 = arith.constant 0 : index
    %349 = tpu.strided_load %arg11[%c399, %c0_570] {strides = array<i32: 2, 1>} : memref<546x16xf32, #tpu.memory_space<vmem>>, vector<9x16xf32>
    %c54_571 = arith.constant 54 : index
    %c320_572 = arith.constant 320 : index
    %350 = vector.load %arg12[%c54_571, %c320_572] : memref<90x400xf32, #tpu.memory_space<vmem>>, vector<9x16xf32>
    tpu.vector_store %arg12[%c54_571, %c320_572], %349 {strides = array<i32>} : memref<90x400xf32, #tpu.memory_space<vmem>>, vector<9x16xf32>,
    %c400 = arith.constant 400 : index
    %c0_573 = arith.constant 0 : index
    %351 = tpu.strided_load %arg11[%c400, %c0_573] {strides = array<i32: 2, 1>} : memref<546x16xf32, #tpu.memory_space<vmem>>, vector<9x16xf32>
    %c54_574 = arith.constant 54 : index
    %c336_575 = arith.constant 336 : index
    %352 = vector.load %arg12[%c54_574, %c336_575] : memref<90x400xf32, #tpu.memory_space<vmem>>, vector<9x16xf32>
    tpu.vector_store %arg12[%c54_574, %c336_575], %351 {strides = array<i32>} : memref<90x400xf32, #tpu.memory_space<vmem>>, vector<9x16xf32>,
    %c401 = arith.constant 401 : index
    %c0_576 = arith.constant 0 : index
    %353 = tpu.strided_load %arg11[%c401, %c0_576] {strides = array<i32: 2, 1>} : memref<546x16xf32, #tpu.memory_space<vmem>>, vector<9x16xf32>
    %c54_577 = arith.constant 54 : index
    %c352_578 = arith.constant 352 : index
    %354 = vector.load %arg12[%c54_577, %c352_578] : memref<90x400xf32, #tpu.memory_space<vmem>>, vector<9x16xf32>
    tpu.vector_store %arg12[%c54_577, %c352_578], %353 {strides = array<i32>} : memref<90x400xf32, #tpu.memory_space<vmem>>, vector<9x16xf32>,
    %c402 = arith.constant 402 : index
    %c0_579 = arith.constant 0 : index
    %355 = tpu.strided_load %arg11[%c402, %c0_579] {strides = array<i32: 2, 1>} : memref<546x16xf32, #tpu.memory_space<vmem>>, vector<9x16xf32>
    %c54_580 = arith.constant 54 : index
    %c368_581 = arith.constant 368 : index
    %356 = vector.load %arg12[%c54_580, %c368_581] : memref<90x400xf32, #tpu.memory_space<vmem>>, vector<9x16xf32>
    tpu.vector_store %arg12[%c54_580, %c368_581], %355 {strides = array<i32>} : memref<90x400xf32, #tpu.memory_space<vmem>>, vector<9x16xf32>,
    %c403 = arith.constant 403 : index
    %c0_582 = arith.constant 0 : index
    %357 = tpu.strided_load %arg11[%c403, %c0_582] {strides = array<i32: 2, 1>} : memref<546x16xf32, #tpu.memory_space<vmem>>, vector<9x16xf32>
    %c54_583 = arith.constant 54 : index
    %c384_584 = arith.constant 384 : index
    %358 = vector.load %arg12[%c54_583, %c384_584] : memref<90x400xf32, #tpu.memory_space<vmem>>, vector<9x16xf32>
    tpu.vector_store %arg12[%c54_583, %c384_584], %357 {strides = array<i32>} : memref<90x400xf32, #tpu.memory_space<vmem>>, vector<9x16xf32>,
    %c357_585 = arith.constant 357 : index
    %c0_586 = arith.constant 0 : index
    %359 = tpu.strided_load %arg11[%c357_585, %c0_586] {strides = array<i32: 2, 1>} : memref<546x16xf32, #tpu.memory_space<vmem>>, vector<9x16xf32>
    %c63_587 = arith.constant 63 : index
    %c0_588 = arith.constant 0 : index
    %360 = vector.load %arg12[%c63_587, %c0_588] : memref<90x400xf32, #tpu.memory_space<vmem>>, vector<9x16xf32>
    tpu.vector_store %arg12[%c63_587, %c0_588], %359 {strides = array<i32>} : memref<90x400xf32, #tpu.memory_space<vmem>>, vector<9x16xf32>,
    %c358_589 = arith.constant 358 : index
    %c0_590 = arith.constant 0 : index
    %361 = tpu.strided_load %arg11[%c358_589, %c0_590] {strides = array<i32: 2, 1>} : memref<546x16xf32, #tpu.memory_space<vmem>>, vector<9x16xf32>
    %c63_591 = arith.constant 63 : index
    %c16_592 = arith.constant 16 : index
    %362 = vector.load %arg12[%c63_591, %c16_592] : memref<90x400xf32, #tpu.memory_space<vmem>>, vector<9x16xf32>
    tpu.vector_store %arg12[%c63_591, %c16_592], %361 {strides = array<i32>} : memref<90x400xf32, #tpu.memory_space<vmem>>, vector<9x16xf32>,
    %c359_593 = arith.constant 359 : index
    %c0_594 = arith.constant 0 : index
    %363 = tpu.strided_load %arg11[%c359_593, %c0_594] {strides = array<i32: 2, 1>} : memref<546x16xf32, #tpu.memory_space<vmem>>, vector<9x16xf32>
    %c63_595 = arith.constant 63 : index
    %c32_596 = arith.constant 32 : index
    %364 = vector.load %arg12[%c63_595, %c32_596] : memref<90x400xf32, #tpu.memory_space<vmem>>, vector<9x16xf32>
    tpu.vector_store %arg12[%c63_595, %c32_596], %363 {strides = array<i32>} : memref<90x400xf32, #tpu.memory_space<vmem>>, vector<9x16xf32>,
    %c360_597 = arith.constant 360 : index
    %c0_598 = arith.constant 0 : index
    %365 = tpu.strided_load %arg11[%c360_597, %c0_598] {strides = array<i32: 2, 1>} : memref<546x16xf32, #tpu.memory_space<vmem>>, vector<9x16xf32>
    %c63_599 = arith.constant 63 : index
    %c48_600 = arith.constant 48 : index
    %366 = vector.load %arg12[%c63_599, %c48_600] : memref<90x400xf32, #tpu.memory_space<vmem>>, vector<9x16xf32>
    tpu.vector_store %arg12[%c63_599, %c48_600], %365 {strides = array<i32>} : memref<90x400xf32, #tpu.memory_space<vmem>>, vector<9x16xf32>,
    %c361_601 = arith.constant 361 : index
    %c0_602 = arith.constant 0 : index
    %367 = tpu.strided_load %arg11[%c361_601, %c0_602] {strides = array<i32: 2, 1>} : memref<546x16xf32, #tpu.memory_space<vmem>>, vector<9x16xf32>
    %c63_603 = arith.constant 63 : index
    %c64_604 = arith.constant 64 : index
    %368 = vector.load %arg12[%c63_603, %c64_604] : memref<90x400xf32, #tpu.memory_space<vmem>>, vector<9x16xf32>
    tpu.vector_store %arg12[%c63_603, %c64_604], %367 {strides = array<i32>} : memref<90x400xf32, #tpu.memory_space<vmem>>, vector<9x16xf32>,
    %c378_605 = arith.constant 378 : index
    %c0_606 = arith.constant 0 : index
    %369 = tpu.strided_load %arg11[%c378_605, %c0_606] {strides = array<i32: 2, 1>} : memref<546x16xf32, #tpu.memory_space<vmem>>, vector<9x16xf32>
    %c63_607 = arith.constant 63 : index
    %c80_608 = arith.constant 80 : index
    %370 = vector.load %arg12[%c63_607, %c80_608] : memref<90x400xf32, #tpu.memory_space<vmem>>, vector<9x16xf32>
    tpu.vector_store %arg12[%c63_607, %c80_608], %369 {strides = array<i32>} : memref<90x400xf32, #tpu.memory_space<vmem>>, vector<9x16xf32>,
    %c379_609 = arith.constant 379 : index
    %c0_610 = arith.constant 0 : index
    %371 = tpu.strided_load %arg11[%c379_609, %c0_610] {strides = array<i32: 2, 1>} : memref<546x16xf32, #tpu.memory_space<vmem>>, vector<9x16xf32>
    %c63_611 = arith.constant 63 : index
    %c96_612 = arith.constant 96 : index
    %372 = vector.load %arg12[%c63_611, %c96_612] : memref<90x400xf32, #tpu.memory_space<vmem>>, vector<9x16xf32>
    tpu.vector_store %arg12[%c63_611, %c96_612], %371 {strides = array<i32>} : memref<90x400xf32, #tpu.memory_space<vmem>>, vector<9x16xf32>,
    %c380_613 = arith.constant 380 : index
    %c0_614 = arith.constant 0 : index
    %373 = tpu.strided_load %arg11[%c380_613, %c0_614] {strides = array<i32: 2, 1>} : memref<546x16xf32, #tpu.memory_space<vmem>>, vector<9x16xf32>
    %c63_615 = arith.constant 63 : index
    %c112_616 = arith.constant 112 : index
    %374 = vector.load %arg12[%c63_615, %c112_616] : memref<90x400xf32, #tpu.memory_space<vmem>>, vector<9x16xf32>
    tpu.vector_store %arg12[%c63_615, %c112_616], %373 {strides = array<i32>} : memref<90x400xf32, #tpu.memory_space<vmem>>, vector<9x16xf32>,
    %c381_617 = arith.constant 381 : index
    %c0_618 = arith.constant 0 : index
    %375 = tpu.strided_load %arg11[%c381_617, %c0_618] {strides = array<i32: 2, 1>} : memref<546x16xf32, #tpu.memory_space<vmem>>, vector<9x16xf32>
    %c63_619 = arith.constant 63 : index
    %c128_620 = arith.constant 128 : index
    %376 = vector.load %arg12[%c63_619, %c128_620] : memref<90x400xf32, #tpu.memory_space<vmem>>, vector<9x16xf32>
    tpu.vector_store %arg12[%c63_619, %c128_620], %375 {strides = array<i32>} : memref<90x400xf32, #tpu.memory_space<vmem>>, vector<9x16xf32>,
    %c382_621 = arith.constant 382 : index
    %c0_622 = arith.constant 0 : index
    %377 = tpu.strided_load %arg11[%c382_621, %c0_622] {strides = array<i32: 2, 1>} : memref<546x16xf32, #tpu.memory_space<vmem>>, vector<9x16xf32>
    %c63_623 = arith.constant 63 : index
    %c144_624 = arith.constant 144 : index
    %378 = vector.load %arg12[%c63_623, %c144_624] : memref<90x400xf32, #tpu.memory_space<vmem>>, vector<9x16xf32>
    tpu.vector_store %arg12[%c63_623, %c144_624], %377 {strides = array<i32>} : memref<90x400xf32, #tpu.memory_space<vmem>>, vector<9x16xf32>,
    %c399_625 = arith.constant 399 : index
    %c0_626 = arith.constant 0 : index
    %379 = tpu.strided_load %arg11[%c399_625, %c0_626] {strides = array<i32: 2, 1>} : memref<546x16xf32, #tpu.memory_space<vmem>>, vector<9x16xf32>
    %c63_627 = arith.constant 63 : index
    %c160_628 = arith.constant 160 : index
    %380 = vector.load %arg12[%c63_627, %c160_628] : memref<90x400xf32, #tpu.memory_space<vmem>>, vector<9x16xf32>
    tpu.vector_store %arg12[%c63_627, %c160_628], %379 {strides = array<i32>} : memref<90x400xf32, #tpu.memory_space<vmem>>, vector<9x16xf32>,
    %c400_629 = arith.constant 400 : index
    %c0_630 = arith.constant 0 : index
    %381 = tpu.strided_load %arg11[%c400_629, %c0_630] {strides = array<i32: 2, 1>} : memref<546x16xf32, #tpu.memory_space<vmem>>, vector<9x16xf32>
    %c63_631 = arith.constant 63 : index
    %c176_632 = arith.constant 176 : index
    %382 = vector.load %arg12[%c63_631, %c176_632] : memref<90x400xf32, #tpu.memory_space<vmem>>, vector<9x16xf32>
    tpu.vector_store %arg12[%c63_631, %c176_632], %381 {strides = array<i32>} : memref<90x400xf32, #tpu.memory_space<vmem>>, vector<9x16xf32>,
    %c401_633 = arith.constant 401 : index
    %c0_634 = arith.constant 0 : index
    %383 = tpu.strided_load %arg11[%c401_633, %c0_634] {strides = array<i32: 2, 1>} : memref<546x16xf32, #tpu.memory_space<vmem>>, vector<9x16xf32>
    %c63_635 = arith.constant 63 : index
    %c192_636 = arith.constant 192 : index
    %384 = vector.load %arg12[%c63_635, %c192_636] : memref<90x400xf32, #tpu.memory_space<vmem>>, vector<9x16xf32>
    tpu.vector_store %arg12[%c63_635, %c192_636], %383 {strides = array<i32>} : memref<90x400xf32, #tpu.memory_space<vmem>>, vector<9x16xf32>,
    %c402_637 = arith.constant 402 : index
    %c0_638 = arith.constant 0 : index
    %385 = tpu.strided_load %arg11[%c402_637, %c0_638] {strides = array<i32: 2, 1>} : memref<546x16xf32, #tpu.memory_space<vmem>>, vector<9x16xf32>
    %c63_639 = arith.constant 63 : index
    %c208_640 = arith.constant 208 : index
    %386 = vector.load %arg12[%c63_639, %c208_640] : memref<90x400xf32, #tpu.memory_space<vmem>>, vector<9x16xf32>
    tpu.vector_store %arg12[%c63_639, %c208_640], %385 {strides = array<i32>} : memref<90x400xf32, #tpu.memory_space<vmem>>, vector<9x16xf32>,
    %c403_641 = arith.constant 403 : index
    %c0_642 = arith.constant 0 : index
    %387 = tpu.strided_load %arg11[%c403_641, %c0_642] {strides = array<i32: 2, 1>} : memref<546x16xf32, #tpu.memory_space<vmem>>, vector<9x16xf32>
    %c63_643 = arith.constant 63 : index
    %c224_644 = arith.constant 224 : index
    %388 = vector.load %arg12[%c63_643, %c224_644] : memref<90x400xf32, #tpu.memory_space<vmem>>, vector<9x16xf32>
    tpu.vector_store %arg12[%c63_643, %c224_644], %387 {strides = array<i32>} : memref<90x400xf32, #tpu.memory_space<vmem>>, vector<9x16xf32>,
    %c420 = arith.constant 420 : index
    %c0_645 = arith.constant 0 : index
    %389 = tpu.strided_load %arg11[%c420, %c0_645] {strides = array<i32: 2, 1>} : memref<546x16xf32, #tpu.memory_space<vmem>>, vector<9x16xf32>
    %c63_646 = arith.constant 63 : index
    %c240_647 = arith.constant 240 : index
    %390 = vector.load %arg12[%c63_646, %c240_647] : memref<90x400xf32, #tpu.memory_space<vmem>>, vector<9x16xf32>
    tpu.vector_store %arg12[%c63_646, %c240_647], %389 {strides = array<i32>} : memref<90x400xf32, #tpu.memory_space<vmem>>, vector<9x16xf32>,
    %c421 = arith.constant 421 : index
    %c0_648 = arith.constant 0 : index
    %391 = tpu.strided_load %arg11[%c421, %c0_648] {strides = array<i32: 2, 1>} : memref<546x16xf32, #tpu.memory_space<vmem>>, vector<9x16xf32>
    %c63_649 = arith.constant 63 : index
    %c256_650 = arith.constant 256 : index
    %392 = vector.load %arg12[%c63_649, %c256_650] : memref<90x400xf32, #tpu.memory_space<vmem>>, vector<9x16xf32>
    tpu.vector_store %arg12[%c63_649, %c256_650], %391 {strides = array<i32>} : memref<90x400xf32, #tpu.memory_space<vmem>>, vector<9x16xf32>,
    %c422 = arith.constant 422 : index
    %c0_651 = arith.constant 0 : index
    %393 = tpu.strided_load %arg11[%c422, %c0_651] {strides = array<i32: 2, 1>} : memref<546x16xf32, #tpu.memory_space<vmem>>, vector<9x16xf32>
    %c63_652 = arith.constant 63 : index
    %c272_653 = arith.constant 272 : index
    %394 = vector.load %arg12[%c63_652, %c272_653] : memref<90x400xf32, #tpu.memory_space<vmem>>, vector<9x16xf32>
    tpu.vector_store %arg12[%c63_652, %c272_653], %393 {strides = array<i32>} : memref<90x400xf32, #tpu.memory_space<vmem>>, vector<9x16xf32>,
    %c423 = arith.constant 423 : index
    %c0_654 = arith.constant 0 : index
    %395 = tpu.strided_load %arg11[%c423, %c0_654] {strides = array<i32: 2, 1>} : memref<546x16xf32, #tpu.memory_space<vmem>>, vector<9x16xf32>
    %c63_655 = arith.constant 63 : index
    %c288_656 = arith.constant 288 : index
    %396 = vector.load %arg12[%c63_655, %c288_656] : memref<90x400xf32, #tpu.memory_space<vmem>>, vector<9x16xf32>
    tpu.vector_store %arg12[%c63_655, %c288_656], %395 {strides = array<i32>} : memref<90x400xf32, #tpu.memory_space<vmem>>, vector<9x16xf32>,
    %c424 = arith.constant 424 : index
    %c0_657 = arith.constant 0 : index
    %397 = tpu.strided_load %arg11[%c424, %c0_657] {strides = array<i32: 2, 1>} : memref<546x16xf32, #tpu.memory_space<vmem>>, vector<9x16xf32>
    %c63_658 = arith.constant 63 : index
    %c304_659 = arith.constant 304 : index
    %398 = vector.load %arg12[%c63_658, %c304_659] : memref<90x400xf32, #tpu.memory_space<vmem>>, vector<9x16xf32>
    tpu.vector_store %arg12[%c63_658, %c304_659], %397 {strides = array<i32>} : memref<90x400xf32, #tpu.memory_space<vmem>>, vector<9x16xf32>,
    %c441 = arith.constant 441 : index
    %c0_660 = arith.constant 0 : index
    %399 = tpu.strided_load %arg11[%c441, %c0_660] {strides = array<i32: 2, 1>} : memref<546x16xf32, #tpu.memory_space<vmem>>, vector<9x16xf32>
    %c63_661 = arith.constant 63 : index
    %c320_662 = arith.constant 320 : index
    %400 = vector.load %arg12[%c63_661, %c320_662] : memref<90x400xf32, #tpu.memory_space<vmem>>, vector<9x16xf32>
    tpu.vector_store %arg12[%c63_661, %c320_662], %399 {strides = array<i32>} : memref<90x400xf32, #tpu.memory_space<vmem>>, vector<9x16xf32>,
    %c442 = arith.constant 442 : index
    %c0_663 = arith.constant 0 : index
    %401 = tpu.strided_load %arg11[%c442, %c0_663] {strides = array<i32: 2, 1>} : memref<546x16xf32, #tpu.memory_space<vmem>>, vector<9x16xf32>
    %c63_664 = arith.constant 63 : index
    %c336_665 = arith.constant 336 : index
    %402 = vector.load %arg12[%c63_664, %c336_665] : memref<90x400xf32, #tpu.memory_space<vmem>>, vector<9x16xf32>
    tpu.vector_store %arg12[%c63_664, %c336_665], %401 {strides = array<i32>} : memref<90x400xf32, #tpu.memory_space<vmem>>, vector<9x16xf32>,
    %c443 = arith.constant 443 : index
    %c0_666 = arith.constant 0 : index
    %403 = tpu.strided_load %arg11[%c443, %c0_666] {strides = array<i32: 2, 1>} : memref<546x16xf32, #tpu.memory_space<vmem>>, vector<9x16xf32>
    %c63_667 = arith.constant 63 : index
    %c352_668 = arith.constant 352 : index
    %404 = vector.load %arg12[%c63_667, %c352_668] : memref<90x400xf32, #tpu.memory_space<vmem>>, vector<9x16xf32>
    tpu.vector_store %arg12[%c63_667, %c352_668], %403 {strides = array<i32>} : memref<90x400xf32, #tpu.memory_space<vmem>>, vector<9x16xf32>,
    %c444 = arith.constant 444 : index
    %c0_669 = arith.constant 0 : index
    %405 = tpu.strided_load %arg11[%c444, %c0_669] {strides = array<i32: 2, 1>} : memref<546x16xf32, #tpu.memory_space<vmem>>, vector<9x16xf32>
    %c63_670 = arith.constant 63 : index
    %c368_671 = arith.constant 368 : index
    %406 = vector.load %arg12[%c63_670, %c368_671] : memref<90x400xf32, #tpu.memory_space<vmem>>, vector<9x16xf32>
    tpu.vector_store %arg12[%c63_670, %c368_671], %405 {strides = array<i32>} : memref<90x400xf32, #tpu.memory_space<vmem>>, vector<9x16xf32>,
    %c445 = arith.constant 445 : index
    %c0_672 = arith.constant 0 : index
    %407 = tpu.strided_load %arg11[%c445, %c0_672] {strides = array<i32: 2, 1>} : memref<546x16xf32, #tpu.memory_space<vmem>>, vector<9x16xf32>
    %c63_673 = arith.constant 63 : index
    %c384_674 = arith.constant 384 : index
    %408 = vector.load %arg12[%c63_673, %c384_674] : memref<90x400xf32, #tpu.memory_space<vmem>>, vector<9x16xf32>
    tpu.vector_store %arg12[%c63_673, %c384_674], %407 {strides = array<i32>} : memref<90x400xf32, #tpu.memory_space<vmem>>, vector<9x16xf32>,
    %c399_675 = arith.constant 399 : index
    %c0_676 = arith.constant 0 : index
    %409 = tpu.strided_load %arg11[%c399_675, %c0_676] {strides = array<i32: 2, 1>} : memref<546x16xf32, #tpu.memory_space<vmem>>, vector<9x16xf32>
    %c72 = arith.constant 72 : index
    %c0_677 = arith.constant 0 : index
    %410 = vector.load %arg12[%c72, %c0_677] : memref<90x400xf32, #tpu.memory_space<vmem>>, vector<9x16xf32>
    tpu.vector_store %arg12[%c72, %c0_677], %409 {strides = array<i32>} : memref<90x400xf32, #tpu.memory_space<vmem>>, vector<9x16xf32>,
    %c400_678 = arith.constant 400 : index
    %c0_679 = arith.constant 0 : index
    %411 = tpu.strided_load %arg11[%c400_678, %c0_679] {strides = array<i32: 2, 1>} : memref<546x16xf32, #tpu.memory_space<vmem>>, vector<9x16xf32>
    %c72_680 = arith.constant 72 : index
    %c16_681 = arith.constant 16 : index
    %412 = vector.load %arg12[%c72_680, %c16_681] : memref<90x400xf32, #tpu.memory_space<vmem>>, vector<9x16xf32>
    tpu.vector_store %arg12[%c72_680, %c16_681], %411 {strides = array<i32>} : memref<90x400xf32, #tpu.memory_space<vmem>>, vector<9x16xf32>,
    %c401_682 = arith.constant 401 : index
    %c0_683 = arith.constant 0 : index
    %413 = tpu.strided_load %arg11[%c401_682, %c0_683] {strides = array<i32: 2, 1>} : memref<546x16xf32, #tpu.memory_space<vmem>>, vector<9x16xf32>
    %c72_684 = arith.constant 72 : index
    %c32_685 = arith.constant 32 : index
    %414 = vector.load %arg12[%c72_684, %c32_685] : memref<90x400xf32, #tpu.memory_space<vmem>>, vector<9x16xf32>
    tpu.vector_store %arg12[%c72_684, %c32_685], %413 {strides = array<i32>} : memref<90x400xf32, #tpu.memory_space<vmem>>, vector<9x16xf32>,
    %c402_686 = arith.constant 402 : index
    %c0_687 = arith.constant 0 : index
    %415 = tpu.strided_load %arg11[%c402_686, %c0_687] {strides = array<i32: 2, 1>} : memref<546x16xf32, #tpu.memory_space<vmem>>, vector<9x16xf32>
    %c72_688 = arith.constant 72 : index
    %c48_689 = arith.constant 48 : index
    %416 = vector.load %arg12[%c72_688, %c48_689] : memref<90x400xf32, #tpu.memory_space<vmem>>, vector<9x16xf32>
    tpu.vector_store %arg12[%c72_688, %c48_689], %415 {strides = array<i32>} : memref<90x400xf32, #tpu.memory_space<vmem>>, vector<9x16xf32>,
    %c403_690 = arith.constant 403 : index
    %c0_691 = arith.constant 0 : index
    %417 = tpu.strided_load %arg11[%c403_690, %c0_691] {strides = array<i32: 2, 1>} : memref<546x16xf32, #tpu.memory_space<vmem>>, vector<9x16xf32>
    %c72_692 = arith.constant 72 : index
    %c64_693 = arith.constant 64 : index
    %418 = vector.load %arg12[%c72_692, %c64_693] : memref<90x400xf32, #tpu.memory_space<vmem>>, vector<9x16xf32>
    tpu.vector_store %arg12[%c72_692, %c64_693], %417 {strides = array<i32>} : memref<90x400xf32, #tpu.memory_space<vmem>>, vector<9x16xf32>,
    %c420_694 = arith.constant 420 : index
    %c0_695 = arith.constant 0 : index
    %419 = tpu.strided_load %arg11[%c420_694, %c0_695] {strides = array<i32: 2, 1>} : memref<546x16xf32, #tpu.memory_space<vmem>>, vector<9x16xf32>
    %c72_696 = arith.constant 72 : index
    %c80_697 = arith.constant 80 : index
    %420 = vector.load %arg12[%c72_696, %c80_697] : memref<90x400xf32, #tpu.memory_space<vmem>>, vector<9x16xf32>
    tpu.vector_store %arg12[%c72_696, %c80_697], %419 {strides = array<i32>} : memref<90x400xf32, #tpu.memory_space<vmem>>, vector<9x16xf32>,
    %c421_698 = arith.constant 421 : index
    %c0_699 = arith.constant 0 : index
    %421 = tpu.strided_load %arg11[%c421_698, %c0_699] {strides = array<i32: 2, 1>} : memref<546x16xf32, #tpu.memory_space<vmem>>, vector<9x16xf32>
    %c72_700 = arith.constant 72 : index
    %c96_701 = arith.constant 96 : index
    %422 = vector.load %arg12[%c72_700, %c96_701] : memref<90x400xf32, #tpu.memory_space<vmem>>, vector<9x16xf32>
    tpu.vector_store %arg12[%c72_700, %c96_701], %421 {strides = array<i32>} : memref<90x400xf32, #tpu.memory_space<vmem>>, vector<9x16xf32>,
    %c422_702 = arith.constant 422 : index
    %c0_703 = arith.constant 0 : index
    %423 = tpu.strided_load %arg11[%c422_702, %c0_703] {strides = array<i32: 2, 1>} : memref<546x16xf32, #tpu.memory_space<vmem>>, vector<9x16xf32>
    %c72_704 = arith.constant 72 : index
    %c112_705 = arith.constant 112 : index
    %424 = vector.load %arg12[%c72_704, %c112_705] : memref<90x400xf32, #tpu.memory_space<vmem>>, vector<9x16xf32>
    tpu.vector_store %arg12[%c72_704, %c112_705], %423 {strides = array<i32>} : memref<90x400xf32, #tpu.memory_space<vmem>>, vector<9x16xf32>,
    %c423_706 = arith.constant 423 : index
    %c0_707 = arith.constant 0 : index
    %425 = tpu.strided_load %arg11[%c423_706, %c0_707] {strides = array<i32: 2, 1>} : memref<546x16xf32, #tpu.memory_space<vmem>>, vector<9x16xf32>
    %c72_708 = arith.constant 72 : index
    %c128_709 = arith.constant 128 : index
    %426 = vector.load %arg12[%c72_708, %c128_709] : memref<90x400xf32, #tpu.memory_space<vmem>>, vector<9x16xf32>
    tpu.vector_store %arg12[%c72_708, %c128_709], %425 {strides = array<i32>} : memref<90x400xf32, #tpu.memory_space<vmem>>, vector<9x16xf32>,
    %c424_710 = arith.constant 424 : index
    %c0_711 = arith.constant 0 : index
    %427 = tpu.strided_load %arg11[%c424_710, %c0_711] {strides = array<i32: 2, 1>} : memref<546x16xf32, #tpu.memory_space<vmem>>, vector<9x16xf32>
    %c72_712 = arith.constant 72 : index
    %c144_713 = arith.constant 144 : index
    %428 = vector.load %arg12[%c72_712, %c144_713] : memref<90x400xf32, #tpu.memory_space<vmem>>, vector<9x16xf32>
    tpu.vector_store %arg12[%c72_712, %c144_713], %427 {strides = array<i32>} : memref<90x400xf32, #tpu.memory_space<vmem>>, vector<9x16xf32>,
    %c441_714 = arith.constant 441 : index
    %c0_715 = arith.constant 0 : index
    %429 = tpu.strided_load %arg11[%c441_714, %c0_715] {strides = array<i32: 2, 1>} : memref<546x16xf32, #tpu.memory_space<vmem>>, vector<9x16xf32>
    %c72_716 = arith.constant 72 : index
    %c160_717 = arith.constant 160 : index
    %430 = vector.load %arg12[%c72_716, %c160_717] : memref<90x400xf32, #tpu.memory_space<vmem>>, vector<9x16xf32>
    tpu.vector_store %arg12[%c72_716, %c160_717], %429 {strides = array<i32>} : memref<90x400xf32, #tpu.memory_space<vmem>>, vector<9x16xf32>,
    %c442_718 = arith.constant 442 : index
    %c0_719 = arith.constant 0 : index
    %431 = tpu.strided_load %arg11[%c442_718, %c0_719] {strides = array<i32: 2, 1>} : memref<546x16xf32, #tpu.memory_space<vmem>>, vector<9x16xf32>
    %c72_720 = arith.constant 72 : index
    %c176_721 = arith.constant 176 : index
    %432 = vector.load %arg12[%c72_720, %c176_721] : memref<90x400xf32, #tpu.memory_space<vmem>>, vector<9x16xf32>
    tpu.vector_store %arg12[%c72_720, %c176_721], %431 {strides = array<i32>} : memref<90x400xf32, #tpu.memory_space<vmem>>, vector<9x16xf32>,
    %c443_722 = arith.constant 443 : index
    %c0_723 = arith.constant 0 : index
    %433 = tpu.strided_load %arg11[%c443_722, %c0_723] {strides = array<i32: 2, 1>} : memref<546x16xf32, #tpu.memory_space<vmem>>, vector<9x16xf32>
    %c72_724 = arith.constant 72 : index
    %c192_725 = arith.constant 192 : index
    %434 = vector.load %arg12[%c72_724, %c192_725] : memref<90x400xf32, #tpu.memory_space<vmem>>, vector<9x16xf32>
    tpu.vector_store %arg12[%c72_724, %c192_725], %433 {strides = array<i32>} : memref<90x400xf32, #tpu.memory_space<vmem>>, vector<9x16xf32>,
    %c444_726 = arith.constant 444 : index
    %c0_727 = arith.constant 0 : index
    %435 = tpu.strided_load %arg11[%c444_726, %c0_727] {strides = array<i32: 2, 1>} : memref<546x16xf32, #tpu.memory_space<vmem>>, vector<9x16xf32>
    %c72_728 = arith.constant 72 : index
    %c208_729 = arith.constant 208 : index
    %436 = vector.load %arg12[%c72_728, %c208_729] : memref<90x400xf32, #tpu.memory_space<vmem>>, vector<9x16xf32>
    tpu.vector_store %arg12[%c72_728, %c208_729], %435 {strides = array<i32>} : memref<90x400xf32, #tpu.memory_space<vmem>>, vector<9x16xf32>,
    %c445_730 = arith.constant 445 : index
    %c0_731 = arith.constant 0 : index
    %437 = tpu.strided_load %arg11[%c445_730, %c0_731] {strides = array<i32: 2, 1>} : memref<546x16xf32, #tpu.memory_space<vmem>>, vector<9x16xf32>
    %c72_732 = arith.constant 72 : index
    %c224_733 = arith.constant 224 : index
    %438 = vector.load %arg12[%c72_732, %c224_733] : memref<90x400xf32, #tpu.memory_space<vmem>>, vector<9x16xf32>
    tpu.vector_store %arg12[%c72_732, %c224_733], %437 {strides = array<i32>} : memref<90x400xf32, #tpu.memory_space<vmem>>, vector<9x16xf32>,
    %c462 = arith.constant 462 : index
    %c0_734 = arith.constant 0 : index
    %439 = tpu.strided_load %arg11[%c462, %c0_734] {strides = array<i32: 2, 1>} : memref<546x16xf32, #tpu.memory_space<vmem>>, vector<9x16xf32>
    %c72_735 = arith.constant 72 : index
    %c240_736 = arith.constant 240 : index
    %440 = vector.load %arg12[%c72_735, %c240_736] : memref<90x400xf32, #tpu.memory_space<vmem>>, vector<9x16xf32>
    tpu.vector_store %arg12[%c72_735, %c240_736], %439 {strides = array<i32>} : memref<90x400xf32, #tpu.memory_space<vmem>>, vector<9x16xf32>,
    %c463 = arith.constant 463 : index
    %c0_737 = arith.constant 0 : index
    %441 = tpu.strided_load %arg11[%c463, %c0_737] {strides = array<i32: 2, 1>} : memref<546x16xf32, #tpu.memory_space<vmem>>, vector<9x16xf32>
    %c72_738 = arith.constant 72 : index
    %c256_739 = arith.constant 256 : index
    %442 = vector.load %arg12[%c72_738, %c256_739] : memref<90x400xf32, #tpu.memory_space<vmem>>, vector<9x16xf32>
    tpu.vector_store %arg12[%c72_738, %c256_739], %441 {strides = array<i32>} : memref<90x400xf32, #tpu.memory_space<vmem>>, vector<9x16xf32>,
    %c464 = arith.constant 464 : index
    %c0_740 = arith.constant 0 : index
    %443 = tpu.strided_load %arg11[%c464, %c0_740] {strides = array<i32: 2, 1>} : memref<546x16xf32, #tpu.memory_space<vmem>>, vector<9x16xf32>
    %c72_741 = arith.constant 72 : index
    %c272_742 = arith.constant 272 : index
    %444 = vector.load %arg12[%c72_741, %c272_742] : memref<90x400xf32, #tpu.memory_space<vmem>>, vector<9x16xf32>
    tpu.vector_store %arg12[%c72_741, %c272_742], %443 {strides = array<i32>} : memref<90x400xf32, #tpu.memory_space<vmem>>, vector<9x16xf32>,
    %c465 = arith.constant 465 : index
    %c0_743 = arith.constant 0 : index
    %445 = tpu.strided_load %arg11[%c465, %c0_743] {strides = array<i32: 2, 1>} : memref<546x16xf32, #tpu.memory_space<vmem>>, vector<9x16xf32>
    %c72_744 = arith.constant 72 : index
    %c288_745 = arith.constant 288 : index
    %446 = vector.load %arg12[%c72_744, %c288_745] : memref<90x400xf32, #tpu.memory_space<vmem>>, vector<9x16xf32>
    tpu.vector_store %arg12[%c72_744, %c288_745], %445 {strides = array<i32>} : memref<90x400xf32, #tpu.memory_space<vmem>>, vector<9x16xf32>,
    %c466 = arith.constant 466 : index
    %c0_746 = arith.constant 0 : index
    %447 = tpu.strided_load %arg11[%c466, %c0_746] {strides = array<i32: 2, 1>} : memref<546x16xf32, #tpu.memory_space<vmem>>, vector<9x16xf32>
    %c72_747 = arith.constant 72 : index
    %c304_748 = arith.constant 304 : index
    %448 = vector.load %arg12[%c72_747, %c304_748] : memref<90x400xf32, #tpu.memory_space<vmem>>, vector<9x16xf32>
    tpu.vector_store %arg12[%c72_747, %c304_748], %447 {strides = array<i32>} : memref<90x400xf32, #tpu.memory_space<vmem>>, vector<9x16xf32>,
    %c483 = arith.constant 483 : index
    %c0_749 = arith.constant 0 : index
    %449 = tpu.strided_load %arg11[%c483, %c0_749] {strides = array<i32: 2, 1>} : memref<546x16xf32, #tpu.memory_space<vmem>>, vector<9x16xf32>
    %c72_750 = arith.constant 72 : index
    %c320_751 = arith.constant 320 : index
    %450 = vector.load %arg12[%c72_750, %c320_751] : memref<90x400xf32, #tpu.memory_space<vmem>>, vector<9x16xf32>
    tpu.vector_store %arg12[%c72_750, %c320_751], %449 {strides = array<i32>} : memref<90x400xf32, #tpu.memory_space<vmem>>, vector<9x16xf32>,
    %c484 = arith.constant 484 : index
    %c0_752 = arith.constant 0 : index
    %451 = tpu.strided_load %arg11[%c484, %c0_752] {strides = array<i32: 2, 1>} : memref<546x16xf32, #tpu.memory_space<vmem>>, vector<9x16xf32>
    %c72_753 = arith.constant 72 : index
    %c336_754 = arith.constant 336 : index
    %452 = vector.load %arg12[%c72_753, %c336_754] : memref<90x400xf32, #tpu.memory_space<vmem>>, vector<9x16xf32>
    tpu.vector_store %arg12[%c72_753, %c336_754], %451 {strides = array<i32>} : memref<90x400xf32, #tpu.memory_space<vmem>>, vector<9x16xf32>,
    %c485 = arith.constant 485 : index
    %c0_755 = arith.constant 0 : index
    %453 = tpu.strided_load %arg11[%c485, %c0_755] {strides = array<i32: 2, 1>} : memref<546x16xf32, #tpu.memory_space<vmem>>, vector<9x16xf32>
    %c72_756 = arith.constant 72 : index
    %c352_757 = arith.constant 352 : index
    %454 = vector.load %arg12[%c72_756, %c352_757] : memref<90x400xf32, #tpu.memory_space<vmem>>, vector<9x16xf32>
    tpu.vector_store %arg12[%c72_756, %c352_757], %453 {strides = array<i32>} : memref<90x400xf32, #tpu.memory_space<vmem>>, vector<9x16xf32>,
    %c486 = arith.constant 486 : index
    %c0_758 = arith.constant 0 : index
    %455 = tpu.strided_load %arg11[%c486, %c0_758] {strides = array<i32: 2, 1>} : memref<546x16xf32, #tpu.memory_space<vmem>>, vector<9x16xf32>
    %c72_759 = arith.constant 72 : index
    %c368_760 = arith.constant 368 : index
    %456 = vector.load %arg12[%c72_759, %c368_760] : memref<90x400xf32, #tpu.memory_space<vmem>>, vector<9x16xf32>
    tpu.vector_store %arg12[%c72_759, %c368_760], %455 {strides = array<i32>} : memref<90x400xf32, #tpu.memory_space<vmem>>, vector<9x16xf32>,
    %c487 = arith.constant 487 : index
    %c0_761 = arith.constant 0 : index
    %457 = tpu.strided_load %arg11[%c487, %c0_761] {strides = array<i32: 2, 1>} : memref<546x16xf32, #tpu.memory_space<vmem>>, vector<9x16xf32>
    %c72_762 = arith.constant 72 : index
    %c384_763 = arith.constant 384 : index
    %458 = vector.load %arg12[%c72_762, %c384_763] : memref<90x400xf32, #tpu.memory_space<vmem>>, vector<9x16xf32>
    tpu.vector_store %arg12[%c72_762, %c384_763], %457 {strides = array<i32>} : memref<90x400xf32, #tpu.memory_space<vmem>>, vector<9x16xf32>,
    %c441_764 = arith.constant 441 : index
    %c0_765 = arith.constant 0 : index
    %459 = tpu.strided_load %arg11[%c441_764, %c0_765] {strides = array<i32: 2, 1>} : memref<546x16xf32, #tpu.memory_space<vmem>>, vector<9x16xf32>
    %c81 = arith.constant 81 : index
    %c0_766 = arith.constant 0 : index
    %460 = vector.load %arg12[%c81, %c0_766] : memref<90x400xf32, #tpu.memory_space<vmem>>, vector<9x16xf32>
    tpu.vector_store %arg12[%c81, %c0_766], %459 {strides = array<i32>} : memref<90x400xf32, #tpu.memory_space<vmem>>, vector<9x16xf32>,
    %c442_767 = arith.constant 442 : index
    %c0_768 = arith.constant 0 : index
    %461 = tpu.strided_load %arg11[%c442_767, %c0_768] {strides = array<i32: 2, 1>} : memref<546x16xf32, #tpu.memory_space<vmem>>, vector<9x16xf32>
    %c81_769 = arith.constant 81 : index
    %c16_770 = arith.constant 16 : index
    %462 = vector.load %arg12[%c81_769, %c16_770] : memref<90x400xf32, #tpu.memory_space<vmem>>, vector<9x16xf32>
    tpu.vector_store %arg12[%c81_769, %c16_770], %461 {strides = array<i32>} : memref<90x400xf32, #tpu.memory_space<vmem>>, vector<9x16xf32>,
    %c443_771 = arith.constant 443 : index
    %c0_772 = arith.constant 0 : index
    %463 = tpu.strided_load %arg11[%c443_771, %c0_772] {strides = array<i32: 2, 1>} : memref<546x16xf32, #tpu.memory_space<vmem>>, vector<9x16xf32>
    %c81_773 = arith.constant 81 : index
    %c32_774 = arith.constant 32 : index
    %464 = vector.load %arg12[%c81_773, %c32_774] : memref<90x400xf32, #tpu.memory_space<vmem>>, vector<9x16xf32>
    tpu.vector_store %arg12[%c81_773, %c32_774], %463 {strides = array<i32>} : memref<90x400xf32, #tpu.memory_space<vmem>>, vector<9x16xf32>,
    %c444_775 = arith.constant 444 : index
    %c0_776 = arith.constant 0 : index
    %465 = tpu.strided_load %arg11[%c444_775, %c0_776] {strides = array<i32: 2, 1>} : memref<546x16xf32, #tpu.memory_space<vmem>>, vector<9x16xf32>
    %c81_777 = arith.constant 81 : index
    %c48_778 = arith.constant 48 : index
    %466 = vector.load %arg12[%c81_777, %c48_778] : memref<90x400xf32, #tpu.memory_space<vmem>>, vector<9x16xf32>
    tpu.vector_store %arg12[%c81_777, %c48_778], %465 {strides = array<i32>} : memref<90x400xf32, #tpu.memory_space<vmem>>, vector<9x16xf32>,
    %c445_779 = arith.constant 445 : index
    %c0_780 = arith.constant 0 : index
    %467 = tpu.strided_load %arg11[%c445_779, %c0_780] {strides = array<i32: 2, 1>} : memref<546x16xf32, #tpu.memory_space<vmem>>, vector<9x16xf32>
    %c81_781 = arith.constant 81 : index
    %c64_782 = arith.constant 64 : index
    %468 = vector.load %arg12[%c81_781, %c64_782] : memref<90x400xf32, #tpu.memory_space<vmem>>, vector<9x16xf32>
    tpu.vector_store %arg12[%c81_781, %c64_782], %467 {strides = array<i32>} : memref<90x400xf32, #tpu.memory_space<vmem>>, vector<9x16xf32>,
    %c462_783 = arith.constant 462 : index
    %c0_784 = arith.constant 0 : index
    %469 = tpu.strided_load %arg11[%c462_783, %c0_784] {strides = array<i32: 2, 1>} : memref<546x16xf32, #tpu.memory_space<vmem>>, vector<9x16xf32>
    %c81_785 = arith.constant 81 : index
    %c80_786 = arith.constant 80 : index
    %470 = vector.load %arg12[%c81_785, %c80_786] : memref<90x400xf32, #tpu.memory_space<vmem>>, vector<9x16xf32>
    tpu.vector_store %arg12[%c81_785, %c80_786], %469 {strides = array<i32>} : memref<90x400xf32, #tpu.memory_space<vmem>>, vector<9x16xf32>,
    %c463_787 = arith.constant 463 : index
    %c0_788 = arith.constant 0 : index
    %471 = tpu.strided_load %arg11[%c463_787, %c0_788] {strides = array<i32: 2, 1>} : memref<546x16xf32, #tpu.memory_space<vmem>>, vector<9x16xf32>
    %c81_789 = arith.constant 81 : index
    %c96_790 = arith.constant 96 : index
    %472 = vector.load %arg12[%c81_789, %c96_790] : memref<90x400xf32, #tpu.memory_space<vmem>>, vector<9x16xf32>
    tpu.vector_store %arg12[%c81_789, %c96_790], %471 {strides = array<i32>} : memref<90x400xf32, #tpu.memory_space<vmem>>, vector<9x16xf32>,
    %c464_791 = arith.constant 464 : index
    %c0_792 = arith.constant 0 : index
    %473 = tpu.strided_load %arg11[%c464_791, %c0_792] {strides = array<i32: 2, 1>} : memref<546x16xf32, #tpu.memory_space<vmem>>, vector<9x16xf32>
    %c81_793 = arith.constant 81 : index
    %c112_794 = arith.constant 112 : index
    %474 = vector.load %arg12[%c81_793, %c112_794] : memref<90x400xf32, #tpu.memory_space<vmem>>, vector<9x16xf32>
    tpu.vector_store %arg12[%c81_793, %c112_794], %473 {strides = array<i32>} : memref<90x400xf32, #tpu.memory_space<vmem>>, vector<9x16xf32>,
    %c465_795 = arith.constant 465 : index
    %c0_796 = arith.constant 0 : index
    %475 = tpu.strided_load %arg11[%c465_795, %c0_796] {strides = array<i32: 2, 1>} : memref<546x16xf32, #tpu.memory_space<vmem>>, vector<9x16xf32>
    %c81_797 = arith.constant 81 : index
    %c128_798 = arith.constant 128 : index
    %476 = vector.load %arg12[%c81_797, %c128_798] : memref<90x400xf32, #tpu.memory_space<vmem>>, vector<9x16xf32>
    tpu.vector_store %arg12[%c81_797, %c128_798], %475 {strides = array<i32>} : memref<90x400xf32, #tpu.memory_space<vmem>>, vector<9x16xf32>,
    %c466_799 = arith.constant 466 : index
    %c0_800 = arith.constant 0 : index
    %477 = tpu.strided_load %arg11[%c466_799, %c0_800] {strides = array<i32: 2, 1>} : memref<546x16xf32, #tpu.memory_space<vmem>>, vector<9x16xf32>
    %c81_801 = arith.constant 81 : index
    %c144_802 = arith.constant 144 : index
    %478 = vector.load %arg12[%c81_801, %c144_802] : memref<90x400xf32, #tpu.memory_space<vmem>>, vector<9x16xf32>
    tpu.vector_store %arg12[%c81_801, %c144_802], %477 {strides = array<i32>} : memref<90x400xf32, #tpu.memory_space<vmem>>, vector<9x16xf32>,
    %c483_803 = arith.constant 483 : index
    %c0_804 = arith.constant 0 : index
    %479 = tpu.strided_load %arg11[%c483_803, %c0_804] {strides = array<i32: 2, 1>} : memref<546x16xf32, #tpu.memory_space<vmem>>, vector<9x16xf32>
    %c81_805 = arith.constant 81 : index
    %c160_806 = arith.constant 160 : index
    %480 = vector.load %arg12[%c81_805, %c160_806] : memref<90x400xf32, #tpu.memory_space<vmem>>, vector<9x16xf32>
    tpu.vector_store %arg12[%c81_805, %c160_806], %479 {strides = array<i32>} : memref<90x400xf32, #tpu.memory_space<vmem>>, vector<9x16xf32>,
    %c484_807 = arith.constant 484 : index
    %c0_808 = arith.constant 0 : index
    %481 = tpu.strided_load %arg11[%c484_807, %c0_808] {strides = array<i32: 2, 1>} : memref<546x16xf32, #tpu.memory_space<vmem>>, vector<9x16xf32>
    %c81_809 = arith.constant 81 : index
    %c176_810 = arith.constant 176 : index
    %482 = vector.load %arg12[%c81_809, %c176_810] : memref<90x400xf32, #tpu.memory_space<vmem>>, vector<9x16xf32>
    tpu.vector_store %arg12[%c81_809, %c176_810], %481 {strides = array<i32>} : memref<90x400xf32, #tpu.memory_space<vmem>>, vector<9x16xf32>,
    %c485_811 = arith.constant 485 : index
    %c0_812 = arith.constant 0 : index
    %483 = tpu.strided_load %arg11[%c485_811, %c0_812] {strides = array<i32: 2, 1>} : memref<546x16xf32, #tpu.memory_space<vmem>>, vector<9x16xf32>
    %c81_813 = arith.constant 81 : index
    %c192_814 = arith.constant 192 : index
    %484 = vector.load %arg12[%c81_813, %c192_814] : memref<90x400xf32, #tpu.memory_space<vmem>>, vector<9x16xf32>
    tpu.vector_store %arg12[%c81_813, %c192_814], %483 {strides = array<i32>} : memref<90x400xf32, #tpu.memory_space<vmem>>, vector<9x16xf32>,
    %c486_815 = arith.constant 486 : index
    %c0_816 = arith.constant 0 : index
    %485 = tpu.strided_load %arg11[%c486_815, %c0_816] {strides = array<i32: 2, 1>} : memref<546x16xf32, #tpu.memory_space<vmem>>, vector<9x16xf32>
    %c81_817 = arith.constant 81 : index
    %c208_818 = arith.constant 208 : index
    %486 = vector.load %arg12[%c81_817, %c208_818] : memref<90x400xf32, #tpu.memory_space<vmem>>, vector<9x16xf32>
    tpu.vector_store %arg12[%c81_817, %c208_818], %485 {strides = array<i32>} : memref<90x400xf32, #tpu.memory_space<vmem>>, vector<9x16xf32>,
    %c487_819 = arith.constant 487 : index
    %c0_820 = arith.constant 0 : index
    %487 = tpu.strided_load %arg11[%c487_819, %c0_820] {strides = array<i32: 2, 1>} : memref<546x16xf32, #tpu.memory_space<vmem>>, vector<9x16xf32>
    %c81_821 = arith.constant 81 : index
    %c224_822 = arith.constant 224 : index
    %488 = vector.load %arg12[%c81_821, %c224_822] : memref<90x400xf32, #tpu.memory_space<vmem>>, vector<9x16xf32>
    tpu.vector_store %arg12[%c81_821, %c224_822], %487 {strides = array<i32>} : memref<90x400xf32, #tpu.memory_space<vmem>>, vector<9x16xf32>,
    %c504 = arith.constant 504 : index
    %c0_823 = arith.constant 0 : index
    %489 = tpu.strided_load %arg11[%c504, %c0_823] {strides = array<i32: 2, 1>} : memref<546x16xf32, #tpu.memory_space<vmem>>, vector<9x16xf32>
    %c81_824 = arith.constant 81 : index
    %c240_825 = arith.constant 240 : index
    %490 = vector.load %arg12[%c81_824, %c240_825] : memref<90x400xf32, #tpu.memory_space<vmem>>, vector<9x16xf32>
    tpu.vector_store %arg12[%c81_824, %c240_825], %489 {strides = array<i32>} : memref<90x400xf32, #tpu.memory_space<vmem>>, vector<9x16xf32>,
    %c505 = arith.constant 505 : index
    %c0_826 = arith.constant 0 : index
    %491 = tpu.strided_load %arg11[%c505, %c0_826] {strides = array<i32: 2, 1>} : memref<546x16xf32, #tpu.memory_space<vmem>>, vector<9x16xf32>
    %c81_827 = arith.constant 81 : index
    %c256_828 = arith.constant 256 : index
    %492 = vector.load %arg12[%c81_827, %c256_828] : memref<90x400xf32, #tpu.memory_space<vmem>>, vector<9x16xf32>
    tpu.vector_store %arg12[%c81_827, %c256_828], %491 {strides = array<i32>} : memref<90x400xf32, #tpu.memory_space<vmem>>, vector<9x16xf32>,
    %c506 = arith.constant 506 : index
    %c0_829 = arith.constant 0 : index
    %493 = tpu.strided_load %arg11[%c506, %c0_829] {strides = array<i32: 2, 1>} : memref<546x16xf32, #tpu.memory_space<vmem>>, vector<9x16xf32>
    %c81_830 = arith.constant 81 : index
    %c272_831 = arith.constant 272 : index
    %494 = vector.load %arg12[%c81_830, %c272_831] : memref<90x400xf32, #tpu.memory_space<vmem>>, vector<9x16xf32>
    tpu.vector_store %arg12[%c81_830, %c272_831], %493 {strides = array<i32>} : memref<90x400xf32, #tpu.memory_space<vmem>>, vector<9x16xf32>,
    %c507 = arith.constant 507 : index
    %c0_832 = arith.constant 0 : index
    %495 = tpu.strided_load %arg11[%c507, %c0_832] {strides = array<i32: 2, 1>} : memref<546x16xf32, #tpu.memory_space<vmem>>, vector<9x16xf32>
    %c81_833 = arith.constant 81 : index
    %c288_834 = arith.constant 288 : index
    %496 = vector.load %arg12[%c81_833, %c288_834] : memref<90x400xf32, #tpu.memory_space<vmem>>, vector<9x16xf32>
    tpu.vector_store %arg12[%c81_833, %c288_834], %495 {strides = array<i32>} : memref<90x400xf32, #tpu.memory_space<vmem>>, vector<9x16xf32>,
    %c508 = arith.constant 508 : index
    %c0_835 = arith.constant 0 : index
    %497 = tpu.strided_load %arg11[%c508, %c0_835] {strides = array<i32: 2, 1>} : memref<546x16xf32, #tpu.memory_space<vmem>>, vector<9x16xf32>
    %c81_836 = arith.constant 81 : index
    %c304_837 = arith.constant 304 : index
    %498 = vector.load %arg12[%c81_836, %c304_837] : memref<90x400xf32, #tpu.memory_space<vmem>>, vector<9x16xf32>
    tpu.vector_store %arg12[%c81_836, %c304_837], %497 {strides = array<i32>} : memref<90x400xf32, #tpu.memory_space<vmem>>, vector<9x16xf32>,
    %c525 = arith.constant 525 : index
    %c0_838 = arith.constant 0 : index
    %499 = tpu.strided_load %arg11[%c525, %c0_838] {strides = array<i32: 2, 1>} : memref<546x16xf32, #tpu.memory_space<vmem>>, vector<9x16xf32>
    %c81_839 = arith.constant 81 : index
    %c320_840 = arith.constant 320 : index
    %500 = vector.load %arg12[%c81_839, %c320_840] : memref<90x400xf32, #tpu.memory_space<vmem>>, vector<9x16xf32>
    tpu.vector_store %arg12[%c81_839, %c320_840], %499 {strides = array<i32>} : memref<90x400xf32, #tpu.memory_space<vmem>>, vector<9x16xf32>,
    %c526 = arith.constant 526 : index
    %c0_841 = arith.constant 0 : index
    %501 = tpu.strided_load %arg11[%c526, %c0_841] {strides = array<i32: 2, 1>} : memref<546x16xf32, #tpu.memory_space<vmem>>, vector<9x16xf32>
    %c81_842 = arith.constant 81 : index
    %c336_843 = arith.constant 336 : index
    %502 = vector.load %arg12[%c81_842, %c336_843] : memref<90x400xf32, #tpu.memory_space<vmem>>, vector<9x16xf32>
    tpu.vector_store %arg12[%c81_842, %c336_843], %501 {strides = array<i32>} : memref<90x400xf32, #tpu.memory_space<vmem>>, vector<9x16xf32>,
    %c527 = arith.constant 527 : index
    %c0_844 = arith.constant 0 : index
    %503 = tpu.strided_load %arg11[%c527, %c0_844] {strides = array<i32: 2, 1>} : memref<546x16xf32, #tpu.memory_space<vmem>>, vector<9x16xf32>
    %c81_845 = arith.constant 81 : index
    %c352_846 = arith.constant 352 : index
    %504 = vector.load %arg12[%c81_845, %c352_846] : memref<90x400xf32, #tpu.memory_space<vmem>>, vector<9x16xf32>
    tpu.vector_store %arg12[%c81_845, %c352_846], %503 {strides = array<i32>} : memref<90x400xf32, #tpu.memory_space<vmem>>, vector<9x16xf32>,
    %c528 = arith.constant 528 : index
    %c0_847 = arith.constant 0 : index
    %505 = tpu.strided_load %arg11[%c528, %c0_847] {strides = array<i32: 2, 1>} : memref<546x16xf32, #tpu.memory_space<vmem>>, vector<9x16xf32>
    %c81_848 = arith.constant 81 : index
    %c368_849 = arith.constant 368 : index
    %506 = vector.load %arg12[%c81_848, %c368_849] : memref<90x400xf32, #tpu.memory_space<vmem>>, vector<9x16xf32>
    tpu.vector_store %arg12[%c81_848, %c368_849], %505 {strides = array<i32>} : memref<90x400xf32, #tpu.memory_space<vmem>>, vector<9x16xf32>,
    %c529 = arith.constant 529 : index
    %c0_850 = arith.constant 0 : index
    %507 = tpu.strided_load %arg11[%c529, %c0_850] {strides = array<i32: 2, 1>} : memref<546x16xf32, #tpu.memory_space<vmem>>, vector<9x16xf32>
    %c81_851 = arith.constant 81 : index
    %c384_852 = arith.constant 384 : index
    %508 = vector.load %arg12[%c81_851, %c384_852] : memref<90x400xf32, #tpu.memory_space<vmem>>, vector<9x16xf32>
    tpu.vector_store %arg12[%c81_851, %c384_852], %507 {strides = array<i32>} : memref<90x400xf32, #tpu.memory_space<vmem>>, vector<9x16xf32>,
    %c0_853 = arith.constant 0 : index
    %c0_854 = arith.constant 0 : index
    %509 = vector.load %arg12[%c0_853, %c0_854] : memref<90x400xf32, #tpu.memory_space<vmem>>, vector<90x400xf32>
    %c0_855 = arith.constant 0 : index
    %c0_856 = arith.constant 0 : index
    %510 = vector.load %arg4[%c0_855, %c0_856] : memref<400x32xf32, #tpu.memory_space<vmem>>, vector<400x32xf32>
    %cst_857 = arith.constant dense<0.000000e+00> : vector<90x32xf32>
    %511 = tpu.matmul %509, %510, %cst_857 {dimension_numbers = #tpu.dot_dimension_numbers<[1], [0], [0], [1], [0, 0, 1, 1], [], []>} : vector<90x400xf32>, vector<400x32xf32>, vector<90x32xf32> -> vector<90x32xf32>
    %c0_858 = arith.constant 0 : index
    %c0_859 = arith.constant 0 : index
    %512 = vector.load %arg5[%c0_858, %c0_859] : memref<1x32xf32, #tpu.memory_space<vmem>>, vector<1x32xf32>
    %513 = vector.broadcast %512 : vector<1x32xf32> to vector<90x32xf32>
    %514 = arith.addf %511, %513 : vector<90x32xf32>
    %cst_860 = arith.constant 0.000000e+00 : f32
    %515 = vector.broadcast %cst_860 : f32 to vector<90x32xf32>
    %516 = arith.maximumf %514, %515 : vector<90x32xf32>
    %c0_861 = arith.constant 0 : index
    %c0_862 = arith.constant 0 : index
    %517 = vector.load %arg13[%c0_861, %c0_862] : memref<90x32xf32, #tpu.memory_space<vmem>>, vector<90x32xf32>
    tpu.vector_store %arg13[%c0_861, %c0_862], %516 {strides = array<i32>} : memref<90x32xf32, #tpu.memory_space<vmem>>, vector<90x32xf32>,
    %c0_863 = arith.constant 0 : index
    %c0_864 = arith.constant 0 : index
    %518 = tpu.strided_load %arg13[%c0_863, %c0_864] {strides = array<i32: 2, 1>} : memref<90x32xf32, #tpu.memory_space<vmem>>, vector<3x32xf32>
    %c0_865 = arith.constant 0 : index
    %c0_866 = arith.constant 0 : index
    %519 = vector.load %arg14[%c0_865, %c0_866] : memref<6x800xf32, #tpu.memory_space<vmem>>, vector<3x32xf32>
    tpu.vector_store %arg14[%c0_865, %c0_866], %518 {strides = array<i32>} : memref<6x800xf32, #tpu.memory_space<vmem>>, vector<3x32xf32>,
    %c1_867 = arith.constant 1 : index
    %c0_868 = arith.constant 0 : index
    %520 = tpu.strided_load %arg13[%c1_867, %c0_868] {strides = array<i32: 2, 1>} : memref<90x32xf32, #tpu.memory_space<vmem>>, vector<3x32xf32>
    %c0_869 = arith.constant 0 : index
    %c32_870 = arith.constant 32 : index
    %521 = vector.load %arg14[%c0_869, %c32_870] : memref<6x800xf32, #tpu.memory_space<vmem>>, vector<3x32xf32>
    tpu.vector_store %arg14[%c0_869, %c32_870], %520 {strides = array<i32>} : memref<6x800xf32, #tpu.memory_space<vmem>>, vector<3x32xf32>,
    %c2_871 = arith.constant 2 : index
    %c0_872 = arith.constant 0 : index
    %522 = tpu.strided_load %arg13[%c2_871, %c0_872] {strides = array<i32: 2, 1>} : memref<90x32xf32, #tpu.memory_space<vmem>>, vector<3x32xf32>
    %c0_873 = arith.constant 0 : index
    %c64_874 = arith.constant 64 : index
    %523 = vector.load %arg14[%c0_873, %c64_874] : memref<6x800xf32, #tpu.memory_space<vmem>>, vector<3x32xf32>
    tpu.vector_store %arg14[%c0_873, %c64_874], %522 {strides = array<i32>} : memref<6x800xf32, #tpu.memory_space<vmem>>, vector<3x32xf32>,
    %c3_875 = arith.constant 3 : index
    %c0_876 = arith.constant 0 : index
    %524 = tpu.strided_load %arg13[%c3_875, %c0_876] {strides = array<i32: 2, 1>} : memref<90x32xf32, #tpu.memory_space<vmem>>, vector<3x32xf32>
    %c0_877 = arith.constant 0 : index
    %c96_878 = arith.constant 96 : index
    %525 = vector.load %arg14[%c0_877, %c96_878] : memref<6x800xf32, #tpu.memory_space<vmem>>, vector<3x32xf32>
    tpu.vector_store %arg14[%c0_877, %c96_878], %524 {strides = array<i32>} : memref<6x800xf32, #tpu.memory_space<vmem>>, vector<3x32xf32>,
    %c4_879 = arith.constant 4 : index
    %c0_880 = arith.constant 0 : index
    %526 = tpu.strided_load %arg13[%c4_879, %c0_880] {strides = array<i32: 2, 1>} : memref<90x32xf32, #tpu.memory_space<vmem>>, vector<3x32xf32>
    %c0_881 = arith.constant 0 : index
    %c128_882 = arith.constant 128 : index
    %527 = vector.load %arg14[%c0_881, %c128_882] : memref<6x800xf32, #tpu.memory_space<vmem>>, vector<3x32xf32>
    tpu.vector_store %arg14[%c0_881, %c128_882], %526 {strides = array<i32>} : memref<6x800xf32, #tpu.memory_space<vmem>>, vector<3x32xf32>,
    %c9_883 = arith.constant 9 : index
    %c0_884 = arith.constant 0 : index
    %528 = tpu.strided_load %arg13[%c9_883, %c0_884] {strides = array<i32: 2, 1>} : memref<90x32xf32, #tpu.memory_space<vmem>>, vector<3x32xf32>
    %c0_885 = arith.constant 0 : index
    %c160_886 = arith.constant 160 : index
    %529 = vector.load %arg14[%c0_885, %c160_886] : memref<6x800xf32, #tpu.memory_space<vmem>>, vector<3x32xf32>
    tpu.vector_store %arg14[%c0_885, %c160_886], %528 {strides = array<i32>} : memref<6x800xf32, #tpu.memory_space<vmem>>, vector<3x32xf32>,
    %c10 = arith.constant 10 : index
    %c0_887 = arith.constant 0 : index
    %530 = tpu.strided_load %arg13[%c10, %c0_887] {strides = array<i32: 2, 1>} : memref<90x32xf32, #tpu.memory_space<vmem>>, vector<3x32xf32>
    %c0_888 = arith.constant 0 : index
    %c192_889 = arith.constant 192 : index
    %531 = vector.load %arg14[%c0_888, %c192_889] : memref<6x800xf32, #tpu.memory_space<vmem>>, vector<3x32xf32>
    tpu.vector_store %arg14[%c0_888, %c192_889], %530 {strides = array<i32>} : memref<6x800xf32, #tpu.memory_space<vmem>>, vector<3x32xf32>,
    %c11 = arith.constant 11 : index
    %c0_890 = arith.constant 0 : index
    %532 = tpu.strided_load %arg13[%c11, %c0_890] {strides = array<i32: 2, 1>} : memref<90x32xf32, #tpu.memory_space<vmem>>, vector<3x32xf32>
    %c0_891 = arith.constant 0 : index
    %c224_892 = arith.constant 224 : index
    %533 = vector.load %arg14[%c0_891, %c224_892] : memref<6x800xf32, #tpu.memory_space<vmem>>, vector<3x32xf32>
    tpu.vector_store %arg14[%c0_891, %c224_892], %532 {strides = array<i32>} : memref<6x800xf32, #tpu.memory_space<vmem>>, vector<3x32xf32>,
    %c12 = arith.constant 12 : index
    %c0_893 = arith.constant 0 : index
    %534 = tpu.strided_load %arg13[%c12, %c0_893] {strides = array<i32: 2, 1>} : memref<90x32xf32, #tpu.memory_space<vmem>>, vector<3x32xf32>
    %c0_894 = arith.constant 0 : index
    %c256_895 = arith.constant 256 : index
    %535 = vector.load %arg14[%c0_894, %c256_895] : memref<6x800xf32, #tpu.memory_space<vmem>>, vector<3x32xf32>
    tpu.vector_store %arg14[%c0_894, %c256_895], %534 {strides = array<i32>} : memref<6x800xf32, #tpu.memory_space<vmem>>, vector<3x32xf32>,
    %c13 = arith.constant 13 : index
    %c0_896 = arith.constant 0 : index
    %536 = tpu.strided_load %arg13[%c13, %c0_896] {strides = array<i32: 2, 1>} : memref<90x32xf32, #tpu.memory_space<vmem>>, vector<3x32xf32>
    %c0_897 = arith.constant 0 : index
    %c288_898 = arith.constant 288 : index
    %537 = vector.load %arg14[%c0_897, %c288_898] : memref<6x800xf32, #tpu.memory_space<vmem>>, vector<3x32xf32>
    tpu.vector_store %arg14[%c0_897, %c288_898], %536 {strides = array<i32>} : memref<6x800xf32, #tpu.memory_space<vmem>>, vector<3x32xf32>,
    %c18_899 = arith.constant 18 : index
    %c0_900 = arith.constant 0 : index
    %538 = tpu.strided_load %arg13[%c18_899, %c0_900] {strides = array<i32: 2, 1>} : memref<90x32xf32, #tpu.memory_space<vmem>>, vector<3x32xf32>
    %c0_901 = arith.constant 0 : index
    %c320_902 = arith.constant 320 : index
    %539 = vector.load %arg14[%c0_901, %c320_902] : memref<6x800xf32, #tpu.memory_space<vmem>>, vector<3x32xf32>
    tpu.vector_store %arg14[%c0_901, %c320_902], %538 {strides = array<i32>} : memref<6x800xf32, #tpu.memory_space<vmem>>, vector<3x32xf32>,
    %c19 = arith.constant 19 : index
    %c0_903 = arith.constant 0 : index
    %540 = tpu.strided_load %arg13[%c19, %c0_903] {strides = array<i32: 2, 1>} : memref<90x32xf32, #tpu.memory_space<vmem>>, vector<3x32xf32>
    %c0_904 = arith.constant 0 : index
    %c352_905 = arith.constant 352 : index
    %541 = vector.load %arg14[%c0_904, %c352_905] : memref<6x800xf32, #tpu.memory_space<vmem>>, vector<3x32xf32>
    tpu.vector_store %arg14[%c0_904, %c352_905], %540 {strides = array<i32>} : memref<6x800xf32, #tpu.memory_space<vmem>>, vector<3x32xf32>,
    %c20 = arith.constant 20 : index
    %c0_906 = arith.constant 0 : index
    %542 = tpu.strided_load %arg13[%c20, %c0_906] {strides = array<i32: 2, 1>} : memref<90x32xf32, #tpu.memory_space<vmem>>, vector<3x32xf32>
    %c0_907 = arith.constant 0 : index
    %c384_908 = arith.constant 384 : index
    %543 = vector.load %arg14[%c0_907, %c384_908] : memref<6x800xf32, #tpu.memory_space<vmem>>, vector<3x32xf32>
    tpu.vector_store %arg14[%c0_907, %c384_908], %542 {strides = array<i32>} : memref<6x800xf32, #tpu.memory_space<vmem>>, vector<3x32xf32>,
    %c21_909 = arith.constant 21 : index
    %c0_910 = arith.constant 0 : index
    %544 = tpu.strided_load %arg13[%c21_909, %c0_910] {strides = array<i32: 2, 1>} : memref<90x32xf32, #tpu.memory_space<vmem>>, vector<3x32xf32>
    %c0_911 = arith.constant 0 : index
    %c416 = arith.constant 416 : index
    %545 = vector.load %arg14[%c0_911, %c416] : memref<6x800xf32, #tpu.memory_space<vmem>>, vector<3x32xf32>
    tpu.vector_store %arg14[%c0_911, %c416], %544 {strides = array<i32>} : memref<6x800xf32, #tpu.memory_space<vmem>>, vector<3x32xf32>,
    %c22_912 = arith.constant 22 : index
    %c0_913 = arith.constant 0 : index
    %546 = tpu.strided_load %arg13[%c22_912, %c0_913] {strides = array<i32: 2, 1>} : memref<90x32xf32, #tpu.memory_space<vmem>>, vector<3x32xf32>
    %c0_914 = arith.constant 0 : index
    %c448 = arith.constant 448 : index
    %547 = vector.load %arg14[%c0_914, %c448] : memref<6x800xf32, #tpu.memory_space<vmem>>, vector<3x32xf32>
    tpu.vector_store %arg14[%c0_914, %c448], %546 {strides = array<i32>} : memref<6x800xf32, #tpu.memory_space<vmem>>, vector<3x32xf32>,
    %c27_915 = arith.constant 27 : index
    %c0_916 = arith.constant 0 : index
    %548 = tpu.strided_load %arg13[%c27_915, %c0_916] {strides = array<i32: 2, 1>} : memref<90x32xf32, #tpu.memory_space<vmem>>, vector<3x32xf32>
    %c0_917 = arith.constant 0 : index
    %c480 = arith.constant 480 : index
    %549 = vector.load %arg14[%c0_917, %c480] : memref<6x800xf32, #tpu.memory_space<vmem>>, vector<3x32xf32>
    tpu.vector_store %arg14[%c0_917, %c480], %548 {strides = array<i32>} : memref<6x800xf32, #tpu.memory_space<vmem>>, vector<3x32xf32>,
    %c28 = arith.constant 28 : index
    %c0_918 = arith.constant 0 : index
    %550 = tpu.strided_load %arg13[%c28, %c0_918] {strides = array<i32: 2, 1>} : memref<90x32xf32, #tpu.memory_space<vmem>>, vector<3x32xf32>
    %c0_919 = arith.constant 0 : index
    %c512 = arith.constant 512 : index
    %551 = vector.load %arg14[%c0_919, %c512] : memref<6x800xf32, #tpu.memory_space<vmem>>, vector<3x32xf32>
    tpu.vector_store %arg14[%c0_919, %c512], %550 {strides = array<i32>} : memref<6x800xf32, #tpu.memory_space<vmem>>, vector<3x32xf32>,
    %c29 = arith.constant 29 : index
    %c0_920 = arith.constant 0 : index
    %552 = tpu.strided_load %arg13[%c29, %c0_920] {strides = array<i32: 2, 1>} : memref<90x32xf32, #tpu.memory_space<vmem>>, vector<3x32xf32>
    %c0_921 = arith.constant 0 : index
    %c544 = arith.constant 544 : index
    %553 = vector.load %arg14[%c0_921, %c544] : memref<6x800xf32, #tpu.memory_space<vmem>>, vector<3x32xf32>
    tpu.vector_store %arg14[%c0_921, %c544], %552 {strides = array<i32>} : memref<6x800xf32, #tpu.memory_space<vmem>>, vector<3x32xf32>,
    %c30 = arith.constant 30 : index
    %c0_922 = arith.constant 0 : index
    %554 = tpu.strided_load %arg13[%c30, %c0_922] {strides = array<i32: 2, 1>} : memref<90x32xf32, #tpu.memory_space<vmem>>, vector<3x32xf32>
    %c0_923 = arith.constant 0 : index
    %c576 = arith.constant 576 : index
    %555 = vector.load %arg14[%c0_923, %c576] : memref<6x800xf32, #tpu.memory_space<vmem>>, vector<3x32xf32>
    tpu.vector_store %arg14[%c0_923, %c576], %554 {strides = array<i32>} : memref<6x800xf32, #tpu.memory_space<vmem>>, vector<3x32xf32>,
    %c31 = arith.constant 31 : index
    %c0_924 = arith.constant 0 : index
    %556 = tpu.strided_load %arg13[%c31, %c0_924] {strides = array<i32: 2, 1>} : memref<90x32xf32, #tpu.memory_space<vmem>>, vector<3x32xf32>
    %c0_925 = arith.constant 0 : index
    %c608 = arith.constant 608 : index
    %557 = vector.load %arg14[%c0_925, %c608] : memref<6x800xf32, #tpu.memory_space<vmem>>, vector<3x32xf32>
    tpu.vector_store %arg14[%c0_925, %c608], %556 {strides = array<i32>} : memref<6x800xf32, #tpu.memory_space<vmem>>, vector<3x32xf32>,
    %c36_926 = arith.constant 36 : index
    %c0_927 = arith.constant 0 : index
    %558 = tpu.strided_load %arg13[%c36_926, %c0_927] {strides = array<i32: 2, 1>} : memref<90x32xf32, #tpu.memory_space<vmem>>, vector<3x32xf32>
    %c0_928 = arith.constant 0 : index
    %c640 = arith.constant 640 : index
    %559 = vector.load %arg14[%c0_928, %c640] : memref<6x800xf32, #tpu.memory_space<vmem>>, vector<3x32xf32>
    tpu.vector_store %arg14[%c0_928, %c640], %558 {strides = array<i32>} : memref<6x800xf32, #tpu.memory_space<vmem>>, vector<3x32xf32>,
    %c37 = arith.constant 37 : index
    %c0_929 = arith.constant 0 : index
    %560 = tpu.strided_load %arg13[%c37, %c0_929] {strides = array<i32: 2, 1>} : memref<90x32xf32, #tpu.memory_space<vmem>>, vector<3x32xf32>
    %c0_930 = arith.constant 0 : index
    %c672 = arith.constant 672 : index
    %561 = vector.load %arg14[%c0_930, %c672] : memref<6x800xf32, #tpu.memory_space<vmem>>, vector<3x32xf32>
    tpu.vector_store %arg14[%c0_930, %c672], %560 {strides = array<i32>} : memref<6x800xf32, #tpu.memory_space<vmem>>, vector<3x32xf32>,
    %c38 = arith.constant 38 : index
    %c0_931 = arith.constant 0 : index
    %562 = tpu.strided_load %arg13[%c38, %c0_931] {strides = array<i32: 2, 1>} : memref<90x32xf32, #tpu.memory_space<vmem>>, vector<3x32xf32>
    %c0_932 = arith.constant 0 : index
    %c704 = arith.constant 704 : index
    %563 = vector.load %arg14[%c0_932, %c704] : memref<6x800xf32, #tpu.memory_space<vmem>>, vector<3x32xf32>
    tpu.vector_store %arg14[%c0_932, %c704], %562 {strides = array<i32>} : memref<6x800xf32, #tpu.memory_space<vmem>>, vector<3x32xf32>,
    %c39 = arith.constant 39 : index
    %c0_933 = arith.constant 0 : index
    %564 = tpu.strided_load %arg13[%c39, %c0_933] {strides = array<i32: 2, 1>} : memref<90x32xf32, #tpu.memory_space<vmem>>, vector<3x32xf32>
    %c0_934 = arith.constant 0 : index
    %c736 = arith.constant 736 : index
    %565 = vector.load %arg14[%c0_934, %c736] : memref<6x800xf32, #tpu.memory_space<vmem>>, vector<3x32xf32>
    tpu.vector_store %arg14[%c0_934, %c736], %564 {strides = array<i32>} : memref<6x800xf32, #tpu.memory_space<vmem>>, vector<3x32xf32>,
    %c40 = arith.constant 40 : index
    %c0_935 = arith.constant 0 : index
    %566 = tpu.strided_load %arg13[%c40, %c0_935] {strides = array<i32: 2, 1>} : memref<90x32xf32, #tpu.memory_space<vmem>>, vector<3x32xf32>
    %c0_936 = arith.constant 0 : index
    %c768 = arith.constant 768 : index
    %567 = vector.load %arg14[%c0_936, %c768] : memref<6x800xf32, #tpu.memory_space<vmem>>, vector<3x32xf32>
    tpu.vector_store %arg14[%c0_936, %c768], %566 {strides = array<i32>} : memref<6x800xf32, #tpu.memory_space<vmem>>, vector<3x32xf32>,
    %c45_937 = arith.constant 45 : index
    %c0_938 = arith.constant 0 : index
    %568 = tpu.strided_load %arg13[%c45_937, %c0_938] {strides = array<i32: 2, 1>} : memref<90x32xf32, #tpu.memory_space<vmem>>, vector<3x32xf32>
    %c3_939 = arith.constant 3 : index
    %c0_940 = arith.constant 0 : index
    %569 = vector.load %arg14[%c3_939, %c0_940] : memref<6x800xf32, #tpu.memory_space<vmem>>, vector<3x32xf32>
    tpu.vector_store %arg14[%c3_939, %c0_940], %568 {strides = array<i32>} : memref<6x800xf32, #tpu.memory_space<vmem>>, vector<3x32xf32>,
    %c46_941 = arith.constant 46 : index
    %c0_942 = arith.constant 0 : index
    %570 = tpu.strided_load %arg13[%c46_941, %c0_942] {strides = array<i32: 2, 1>} : memref<90x32xf32, #tpu.memory_space<vmem>>, vector<3x32xf32>
    %c3_943 = arith.constant 3 : index
    %c32_944 = arith.constant 32 : index
    %571 = vector.load %arg14[%c3_943, %c32_944] : memref<6x800xf32, #tpu.memory_space<vmem>>, vector<3x32xf32>
    tpu.vector_store %arg14[%c3_943, %c32_944], %570 {strides = array<i32>} : memref<6x800xf32, #tpu.memory_space<vmem>>, vector<3x32xf32>,
    %c47 = arith.constant 47 : index
    %c0_945 = arith.constant 0 : index
    %572 = tpu.strided_load %arg13[%c47, %c0_945] {strides = array<i32: 2, 1>} : memref<90x32xf32, #tpu.memory_space<vmem>>, vector<3x32xf32>
    %c3_946 = arith.constant 3 : index
    %c64_947 = arith.constant 64 : index
    %573 = vector.load %arg14[%c3_946, %c64_947] : memref<6x800xf32, #tpu.memory_space<vmem>>, vector<3x32xf32>
    tpu.vector_store %arg14[%c3_946, %c64_947], %572 {strides = array<i32>} : memref<6x800xf32, #tpu.memory_space<vmem>>, vector<3x32xf32>,
    %c48_948 = arith.constant 48 : index
    %c0_949 = arith.constant 0 : index
    %574 = tpu.strided_load %arg13[%c48_948, %c0_949] {strides = array<i32: 2, 1>} : memref<90x32xf32, #tpu.memory_space<vmem>>, vector<3x32xf32>
    %c3_950 = arith.constant 3 : index
    %c96_951 = arith.constant 96 : index
    %575 = vector.load %arg14[%c3_950, %c96_951] : memref<6x800xf32, #tpu.memory_space<vmem>>, vector<3x32xf32>
    tpu.vector_store %arg14[%c3_950, %c96_951], %574 {strides = array<i32>} : memref<6x800xf32, #tpu.memory_space<vmem>>, vector<3x32xf32>,
    %c49 = arith.constant 49 : index
    %c0_952 = arith.constant 0 : index
    %576 = tpu.strided_load %arg13[%c49, %c0_952] {strides = array<i32: 2, 1>} : memref<90x32xf32, #tpu.memory_space<vmem>>, vector<3x32xf32>
    %c3_953 = arith.constant 3 : index
    %c128_954 = arith.constant 128 : index
    %577 = vector.load %arg14[%c3_953, %c128_954] : memref<6x800xf32, #tpu.memory_space<vmem>>, vector<3x32xf32>
    tpu.vector_store %arg14[%c3_953, %c128_954], %576 {strides = array<i32>} : memref<6x800xf32, #tpu.memory_space<vmem>>, vector<3x32xf32>,
    %c54_955 = arith.constant 54 : index
    %c0_956 = arith.constant 0 : index
    %578 = tpu.strided_load %arg13[%c54_955, %c0_956] {strides = array<i32: 2, 1>} : memref<90x32xf32, #tpu.memory_space<vmem>>, vector<3x32xf32>
    %c3_957 = arith.constant 3 : index
    %c160_958 = arith.constant 160 : index
    %579 = vector.load %arg14[%c3_957, %c160_958] : memref<6x800xf32, #tpu.memory_space<vmem>>, vector<3x32xf32>
    tpu.vector_store %arg14[%c3_957, %c160_958], %578 {strides = array<i32>} : memref<6x800xf32, #tpu.memory_space<vmem>>, vector<3x32xf32>,
    %c55 = arith.constant 55 : index
    %c0_959 = arith.constant 0 : index
    %580 = tpu.strided_load %arg13[%c55, %c0_959] {strides = array<i32: 2, 1>} : memref<90x32xf32, #tpu.memory_space<vmem>>, vector<3x32xf32>
    %c3_960 = arith.constant 3 : index
    %c192_961 = arith.constant 192 : index
    %581 = vector.load %arg14[%c3_960, %c192_961] : memref<6x800xf32, #tpu.memory_space<vmem>>, vector<3x32xf32>
    tpu.vector_store %arg14[%c3_960, %c192_961], %580 {strides = array<i32>} : memref<6x800xf32, #tpu.memory_space<vmem>>, vector<3x32xf32>,
    %c56 = arith.constant 56 : index
    %c0_962 = arith.constant 0 : index
    %582 = tpu.strided_load %arg13[%c56, %c0_962] {strides = array<i32: 2, 1>} : memref<90x32xf32, #tpu.memory_space<vmem>>, vector<3x32xf32>
    %c3_963 = arith.constant 3 : index
    %c224_964 = arith.constant 224 : index
    %583 = vector.load %arg14[%c3_963, %c224_964] : memref<6x800xf32, #tpu.memory_space<vmem>>, vector<3x32xf32>
    tpu.vector_store %arg14[%c3_963, %c224_964], %582 {strides = array<i32>} : memref<6x800xf32, #tpu.memory_space<vmem>>, vector<3x32xf32>,
    %c57 = arith.constant 57 : index
    %c0_965 = arith.constant 0 : index
    %584 = tpu.strided_load %arg13[%c57, %c0_965] {strides = array<i32: 2, 1>} : memref<90x32xf32, #tpu.memory_space<vmem>>, vector<3x32xf32>
    %c3_966 = arith.constant 3 : index
    %c256_967 = arith.constant 256 : index
    %585 = vector.load %arg14[%c3_966, %c256_967] : memref<6x800xf32, #tpu.memory_space<vmem>>, vector<3x32xf32>
    tpu.vector_store %arg14[%c3_966, %c256_967], %584 {strides = array<i32>} : memref<6x800xf32, #tpu.memory_space<vmem>>, vector<3x32xf32>,
    %c58 = arith.constant 58 : index
    %c0_968 = arith.constant 0 : index
    %586 = tpu.strided_load %arg13[%c58, %c0_968] {strides = array<i32: 2, 1>} : memref<90x32xf32, #tpu.memory_space<vmem>>, vector<3x32xf32>
    %c3_969 = arith.constant 3 : index
    %c288_970 = arith.constant 288 : index
    %587 = vector.load %arg14[%c3_969, %c288_970] : memref<6x800xf32, #tpu.memory_space<vmem>>, vector<3x32xf32>
    tpu.vector_store %arg14[%c3_969, %c288_970], %586 {strides = array<i32>} : memref<6x800xf32, #tpu.memory_space<vmem>>, vector<3x32xf32>,
    %c63_971 = arith.constant 63 : index
    %c0_972 = arith.constant 0 : index
    %588 = tpu.strided_load %arg13[%c63_971, %c0_972] {strides = array<i32: 2, 1>} : memref<90x32xf32, #tpu.memory_space<vmem>>, vector<3x32xf32>
    %c3_973 = arith.constant 3 : index
    %c320_974 = arith.constant 320 : index
    %589 = vector.load %arg14[%c3_973, %c320_974] : memref<6x800xf32, #tpu.memory_space<vmem>>, vector<3x32xf32>
    tpu.vector_store %arg14[%c3_973, %c320_974], %588 {strides = array<i32>} : memref<6x800xf32, #tpu.memory_space<vmem>>, vector<3x32xf32>,
    %c64_975 = arith.constant 64 : index
    %c0_976 = arith.constant 0 : index
    %590 = tpu.strided_load %arg13[%c64_975, %c0_976] {strides = array<i32: 2, 1>} : memref<90x32xf32, #tpu.memory_space<vmem>>, vector<3x32xf32>
    %c3_977 = arith.constant 3 : index
    %c352_978 = arith.constant 352 : index
    %591 = vector.load %arg14[%c3_977, %c352_978] : memref<6x800xf32, #tpu.memory_space<vmem>>, vector<3x32xf32>
    tpu.vector_store %arg14[%c3_977, %c352_978], %590 {strides = array<i32>} : memref<6x800xf32, #tpu.memory_space<vmem>>, vector<3x32xf32>,
    %c65_979 = arith.constant 65 : index
    %c0_980 = arith.constant 0 : index
    %592 = tpu.strided_load %arg13[%c65_979, %c0_980] {strides = array<i32: 2, 1>} : memref<90x32xf32, #tpu.memory_space<vmem>>, vector<3x32xf32>
    %c3_981 = arith.constant 3 : index
    %c384_982 = arith.constant 384 : index
    %593 = vector.load %arg14[%c3_981, %c384_982] : memref<6x800xf32, #tpu.memory_space<vmem>>, vector<3x32xf32>
    tpu.vector_store %arg14[%c3_981, %c384_982], %592 {strides = array<i32>} : memref<6x800xf32, #tpu.memory_space<vmem>>, vector<3x32xf32>,
    %c66_983 = arith.constant 66 : index
    %c0_984 = arith.constant 0 : index
    %594 = tpu.strided_load %arg13[%c66_983, %c0_984] {strides = array<i32: 2, 1>} : memref<90x32xf32, #tpu.memory_space<vmem>>, vector<3x32xf32>
    %c3_985 = arith.constant 3 : index
    %c416_986 = arith.constant 416 : index
    %595 = vector.load %arg14[%c3_985, %c416_986] : memref<6x800xf32, #tpu.memory_space<vmem>>, vector<3x32xf32>
    tpu.vector_store %arg14[%c3_985, %c416_986], %594 {strides = array<i32>} : memref<6x800xf32, #tpu.memory_space<vmem>>, vector<3x32xf32>,
    %c67_987 = arith.constant 67 : index
    %c0_988 = arith.constant 0 : index
    %596 = tpu.strided_load %arg13[%c67_987, %c0_988] {strides = array<i32: 2, 1>} : memref<90x32xf32, #tpu.memory_space<vmem>>, vector<3x32xf32>
    %c3_989 = arith.constant 3 : index
    %c448_990 = arith.constant 448 : index
    %597 = vector.load %arg14[%c3_989, %c448_990] : memref<6x800xf32, #tpu.memory_space<vmem>>, vector<3x32xf32>
    tpu.vector_store %arg14[%c3_989, %c448_990], %596 {strides = array<i32>} : memref<6x800xf32, #tpu.memory_space<vmem>>, vector<3x32xf32>,
    %c72_991 = arith.constant 72 : index
    %c0_992 = arith.constant 0 : index
    %598 = tpu.strided_load %arg13[%c72_991, %c0_992] {strides = array<i32: 2, 1>} : memref<90x32xf32, #tpu.memory_space<vmem>>, vector<3x32xf32>
    %c3_993 = arith.constant 3 : index
    %c480_994 = arith.constant 480 : index
    %599 = vector.load %arg14[%c3_993, %c480_994] : memref<6x800xf32, #tpu.memory_space<vmem>>, vector<3x32xf32>
    tpu.vector_store %arg14[%c3_993, %c480_994], %598 {strides = array<i32>} : memref<6x800xf32, #tpu.memory_space<vmem>>, vector<3x32xf32>,
    %c73 = arith.constant 73 : index
    %c0_995 = arith.constant 0 : index
    %600 = tpu.strided_load %arg13[%c73, %c0_995] {strides = array<i32: 2, 1>} : memref<90x32xf32, #tpu.memory_space<vmem>>, vector<3x32xf32>
    %c3_996 = arith.constant 3 : index
    %c512_997 = arith.constant 512 : index
    %601 = vector.load %arg14[%c3_996, %c512_997] : memref<6x800xf32, #tpu.memory_space<vmem>>, vector<3x32xf32>
    tpu.vector_store %arg14[%c3_996, %c512_997], %600 {strides = array<i32>} : memref<6x800xf32, #tpu.memory_space<vmem>>, vector<3x32xf32>,
    %c74 = arith.constant 74 : index
    %c0_998 = arith.constant 0 : index
    %602 = tpu.strided_load %arg13[%c74, %c0_998] {strides = array<i32: 2, 1>} : memref<90x32xf32, #tpu.memory_space<vmem>>, vector<3x32xf32>
    %c3_999 = arith.constant 3 : index
    %c544_1000 = arith.constant 544 : index
    %603 = vector.load %arg14[%c3_999, %c544_1000] : memref<6x800xf32, #tpu.memory_space<vmem>>, vector<3x32xf32>
    tpu.vector_store %arg14[%c3_999, %c544_1000], %602 {strides = array<i32>} : memref<6x800xf32, #tpu.memory_space<vmem>>, vector<3x32xf32>,
    %c75 = arith.constant 75 : index
    %c0_1001 = arith.constant 0 : index
    %604 = tpu.strided_load %arg13[%c75, %c0_1001] {strides = array<i32: 2, 1>} : memref<90x32xf32, #tpu.memory_space<vmem>>, vector<3x32xf32>
    %c3_1002 = arith.constant 3 : index
    %c576_1003 = arith.constant 576 : index
    %605 = vector.load %arg14[%c3_1002, %c576_1003] : memref<6x800xf32, #tpu.memory_space<vmem>>, vector<3x32xf32>
    tpu.vector_store %arg14[%c3_1002, %c576_1003], %604 {strides = array<i32>} : memref<6x800xf32, #tpu.memory_space<vmem>>, vector<3x32xf32>,
    %c76 = arith.constant 76 : index
    %c0_1004 = arith.constant 0 : index
    %606 = tpu.strided_load %arg13[%c76, %c0_1004] {strides = array<i32: 2, 1>} : memref<90x32xf32, #tpu.memory_space<vmem>>, vector<3x32xf32>
    %c3_1005 = arith.constant 3 : index
    %c608_1006 = arith.constant 608 : index
    %607 = vector.load %arg14[%c3_1005, %c608_1006] : memref<6x800xf32, #tpu.memory_space<vmem>>, vector<3x32xf32>
    tpu.vector_store %arg14[%c3_1005, %c608_1006], %606 {strides = array<i32>} : memref<6x800xf32, #tpu.memory_space<vmem>>, vector<3x32xf32>,
    %c81_1007 = arith.constant 81 : index
    %c0_1008 = arith.constant 0 : index
    %608 = tpu.strided_load %arg13[%c81_1007, %c0_1008] {strides = array<i32: 2, 1>} : memref<90x32xf32, #tpu.memory_space<vmem>>, vector<3x32xf32>
    %c3_1009 = arith.constant 3 : index
    %c640_1010 = arith.constant 640 : index
    %609 = vector.load %arg14[%c3_1009, %c640_1010] : memref<6x800xf32, #tpu.memory_space<vmem>>, vector<3x32xf32>
    tpu.vector_store %arg14[%c3_1009, %c640_1010], %608 {strides = array<i32>} : memref<6x800xf32, #tpu.memory_space<vmem>>, vector<3x32xf32>,
    %c82 = arith.constant 82 : index
    %c0_1011 = arith.constant 0 : index
    %610 = tpu.strided_load %arg13[%c82, %c0_1011] {strides = array<i32: 2, 1>} : memref<90x32xf32, #tpu.memory_space<vmem>>, vector<3x32xf32>
    %c3_1012 = arith.constant 3 : index
    %c672_1013 = arith.constant 672 : index
    %611 = vector.load %arg14[%c3_1012, %c672_1013] : memref<6x800xf32, #tpu.memory_space<vmem>>, vector<3x32xf32>
    tpu.vector_store %arg14[%c3_1012, %c672_1013], %610 {strides = array<i32>} : memref<6x800xf32, #tpu.memory_space<vmem>>, vector<3x32xf32>,
    %c83 = arith.constant 83 : index
    %c0_1014 = arith.constant 0 : index
    %612 = tpu.strided_load %arg13[%c83, %c0_1014] {strides = array<i32: 2, 1>} : memref<90x32xf32, #tpu.memory_space<vmem>>, vector<3x32xf32>
    %c3_1015 = arith.constant 3 : index
    %c704_1016 = arith.constant 704 : index
    %613 = vector.load %arg14[%c3_1015, %c704_1016] : memref<6x800xf32, #tpu.memory_space<vmem>>, vector<3x32xf32>
    tpu.vector_store %arg14[%c3_1015, %c704_1016], %612 {strides = array<i32>} : memref<6x800xf32, #tpu.memory_space<vmem>>, vector<3x32xf32>,
    %c84_1017 = arith.constant 84 : index
    %c0_1018 = arith.constant 0 : index
    %614 = tpu.strided_load %arg13[%c84_1017, %c0_1018] {strides = array<i32: 2, 1>} : memref<90x32xf32, #tpu.memory_space<vmem>>, vector<3x32xf32>
    %c3_1019 = arith.constant 3 : index
    %c736_1020 = arith.constant 736 : index
    %615 = vector.load %arg14[%c3_1019, %c736_1020] : memref<6x800xf32, #tpu.memory_space<vmem>>, vector<3x32xf32>
    tpu.vector_store %arg14[%c3_1019, %c736_1020], %614 {strides = array<i32>} : memref<6x800xf32, #tpu.memory_space<vmem>>, vector<3x32xf32>,
    %c85_1021 = arith.constant 85 : index
    %c0_1022 = arith.constant 0 : index
    %616 = tpu.strided_load %arg13[%c85_1021, %c0_1022] {strides = array<i32: 2, 1>} : memref<90x32xf32, #tpu.memory_space<vmem>>, vector<3x32xf32>
    %c3_1023 = arith.constant 3 : index
    %c768_1024 = arith.constant 768 : index
    %617 = vector.load %arg14[%c3_1023, %c768_1024] : memref<6x800xf32, #tpu.memory_space<vmem>>, vector<3x32xf32>
    tpu.vector_store %arg14[%c3_1023, %c768_1024], %616 {strides = array<i32>} : memref<6x800xf32, #tpu.memory_space<vmem>>, vector<3x32xf32>,
    %c0_1025 = arith.constant 0 : index
    %c0_1026 = arith.constant 0 : index
    %618 = vector.load %arg14[%c0_1025, %c0_1026] : memref<6x800xf32, #tpu.memory_space<vmem>>, vector<6x800xf32>
    %c0_1027 = arith.constant 0 : index
    %c0_1028 = arith.constant 0 : index
    %619 = vector.load %arg6[%c0_1027, %c0_1028] : memref<800x32xf32, #tpu.memory_space<vmem>>, vector<800x32xf32>
    %cst_1029 = arith.constant dense<0.000000e+00> : vector<6x32xf32>
    %620 = tpu.matmul %618, %619, %cst_1029 {dimension_numbers = #tpu.dot_dimension_numbers<[1], [0], [0], [1], [0, 0, 1, 1], [], []>} : vector<6x800xf32>, vector<800x32xf32>, vector<6x32xf32> -> vector<6x32xf32>
    %c0_1030 = arith.constant 0 : index
    %c0_1031 = arith.constant 0 : index
    %621 = vector.load %arg7[%c0_1030, %c0_1031] : memref<1x32xf32, #tpu.memory_space<vmem>>, vector<1x32xf32>
    %622 = vector.broadcast %621 : vector<1x32xf32> to vector<6x32xf32>
    %623 = arith.addf %620, %622 : vector<6x32xf32>
    %cst_1032 = arith.constant 0.000000e+00 : f32
    %624 = vector.broadcast %cst_1032 : f32 to vector<6x32xf32>
    %625 = arith.maximumf %623, %624 : vector<6x32xf32>
    %c0_1033 = arith.constant 0 : index
    %c0_1034 = arith.constant 0 : index
    %626 = vector.load %arg15[%c0_1033, %c0_1034] : memref<6x32xf32, #tpu.memory_space<vmem>>, vector<6x32xf32>
    tpu.vector_store %arg15[%c0_1033, %c0_1034], %625 {strides = array<i32>} : memref<6x32xf32, #tpu.memory_space<vmem>>, vector<6x32xf32>,
    %c0_1035 = arith.constant 0 : index
    %c0_1036 = arith.constant 0 : index
    %627 = vector.load %arg9[%c0_1035, %c0_1036] : memref<1x2xf32, #tpu.memory_space<vmem>>, vector<1x2xf32>
    %628 = vector.shape_cast %627 : vector<1x2xf32> to vector<1x2xf32>
    %629 = vector.broadcast %628 : vector<1x2xf32> to vector<2x2xf32>
    %c0_1037 = arith.constant 0 : index
    %c0_1038 = arith.constant 0 : index
    %630 = tpu.strided_load %arg15[%c0_1037, %c0_1038] {strides = array<i32: 3, 1>} : memref<6x32xf32, #tpu.memory_space<vmem>>, vector<2x32xf32>
    %c0_1039 = arith.constant 0 : index
    %c0_1040 = arith.constant 0 : index
    %631 = vector.load %arg8[%c0_1039, %c0_1040] : memref<96x2xf32, #tpu.memory_space<vmem>>, vector<32x2xf32>
    %cst_1041 = arith.constant dense<0.000000e+00> : vector<2x2xf32>
    %632 = tpu.matmul %630, %631, %cst_1041 {dimension_numbers = #tpu.dot_dimension_numbers<[1], [0], [0], [1], [0, 0, 1, 1], [], []>} : vector<2x32xf32>, vector<32x2xf32>, vector<2x2xf32> -> vector<2x2xf32>
    %633 = arith.addf %629, %632 : vector<2x2xf32>
    %c1_1042 = arith.constant 1 : index
    %c0_1043 = arith.constant 0 : index
    %634 = tpu.strided_load %arg15[%c1_1042, %c0_1043] {strides = array<i32: 3, 1>} : memref<6x32xf32, #tpu.memory_space<vmem>>, vector<2x32xf32>
    %c32_1044 = arith.constant 32 : index
    %c0_1045 = arith.constant 0 : index
    %635 = vector.load %arg8[%c32_1044, %c0_1045] : memref<96x2xf32, #tpu.memory_space<vmem>>, vector<32x2xf32>
    %cst_1046 = arith.constant dense<0.000000e+00> : vector<2x2xf32>
    %636 = tpu.matmul %634, %635, %cst_1046 {dimension_numbers = #tpu.dot_dimension_numbers<[1], [0], [0], [1], [0, 0, 1, 1], [], []>} : vector<2x32xf32>, vector<32x2xf32>, vector<2x2xf32> -> vector<2x2xf32>
    %637 = arith.addf %633, %636 : vector<2x2xf32>
    %c2_1047 = arith.constant 2 : index
    %c0_1048 = arith.constant 0 : index
    %638 = tpu.strided_load %arg15[%c2_1047, %c0_1048] {strides = array<i32: 3, 1>} : memref<6x32xf32, #tpu.memory_space<vmem>>, vector<2x32xf32>
    %c64_1049 = arith.constant 64 : index
    %c0_1050 = arith.constant 0 : index
    %639 = vector.load %arg8[%c64_1049, %c0_1050] : memref<96x2xf32, #tpu.memory_space<vmem>>, vector<32x2xf32>
    %cst_1051 = arith.constant dense<0.000000e+00> : vector<2x2xf32>
    %640 = tpu.matmul %638, %639, %cst_1051 {dimension_numbers = #tpu.dot_dimension_numbers<[1], [0], [0], [1], [0, 0, 1, 1], [], []>} : vector<2x32xf32>, vector<32x2xf32>, vector<2x2xf32> -> vector<2x2xf32>
    %641 = arith.addf %637, %640 : vector<2x2xf32>
    %c0_1052 = arith.constant 0 : index
    %c0_1053 = arith.constant 0 : index
    %642 = vector.load %arg10[%c0_1052, %c0_1053] : memref<2x2xf32, #tpu.memory_space<vmem>>, vector<2x2xf32>
    tpu.vector_store %arg10[%c0_1052, %c0_1053], %641 {strides = array<i32>} : memref<2x2xf32, #tpu.memory_space<vmem>>, vector<2x2xf32>,
    return
  }
  func.func @transform_0(%arg0: i32) -> (i32, i32) {
    %c0_i32 = arith.constant 0 : i32
    %c0_i32_0 = arith.constant 0 : i32
    %c0_i32_1 = arith.constant 0 : i32
    return %c0_i32, %c0_i32_0 : i32, i32
  }
  func.func @transform_1(%arg0: i32) -> (i32, i32) {
    %c0_i32 = arith.constant 0 : i32
    %c0_i32_0 = arith.constant 0 : i32
    %c0_i32_1 = arith.constant 0 : i32
    return %c0_i32, %c0_i32_0 : i32, i32
  }
  func.func @transform_2(%arg0: i32) -> (i32, i32) {
    %c0_i32 = arith.constant 0 : i32
    %c0_i32_0 = arith.constant 0 : i32
    %c0_i32_1 = arith.constant 0 : i32
    return %c0_i32, %c0_i32_0 : i32, i32
  }
  func.func @transform_3(%arg0: i32) -> (i32, i32) {
    %c0_i32 = arith.constant 0 : i32
    %c0_i32_0 = arith.constant 0 : i32
    %c0_i32_1 = arith.constant 0 : i32
    return %c0_i32, %c0_i32_0 : i32, i32
  }
  func.func @transform_4(%arg0: i32) -> (i32, i32) {
    %c0_i32 = arith.constant 0 : i32
    %c0_i32_0 = arith.constant 0 : i32
    %c0_i32_1 = arith.constant 0 : i32
    return %c0_i32, %c0_i32_0 : i32, i32
  }
  func.func @transform_5(%arg0: i32) -> (i32, i32) {
    %c0_i32 = arith.constant 0 : i32
    %c0_i32_0 = arith.constant 0 : i32
    %c0_i32_1 = arith.constant 0 : i32
    return %c0_i32, %c0_i32_0 : i32, i32
  }
  func.func @transform_6(%arg0: i32) -> (i32, i32) {
    %c0_i32 = arith.constant 0 : i32
    %c0_i32_0 = arith.constant 0 : i32
    %c0_i32_1 = arith.constant 0 : i32
    return %c0_i32, %c0_i32_0 : i32, i32
  }
  func.func @transform_7(%arg0: i32) -> (i32, i32) {
    %c0_i32 = arith.constant 0 : i32
    %c0_i32_0 = arith.constant 0 : i32
    %c0_i32_1 = arith.constant 0 : i32
    return %c0_i32, %c0_i32_0 : i32, i32
  }
  func.func @transform_8(%arg0: i32) -> (i32, i32) {
    %c0_i32 = arith.constant 0 : i32
    %c0_i32_0 = arith.constant 0 : i32
    %c0_i32_1 = arith.constant 0 : i32
    return %c0_i32, %c0_i32_0 : i32, i32
  }
  func.func @transform_9(%arg0: i32) -> (i32, i32) {
    %c0_i32 = arith.constant 0 : i32
    %c0_i32_0 = arith.constant 0 : i32
    %c0_i32_1 = arith.constant 0 : i32
    return %c0_i32, %c0_i32_0 : i32, i32
  }
}

</mosaic_0001>

<bundles_post_ra>
// kernel: dqn_forward.1
= control target key start
LH: loop header
LB: loop body
LE: loop exit
PB: predicated region body
PF: predicated region fallthrough
CT: control target
= control target key end

     0   :  { %vm8902_vm0 = vcmask 1042432   ;;  %s8891_s0 = inlined_call_operand.vmem [shape: f32[546,75], index: 0, kind: input, shape index: {}]   ;;  %s8892_s1 = inlined_call_operand.vmem [shape: f32[75,16], index: 1, kind: input, shape index: {}]   ;;  %s8893_s2 = inlined_call_operand.vmem [shape: f32[1,16], index: 2, kind: input, shape index: {}]   ;;  %s8894_s3 = inlined_call_operand.vmem [shape: f32[400,32], index: 3, kind: input, shape index: {}]   ;;  %s8895_s4 = inlined_call_operand.vmem [shape: f32[1,32], index: 4, kind: input, shape index: {}]   ;;  %s8896_s5 = inlined_call_operand.vmem [shape: f32[800,32], index: 5, kind: input, shape index: {}]   ;;  %s8897_s6 = inlined_call_operand.vmem [shape: f32[1,32], index: 6, kind: input, shape index: {}]   ;;  %s8898_s7 = inlined_call_operand.vmem [shape: f32[96,2], index: 7, kind: input, shape index: {}]   ;;  %s8899_s8 = inlined_call_operand.vmem [shape: f32[1,2], index: 8, kind: input, shape index: {}]   ;;  %s8900_s9 = inlined_call_operand.hbm [shape: f32[2,2], index: 9, kind: output, shape index: {}]  }
   0x1   :  { %v111_v0 = vld [vmem:[%s8892_s1 + $0x48] sm:$0x7]  ;;  %v110_v1 = vld [vmem:[%s8892_s1 + $0x40] sm:$0xff]  ;;  %v109_v2 = vld [vmem:[%s8892_s1 + $0x38] sm:$0xff] }
   0x2   :  { %5567 = vmatpush.msk.msra.mxu0 %vm8902_vm0, %v111_v0  ;;  %5654 = vmatpush.msk.msra.mxu2 %vm8902_vm0, %v111_v0  ;;  %v108_v3 = vld [vmem:[%s8892_s1 + $0x30] sm:$0xff]  ;;  %v107_v4 = vld [vmem:[%s8892_s1 + $0x28] sm:$0xff] }
   0x3   :  { %5653 = vmatpush.msk.msra.mxu1 %vm8902_vm0, %v111_v0  ;;  %5655 = vmatpush.msk.msra.mxu3 %vm8902_vm0, %v111_v0 }
   0x4   :  { %335 = vmatpush.msra.mxu0 %v110_v1  ;;  %5657 = vmatpush.msra.mxu2 %v110_v1 }
   0x5   :  { %5656 = vmatpush.msra.mxu1 %v110_v1  ;;  %5658 = vmatpush.msra.mxu3 %v110_v1 }
   0x6   :  { %336 = vmatpush.msra.mxu0 %v109_v2  ;;  %5660 = vmatpush.msra.mxu2 %v109_v2 }
   0x7   :  { %5659 = vmatpush.msra.mxu1 %v109_v2  ;;  %5661 = vmatpush.msra.mxu3 %v109_v2 }
   0x8   :  { %14 = vsyncpa [#allocation8], 0  ;;  %337 = vmatpush.msra.mxu0 %v108_v3  ;;  %5663 = vmatpush.msra.mxu2 %v108_v3  ;;  %v106_v5 = vld [vmem:[%s8892_s1 + $0x20] sm:$0xff]  ;;  %v105_v6 = vld [vmem:[%s8892_s1 + $0x18] sm:$0xff]  ;;  %vm116_vm1 = vcmask 613376   ;;  %vm8952_vm2 = vcmask 130048  }
   0x9   :  { %5662 = vmatpush.msra.mxu1 %v108_v3  ;;  %5664 = vmatpush.msra.mxu3 %v108_v3  ;;  %v104_v7 = vld [vmem:[%s8892_s1 + $0x10] sm:$0xff]  ;;  %v103_v8 = vld [vmem:[%s8892_s1 + $0x8] sm:$0xff]  ;;  %v102_v9 = vld [vmem:[%s8892_s1] sm:$0xff]  ;;  %s5725_s17 = smov 16   ;;  %s5726_s20 = smov 48   ;;  %vm8901_vm3 = vcmask 122880  }
   0xa   :  { %338 = vmatpush.msra.mxu0 %v107_v4  ;;  %5666 = vmatpush.msra.mxu2 %v107_v4  ;;  %v33_v10 = vld [vmem:[%s8891_s0] sm:$0xff]  ;;  %v34_v11 = vld [vmem:[%s8891_s0 + $0x8] sm:$0xff]  ;;  %v35_v12 = vld [vmem:[%s8891_s0 + $0x10] sm:$0xff]  ;;  %s5727_s21 = smov 32   ;;  %s5728_s24 = smov 64   ;;  %vm8920_vm4 = vcmask 130049  }
   0xb   :  { %5665 = vmatpush.msra.mxu1 %v107_v4  ;;  %5667 = vmatpush.msra.mxu3 %v107_v4  ;;  %v36_v13 = vld [vmem:[%s8891_s0 + $0x18] sm:$0xff]  ;;  %v37_v14 = vld [vmem:[%s8891_s0 + $0x20] sm:$0xff]  ;;  %v38_v15 = vld [vmem:[%s8891_s0 + $0x28] sm:$0xff]  ;;  %s5729_s27 = smov 80   ;;  %s5730_s30 = smov 96   ;;  %vm8931_vm5 = vcmask 1040384  }
   0xc   :  { %339 = vmatpush.msra.mxu0 %v106_v5  ;;  %5669 = vmatpush.msra.mxu2 %v106_v5  ;;  %v39_v16 = vld [vmem:[%s8891_s0 + $0x30] sm:$0xff]  ;;  %v40_v17 = vld [vmem:[%s8891_s0 + $0x38] sm:$0xff]  ;;  %v41_v18 = vld [vmem:[%s8891_s0 + $0x40] sm:$0xff]  ;;  %s5731_s10 = smov 112   ;;  %vm8905_vm6 = vcmask 123904   ;;  %vm8908_vm7 = vcmask 130050  }
   0xd   :  { %5668 = vmatpush.msra.mxu1 %v106_v5  ;;  %5670 = vmatpush.msra.mxu3 %v106_v5  ;;  %v42_v19 = vld [vmem:[%s8891_s0 + $0x48] sm:$0xff]  ;;  %v43_v20 = vld [vmem:[%s8891_s0 + $0x50] sm:$0xff]  ;;  %v44_v21 = vld [vmem:[%s8891_s0 + $0x58] sm:$0xff]  ;;  %vm8903_vm8 = vcmask 261248   ;;  %vm8930_vm9 = vcmask 392448   ;;  %vm8913_vm10 = vcmask 254080  }
   0xe   :  { %340 = vmatpush.msra.mxu0 %v105_v6  ;;  %5672 = vmatpush.msra.mxu2 %v105_v6  ;;  %v45_v22 = vld [vmem:[%s8891_s0 + $0x60] sm:$0xff]  ;;  %v46_v23 = vld [vmem:[%s8891_s0 + $0x68] sm:$0xff]  ;;  %v47_v31 = vld [vmem:[%s8891_s0 + $0x70] sm:$0xff]  ;;  %vm8926_vm11 = vcmask 523648   ;;  %vm8906_vm12 = vcmask 1041408   ;;  %vm8904_vm13 = vcmask 124928  }
   0xf   :  { %5671 = vmatpush.msra.mxu1 %v105_v6  ;;  %5673 = vmatpush.msra.mxu3 %v105_v6  ;;  %v5876_v24 = vld [vmem:[%s8893_s2] ss:$0 sm:$0xff]  ;;  %v48_v37 = vld [vmem:[%s8891_s0 + $0x78] sm:$0xff]  ;;  %v50_v52 = vld [vmem:[%s8891_s0 + $0x88] sm:$0xff]  ;;  %vm8925_vm14 = vcmask 385280   ;;  %vm8917_vm15 = vcmask 654848  }
  0x10   :  { %341 = vmatpush.msra.mxu0 %v104_v7  ;;  %5675 = vmatpush.msra.mxu2 %v104_v7  ;;  %v49_v44 = vld [vmem:[%s8891_s0 + $0x80] sm:$0xff]  ;;  %v51_v59 = vld [vmem:[%s8891_s0 + $0x90] sm:$0xff]  ;;  %v52_v4 = vld [vmem:[%s8891_s0 + $0x98] sm:$0xff]  ;;  %vm8911_vm0 = vcmask 786048   ;;  %s5732_s29 = smov [#allocation7]   ;;  %s5558_s1 = sshll.u32 %s8900_s9, 4  ;;  %s5559_s1 = int_to_ptr.hbm [resolvable:$true] %s5558_s1 }
  0x11   :  { %5674 = vmatpush.msra.mxu1 %v104_v7  ;;  %5676 = vmatpush.msra.mxu3 %v104_v7 }
  0x12   :  { %342 = vmatpush.msra.mxu0 %v103_v8  ;;  %5678 = vmatpush.msra.mxu2 %v103_v8 }
  0x13   :  { %5677 = vmatpush.msra.mxu1 %v103_v8  ;;  %5679 = vmatpush.msra.mxu3 %v103_v8 }
  0x14   :  { %343 = vmatpush.msra.mxu0 %v102_v9  ;;  %5681 = vmatpush.msra.mxu2 %v102_v9 }
  0x15   :  { %5568 = vmatmul.msk.f32.vlgmr.msra.gmra.mxu0 %vm116_vm1, %v33_v10  ;;  %5680 = vmatpush.msra.mxu1 %v102_v9 }
  0x16   :  { %5682 = vmatpush.msra.mxu3 %v102_v9 }
  0x1d   :  { %5569 = vmatmul.msk.f32.gmra.mxu0 %vm116_vm1, %v34_v11  ;;  %v53_v11 = vld [vmem:[%s8891_s0 + $0xa0] sm:$0xff] }
  0x25   :  { %5570 = vmatmul.msk.f32.gmra.mxu0 %vm116_vm1, %v35_v12 }
  0x2d   :  { %5571 = vmatmul.msk.f32.gmra.mxu0 %vm116_vm1, %v36_v13 }
  0x35   :  { %5572 = vmatmul.msk.f32.gmra.mxu0 %vm116_vm1, %v37_v14 }
  0x3d   :  { %5573 = vmatmul.msk.f32.gmra.mxu0 %vm116_vm1, %v38_v15 }
  0x45   :  { %5574 = vmatmul.msk.f32.gmra.mxu0 %vm116_vm1, %v39_v16 }
  0x4d   :  { %5575 = vmatmul.msk.f32.gmra.mxu0 %vm116_vm1, %v40_v17 }
  0x55   :  { %5576 = vmatmul.msk.f32.gmra.mxu0 %vm116_vm1, %v41_v18  ;;  %v54_v18 = vld [vmem:[%s8891_s0 + $0xa8] sm:$0xff] }
  0x5d   :  { %5577 = vmatmul.msk.f32.gmra.mxu0 %vm116_vm1, %v42_v19 }
  0x65   :  { %5578 = vmatmul.msk.f32.gmra.mxu0 %vm116_vm1, %v43_v20 }
  0x6d   :  { %5579 = vmatmul.msk.f32.gmra.mxu0 %vm116_vm1, %v44_v21  ;;  %v77_v21 = vld [vmem:[%s8891_s0 + $0x160] sm:$0xff] }
  0x6e   :  { %5612 = vmatmul.msk.f32.vlgmr.msra.gmra.mxu2 %vm116_vm1, %v77_v21 }
  0x75   :  { %5580 = vmatmul.msk.f32.gmra.mxu0 %vm116_vm1, %v45_v22 }
  0x7d   :  { %5581 = vmatmul.msk.f32.gmra.mxu0 %vm116_vm1, %v46_v23 }
  0x85   :  { %5582 = vmatmul.msk.f32.gmra.mxu0 %vm116_vm1, %v47_v31  ;;  %v78_v31 = vld [vmem:[%s8891_s0 + $0x168] sm:$0xff] }
  0x86   :  { %5613 = vmatmul.msk.f32.gmra.mxu2 %vm116_vm1, %v78_v31 }
  0x8d   :  { %5583 = vmatmul.msk.f32.gmra.mxu0 %vm116_vm1, %v48_v37 }
  0x92   :  { %v345_v25 = vpop.f32.mrf.mxu0 }
  0x93   :  { %v346_v26 = vadd.f32 %v5876_v24, %v345_v25 }
  0x95   :  { %v552_v27 = vmax.f32 %v346_v26, 0.0  ;;  %5584 = vmatmul.msk.f32.gmra.mxu0 %vm116_vm1, %v49_v44 }
  0x97   :  { %622 = vst.msk [vmem:[#allocation2] sm:$0xff] %vm8952_vm2, %v552_v27 }
  0x9a   :  { %v348_v28 = vpop.f32.mrf.mxu0 }
  0x9b   :  { %v349_v29 = vadd.f32 %v5876_v24, %v348_v28 }
  0x9d   :  { %v553_v30 = vmax.f32 %v349_v29, 0.0  ;;  %5585 = vmatmul.msk.f32.gmra.mxu0 %vm116_vm1, %v50_v52  ;;  %v69_v29 = vld [vmem:[%s8891_s0 + $0x120] sm:$0xff] }
  0x9e   :  { %5604 = vmatmul.msk.f32.vlgmr.msra.gmra.mxu1 %vm116_vm1, %v69_v29 }
  0x9f   :  { %623 = vst.msk [vmem:[#allocation2 + $0x8] sm:$0xff] %vm8952_vm2, %v553_v30  ;;  %v55_v30 = vld [vmem:[%s8891_s0 + $0xb0] sm:$0xff] }
  0xa2   :  { %v351_v32 = vpop.f32.mrf.mxu0 }
  0xa3   :  { %v352_v33 = vadd.f32 %v5876_v24, %v351_v32 }
  0xa5   :  { %v554_v34 = vmax.f32 %v352_v33, 0.0  ;;  %5586 = vmatmul.msk.f32.gmra.mxu0 %vm116_vm1, %v51_v59 }
  0xa6   :  { %v699_v35 = vld [vmem:[#allocation2 + $0x1] ss:$2 sm:$0xff]  ;;  %v692_v36 = vld [vmem:[#allocation2] ss:$2 sm:$0xff] }
  0xa7   :  { %624 = vst.msk [vmem:[#allocation2 + $0x10] sm:$0xff] %vm8952_vm2, %v554_v34  ;;  %704 = vrot.lane.b32.xlu0 %v699_v35, %s5725_s17 }
  0xa8   :  { %695 = vst.msk [vmem:[#allocation3] sm:$0xff] %vm8952_vm2, %v692_v36 }
  0xaa   :  { %v354_v38 = vpop.f32.mrf.mxu0 }
  0xab   :  { %v355_v39 = vadd.f32 %v5876_v24, %v354_v38 }
  0xad   :  { %v555_v40 = vmax.f32 %v355_v39, 0.0  ;;  %5587 = vmatmul.msk.f32.gmra.mxu0 %vm116_vm1, %v52_v4 }
  0xae   :  { %v731_v41 = vld [vmem:[#allocation2 + $0x3] ss:$2 sm:$0xff]  ;;  %v715_v42 = vld [vmem:[#allocation2 + $0x2] ss:$2 sm:$0xff] }
  0xaf   :  { %625 = vst.msk [vmem:[#allocation2 + $0x18] sm:$0xff] %vm8952_vm2, %v555_v40  ;;  %736 = vrot.lane.b32.xlu2 %v731_v41, %s5726_s20  ;;  %720 = vrot.lane.b32.xlu1 %v715_v42, %s5727_s21  ;;  %v701_v43 = vld [vmem:[#allocation2 + $0x11] ss:$2 sm:$0x1]  ;;  %v747_v51 = vld [vmem:[#allocation2 + $0x4] ss:$2 sm:$0xff] }
  0xb0   :  { %706 = vrot.lane.b32.xlu0 %v701_v43, %s5725_s17  ;;  %v694_v46 = vld [vmem:[#allocation2 + $0x10] ss:$2 sm:$0x1]  ;;  %v733_v49 = vld [vmem:[#allocation2 + $0x13] ss:$2 sm:$0x1] }
  0xb1   :  { %697 = vst.msk [vmem:[#allocation3 + $0x20] sm:$0x1] %vm8901_vm3, %v694_v46  ;;  %v717_v50 = vld [vmem:[#allocation2 + $0x12] ss:$2 sm:$0x1]  ;;  %v70_v41 = vld [vmem:[%s8891_s0 + $0x128] sm:$0xff] }
  0xb2   :  { %v357_v45 = vpop.f32.mrf.mxu0  ;;  %v749_v56 = vld [vmem:[#allocation2 + $0x14] ss:$2 sm:$0x1]  ;;  %v56_v42 = vld [vmem:[%s8891_s0 + $0xb8] sm:$0xff]  ;;  %5605 = vmatmul.msk.f32.gmra.mxu1 %vm116_vm1, %v70_v41 }
  0xb3   :  { %v358_v47 = vadd.f32 %v5876_v24, %v357_v45  ;;  %v79_v43 = vld [vmem:[%s8891_s0 + $0x170] sm:$0xff] }
  0xb4   :  { %5614 = vmatmul.msk.f32.gmra.mxu2 %vm116_vm1, %v79_v43  ;;  %v4540_v43 = vld [vmem:[%s8894_s3 + $0x48] sm:$0xff] }
  0xb5   :  { %v556_v48 = vmax.f32 %v358_v47, 0.0  ;;  %5588 = vmatmul.msk.f32.gmra.mxu0 %vm116_vm1, %v53_v11  ;;  %v81_v11 = vld [vmem:[%s8891_s0 + $0x180] sm:$0xff] }
  0xb7   :  { %626 = vst.msk [vmem:[#allocation2 + $0x20] sm:$0xff] %vm8952_vm2, %v556_v48  ;;  %738 = vrot.lane.b32.xlu2 %v733_v49, %s5726_s20  ;;  %722 = vrot.lane.b32.xlu1 %v717_v50, %s5727_s21 }
  0xb8   :  { %752 = vrot.lane.b32.xlu0 %v747_v51, %s5728_s24 }
  0xba   :  { %v360_v53 = vpop.f32.mrf.mxu0 }
  0xbb   :  { %v361_v54 = vadd.f32 %v5876_v24, %v360_v53 }
  0xbd   :  { %v557_v55 = vmax.f32 %v361_v54, 0.0  ;;  %5589 = vmatmul.msk.f32.gmra.mxu0 %vm116_vm1, %v54_v18  ;;  %v71_v54 = vld [vmem:[%s8891_s0 + $0x130] sm:$0xff] }
  0xbe   :  { %v763_v57 = vld [vmem:[#allocation2 + $0x15] ss:$2 sm:$0xff]  ;;  %v765_v58 = vld [vmem:[#allocation2 + $0x25] ss:$2 sm:$0x1]  ;;  %5606 = vmatmul.msk.f32.gmra.mxu1 %vm116_vm1, %v71_v54 }
  0xbf   :  { %627 = vst.msk [vmem:[#allocation2 + $0x28] sm:$0xff] %vm8952_vm2, %v557_v55  ;;  %768 = vrot.lane.b32.xlu2 %v763_v57, %s5729_s27  ;;  %754 = vrot.lane.b32.xlu1 %v749_v56, %s5728_s24  ;;  %v811_v60 = vld [vmem:[#allocation2 + $0x18] ss:$2 sm:$0xff]  ;;  %v795_v3 = vld [vmem:[#allocation2 + $0x17] ss:$2 sm:$0xff] }
  0xc0   :  { %770 = vrot.lane.b32.xlu0 %v765_v58, %s5729_s27  ;;  %814 = vst.msk [vmem:[#allocation3 + $0x8] sm:$0xff] %vm8952_vm2, %v811_v60  ;;  %v781_v0 = vld [vmem:[#allocation2 + $0x26] ss:$2 sm:$0x1]  ;;  %v779_v1 = vld [vmem:[#allocation2 + $0x16] ss:$2 sm:$0xff] }
  0xc1   :  { %v817_v8 = vld [vmem:[#allocation2 + $0x19] ss:$2 sm:$0xff] }
  0xc2   :  { %v363_v61 = vpop.f32.mrf.mxu0  ;;  %v797_v9 = vld [vmem:[#allocation2 + $0x27] ss:$2 sm:$0x1]  ;;  %v80_v55 = vld [vmem:[%s8891_s0 + $0x178] sm:$0xff] }
  0xc3   :  { %v364_v62 = vadd.f32 %v5876_v24, %v363_v61  ;;  %5615 = vmatmul.msk.f32.gmra.mxu2 %vm116_vm1, %v80_v55  ;;  %v4537_v55 = vld [vmem:[%s8894_s3 + $0x30] sm:$0xff] }
  0xc5   :  { %v558_v63 = vmax.f32 %v364_v62, 0.0  ;;  %5590 = vmatmul.msk.f32.gmra.mxu0 %vm116_vm1, %v55_v30  ;;  %v4544_v30 = vld [vmem:[%s8894_s3 + $0x68] sm:$0xff] }
  0xc6   :  { %v813_v2 = vld [vmem:[#allocation2 + $0x28] ss:$2 sm:$0x1]  ;;  %v819_v10 = vld [vmem:[#allocation2 + $0x29] ss:$2 sm:$0x1] }
  0xc7   :  { %628 = vst.msk [vmem:[#allocation2 + $0x30] sm:$0xff] %vm8952_vm2, %v558_v63  ;;  %786 = vrot.lane.b32.xlu2 %v781_v0, %s5730_s30  ;;  %784 = vrot.lane.b32.xlu1 %v779_v1, %s5730_s30 }
  0xc8   :  { %800 = vrot.lane.b32.xlu0 %v795_v3, %s5731_s10  ;;  %815 = vst.msk [vmem:[#allocation3 + $0x28] sm:$0x1] %vm8901_vm3, %v813_v2 }
  0xca   :  { %v366_v5 = vpop.f32.mrf.mxu0 }
  0xcb   :  { %v367_v6 = vadd.f32 %v5876_v24, %v366_v5  ;;  %5616 = vmatmul.msk.f32.gmra.mxu2 %vm116_vm1, %v81_v11  ;;  %v4533_v11 = vld [vmem:[%s8894_s3 + $0x10] sm:$0xff] }
  0xcd   :  { %v559_v7 = vmax.f32 %v367_v6, 0.0  ;;  %5591 = vmatmul.msk.f32.gmra.mxu0 %vm116_vm1, %v56_v42 }
  0xcf   :  { %629 = vst.msk [vmem:[#allocation2 + $0x38] sm:$0xff] %vm8952_vm2, %v559_v7  ;;  %822 = vrot.lane.b32.xlu2 %v817_v8, %s5725_s17  ;;  %802 = vrot.lane.b32.xlu1 %v797_v9, %s5731_s10 }
  0xd0   :  { %824 = vrot.lane.b32.xlu0 %v819_v10, %s5725_s17  ;;  %v72_v10 = vld [vmem:[%s8891_s0 + $0x138] sm:$0xff] }
  0xd1   :  { %5607 = vmatmul.msk.f32.gmra.mxu1 %vm116_vm1, %v72_v10 }
  0xd2   :  { %v369_v12 = vpop.f32.mrf.mxu0 }
  0xd3   :  { %v370_v13 = vadd.f32 %v5876_v24, %v369_v12 }
  0xd5   :  { %v560_v14 = vmax.f32 %v370_v13, 0.0 }
  0xd6   :  { %v833_v15 = vld [vmem:[#allocation2 + $0x3a] ss:$2 sm:$0x1]  ;;  %v831_v16 = vld [vmem:[#allocation2 + $0x2a] ss:$2 sm:$0xff] }
  0xd7   :  { %630 = vst.msk [vmem:[#allocation2 + $0x40] sm:$0xff] %vm8952_vm2, %v560_v14  ;;  %838 = vrot.lane.b32.xlu2 %v833_v15, %s5727_s21  ;;  %836 = vrot.lane.b32.xlu1 %v831_v16, %s5727_s21  ;;  %v845_v17 = vld [vmem:[#allocation2 + $0x2b] ss:$2 sm:$0xff]  ;;  %v859_v23 = vld [vmem:[#allocation2 + $0x2c] ss:$2 sm:$0xff] }
  0xd8   :  { %850 = vrot.lane.b32.xlu0 %v845_v17, %s5726_s20  ;;  %v847_v25 = vld [vmem:[#allocation2 + $0x3b] ss:$2 sm:$0x1]  ;;  %v1024_v26 = vld [vmem:[#allocation2 + $0x2a] ss:$2 sm:$0xff] }
  0xd9   :  { %v861_v27 = vld [vmem:[#allocation2 + $0x3c] ss:$2 sm:$0x1]  ;;  %v1029_v28 = vrot.slane %v1024_v26, 7  ;;  %v873_v39 = vld [vmem:[#allocation2 + $0x2d] ss:$2 sm:$0xff] }
  0xda   :  { %v372_v19 = vpop.f32.mrf.mxu0  ;;  %v1025_v33 = vld [vmem:[#allocation2 + $0x3a] ss:$2 sm:$0x1]  ;;  %v875_v36 = vld [vmem:[#allocation2 + $0x3d] ss:$2 sm:$0x1] }
  0xdb   :  { %v373_v20 = vadd.f32 %v5876_v24, %v372_v19  ;;  %1035 = vst.msk [vmem:[#allocation3 + $0x20] sm:$0xfe] %vm8920_vm4, %v1029_v28  ;;  %v1030_v35 = vrot.slane %v1025_v33, 7  ;;  %v887_v40 = vld [vmem:[#allocation2 + $0x2e] ss:$2 sm:$0xff] }
  0xdc   :  { %v1054_v44 = vld [vmem:[#allocation2 + $0x2c] ss:$2 sm:$0xff]  ;;  %v1037_v46 = vld [vmem:[#allocation2 + $0x2b] ss:$2 sm:$0xff] }
  0xdd   :  { %v561_v22 = vmax.f32 %v373_v20, 0.0  ;;  %v1031_v38 = vsel %vm8931_vm5, %v1029_v28, %v1030_v35  ;;  %v1058_v48 = vrot.slane %v1054_v44, 7  ;;  %v889_v50 = vld [vmem:[#allocation2 + $0x3e] ss:$2 sm:$0x1]  ;;  %v1041_v51 = vrot.slane %v1037_v46, 7 }
  0xde   :  { %1036 = vst.msk [vmem:[#allocation3 + $0x40] sm:$0x3] %vm8905_vm6, %v1031_v38  ;;  %v1071_v52 = vld [vmem:[#allocation2 + $0x2d] ss:$2 sm:$0xff]  ;;  %v1088_v59 = vld [vmem:[#allocation2 + $0x2e] ss:$2 sm:$0xff] }
  0xdf   :  { %631 = vst.msk [vmem:[#allocation2 + $0x48] sm:$0xff] %vm8952_vm2, %v561_v22  ;;  %864 = vrot.lane.b32.xlu2 %v859_v23, %s5728_s24  ;;  %852 = vrot.lane.b32.xlu1 %v847_v25, %s5726_s20  ;;  %v1072_v53 = vld [vmem:[#allocation2 + $0x3d] ss:$2 sm:$0x1]  ;;  %v1075_v56 = vrot.slane %v1071_v52, 7  ;;  %v1092_v2 = vrot.slane %v1088_v59, 7 }
  0xe0   :  { %866 = vrot.lane.b32.xlu0 %v861_v27, %s5728_s24  ;;  %v1076_v57 = vrot.slane %v1072_v53, 7  ;;  %v1038_v4 = vld [vmem:[#allocation2 + $0x3b] ss:$2 sm:$0x1]  ;;  %v73_v22 = vld [vmem:[%s8891_s0 + $0x140] sm:$0xff]  ;;  %v82_v23 = vld [vmem:[%s8891_s0 + $0x188] sm:$0xff] }
  0xe1   :  { %v1055_v6 = vld [vmem:[#allocation2 + $0x3c] ss:$2 sm:$0x1]  ;;  %v1042_v8 = vrot.slane %v1038_v4, 7  ;;  %5608 = vmatmul.msk.f32.gmra.mxu1 %vm116_vm1, %v73_v22  ;;  %5617 = vmatmul.msk.f32.gmra.mxu2 %vm116_vm1, %v82_v23  ;;  %v4545_v28 = vld [vmem:[%s8894_s3 + $0x70] sm:$0xff]  ;;  %v74_v35 = vld [vmem:[%s8891_s0 + $0x148] sm:$0xff] }
  0xe2   :  { %v375_v32 = vpop.f32.mrf.mxu0  ;;  %v1077_v1 = vsel %vm8931_vm5, %v1075_v56, %v1076_v57  ;;  %v1059_v12 = vrot.slane %v1055_v6, 7  ;;  %v1089_v19 = vld [vmem:[#allocation2 + $0x3e] ss:$2 sm:$0x1]  ;;  %v4539_v46 = vld [vmem:[%s8894_s3 + $0x40] sm:$0xff]  ;;  %v4536_v59 = vld [vmem:[%s8894_s3 + $0x28] sm:$0xff] }
  0xe3   :  { %v376_v34 = vadd.f32 %v5876_v24, %v375_v32  ;;  %v1043_v16 = vsel %vm8931_vm5, %v1041_v51, %v1042_v8  ;;  %v1093_v21 = vrot.slane %v1089_v19, 7  ;;  %v4546_v25 = vld [vmem:[%s8894_s3 + $0x78] sm:$0xff]  ;;  %v86_v19 = vld [vmem:[%s8891_s0 + $0x1a8] sm:$0xff] }
  0xe4   :  { %v1060_v18 = vsel %vm8931_vm5, %v1058_v48, %v1059_v12  ;;  %4621 = vmatpush.msrb.mxu1 %v4546_v25  ;;  %v4538_v52 = vld [vmem:[%s8894_s3 + $0x38] sm:$0xff] }
  0xe5   :  { %v562_v37 = vmax.f32 %v376_v34, 0.0  ;;  %v1094_v29 = vsel %vm8931_vm5, %v1092_v2, %v1093_v21  ;;  %v4543_v34 = vld [vmem:[%s8894_s3 + $0x60] sm:$0xff]  ;;  %v4534_v6 = vld [vmem:[%s8894_s3 + $0x18] sm:$0xff] }
  0xe6   :  { %v915_v0 = vld [vmem:[#allocation2 + $0x40] ss:$2 sm:$0xff]  ;;  %v901_v15 = vld [vmem:[#allocation2 + $0x3f] ss:$2 sm:$0xff]  ;;  %4622 = vmatpush.msrb.mxu1 %v4545_v28 }
  0xe7   :  { %880 = vrot.lane.b32.xlu2 %v875_v36, %s5729_s27  ;;  %878 = vrot.lane.b32.xlu1 %v873_v39, %s5729_s27  ;;  %632 = vst.msk [vmem:[#allocation2 + $0x50] sm:$0xff] %vm8952_vm2, %v562_v37  ;;  %v1105_v20 = vld [vmem:[#allocation2 + $0x3f] ss:$2 sm:$0xff]  ;;  %v903_v27 = vld [vmem:[#allocation2 + $0x4f] ss:$2 sm:$0x1] }
  0xe8   :  { %892 = vrot.lane.b32.xlu0 %v887_v40, %s5730_s30  ;;  %918 = vst.msk [vmem:[#allocation3 + $0x10] sm:$0xff] %vm8952_vm2, %v915_v0  ;;  %v1109_v26 = vrot.slane %v1105_v20, 7  ;;  %4623 = vmatpush.msrb.mxu1 %v4544_v30  ;;  %v6054_v33 = vld [vmem:[#allocation2 + $0x41] ss:$2 sm:$0xff]  ;;  %v83_v36 = vld [vmem:[%s8891_s0 + $0x190] sm:$0xff]  ;;  %v4542_v37 = vld [vmem:[%s8894_s3 + $0x58] sm:$0xff] }
  0xe9   :  { %5618 = vmatmul.msk.f32.gmra.mxu2 %vm116_vm1, %v83_v36  ;;  %v921_v38 = vld [vmem:[#allocation2 + $0x41] ss:$2 sm:$0xff]  ;;  %v1143_v39 = vrot.slane %v6054_v33, 7  ;;  %5609 = vmatmul.msk.f32.gmra.mxu1 %vm116_vm1, %v74_v35  ;;  %v4541_v40 = vld [vmem:[%s8894_s3 + $0x50] sm:$0xff]  ;;  %v6084_v44 = vld [vmem:[#allocation2 + $0x40] ss:$2 sm:$0xff] }
  0xea   :  { %v378_v45 = vpop.f32.mrf.mxu0  ;;  %4624 = vmatpush.msrb.mxu1 %v4543_v34  ;;  %v1106_v41 = vld [vmem:[#allocation2 + $0x4f] ss:$2 sm:$0x1]  ;;  %v4535_v0 = vld [vmem:[%s8894_s3 + $0x20] sm:$0xff]  ;;  %v4562_v22 = vld [vmem:[%s8894_s3 + $0xf8] sm:$0xff] }
  0xeb   :  { %v379_v47 = vadd.f32 %v5876_v24, %v378_v45  ;;  %v1110_v45 = vrot.slane %v1106_v41, 7  ;;  %v4531_v21 = vld [vmem:[%s8894_s3] sm:$0xff]  ;;  %4674 = vmatpush.msrb.mxu2 %v4562_v22  ;;  %v4558_v41 = vld [vmem:[%s8894_s3 + $0xd8] sm:$0xff]  ;;  %v4548_v22 = vld [vmem:[%s8894_s3 + $0x88] sm:$0xff] }
  0xec   :  { %4625 = vmatpush.msrb.mxu1 %v4542_v37 }
  0xed   :  { %v563_v49 = vmax.f32 %v379_v47, 0.0  ;;  %v84_v47 = vld [vmem:[%s8891_s0 + $0x198] sm:$0xff]  ;;  %v1111_v54 = vsel %vm8931_vm5, %v1109_v26, %v1110_v45  ;;  %v4557_v45 = vld [vmem:[%s8894_s3 + $0xd0] sm:$0xff] }
  0xee   :  { %v1156_v61 = vld [vmem:[#allocation2 + $0x42] ss:$2 sm:$0xff]  ;;  %v1157_v3 = vld [vmem:[#allocation2 + $0x52] ss:$2 sm:$0x1]  ;;  %4626 = vmatpush.msrb.mxu1 %v4541_v40 }
  0xef   :  { %1061 = vrot.lane.b32.xlu2 %v1058_v48, %s5727_s21  ;;  %894 = vrot.lane.b32.xlu1 %v889_v50, %s5730_s30  ;;  %633 = vst.msk [vmem:[#allocation2 + $0x58] sm:$0xff] %vm8952_vm2, %v563_v49  ;;  %v1160_v62 = vrot.slane %v1156_v61, 7  ;;  %v1161_v5 = vrot.slane %v1157_v3, 7  ;;  %v923_v32 = vld [vmem:[#allocation2 + $0x51] ss:$2 sm:$0x1] }
  0xf0   :  { %1044 = vrot.lane.b32.xlu0 %v1041_v51, %s5725_s17  ;;  %4627 = vmatpush.msrb.mxu1 %v4540_v43  ;;  %v1126_v48 = vrot.slane %v6084_v44, 7  ;;  %v75_v49 = vld [vmem:[%s8891_s0 + $0x150] sm:$0xff]  ;;  %v76_v3 = vld [vmem:[%s8891_s0 + $0x158] sm:$0xff] }
  0xf1   :  { %1165 = vst.msk [vmem:[#allocation3 + $0x28] sm:$0xfe] %vm8920_vm4, %v1160_v62  ;;  %v1162_v7 = vsel %vm8931_vm5, %v1160_v62, %v1161_v5  ;;  %5619 = vmatmul.msk.f32.gmra.mxu2 %vm116_vm1, %v84_v47  ;;  %v949_v51 = vld [vmem:[#allocation2 + $0x43] ss:$2 sm:$0xff]  ;;  %5610 = vmatmul.msk.f32.gmra.mxu1 %vm116_vm1, %v75_v49 }
  0xf2   :  { %v381_v58 = vpop.f32.mrf.mxu0  ;;  %1166 = vst.msk [vmem:[#allocation3 + $0x48] sm:$0x3] %vm8905_vm6, %v1162_v7  ;;  %4628 = vmatpush.msrb.mxu1 %v4539_v46  ;;  %v937_v62 = vld [vmem:[#allocation2 + $0x52] ss:$2 sm:$0x1]  ;;  %vm8907_vm6 = vcmask 910080  }
  0xf3   :  { %v382_v60 = vadd.f32 %v5876_v24, %v381_v58  ;;  %v6116_v58 = vld [vmem:[#allocation2 + $0x43] ss:$2 sm:$0xff]  ;;  %v951_v28 = vld [vmem:[#allocation2 + $0x53] ss:$2 sm:$0x1] }
  0xf4   :  { %4629 = vmatpush.msrb.mxu1 %v4538_v52  ;;  %v1171_v61 = vrot.slane %v6116_v58, 7  ;;  %v1140_v5 = vld [vmem:[#allocation2 + $0x51] ss:$2 sm:$0x1]  ;;  %v4556_v49 = vld [vmem:[%s8894_s3 + $0xc8] sm:$0xff]  ;;  %v4555_v52 = vld [vmem:[%s8894_s3 + $0xc0] sm:$0xff] }
  0xf5   :  { %v564_v63 = vmax.f32 %v382_v60, 0.0  ;;  %v85_v60 = vld [vmem:[%s8891_s0 + $0x1a0] sm:$0xff]  ;;  %v1168_v30 = vld [vmem:[#allocation2 + $0x53] ss:$2 sm:$0x1] }
  0xf6   :  { %4630 = vmatpush.msrb.mxu1 %v4537_v55  ;;  %v1172_v36 = vrot.slane %v1168_v30, 7  ;;  %v87_v40 = vld [vmem:[%s8891_s0 + $0x1b0] sm:$0xff] }
  0xf7   :  { %1080 = vrot.lane.b32.xlu2 %v1077_v1, %s5726_s20  ;;  %1078 = vrot.lane.b32.xlu1 %v1075_v56, %s5726_s20  ;;  %634 = vst.msk [vmem:[#allocation2 + $0x60] sm:$0xff] %vm8952_vm2, %v564_v63  ;;  %v935_v63 = vld [vmem:[#allocation2 + $0x42] ss:$2 sm:$0xff] }
  0xf8   :  { %1095 = vrot.lane.b32.xlu0 %v1092_v2, %s5728_s24  ;;  %4631 = vmatpush.msrb.mxu1 %v4536_v59  ;;  %v917_v1 = vld [vmem:[#allocation2 + $0x50] ss:$2 sm:$0x1] }
  0xf9   :  { %5620 = vmatmul.msk.f32.gmra.mxu2 %vm116_vm1, %v85_v60  ;;  %v1123_v2 = vld [vmem:[#allocation2 + $0x50] ss:$2 sm:$0x1]  ;;  %919 = vst.msk [vmem:[#allocation3 + $0x30] sm:$0x1] %vm8901_vm3, %v917_v1  ;;  %5611 = vmatmul.msk.f32.gmra.mxu1 %vm116_vm1, %v76_v3  ;;  %vm8929_vm3 = vcmask 516480  }
  0xfa   :  { %v384_v9 = vpop.f32.mrf.mxu0  ;;  %4632 = vmatpush.msrb.mxu1 %v4535_v0  ;;  %v90_v3 = vld [vmem:[%s8891_s0 + $0x1c8] sm:$0xff] }
  0xfb   :  { %v385_v13 = vadd.f32 %v5876_v24, %v384_v9  ;;  %5625 = vmatmul.msk.f32.vlgmr.msra.gmra.mxu3 %vm116_vm1, %v90_v3 }
  0xfc   :  { %4633 = vmatpush.msrb.mxu1 %v4534_v6 }
  0xfd   :  { %v565_v14 = vmax.f32 %v385_v13, 0.0 }
  0xfe   :  { %v1019_v17 = vld [vmem:[#allocation2 + $0x58] ss:$2 sm:$0xff]  ;;  %4634 = vmatpush.msrb.mxu1 %v4533_v11  ;;  %v977_v58 = vld [vmem:[#allocation2 + $0x55] ss:$2 sm:$0xff] }
  0xff   :  { %906 = vrot.lane.b32.xlu2 %v901_v15, %s5731_s10  ;;  %1046 = vrot.lane.b32.xlu1 %v1043_v16, %s5725_s17  ;;  %1022 = vst.msk [vmem:[#allocation3 + $0x18] sm:$0xff] %vm8952_vm2, %v1019_v17  ;;  %v6097_v50 = vld [vmem:[#allocation2 + $0x54] ss:$2 sm:$0xff]  ;;  %v1420_v12 = vld [vmem:[#allocation2 + $0x64] ss:$2 sm:$0x1] }
 0x100   :  { %1063 = vrot.lane.b32.xlu0 %v1060_v18, %s5727_s21  ;;  %635 = vst.msk [vmem:[#allocation2 + $0x68] sm:$0xff] %vm8952_vm2, %v565_v14  ;;  %v1424_v53 = vrot.slane %v6097_v50, 6  ;;  %v1127_v14 = vrot.slane %v1123_v2, 7  ;;  %v1144_v15 = vrot.slane %v1140_v5, 7  ;;  %v1425_v16 = vrot.slane %v1420_v12, 6  ;;  %v4532_v17 = vld [vmem:[%s8894_s3 + $0x8] sm:$0xff] }
 0x101   :  { %v57_v18 = vld [vmem:[%s8891_s0 + $0xc0] sm:$0xff]  ;;  %5621 = vmatmul.msk.f32.gmra.mxu2 %vm116_vm1, %v86_v19  ;;  %4635 = vmatpush.msrb.mxu1 %v4532_v17  ;;  %v4552_v2 = vld [vmem:[%s8894_s3 + $0xa8] sm:$0xff]  ;;  %v4550_v11 = vld [vmem:[%s8894_s3 + $0x98] sm:$0xff] }
 0x102   :  { %1430 = vst.msk [vmem:[#allocation3 + $0x40] sm:$0xfc] %vm8908_vm7, %v1424_v53  ;;  %v387_v4 = vpop.f32.mrf.mxu0  ;;  %v1426_v20 = vsel %vm8906_vm12, %v1424_v53, %v1425_v16  ;;  %5592 = vmatmul.msk.f32.gmra.mxu0 %vm116_vm1, %v57_v18  ;;  %v1128_v23 = vsel %vm8931_vm5, %v1126_v48, %v1127_v14  ;;  %v1145_v25 = vsel %vm8931_vm5, %v1143_v39, %v1144_v15  ;;  %v965_v35 = vld [vmem:[#allocation2 + $0x64] ss:$2 sm:$0x1]  ;;  %v59_v53 = vld [vmem:[%s8891_s0 + $0xd0] sm:$0xff] }
 0x103   :  { %v388_v7 = vadd.f32 %v5876_v24, %v387_v4  ;;  %1432 = vst.msk [vmem:[#allocation3 + $0x60] sm:$0x7] %vm8904_vm13, %v1426_v20  ;;  %4636 = vmatpush.msrb.mxu1 %v4531_v21  ;;  %v963_v43 = vld [vmem:[#allocation2 + $0x54] ss:$2 sm:$0xff]  ;;  %vm8912_vm13 = vcmask 778880   ;;  %vm8910_vm12 = vcmask 917248  }
 0x104   :  { %v991_v55 = vld [vmem:[#allocation2 + $0x56] ss:$2 sm:$0xff]  ;;  %v1007_v6 = vld [vmem:[#allocation2 + $0x67] ss:$2 sm:$0x1]  ;;  %vm8928_vm7 = vcmask 1041280  }
 0x105   :  { %v566_v10 = vmax.f32 %v388_v7, 0.0  ;;  %v60_v4 = vld [vmem:[%s8891_s0 + $0xd8] sm:$0xff]  ;;  %v4551_v5 = vld [vmem:[%s8894_s3 + $0xa0] sm:$0xff]  ;;  %v4549_v17 = vld [vmem:[%s8894_s3 + $0x90] sm:$0xff] }
 0x106   :  { %v1005_v7 = vld [vmem:[#allocation2 + $0x57] ss:$2 sm:$0xff]  ;;  %v6283_v15 = vld [vmem:[#allocation2 + $0x56] ss:$2 sm:$0xff] }
 0x107   :  { %1112 = vrot.lane.b32.xlu2 %v1109_v26, %s5729_s27  ;;  %1097 = vrot.lane.b32.xlu1 %v1094_v29, %s5728_s24  ;;  %636 = vst.msk [vmem:[#allocation2 + $0x70] sm:$0xff] %vm8952_vm2, %v566_v10  ;;  %v6285_v16 = vld [vmem:[#allocation2 + $0x54] ss:$2 sm:$0xff]  ;;  %v6292_v20 = vld [vmem:[#allocation2 + $0x55] ss:$2 sm:$0xff] }
 0x108   :  { %908 = vrot.lane.b32.xlu0 %v903_v27, %s5731_s10  ;;  %v4561_v27 = vld [vmem:[%s8894_s3 + $0xf0] sm:$0xff] }
 0x109   :  { %v6052_v31 = vpop.permute.xlu2 %736  ;;  %4675 = vmatpush.msrb.mxu2 %v4561_v27  ;;  %v1186_v27 = vrot.slane %v6285_v16, 7 }
 0x10a   :  { %v390_v26 = vpop.f32.mrf.mxu0  ;;  %5622 = vmatmul.msk.f32.gmra.mxu2 %vm116_vm1, %v87_v40 }
 0x10b   :  { %v391_v29 = vadd.f32 %v5876_v24, %v390_v26  ;;  %v1216_v26 = vrot.slane %v6283_v15, 7 }
 0x10d   :  { %v567_v37 = vmax.f32 %v391_v29, 0.0  ;;  %v1201_v29 = vrot.slane %v6292_v20, 7 }
 0x10f   :  { %928 = vrot.lane.b32.xlu2 %v923_v32, %s5725_s17  ;;  %926 = vrot.lane.b32.xlu1 %v921_v38, %s5725_s17  ;;  %v4559_v38 = vld [vmem:[%s8894_s3 + $0xe0] sm:$0xff]  ;;  %637 = vst.msk [vmem:[#allocation2 + $0x78] sm:$0xff] %vm8952_vm2, %v567_v37 }
 0x110   :  { %1146 = vrot.lane.b32.xlu0 %v1143_v39, %s5731_s10  ;;  %v58_v39 = vld [vmem:[%s8891_s0 + $0xc8] sm:$0xff]  ;;  %v6329_v37 = vld [vmem:[#allocation2 + $0x58] ss:$2 sm:$0xff] }
 0x111   :  { %v6079_v42 = vpop.permute.xlu2 %738  ;;  %5593 = vmatmul.msk.f32.gmra.mxu0 %vm116_vm1, %v58_v39 }
 0x112   :  { %v393_v44 = vpop.f32.mrf.mxu0 }
 0x113   :  { %v394_v46 = vadd.f32 %v5876_v24, %v393_v44  ;;  %v1246_v44 = vrot.slane %v6329_v37, 7  ;;  %v1485_v37 = vld [vmem:[#allocation2 + $0x68] ss:$2 sm:$0x1] }
 0x117   :  { %954 = vrot.lane.b32.xlu2 %v949_v51, %s5726_s20  ;;  %1129 = vrot.lane.b32.xlu1 %v1126_v48, %s5730_s30  ;;  %v568_v51 = vmax.f32 %v394_v46, 0.0 }
 0x118   :  { %1114 = vrot.lane.b32.xlu0 %v1111_v54, %s5729_s27  ;;  %v88_v54 = vld [vmem:[%s8891_s0 + $0x1b8] sm:$0xff] }
 0x119   :  { %v6114_v56 = vpop.permute.xlu2 %768  ;;  %v705_v57 = vpop.permute.xlu0 %704  ;;  %638 = vst.msk [vmem:[#allocation2 + $0x80] sm:$0xff] %vm8952_vm2, %v568_v51  ;;  %5594 = vmatmul.msk.f32.gmra.mxu0 %vm116_vm1, %v59_v53  ;;  %5623 = vmatmul.msk.f32.gmra.mxu2 %vm116_vm1, %v88_v54  ;;  %v6360_v53 = vld [vmem:[#allocation2 + $0x55] ss:$2 sm:$0xff] }
 0x11a   :  { %711 = vst.msk [vmem:[#allocation3] sm:$0xff] %vm8903_vm8, %v705_v57  ;;  %v4554_v57 = vld [vmem:[%s8894_s3 + $0xb8] sm:$0xff]  ;;  %v396_v59 = vpop.f32.mrf.mxu0 }
 0x11b   :  { %v397_v60 = vadd.f32 %v5876_v24, %v396_v59  ;;  %v1198_v59 = vld [vmem:[#allocation2 + $0x65] ss:$2 sm:$0x1] }
 0x11c   :  { %v1202_v3 = vrot.slane %v1198_v59, 7 }
 0x11d   :  { %v569_v1 = vmax.f32 %v397_v60, 0.0 }
 0x11f   :  { %1174 = vrot.lane.b32.xlu2 %v1171_v61, %s5725_s17  ;;  %942 = vrot.lane.b32.xlu1 %v937_v62, %s5727_s21  ;;  %639 = vst.msk [vmem:[#allocation2 + $0x88] sm:$0xff] %vm8952_vm2, %v569_v1 }
 0x120   :  { %940 = vrot.lane.b32.xlu0 %v935_v63, %s5727_s21 }
 0x121   :  { %v6143_v8 = vpop.permute.xlu2 %786  ;;  %v721_v9 = vpop.permute.xlu1 %720  ;;  %5595 = vmatmul.msk.f32.gmra.mxu0 %vm116_vm1, %v60_v4  ;;  %v6385_v4 = vld [vmem:[#allocation2 + $0x58] ss:$2 sm:$0xff] }
 0x122   :  { %727 = vst.msk [vmem:[#allocation3] sm:$0xff] %vm8930_vm9, %v721_v9  ;;  %v707_v13 = vpop.permute.xlu0 %706  ;;  %v993_v9 = vld [vmem:[#allocation2 + $0x66] ss:$2 sm:$0x1]  ;;  %v399_v10 = vpop.f32.mrf.mxu0 }
 0x123   :  { %713 = vst.msk [vmem:[#allocation3 + $0x20] sm:$0x1] %vm8913_vm10, %v707_v13  ;;  %v400_v12 = vadd.f32 %v5876_v24, %v399_v10  ;;  %v1488_v10 = vrot.slane %v6385_v4, 6 }
 0x124   :  { %743 = vst.msk [vmem:[#allocation3] sm:$0xff] %vm8926_vm11, %v6052_v31  ;;  %v4560_v31 = vld [vmem:[%s8894_s3 + $0xe8] sm:$0xff] }
 0x125   :  { %4676 = vmatpush.msrb.mxu2 %v4560_v31  ;;  %v570_v21 = vmax.f32 %v400_v12, 0.0  ;;  %v6398_v12 = vld [vmem:[#allocation2 + $0x6c] ss:$2 sm:$0xff] }
 0x126   :  { %v1556_v16 = vrot.slane %v6398_v12, 6 }
 0x127   :  { %1131 = vrot.lane.b32.xlu2 %v1128_v23, %s5730_s30  ;;  %1148 = vrot.lane.b32.xlu1 %v1145_v25, %s5731_s10  ;;  %v91_v23 = vld [vmem:[%s8891_s0 + $0x1d0] sm:$0xff]  ;;  %v61_v25 = vld [vmem:[%s8891_s0 + $0xe0] sm:$0xff]  ;;  %640 = vst.msk [vmem:[#allocation2 + $0x90] sm:$0xff] %vm8952_vm2, %v570_v21 }
 0x128   :  { %956 = vrot.lane.b32.xlu0 %v951_v28, %s5726_s20  ;;  %4677 = vmatpush.msrb.mxu2 %v4559_v38  ;;  %v4547_v28 = vld [vmem:[%s8894_s3 + $0x80] sm:$0xff] }
 0x129   :  { %v823_v32 = vpop.permute.xlu2 %822  ;;  %v723_v33 = vpop.permute.xlu1 %722  ;;  %5626 = vmatmul.msk.f32.gmra.mxu3 %vm116_vm1, %v91_v23  ;;  %5596 = vmatmul.msk.f32.gmra.mxu0 %vm116_vm1, %v61_v25 }
 0x12a   :  { %828 = vst.msk [vmem:[#allocation3 + $0x8] sm:$0xff] %vm8903_vm8, %v823_v32  ;;  %v753_v34 = vpop.permute.xlu0 %752  ;;  %vm8927_vm8 = vcmask 647680   ;;  %4678 = vmatpush.msrb.mxu2 %v4558_v41  ;;  %v402_v30 = vpop.f32.mrf.mxu0 }
 0x12b   :  { %729 = vst.msk [vmem:[#allocation3 + $0x20] sm:$0x1] %vm8925_vm14, %v723_v33  ;;  %v403_v33 = vadd.f32 %v5876_v24, %v402_v30 }
 0x12c   :  { %759 = vst.msk [vmem:[#allocation3] sm:$0xff] %vm8917_vm15, %v753_v34  ;;  %4679 = vmatpush.msrb.mxu2 %v4557_v45  ;;  %v1183_v45 = vld [vmem:[#allocation2 + $0x64] ss:$2 sm:$0x1] }
 0x12d   :  { %745 = vst.msk [vmem:[#allocation3 + $0x20] sm:$0x1] %vm8929_vm3, %v6079_v42  ;;  %v1173_v42 = vsel %vm8931_vm5, %v1171_v61, %v1172_v36  ;;  %v4553_v61 = vld [vmem:[%s8894_s3 + $0xb0] sm:$0xff]  ;;  %v571_v38 = vmax.f32 %v403_v33, 0.0  ;;  %v1187_v51 = vrot.slane %v1183_v45, 7 }
 0x12e   :  { %775 = vst.msk [vmem:[#allocation3] sm:$0xff] %vm8911_vm0, %v6114_v56  ;;  %4680 = vmatpush.msrb.mxu2 %v4556_v49  ;;  %v979_v56 = vld [vmem:[#allocation2 + $0x65] ss:$2 sm:$0x1]  ;;  %v6333_v39 = vld [vmem:[#allocation2 + $0x82] ss:$2 sm:$0xff] }
 0x12f   :  { %970 = vrot.lane.b32.xlu2 %v965_v35, %s5728_s24  ;;  %968 = vrot.lane.b32.xlu1 %v963_v43, %s5728_s24  ;;  %v6326_v35 = vld [vmem:[#allocation2 + $0x56] ss:$2 sm:$0xff]  ;;  %v1227_v36 = vld [vmem:[#allocation2 + $0x57] ss:$2 sm:$0xff]  ;;  %v1412_v43 = vrot.slane %v6333_v39, 7  ;;  %641 = vst.msk [vmem:[#allocation2 + $0x98] sm:$0xff] %vm8952_vm2, %v571_v38 }
 0x130   :  { %1176 = vrot.lane.b32.xlu0 %v1173_v42, %s5725_s17  ;;  %4681 = vmatpush.msrb.mxu2 %v4555_v52  ;;  %v1454_v40 = vrot.slane %v6326_v35, 6  ;;  %v1231_v41 = vrot.slane %v1227_v36, 7  ;;  %v92_v42 = vld [vmem:[%s8891_s0 + $0x1d8] sm:$0xff]  ;;  %v95_v36 = vld [vmem:[%s8891_s0 + $0x1f0] sm:$0xff] }
 0x131   :  { %v6221_v47 = vpop.permute.xlu2 %838  ;;  %v755_v48 = vpop.permute.xlu1 %754  ;;  %5627 = vmatmul.msk.f32.gmra.mxu3 %vm116_vm1, %v92_v42  ;;  %1417 = vst.msk [vmem:[#allocation3 + $0x38] sm:$0xfe] %vm8920_vm4, %v1412_v43  ;;  %v6357_v52 = vld [vmem:[#allocation2 + $0x57] ss:$2 sm:$0xff] }
 0x132   :  { %761 = vst.msk [vmem:[#allocation3 + $0x20] sm:$0x1] %vm8927_vm8, %v755_v48  ;;  %v771_v50 = vpop.permute.xlu0 %770  ;;  %4682 = vmatpush.msrb.mxu2 %v4554_v57  ;;  %v405_v46 = vpop.f32.mrf.mxu0  ;;  %v1437_v57 = vrot.slane %v6360_v53, 6  ;;  %v1243_v42 = vld [vmem:[#allocation2 + $0x68] ss:$2 sm:$0x1] }
 0x133   :  { %777 = vst.msk [vmem:[#allocation3 + $0x20] sm:$0x1] %vm8912_vm13, %v771_v50  ;;  %v406_v49 = vadd.f32 %v5876_v24, %v405_v46  ;;  %v1471_v24 = vrot.slane %v6357_v52, 6  ;;  %v6434_v46 = vld [vmem:[#allocation2 + $0x6a] ss:$2 sm:$0xff] }
 0x134   :  { %793 = vst.msk [vmem:[#allocation3 + $0x20] sm:$0x1] %vm8907_vm6, %v6143_v8  ;;  %vm8909_vm6 = vcmask 1048448   ;;  %4683 = vmatpush.msrb.mxu2 %v4553_v61  ;;  %v89_v8 = vld [vmem:[%s8891_s0 + $0x1c0] sm:$0xff]  ;;  %v6471_v35 = vld [vmem:[#allocation2 + $0x69] ss:$2 sm:$0xff] }
 0x135   :  { %5624 = vmatmul.msk.f32.gmra.mxu2 %vm116_vm1, %v89_v8  ;;  %v572_v54 = vmax.f32 %v406_v49, 0.0  ;;  %v6437_v49 = vld [vmem:[#allocation2 + $0x69] ss:$2 sm:$0xff] }
 0x136   :  { %4684 = vmatpush.msrb.mxu2 %v4552_v2 }
 0x137   :  { %996 = vrot.lane.b32.xlu2 %v991_v55, %s5730_s30  ;;  %984 = vrot.lane.b32.xlu1 %v979_v56, %s5729_s27  ;;  %v93_v55 = vld [vmem:[%s8891_s0 + $0x1e0] sm:$0xff]  ;;  %642 = vst.msk [vmem:[#allocation2 + $0xa0] sm:$0xff] %vm8952_vm2, %v572_v54  ;;  %v1188_v56 = vsel %vm8931_vm5, %v1186_v27, %v1187_v51 }
 0x138   :  { %982 = vrot.lane.b32.xlu0 %v977_v58, %s5729_s27  ;;  %4685 = vmatpush.msrb.mxu2 %v4551_v5  ;;  %v1228_v58 = vld [vmem:[#allocation2 + $0x67] ss:$2 sm:$0x1] }
 0x139   :  { %v6252_v62 = vpop.permute.xlu2 %864  ;;  %v785_v63 = vpop.permute.xlu1 %784  ;;  %5628 = vmatmul.msk.f32.gmra.mxu3 %vm116_vm1, %v93_v55  ;;  %v1232_v2 = vrot.slane %v1228_v58, 7  ;;  %v1280_v58 = vrot.slane %v6434_v46, 7  ;;  %v4578_v46 = vld [vmem:[%s8894_s3 + $0x178] sm:$0xff] }
 0x13a   :  { %791 = vst.msk [vmem:[#allocation3] sm:$0xff] %vm8910_vm12, %v785_v63  ;;  %v801_v0 = vpop.permute.xlu0 %800  ;;  %4686 = vmatpush.msrb.mxu2 %v4550_v11  ;;  %v408_v60 = vpop.f32.mrf.mxu0  ;;  %v6380_v63 = vld [vmem:[%s8893_s2] ss:$0 sm:$0xff]  ;;  %v1434_v11 = vld [vmem:[#allocation2 + $0x65] ss:$2 sm:$0x1]  ;;  %4727 = vmatpush.msrb.mxu3 %v4578_v46 }
 0x13b   :  { %807 = vst.msk [vmem:[#allocation3] sm:$0xff] %vm8909_vm6, %v801_v0  ;;  %v409_v0 = vadd.f32 %v6380_v63, %v408_v60  ;;  %v1233_v8 = vsel %vm8931_vm5, %v1231_v41, %v1232_v2  ;;  %v1263_v60 = vrot.slane %v6437_v49, 7  ;;  %v4570_v46 = vld [vmem:[%s8894_s3 + $0x138] sm:$0xff] }
 0x13c   :  { %4687 = vmatpush.msrb.mxu2 %v4549_v17  ;;  %1285 = vst.msk [vmem:[#allocation3 + $0x30] sm:$0xfe] %vm8920_vm4, %v1280_v58  ;;  %vm8923_vm4 = vcmask 125952  }
 0x13d   :  { %v573_v5 = vmax.f32 %v409_v0, 0.0 }
 0x13e   :  { %4688 = vmatpush.msrb.mxu2 %v4548_v22 }
 0x13f   :  { %1012 = vrot.lane.b32.xlu2 %v1007_v6, %s5731_s10  ;;  %1010 = vrot.lane.b32.xlu1 %v1005_v7, %s5731_s10  ;;  %v94_v6 = vld [vmem:[%s8891_s0 + $0x1e8] sm:$0xff]  ;;  %v1468_v7 = vld [vmem:[#allocation2 + $0x67] ss:$2 sm:$0x1]  ;;  %643 = vst.msk [vmem:[#allocation2 + $0xa8] sm:$0xff] %vm8952_vm2, %v573_v5 }
 0x140   :  { %998 = vrot.lane.b32.xlu0 %v993_v9, %s5730_s30  ;;  %4689 = vmatpush.msrb.mxu2 %v4547_v28  ;;  %v1203_v9 = vsel %vm8931_vm5, %v1201_v29, %v1202_v3  ;;  %v1438_v28 = vrot.slane %v1434_v11, 6  ;;  %v1553_v5 = vld [vmem:[#allocation2 + $0x7c] ss:$2 sm:$0x1] }
 0x141   :  { %v6281_v13 = vpop.permute.xlu2 %880  ;;  %v803_v14 = vpop.permute.xlu1 %802  ;;  %5629 = vmatmul.msk.f32.gmra.mxu3 %vm116_vm1, %v94_v6 }
 0x142   :  { %809 = vst.msk [vmem:[#allocation3 + $0x20] sm:$0x1] %vm8928_vm7, %v803_v14  ;;  %v825_v18 = vpop.permute.xlu0 %824  ;;  %v4483_v19 = vld [vmem:[#allocation3] sm:$0xff]  ;;  %v477_v14 = vpop.f32.mrf.mxu2 }
 0x143   :  { %829 = vst.msk [vmem:[#allocation3 + $0x28] sm:$0x1] %vm8913_vm10, %v825_v18  ;;  %4637 = vmatmul.f32.vlgmr.msrb.gmra.mxu1 %v4483_v19  ;;  %v478_v17 = vadd.f32 %v6380_v63, %v477_v14  ;;  %v453_v18 = vpop.f32.mrf.mxu1  ;;  %v411_v19 = vpop.f32.mrf.mxu0 }
 0x144   :  { %843 = vst.msk [vmem:[#allocation3 + $0x28] sm:$0x1] %vm8925_vm14, %v6221_v47  ;;  %v454_v22 = vadd.f32 %v6380_v63, %v453_v18  ;;  %v412_v23 = vadd.f32 %v6380_v63, %v411_v19  ;;  %v1815_v19 = vld [vmem:[#allocation2 + $0x7e] ss:$2 sm:$0xff] }
 0x145   :  { %v596_v30 = vmax.f32 %v478_v17, 0.0  ;;  %v1489_v17 = vrot.slane %v1485_v37, 6  ;;  %v63_v37 = vld [vmem:[%s8891_s0 + $0xf0] sm:$0xff] }
 0x146   :  { %v588_v33 = vmax.f32 %v454_v22, 0.0  ;;  %v97_v22 = vld [vmem:[%s8891_s0 + $0x200] sm:$0xff] }
 0x147   :  { %1219 = vrot.lane.b32.xlu2 %v1216_v26, %s5728_s24  ;;  %1189 = vrot.lane.b32.xlu1 %v1186_v27, %s5727_s21  ;;  %v1472_v27 = vrot.slane %v1468_v7, 6  ;;  %666 = vst.msk [vmem:[#allocation2 + $0x160] sm:$0xff] %vm8952_vm2, %v596_v30 }
 0x148   :  { %1204 = vrot.lane.b32.xlu0 %v1201_v29, %s5726_s20  ;;  %658 = vst.msk [vmem:[#allocation2 + $0x120] sm:$0xff] %vm8952_vm2, %v588_v33  ;;  %v6505_v33 = vld [vmem:[#allocation2 + $0x6d] ss:$2 sm:$0xff] }
 0x149   :  { %v6322_v31 = vpop.permute.xlu2 %1061  ;;  %v837_v32 = vpop.permute.xlu1 %836  ;;  %5630 = vmatmul.msk.f32.gmra.mxu3 %vm116_vm1, %v95_v36 }
 0x14a   :  { %842 = vst.msk [vmem:[#allocation3 + $0x8] sm:$0xff] %vm8930_vm9, %v837_v32  ;;  %v851_v34 = vpop.permute.xlu0 %850  ;;  %v480_v45 = vpop.f32.mrf.mxu2 }
 0x14b   :  { %856 = vst.msk [vmem:[#allocation3 + $0x8] sm:$0xff] %vm8926_vm11, %v851_v34  ;;  %v574_v34 = vmax.f32 %v412_v23, 0.0  ;;  %v481_v51 = vadd.f32 %v6380_v63, %v480_v45  ;;  %v456_v52 = vpop.f32.mrf.mxu1  ;;  %v414_v53 = vpop.f32.mrf.mxu0  ;;  %v1505_v23 = vrot.slane %v6471_v35, 6  ;;  %v98_v45 = vld [vmem:[%s8891_s0 + $0x208] sm:$0xff]  ;;  %v4565_v35 = vld [vmem:[%s8894_s3 + $0x110] sm:$0xff] }
 0x14c   :  { %870 = vst.msk [vmem:[#allocation3 + $0x8] sm:$0xff] %vm8917_vm15, %v6252_v62  ;;  %v415_v55 = vadd.f32 %v6380_v63, %v414_v53  ;;  %vm8989_vm15 = vcmask 123904   ;;  %v4577_v53 = vld [vmem:[%s8894_s3 + $0x170] sm:$0xff] }
 0x14d   :  { %644 = vst.msk [vmem:[#allocation2 + $0xb0] sm:$0xff] %vm8952_vm2, %v574_v34  ;;  %4728 = vmatpush.msrb.mxu3 %v4577_v53 }
 0x14e   :  { %v575_v0 = vmax.f32 %v415_v55, 0.0  ;;  %v1260_v55 = vld [vmem:[#allocation2 + $0x79] ss:$2 sm:$0x1] }
 0x14f   :  { %1457 = vrot.lane.b32.xlu2 %v1454_v40, %s5727_s21  ;;  %1234 = vrot.lane.b32.xlu1 %v1231_v41, %s5729_s27 }
 0x150   :  { %1249 = vrot.lane.b32.xlu0 %v1246_v44, %s5730_s30  ;;  %645 = vst.msk [vmem:[#allocation2 + $0xb8] sm:$0xff] %vm8952_vm2, %v575_v0  ;;  %v6556_v0 = vld [vmem:[#allocation2 + $0x6a] ss:$2 sm:$0xff] }
 0x151   :  { %v6353_v47 = vpop.permute.xlu2 %1080  ;;  %v853_v48 = vpop.permute.xlu1 %852 }
 0x152   :  { %857 = vst.msk [vmem:[#allocation3 + $0x28] sm:$0x1] %vm8929_vm3, %v853_v48  ;;  %v867_v50 = vpop.permute.xlu0 %866  ;;  %v1277_v48 = vld [vmem:[#allocation2 + $0x7a] ss:$2 sm:$0x1] }
 0x153   :  { %871 = vst.msk [vmem:[#allocation3 + $0x28] sm:$0x1] %vm8927_vm8, %v867_v50  ;;  %v1451_v50 = vld [vmem:[#allocation2 + $0x66] ss:$2 sm:$0x1]  ;;  %v1281_v59 = vrot.slane %v1277_v48, 7 }
 0x154   :  { %885 = vst.msk [vmem:[#allocation3 + $0x28] sm:$0x1] %vm8912_vm13, %v6281_v13  ;;  %v1213_v13 = vld [vmem:[#allocation2 + $0x66] ss:$2 sm:$0x1]  ;;  %vm8985_vm13 = vcmask 910080  }
 0x155   :  { %v1217_v29 = vrot.slane %v1213_v13, 7  ;;  %v1282_v3 = vsel %vm8931_vm5, %v1280_v58, %v1281_v59  ;;  %v1557_v13 = vrot.slane %v1553_v5, 6  ;;  %v62_v48 = vld [vmem:[%s8891_s0 + $0xe8] sm:$0xff] }
 0x156   :  { %1286 = vst.msk [vmem:[#allocation3 + $0x50] sm:$0x3] %vm8989_vm15, %v1282_v3  ;;  %vm8990_vm15 = vcmask 1041408   ;;  %5597 = vmatmul.msk.f32.gmra.mxu0 %vm116_vm1, %v62_v48  ;;  %v6550_v59 = vld [vmem:[#allocation2 + $0x6d] ss:$2 sm:$0xff]  ;;  %v1264_v3 = vrot.slane %v1260_v55, 7 }
 0x157   :  { %1191 = vrot.lane.b32.xlu2 %v1188_v56, %s5727_s21  ;;  %1474 = vrot.lane.b32.xlu1 %v1471_v24, %s5726_s20  ;;  %v1247_v56 = vrot.slane %v1243_v42, 7  ;;  %v6513_v42 = vld [vmem:[#allocation2 + $0x6b] ss:$2 sm:$0xff]  ;;  %v1519_v48 = vld [vmem:[#allocation2 + $0x7a] ss:$2 sm:$0x1] }
 0x158   :  { %1440 = vrot.lane.b32.xlu0 %v1437_v57, %s5725_s17  ;;  %v1523_v55 = vrot.slane %v1519_v48, 6  ;;  %v1409_v48 = vld [vmem:[#allocation2 + $0x92] ss:$2 sm:$0x1] }
 0x159   :  { %v907_v61 = vpop.permute.xlu2 %906  ;;  %v879_v62 = vpop.permute.xlu1 %878  ;;  %v1248_v2 = vsel %vm8931_vm5, %v1246_v44, %v1247_v56  ;;  %v1021_v56 = vld [vmem:[#allocation2 + $0x68] ss:$2 sm:$0x1] }
 0x15a   :  { %884 = vst.msk [vmem:[#allocation3 + $0x8] sm:$0xff] %vm8911_vm0, %v879_v62  ;;  %v893_v1 = vpop.permute.xlu0 %892  ;;  %vm8984_vm0 = vcmask 130050   ;;  %v483_v44 = vpop.f32.mrf.mxu2 }
 0x15b   :  { %898 = vst.msk [vmem:[#allocation3 + $0x8] sm:$0xff] %vm8910_vm12, %v893_v1  ;;  %vm8916_vm12 = vcmask 392449   ;;  %v96_v1 = vld [vmem:[%s8891_s0 + $0x1f8] sm:$0xff]  ;;  %v484_v7 = vadd.f32 %v6380_v63, %v483_v44  ;;  %v1567_v44 = vrot.slane %v6550_v59, 6  ;;  %v6719_v59 = vld [vmem:[#allocation2 + $0x81] ss:$2 sm:$0xff] }
 0x15c   :  { %912 = vst.msk [vmem:[#allocation3 + $0x8] sm:$0xff] %vm8909_vm6, %v907_v61  ;;  %vm8921_vm6 = vcmask 261249   ;;  %v1455_v61 = vrot.slane %v1451_v50, 6  ;;  %5631 = vmatmul.msk.f32.gmra.mxu3 %vm116_vm1, %v96_v1 }
 0x15d   :  { %1561 = vst.msk [vmem:[#allocation3 + $0x48] sm:$0xfc] %vm8984_vm0, %v1556_v16  ;;  %vm8986_vm0 = vcmask 1041408   ;;  %v598_v18 = vmax.f32 %v484_v7, 0.0  ;;  %v1522_v7 = vrot.slane %v6556_v0, 6 }
 0x15e   :  { %v1473_v38 = vsel %vm8986_vm0, %v1471_v24, %v1472_v27  ;;  %v1819_v27 = vrot.slane %v1815_v19, 5  ;;  %5598 = vmatmul.msk.f32.gmra.mxu0 %vm116_vm1, %v63_v37 }
 0x15f   :  { %1236 = vrot.lane.b32.xlu2 %v1233_v8, %s5729_s27  ;;  %1206 = vrot.lane.b32.xlu1 %v1203_v9, %s5726_s20  ;;  %v459_v8 = vpop.f32.mrf.mxu1  ;;  %668 = vst.msk [vmem:[#allocation2 + $0x170] sm:$0xff] %vm8952_vm2, %v598_v18  ;;  %v4573_v18 = vld [vmem:[%s8894_s3 + $0x150] sm:$0xff] }
 0x160   :  { %1491 = vrot.lane.b32.xlu0 %v1488_v10, %s5728_s24 }
 0x161   :  { %v6407_v20 = vpop.permute.xlu2 %1112  ;;  %v895_v21 = vpop.permute.xlu1 %894 }
 0x162   :  { %899 = vst.msk [vmem:[#allocation3 + $0x28] sm:$0x1] %vm8985_vm13, %v895_v21  ;;  %v1045_v25 = vpop.permute.xlu0 %1044  ;;  %vm8987_vm13 = vmmov %vm8986_vm0  ;;  %vm8915_vm0 = vcmask 523649   ;;  %v486_v12 = vpop.f32.mrf.mxu2 }
 0x163   :  { %1051 = vst.msk [vmem:[#allocation3 + $0x20] sm:$0xfe] %vm8921_vm6, %v1045_v25  ;;  %v4484_v32 = vld [vmem:[#allocation3 + $0x8] sm:$0xff]  ;;  %v1439_v41 = vsel %vm8987_vm13, %v1437_v57, %v1438_v28  ;;  %vm8914_vm13 = vcmask 654849   ;;  %v597_v57 = vmax.f32 %v481_v51, 0.0  ;;  %v1558_v25 = vsel %vm8990_vm15, %v1556_v16, %v1557_v13 }
 0x164   :  { %4690 = vmatmul.f32.vlgmr.msrb.gmra.mxu2 %v4484_v32  ;;  %1068 = vst.msk [vmem:[#allocation3 + $0x20] sm:$0xfe] %vm8916_vm12, %v6322_v31  ;;  %v1218_v31 = vsel %vm8931_vm5, %v1216_v26, %v1217_v29  ;;  %v457_v26 = vadd.f32 %v6380_v63, %v456_v52  ;;  %vm8942_vm12 = vcmask 386304   ;;  %v1816_v28 = vld [vmem:[#allocation2 + $0x8e] ss:$2 sm:$0x1]  ;;  %5632 = vmatmul.msk.f32.gmra.mxu3 %vm116_vm1, %v97_v22 }
 0x165   :  { %667 = vst.msk [vmem:[#allocation2 + $0x168] sm:$0xff] %vm8952_vm2, %v597_v57  ;;  %v487_v4 = vadd.f32 %v6380_v63, %v486_v12  ;;  %v1820_v16 = vrot.slane %v1816_v28, 5  ;;  %v1327_v51 = vrot.slane %v6505_v33, 7  ;;  %v1307_v13 = vld [vmem:[#allocation2 + $0x7c] ss:$2 sm:$0x1] }
 0x166   :  { %v589_v62 = vmax.f32 %v457_v26, 0.0  ;;  %v4576_v26 = vld [vmem:[%s8894_s3 + $0x168] sm:$0xff]  ;;  %v1324_v22 = vld [vmem:[#allocation2 + $0x7d] ss:$2 sm:$0x1]  ;;  %v1311_v12 = vrot.slane %v1307_v13, 7 }
 0x167   :  { %1476 = vrot.lane.b32.xlu2 %v1473_v38, %s5726_s20  ;;  %1442 = vrot.lane.b32.xlu1 %v1439_v41, %s5725_s17  ;;  %v6510_v38 = vld [vmem:[#allocation2 + $0x6b] ss:$2 sm:$0xff]  ;;  %v599_v41 = vmax.f32 %v487_v4, 0.0  ;;  %v6683_v13 = vld [vmem:[#allocation2 + $0x7e] ss:$2 sm:$0xff] }
 0x168   :  { %1221 = vrot.lane.b32.xlu0 %v1218_v31, %s5728_s24  ;;  %659 = vst.msk [vmem:[#allocation2 + $0x128] sm:$0xff] %vm8952_vm2, %v589_v62  ;;  %v1293_v52 = vrot.slane %v6510_v38, 7  ;;  %4729 = vmatpush.msrb.mxu3 %v4576_v26 }
 0x169   :  { %v929_v54 = vpop.permute.xlu2 %928  ;;  %v1079_v15 = vpop.permute.xlu1 %1078  ;;  %669 = vst.msk [vmem:[#allocation2 + $0x178] sm:$0xff] %vm8952_vm2, %v599_v41 }
 0x16a   :  { %933 = vst.msk [vmem:[#allocation3 + $0x30] sm:$0x1] %vm8913_vm10, %v929_v54  ;;  %v1096_v24 = vpop.permute.xlu0 %1095  ;;  %vm8918_vm10 = vcmask 786049   ;;  %v1539_v54 = vrot.slane %v6513_v42, 6  ;;  %v4566_v42 = vld [vmem:[%s8894_s3 + $0x118] sm:$0xff] }
 0x16b   :  { %1085 = vst.msk [vmem:[#allocation3 + $0x20] sm:$0xfe] %vm8915_vm0, %v1079_v15  ;;  %vm8938_vm0 = vcmask 255104   ;;  %v489_v15 = vpop.f32.mrf.mxu2 }
 0x16c   :  { %1102 = vst.msk [vmem:[#allocation3 + $0x20] sm:$0xfe] %vm8914_vm13, %v1096_v24  ;;  %vm8988_vm13 = vcmask 1041408   ;;  %5633 = vmatmul.msk.f32.gmra.mxu3 %vm116_vm1, %v98_v45  ;;  %v490_v24 = vadd.f32 %v6380_v63, %v489_v15 }
 0x16d   :  { %v1456_v6 = vsel %vm8988_vm13, %v1454_v40, %v1455_v61  ;;  %1119 = vst.msk [vmem:[#allocation3 + $0x20] sm:$0xfe] %vm8918_vm10, %v6407_v20  ;;  %vm8919_vm13 = vcmask 517504   ;;  %v460_v40 = vadd.f32 %v6380_v63, %v459_v8  ;;  %v6477_v20 = vld [vmem:[#allocation2 + $0x6c] ss:$2 sm:$0xff]  ;;  %vm8991_vm10 = vmmov %vm8990_vm15  ;;  %vm8992_vm15 = vcmask 124928  }
 0x16e   :  { %v1490_v29 = vsel %vm8991_vm10, %v1488_v10, %v1489_v17  ;;  %vm8922_vm10 = vcmask 648704   ;;  %v462_v10 = vpop.f32.mrf.mxu1  ;;  %1562 = vst.msk [vmem:[#allocation3 + $0x68] sm:$0x7] %vm8992_vm15, %v1558_v25  ;;  %vm8993_vm15 = vcmask 1042432   ;;  %v4575_v61 = vld [vmem:[%s8894_s3 + $0x160] sm:$0xff]  ;;  %v600_v1 = vmax.f32 %v490_v24, 0.0 }
 0x16f   :  { %1266 = vrot.lane.b32.xlu2 %v1263_v60, %s5731_s10  ;;  %1251 = vrot.lane.b32.xlu1 %v1248_v2, %s5730_s30  ;;  %v590_v21 = vmax.f32 %v460_v40, 0.0  ;;  %v463_v34 = vadd.f32 %v6380_v63, %v462_v10  ;;  %v1821_v50 = vsel %vm8993_vm15, %v1819_v27, %v1820_v16  ;;  %vm8994_vm15 = vcmask 261248   ;;  %v1290_v8 = vld [vmem:[#allocation2 + $0x7b] ss:$2 sm:$0x1] }
 0x170   :  { %1459 = vrot.lane.b32.xlu0 %v1456_v6, %s5727_s21  ;;  %1827 = vst.msk [vmem:[#allocation3 + $0x80] sm:$0xf] %vm8923_vm4, %v1821_v50  ;;  %v99_v6 = vld [vmem:[%s8891_s0 + $0x210] sm:$0xff]  ;;  %4730 = vmatpush.msrb.mxu3 %v4575_v61  ;;  %v4574_v40 = vld [vmem:[%s8894_s3 + $0x158] sm:$0xff]  ;;  %v1265_v17 = vsel %vm8931_vm5, %v1263_v60, %v1264_v3  ;;  %vm8996_vm4 = vcmask 130050   ;;  %v1328_v10 = vrot.slane %v1324_v22, 7 }
 0x171   :  { %v6469_v9 = vpop.permute.xlu2 %954  ;;  %v1047_v11 = vpop.permute.xlu1 %1046  ;;  %660 = vst.msk [vmem:[#allocation2 + $0x130] sm:$0xff] %vm8952_vm2, %v590_v21  ;;  %v591_v31 = vmax.f32 %v463_v34, 0.0  ;;  %v64_v34 = vld [vmem:[%s8891_s0 + $0xf8] sm:$0xff]  ;;  %v4569_v50 = vld [vmem:[%s8894_s3 + $0x130] sm:$0xff]  ;;  %v66_v22 = vld [vmem:[%s8891_s0 + $0x108] sm:$0xff] }
 0x172   :  { %1053 = vst.msk [vmem:[#allocation3 + $0x40] sm:$0x3] %vm8938_vm0, %v1047_v11  ;;  %v1064_v14 = vpop.permute.xlu0 %1063  ;;  %4731 = vmatpush.msrb.mxu3 %v4574_v40  ;;  %5599 = vmatmul.msk.f32.gmra.mxu0 %vm116_vm1, %v64_v34  ;;  %v1329_v38 = vsel %vm8931_vm5, %v1327_v51, %v1328_v10  ;;  %v6681_v40 = vld [vmem:[#allocation2 + $0x80] ss:$2 sm:$0xff] }
 0x173   :  { %1070 = vst.msk [vmem:[#allocation3 + $0x40] sm:$0x3] %vm8942_vm12, %v1064_v14  ;;  %v6574_v14 = vld [vmem:[#allocation2 + $0xac] ss:$2 sm:$0xff]  ;;  %v492_v19 = vpop.f32.mrf.mxu2 }
 0x174   :  { %1087 = vst.msk [vmem:[#allocation3 + $0x40] sm:$0x3] %vm8919_vm13, %v6353_v47  ;;  %v1310_v47 = vrot.slane %v6477_v20, 7  ;;  %vm8924_vm13 = vcmask 130051   ;;  %5634 = vmatmul.msk.f32.gmra.mxu3 %vm116_vm1, %v99_v6  ;;  %v1808_v21 = vrot.slane %v6574_v14, 6  ;;  %v493_v25 = vadd.f32 %v6380_v63, %v492_v19  ;;  %v4564_v19 = vld [vmem:[%s8894_s3 + $0x108] sm:$0xff] }
 0x175   :  { %1825 = vst.msk [vmem:[#allocation3 + $0x60] sm:$0xf8] %vm8924_vm13, %v1819_v27  ;;  %v4572_v27 = vld [vmem:[%s8894_s3 + $0x148] sm:$0xff]  ;;  %vm8936_vm13 = vcmask 911104   ;;  %4732 = vmatpush.msrb.mxu3 %v4573_v18 }
 0x176   :  { %661 = vst.msk [vmem:[#allocation2 + $0x138] sm:$0xff] %vm8952_vm2, %v591_v31  ;;  %v465_v2 = vpop.f32.mrf.mxu1  ;;  %v601_v4 = vmax.f32 %v493_v25, 0.0  ;;  %v1312_v31 = vsel %vm8931_vm5, %v1310_v47, %v1311_v12  ;;  %v1536_v20 = vld [vmem:[#allocation2 + $0x7b] ss:$2 sm:$0x1]  ;;  %v1378_v25 = vrot.slane %v6681_v40, 7 }
 0x177   :  { %1508 = vrot.lane.b32.xlu2 %v1505_v23, %s5729_s27  ;;  %1493 = vrot.lane.b32.xlu1 %v1490_v29, %s5728_s24  ;;  %v466_v5 = vadd.f32 %v6380_v63, %v465_v2  ;;  %670 = vst.msk [vmem:[#allocation2 + $0x180] sm:$0xff] %vm8952_vm2, %v600_v1  ;;  %v1294_v29 = vrot.slane %v1290_v8, 7  ;;  %v1540_v24 = vrot.slane %v1536_v20, 6  ;;  %v65_v1 = vld [vmem:[%s8891_s0 + $0x100] sm:$0xff] }
 0x178   :  { %1313 = vrot.lane.b32.xlu0 %v1310_v47, %s5727_s21  ;;  %1813 = vst.msk [vmem:[#allocation3 + $0x58] sm:$0xfc] %vm8996_vm4, %v1808_v21  ;;  %4733 = vmatpush.msrb.mxu3 %v4572_v27  ;;  %v1502_v47 = vld [vmem:[#allocation2 + $0x79] ss:$2 sm:$0x1]  ;;  %vm8997_vm4 = vcmask 1041408  }
 0x179   :  { %v1175_v30 = vpop.permute.xlu2 %1174  ;;  %v1098_v32 = vpop.permute.xlu1 %1097  ;;  %v592_v11 = vmax.f32 %v466_v5, 0.0  ;;  %v1295_v41 = vsel %vm8931_vm5, %v1293_v52, %v1294_v29  ;;  %671 = vst.msk [vmem:[#allocation2 + $0x188] sm:$0xff] %vm8952_vm2, %v601_v4  ;;  %v1524_v2 = vsel %vm8997_vm4, %v1522_v7, %v1523_v55  ;;  %v101_v5 = vld [vmem:[%s8891_s0 + $0x220] sm:$0x3] }
 0x17a   :  { %1180 = vst.msk [vmem:[#allocation3 + $0x28] sm:$0xfe] %vm8921_vm6, %v1175_v30  ;;  %v909_v36 = vpop.permute.xlu0 %908  ;;  %vm8995_vm6 = vcmask 122880   ;;  %v4571_v30 = vld [vmem:[%s8894_s3 + $0x140] sm:$0xff]  ;;  %5600 = vmatmul.msk.f32.gmra.mxu0 %vm116_vm1, %v65_v1 }
 0x17b   :  { %1104 = vst.msk [vmem:[#allocation3 + $0x40] sm:$0x3] %vm8922_vm10, %v1098_v32  ;;  %vm8933_vm10 = vcmask 779904   ;;  %4734 = vmatpush.msrb.mxu3 %v4571_v30  ;;  %v4563_v27 = vld [vmem:[%s8894_s3 + $0x100] sm:$0xff] }
 0x17c   :  { %913 = vst.msk [vmem:[#allocation3 + $0x28] sm:$0x1] %vm8928_vm7, %v909_v36  ;;  %v100_v36 = vld [vmem:[%s8891_s0 + $0x218] sm:$0xff]  ;;  %v6717_v34 = vld [vmem:[#allocation2 + $0x80] ss:$2 sm:$0xff] }
 0x17d   :  { %1023 = vst.msk [vmem:[#allocation3 + $0x38] sm:$0x1] %vm8995_vm6, %v1021_v56  ;;  %vm8946_vm6 = vcmask 917249   ;;  %5635 = vmatmul.msk.f32.gmra.mxu3 %vm116_vm1, %v100_v36  ;;  %v4568_v56 = vld [vmem:[%s8894_s3 + $0x128] sm:$0xff] }
 0x17e   :  { %662 = vst.msk [vmem:[#allocation2 + $0x140] sm:$0xff] %vm8952_vm2, %v592_v11  ;;  %v468_v16 = vpop.f32.mrf.mxu1  ;;  %4735 = vmatpush.msrb.mxu3 %v4570_v46  ;;  %v6722_v36 = vld [vmem:[#allocation2 + $0x7f] ss:$2 sm:$0xff]  ;;  %v1395_v46 = vrot.slane %v6719_v59, 7  ;;  %v6746_v55 = vld [vmem:[#allocation2 + $0x7e] ss:$2 sm:$0xff] }
 0x17f   :  { %1330 = vrot.lane.b32.xlu2 %v1327_v51, %s5726_s20  ;;  %1296 = vrot.lane.b32.xlu1 %v1293_v52, %s5725_s17  ;;  %v469_v32 = vadd.f32 %v6380_v63, %v468_v16  ;;  %v495_v52 = vpop.f32.mrf.mxu2  ;;  %v1361_v20 = vrot.slane %v6722_v36, 7  ;;  %v1673_v14 = vld [vmem:[#allocation2 + $0xa4] ss:$2 sm:$0x1]  ;;  %v516_v36 = vpop.f32.mrf.mxu3 }
 0x180   :  { %1542 = vrot.lane.b32.xlu0 %v1539_v54, %s5731_s10  ;;  %v496_v33 = vadd.f32 %v6380_v63, %v495_v52  ;;  %4736 = vmatpush.msrb.mxu3 %v4569_v50  ;;  %v1413_v50 = vrot.slane %v1409_v48, 7  ;;  %v1594_v48 = vld [vmem:[#allocation2 + $0x8f] ss:$2 sm:$0x1] }
 0x181   :  { %v1132_v57 = vpop.permute.xlu2 %1131  ;;  %v927_v58 = vpop.permute.xlu1 %926  ;;  %v593_v45 = vmax.f32 %v469_v32, 0.0 }
 0x182   :  { %932 = vst.msk [vmem:[#allocation3 + $0x10] sm:$0xff] %vm8994_vm15, %v927_v58  ;;  %v1147_v62 = vpop.permute.xlu0 %1146  ;;  %vm8945_vm15 = vcmask 1048449   ;;  %v602_v58 = vmax.f32 %v496_v33, 0.0  ;;  %4737 = vmatpush.msrb.mxu3 %v4568_v56  ;;  %5601 = vmatmul.msk.f32.gmra.mxu0 %vm116_vm1, %v66_v22  ;;  %v6749_v56 = vld [vmem:[#allocation2 + $0x7f] ss:$2 sm:$0xff] }
 0x183   :  { %663 = vst.msk [vmem:[#allocation2 + $0x148] sm:$0xff] %vm8952_vm2, %v593_v45  ;;  %v1612_v45 = vrot.slane %v6717_v34, 6  ;;  %v1358_v22 = vld [vmem:[#allocation2 + $0x8f] ss:$2 sm:$0x1] }
 0x184   :  { %672 = vst.msk [vmem:[#allocation2 + $0x190] sm:$0xff] %vm8952_vm2, %v602_v58  ;;  %v1701_v34 = vld [vmem:[#allocation2 + $0x96] ss:$2 sm:$0xff] }
 0x185   :  { %5636 = vmatmul.msk.f32.gmra.mxu3 %vm116_vm1, %v101_v5 }
 0x186   :  { %v471_v61 = vpop.f32.mrf.mxu1 }
 0x187   :  { %1570 = vrot.lane.b32.xlu2 %v1567_v44, %s5725_s17  ;;  %1525 = vrot.lane.b32.xlu1 %v1522_v7, %s5730_s30  ;;  %v472_v3 = vadd.f32 %v6380_v63, %v471_v61  ;;  %v498_v6 = vpop.f32.mrf.mxu2 }
 0x188   :  { %1268 = vrot.lane.b32.xlu0 %v1265_v17, %s5731_s10 }
 0x189   :  { %v6592_v49 = vpop.permute.xlu2 %970  ;;  %v1130_v60 = vpop.permute.xlu1 %1129  ;;  %v594_v8 = vmax.f32 %v472_v3, 0.0 }
 0x18a   :  { %1136 = vst.msk [vmem:[#allocation3 + $0x20] sm:$0xfe] %vm8946_vm6, %v1130_v60  ;;  %v1115_v28 = vpop.permute.xlu0 %1114  ;;  %v1344_v60 = vrot.slane %v6683_v13, 7 }
 0x18b   :  { %1153 = vst.msk [vmem:[#allocation3 + $0x20] sm:$0xfe] %vm8945_vm15, %v1147_v62  ;;  %v4567_v62 = vld [vmem:[%s8894_s3 + $0x120] sm:$0xff] }
 0x18c   :  { %1121 = vst.msk [vmem:[#allocation3 + $0x40] sm:$0x3] %vm8933_vm10, %v1115_v28  ;;  %4738 = vmatpush.msrb.mxu3 %v4567_v62  ;;  %v1582_v62 = vrot.slane %v6746_v55, 6  ;;  %v1947_v55 = vld [vmem:[#allocation2 + $0x96] ss:$2 sm:$0xff] }
 0x18d   :  { %1138 = vst.msk [vmem:[#allocation3 + $0x40] sm:$0x3] %vm8936_vm13, %v1132_v57  ;;  %v1506_v57 = vrot.slane %v1502_v47, 6 }
 0x18e   :  { %4739 = vmatpush.msrb.mxu3 %v4566_v42  ;;  %664 = vst.msk [vmem:[#allocation2 + $0x150] sm:$0xff] %vm8952_vm2, %v594_v8  ;;  %v474_v28 = vpop.f32.mrf.mxu1 }
 0x18f   :  { %1298 = vrot.lane.b32.xlu2 %v1295_v41, %s5725_s17  ;;  %1315 = vrot.lane.b32.xlu1 %v1312_v31, %s5727_s21  ;;  %v475_v29 = vadd.f32 %v6380_v63, %v474_v28  ;;  %v501_v12 = vpop.f32.mrf.mxu2 }
 0x190   :  { %1332 = vrot.lane.b32.xlu0 %v1329_v38, %s5726_s20  ;;  %4740 = vmatpush.msrb.mxu3 %v4565_v35  ;;  %v502_v30 = vadd.f32 %v6380_v63, %v501_v12 }
 0x191   :  { %v6636_v53 = vpop.permute.xlu2 %996  ;;  %v943_v15 = vpop.permute.xlu1 %942  ;;  %v595_v16 = vmax.f32 %v475_v29, 0.0  ;;  %v1362_v29 = vrot.slane %v1358_v22, 7 }
 0x192   :  { %947 = vst.msk [vmem:[#allocation3 + $0x30] sm:$0x1] %vm8925_vm14, %v943_v15  ;;  %v941_v51 = vpop.permute.xlu0 %940  ;;  %v4487_v26 = vld [vmem:[#allocation3 + $0x20] sm:$0xff]  ;;  %vm8998_vm14 = vmmov %vm8997_vm4  ;;  %4741 = vmatpush.msrb.mxu3 %v4564_v19  ;;  %v604_v41 = vmax.f32 %v502_v30, 0.0 }
 0x193   :  { %946 = vst.msk [vmem:[#allocation3 + $0x10] sm:$0xff] %vm8930_vm9, %v941_v51  ;;  %4640 = vmatmul.f32.gmra.mxu1 %v4487_v26  ;;  %v6744_v26 = vld [vmem:[#allocation2 + $0x80] ss:$2 sm:$0xff] }
 0x194   :  { %960 = vst.msk [vmem:[#allocation3 + $0x10] sm:$0xff] %vm8926_vm11, %v6469_v9  ;;  %v1541_v9 = vsel %vm8998_vm14, %v1539_v54, %v1540_v24  ;;  %vm8999_vm11 = vmmov %vm8997_vm4  ;;  %vm8941_vm4 = vcmask 1042304   ;;  %v1564_v54 = vld [vmem:[#allocation2 + $0x7d] ss:$2 sm:$0x1]  ;;  %4742 = vmatpush.msrb.mxu3 %v4563_v27  ;;  %vm9000_vm14 = vcmask 654848  }
 0x195   :  { %v1507_v0 = vsel %vm8999_vm11, %v1505_v23, %v1506_v57  ;;  %v499_v23 = vadd.f32 %v6380_v63, %v498_v6  ;;  %v1568_v17 = vrot.slane %v1564_v54, 6  ;;  %665 = vst.msk [vmem:[#allocation2 + $0x158] sm:$0xff] %vm8952_vm2, %v595_v16  ;;  %v1849_v61 = vrot.slane %v6744_v26, 5  ;;  %v6774_v54 = vld [vmem:[#allocation2 + $0x7f] ss:$2 sm:$0xff] }
 0x196   :  { %674 = vst.msk [vmem:[#allocation2 + $0x1a0] sm:$0xff] %vm8952_vm2, %v604_v41  ;;  %v1805_v27 = vld [vmem:[#allocation2 + $0xbc] ss:$2 sm:$0x1] }
 0x197   :  { %1527 = vrot.lane.b32.xlu2 %v1524_v2, %s5730_s30  ;;  %1544 = vrot.lane.b32.xlu1 %v1541_v9, %s5731_s10  ;;  %v603_v18 = vmax.f32 %v499_v23, 0.0  ;;  %v504_v47 = vpop.f32.mrf.mxu2  ;;  %v1414_v2 = vsel %vm8931_vm5, %v1412_v43, %v1413_v50  ;;  %v1597_v9 = vrot.slane %v6749_v56, 6  ;;  %v1809_v12 = vrot.slane %v1805_v27, 6  ;;  %v1375_v50 = vld [vmem:[#allocation2 + $0x90] ss:$2 sm:$0x1] }
 0x198   :  { %1510 = vrot.lane.b32.xlu0 %v1507_v0, %s5729_s27  ;;  %v505_v33 = vadd.f32 %v6380_v63, %v504_v47  ;;  %v6771_v0 = vld [vmem:[#allocation2 + $0x81] ss:$2 sm:$0xff]  ;;  %v1363_v47 = vsel %vm8931_vm5, %v1361_v20, %v1362_v29 }
 0x199   :  { %v6673_v37 = vpop.permute.xlu2 %1012  ;;  %v1149_v7 = vpop.permute.xlu1 %1148  ;;  %673 = vst.msk [vmem:[#allocation2 + $0x198] sm:$0xff] %vm8952_vm2, %v603_v18  ;;  %v1627_v35 = vrot.slane %v6771_v0, 6  ;;  %v1579_v18 = vld [vmem:[#allocation2 + $0x8e] ss:$2 sm:$0x1] }
 0x19a   :  { %1155 = vst.msk [vmem:[#allocation3 + $0x40] sm:$0x3] %vm8941_vm4, %v1149_v7  ;;  %v957_v11 = vpop.permute.xlu0 %956  ;;  %v605_v57 = vmax.f32 %v505_v33, 0.0 }
 0x19b   :  { %961 = vst.msk [vmem:[#allocation3 + $0x30] sm:$0x1] %vm8929_vm3, %v957_v11  ;;  %vm9020_vm3 = vcmask 1041408  }
 0x19c   :  { %975 = vst.msk [vmem:[#allocation3 + $0x30] sm:$0x1] %vm8927_vm8, %v6592_v49  ;;  %v1569_v49 = vsel %vm8999_vm11, %v1567_v44, %v1568_v17  ;;  %v417_v44 = vpop.f32.mrf.mxu0  ;;  %vm9001_vm11 = vcmask 778880   ;;  %vm9003_vm8 = vcmask 917248   ;;  %v1832_v17 = vrot.slane %v6774_v54, 5 }
 0x19d   :  { %v418_v31 = vadd.f32 %v6380_v63, %v417_v44  ;;  %675 = vst.msk [vmem:[#allocation2 + $0x1a8] sm:$0xff] %vm8952_vm2, %v605_v57 }
 0x19f   :  { %1381 = vrot.lane.b32.xlu2 %v1378_v25, %s5730_s30  ;;  %1347 = vrot.lane.b32.xlu1 %v1344_v60, %s5728_s24  ;;  %v576_v38 = vmax.f32 %v418_v31, 0.0  ;;  %v507_v42 = vpop.f32.mrf.mxu2 }
 0x1a0   :  { %1572 = vrot.lane.b32.xlu0 %v1569_v49, %s5725_s17  ;;  %v508_v6 = vadd.f32 %v6380_v63, %v507_v42 }
 0x1a1   :  { %v6713_v4 = vpop.permute.xlu2 %1219  ;;  %v969_v10 = vpop.permute.xlu1 %968  ;;  %646 = vst.msk [vmem:[#allocation2 + $0xc0] sm:$0xff] %vm8952_vm2, %v576_v38  ;;  %v1392_v38 = vld [vmem:[#allocation2 + $0x91] ss:$2 sm:$0x1] }
 0x1a2   :  { %974 = vst.msk [vmem:[#allocation3 + $0x10] sm:$0xff] %vm9000_vm14, %v969_v10  ;;  %v1177_v32 = vpop.permute.xlu0 %1176  ;;  %vm9002_vm14 = vcmask 786048   ;;  %v606_v23 = vmax.f32 %v508_v6, 0.0  ;;  %v6799_v10 = vld [vmem:[#allocation2 + $0x82] ss:$2 sm:$0xff] }
 0x1a3   :  { %1181 = vst.msk [vmem:[#allocation3 + $0x48] sm:$0x3] %vm8938_vm0, %v1177_v32 }
 0x1a4   :  { %v420_v24 = vpop.f32.mrf.mxu0  ;;  %676 = vst.msk [vmem:[#allocation2 + $0x1b0] sm:$0xff] %vm8952_vm2, %v606_v23 }
 0x1a5   :  { %v421_v58 = vadd.f32 %v6380_v63, %v420_v24 }
 0x1a7   :  { %1615 = vrot.lane.b32.xlu2 %v1612_v45, %s5728_s24  ;;  %1398 = vrot.lane.b32.xlu1 %v1395_v46, %s5731_s10  ;;  %v577_v1 = vmax.f32 %v421_v58, 0.0  ;;  %v510_v16 = vpop.f32.mrf.mxu2  ;;  %v517_v58 = vadd.f32 %v6380_v63, %v516_v36  ;;  %v1684_v36 = vld [vmem:[#allocation2 + $0x95] ss:$2 sm:$0xff] }
 0x1a8   :  { %1364 = vrot.lane.b32.xlu0 %v1361_v20, %s5729_s27  ;;  %v511_v32 = vadd.f32 %v6380_v63, %v510_v16  ;;  %v1677_v20 = vrot.slane %v1673_v14, 6 }
 0x1a9   :  { %v6740_v52 = vpop.permute.xlu2 %1457  ;;  %v985_v15 = vpop.permute.xlu1 %984  ;;  %647 = vst.msk [vmem:[#allocation2 + $0xc8] sm:$0xff] %vm8952_vm2, %v577_v1  ;;  %v1396_v1 = vrot.slane %v1392_v38, 7 }
 0x1aa   :  { %989 = vst.msk [vmem:[#allocation3 + $0x30] sm:$0x1] %vm9001_vm11, %v985_v15  ;;  %v983_v51 = vpop.permute.xlu0 %982  ;;  %vm9004_vm11 = vcmask 123904   ;;  %v607_v15 = vmax.f32 %v511_v32, 0.0 }
 0x1ab   :  { %988 = vst.msk [vmem:[#allocation3 + $0x10] sm:$0xff] %vm9002_vm14, %v983_v51  ;;  %vm9006_vm14 = vcmask 910080   ;;  %v1671_v51 = vld [vmem:[#allocation2 + $0x94] ss:$2 sm:$0xff]  ;;  %v1397_v23 = vsel %vm8931_vm5, %v1395_v46, %v1396_v1 }
 0x1ac   :  { %1002 = vst.msk [vmem:[#allocation3 + $0x10] sm:$0xff] %vm9003_vm8, %v6636_v53  ;;  %v1341_v53 = vld [vmem:[#allocation2 + $0x8e] ss:$2 sm:$0x1]  ;;  %vm9005_vm8 = vcmask 1048448   ;;  %v423_v7 = vpop.f32.mrf.mxu0  ;;  %v519_v56 = vpop.f32.mrf.mxu3 }
 0x1ad   :  { %1418 = vst.msk [vmem:[#allocation3 + $0x58] sm:$0x3] %vm9004_vm11, %v1414_v2  ;;  %v1345_v5 = vrot.slane %v1341_v53, 7  ;;  %v424_v8 = vadd.f32 %v6380_v63, %v423_v7  ;;  %vm9007_vm11 = vcmask 392449   ;;  %v1598_v2 = vrot.slane %v1594_v48, 6 }
 0x1ae   :  { %677 = vst.msk [vmem:[#allocation2 + $0x1b8] sm:$0xff] %vm8952_vm2, %v607_v15  ;;  %v1609_v46 = vld [vmem:[#allocation2 + $0x90] ss:$2 sm:$0x1]  ;;  %v520_v40 = vadd.f32 %v6380_v63, %v519_v56  ;;  %v1706_v15 = vrot.slane %v1701_v34, 6 }
 0x1af   :  { %1852 = vrot.lane.b32.xlu2 %v1849_v61, %s5727_s21  ;;  %1585 = vrot.lane.b32.xlu1 %v1582_v62, %s5727_s21  ;;  %v1346_v11 = vsel %vm8931_vm5, %v1344_v60, %v1345_v5  ;;  %v578_v19 = vmax.f32 %v424_v8, 0.0  ;;  %v1583_v60 = vrot.slane %v1579_v18, 6  ;;  %v1951_v5 = vrot.slane %v1947_v55, 5  ;;  %v1948_v8 = vld [vmem:[#allocation2 + $0xa6] ss:$2 sm:$0x1] }
 0x1b0   :  { %1600 = vrot.lane.b32.xlu0 %v1597_v9, %s5726_s20  ;;  %v1829_v18 = vld [vmem:[#allocation2 + $0x8f] ss:$2 sm:$0x1]  ;;  %v1613_v29 = vrot.slane %v1609_v46, 6 }
 0x1b1   :  { %v1192_v39 = vpop.permute.xlu2 %1191  ;;  %v1011_v3 = vpop.permute.xlu1 %1010  ;;  %648 = vst.msk [vmem:[#allocation2 + $0xd0] sm:$0xff] %vm8952_vm2, %v578_v19  ;;  %v1639_v32 = vld [vmem:[#allocation2 + $0x92] ss:$2 sm:$0x1] }
 0x1b2   :  { %1196 = vst.msk [vmem:[#allocation3 + $0x48] sm:$0x3] %vm8942_vm12, %v1192_v39  ;;  %v999_v43 = vpop.permute.xlu0 %998  ;;  %v1379_v39 = vrot.slane %v1375_v50, 7  ;;  %v1686_v1 = vld [vmem:[#allocation2 + $0xa5] ss:$2 sm:$0x1] }
 0x1b3   :  { %1016 = vst.msk [vmem:[#allocation3 + $0x10] sm:$0xff] %vm9005_vm8, %v1011_v3  ;;  %vm9008_vm8 = vcmask 523649   ;;  %v609_v3 = vmax.f32 %v517_v58, 0.0  ;;  %v1689_v58 = vrot.slane %v1684_v36, 6 }
 0x1b4   :  { %1003 = vst.msk [vmem:[#allocation3 + $0x30] sm:$0x1] %vm9006_vm14, %v999_v43  ;;  %v426_v30 = vpop.f32.mrf.mxu0  ;;  %vm9009_vm14 = vcmask 654849   ;;  %v1380_v22 = vsel %vm8931_vm5, %v1378_v25, %v1379_v39  ;;  %vm9022_vm5 = vmmov %vm9020_vm3  ;;  %v1863_v46 = vld [vmem:[#allocation2 + $0x91] ss:$2 sm:$0x1] }
 0x1b5   :  { %1017 = vst.msk [vmem:[#allocation3 + $0x30] sm:$0x1] %vm8928_vm7, %v6673_v37  ;;  %v427_v44 = vadd.f32 %v6380_v63, %v426_v30 }
 0x1b6   :  { %679 = vst.msk [vmem:[#allocation2 + $0x1c8] sm:$0xff] %vm8952_vm2, %v609_v3  ;;  %v1720_v3 = vld [vmem:[#allocation2 + $0xa7] ss:$2 sm:$0x1] }
 0x1b7   :  { %1349 = vrot.lane.b32.xlu2 %v1346_v11, %s5728_s24  ;;  %1630 = vrot.lane.b32.xlu1 %v1627_v35, %s5729_s27  ;;  %v579_v33 = vmax.f32 %v427_v44, 0.0  ;;  %v1654_v44 = vld [vmem:[#allocation2 + $0x93] ss:$2 sm:$0xff] }
 0x1b8   :  { %1835 = vrot.lane.b32.xlu0 %v1832_v17, %s5725_s17  ;;  %v513_v42 = vpop.f32.mrf.mxu2  ;;  %v1659_v48 = vrot.slane %v1654_v44, 6 }
 0x1b9   :  { %v6795_v37 = vpop.permute.xlu2 %1236  ;;  %v1190_v13 = vpop.permute.xlu1 %1189  ;;  %649 = vst.msk [vmem:[#allocation2 + $0xd8] sm:$0xff] %vm8952_vm2, %v579_v33  ;;  %v514_v7 = vadd.f32 %v6380_v63, %v513_v42  ;;  %v1656_v33 = vld [vmem:[#allocation2 + $0xa3] ss:$2 sm:$0x1]  ;;  %v1690_v42 = vrot.slane %v1686_v1, 6 }
 0x1ba   :  { %1195 = vst.msk [vmem:[#allocation3 + $0x28] sm:$0xfe] %vm9007_vm11, %v1190_v13  ;;  %v1205_v28 = vpop.permute.xlu0 %1204  ;;  %v4485_v49 = vld [vmem:[#allocation3 + $0x10] sm:$0xff]  ;;  %vm9010_vm11 = vcmask 1041408  }
 0x1bb   :  { %1210 = vst.msk [vmem:[#allocation3 + $0x28] sm:$0xfe] %vm9008_vm8, %v1205_v28  ;;  %4743 = vmatmul.f32.vlgmr.msrb.gmra.mxu3 %v4485_v49  ;;  %v1810_v41 = vsel %vm9010_vm11, %v1808_v21, %v1809_v12  ;;  %vm9011_vm7 = vmmov %vm9010_vm11  ;;  %vm9012_vm8 = vcmask 124928   ;;  %v1676_v21 = vrot.slane %v1671_v51, 6  ;;  %v608_v59 = vmax.f32 %v514_v7, 0.0 }
 0x1bc   :  { %1225 = vst.msk [vmem:[#allocation3 + $0x28] sm:$0xfe] %vm9009_vm14, %v6713_v4  ;;  %v1584_v31 = vsel %vm9011_vm7, %v1582_v62, %v1583_v60  ;;  %v1642_v4 = vrot.slane %v6799_v10, 6  ;;  %vm9013_vm7 = vcmask 786049   ;;  %vm9014_vm14 = vmmov %vm9010_vm11  ;;  %v429_v43 = vpop.f32.mrf.mxu0  ;;  %v1833_v49 = vrot.slane %v1829_v18, 5 }
 0x1bd   :  { %1814 = vst.msk [vmem:[#allocation3 + $0x78] sm:$0x7] %vm9012_vm8, %v1810_v41  ;;  %v1678_v53 = vsel %vm9014_vm14, %v1676_v21, %v1677_v20  ;;  %v430_v6 = vadd.f32 %v6380_v63, %v429_v43  ;;  %vm9015_vm11 = vmmov %vm9012_vm8  ;;  %v1624_v13 = vld [vmem:[#allocation2 + $0x91] ss:$2 sm:$0x1]  ;;  %v610_v12 = vmax.f32 %v520_v40, 0.0 }
 0x1be   :  { %1682 = vst.msk [vmem:[#allocation3 + $0x70] sm:$0x7] %vm9015_vm11, %v1678_v53  ;;  %vm9016_vm8 = vmmov %vm9014_vm14  ;;  %vm9018_vm14 = vcmask 130051   ;;  %vm8934_vm11 = vcmask 261250   ;;  %v1628_v28 = vrot.slane %v1624_v13, 6  ;;  %v1643_v41 = vrot.slane %v1639_v32, 6 }
 0x1bf   :  { %1587 = vrot.lane.b32.xlu2 %v1584_v31, %s5727_s21  ;;  %1366 = vrot.lane.b32.xlu1 %v1363_v47, %s5729_s27  ;;  %v1599_v11 = vsel %vm9016_vm8, %v1597_v9, %v1598_v2  ;;  %v580_v19 = vmax.f32 %v430_v6, 0.0  ;;  %1956 = vst.msk [vmem:[#allocation3 + $0x68] sm:$0xf8] %vm9018_vm14, %v1951_v5  ;;  %v1952_v9 = vrot.slane %v1948_v8, 5  ;;  %vm1463_vm8 = vcmask 392450   ;;  %v522_v31 = vpop.f32.mrf.mxu3 }
 0x1c0   :  { %1645 = vrot.lane.b32.xlu0 %v1642_v4, %s5730_s30  ;;  %678 = vst.msk [vmem:[#allocation2 + $0x1c0] sm:$0xff] %vm8952_vm2, %v608_v59  ;;  %vm9019_vm14 = vcmask 1042432   ;;  %v1629_v63 = vsel %vm9020_vm3, %v1627_v35, %v1628_v28  ;;  %vm1497_vm3 = vcmask 654850   ;;  %v1644_v50 = vsel %vm9022_vm5, %v1642_v4, %v1643_v41  ;;  %v1718_v10 = vld [vmem:[#allocation2 + $0x97] ss:$2 sm:$0xff] }
 0x1c1   :  { %v6820_v24 = vpop.permute.xlu2 %1476  ;;  %v1235_v57 = vpop.permute.xlu1 %1234  ;;  %650 = vst.msk [vmem:[#allocation2 + $0xe0] sm:$0xff] %vm8952_vm2, %v580_v19  ;;  %v1953_v16 = vsel %vm9019_vm14, %v1951_v5, %v1952_v9  ;;  %vm9021_vm9 = vmmov %vm9019_vm14  ;;  %vm9023_vm14 = vcmask 125952   ;;  %v1660_v20 = vrot.slane %v1656_v33, 6  ;;  %v1703_v53 = vld [vmem:[#allocation2 + $0xa6] ss:$2 sm:$0x1]  ;;  %v1691_v19 = vsel %vm9022_vm5, %v1689_v58, %v1690_v42 }
 0x1c2   :  { %1240 = vst.msk [vmem:[#allocation3 + $0x28] sm:$0xfe] %vm9013_vm7, %v1235_v57  ;;  %v1250_v62 = vpop.permute.xlu0 %1249  ;;  %vm9017_vm7 = vcmask 130050   ;;  %v1834_v30 = vsel %vm9021_vm9, %v1832_v17, %v1833_v49  ;;  %vm8935_vm9 = vcmask 786050   ;;  %v1723_v57 = vrot.slane %v1718_v10, 6 }
 0x1c3   :  { %1255 = vst.msk [vmem:[#allocation3 + $0x28] sm:$0xfe] %vm8946_vm6, %v1250_v62  ;;  %v1661_v2 = vsel %vm9022_vm5, %v1659_v48, %v1660_v20  ;;  %v1707_v6 = vrot.slane %v1703_v53, 6  ;;  %v1862_v59 = vld [vmem:[#allocation2 + $0x81] ss:$2 sm:$0xff]  ;;  %v1867_v40 = vrot.slane %v1863_v46, 5 }
 0x1c4   :  { %1681 = vst.msk [vmem:[#allocation3 + $0x50] sm:$0xfc] %vm9017_vm7, %v1676_v21  ;;  %vm8932_vm7 = vcmask 523650   ;;  %v1735_v32 = vld [vmem:[#allocation2 + $0xa8] ss:$2 sm:$0xff] }
 0x1c5   :  { %680 = vst.msk [vmem:[#allocation2 + $0x1d0] sm:$0xff] %vm8952_vm2, %v610_v12  ;;  %v1740_v41 = vrot.slane %v1735_v32, 6  ;;  %v1771_v33 = vld [vmem:[#allocation2 + $0xba] ss:$2 sm:$0x1] }
 0x1c6   :  { %1957 = vst.msk [vmem:[#allocation3 + $0x88] sm:$0xf] %vm9023_vm14, %v1953_v16  ;;  %vm9025_vm14 = vcmask 648704   ;;  %v2210_v10 = vld [vmem:[#allocation2 + $0xa8] ss:$2 sm:$0xff] }
 0x1c7   :  { %1400 = vrot.lane.b32.xlu2 %v1397_v23, %s5731_s10  ;;  %1602 = vrot.lane.b32.xlu1 %v1599_v11, %s5726_s20  ;;  %v525_v4 = vpop.f32.mrf.mxu3  ;;  %v1724_v23 = vrot.slane %v1720_v3, 6  ;;  %v1788_v3 = vld [vmem:[#allocation2 + $0xbb] ss:$2 sm:$0x1] }
 0x1c8   :  { %1383 = vrot.lane.b32.xlu0 %v1380_v22, %s5730_s30  ;;  %v6895_v39 = vld [vmem:[#allocation2 + $0xd6] ss:$2 sm:$0xff] }
 0x1c9   :  { %v1267_v60 = vpop.permute.xlu2 %1266  ;;  %v1475_v27 = vpop.permute.xlu1 %1474  ;;  %v2203_v8 = vrot.slane %v6895_v39, 5 }
 0x1ca   :  { %1272 = vst.msk [vmem:[#allocation3 + $0x28] sm:$0xfe] %vm8945_vm15, %v1267_v60  ;;  %v1441_v25 = vpop.permute.xlu0 %1440 }
 0x1cb   :  { %1447 = vst.msk [vmem:[#allocation3 + $0x40] sm:$0xfc] %vm8934_vm11, %v1441_v25 }
 0x1cc   :  { %1464 = vst.msk [vmem:[#allocation3 + $0x40] sm:$0xfc] %vm1463_vm8, %v6740_v52  ;;  %v1614_v52 = vsel %vm9022_vm5, %v1612_v45, %v1613_v29  ;;  %v6873_v45 = vld [vmem:[%s8893_s2] ss:$0 sm:$0xff] }
 0x1cd   :  { %1481 = vst.msk [vmem:[#allocation3 + $0x40] sm:$0xfc] %vm8932_vm7, %v1475_v27  ;;  %vm9024_vm7 = vcmask 517504   ;;  %v523_v38 = vadd.f32 %v6873_v45, %v522_v31  ;;  %v526_v55 = vadd.f32 %v6873_v45, %v525_v4  ;;  %v1866_v27 = vrot.slane %v1862_v59, 5 }
 0x1ce   :  { %v1792_v59 = vrot.slane %v1788_v3, 6  ;;  %v1958_v3 = vld [vmem:[#allocation2 + $0x97] ss:$2 sm:$0xff] }
 0x1cf   :  { %1632 = vrot.lane.b32.xlu2 %v1629_v63, %s5729_s27  ;;  %1837 = vrot.lane.b32.xlu1 %v1834_v30, %s5725_s17  ;;  %v611_v47 = vmax.f32 %v523_v38, 0.0  ;;  %v612_v62 = vmax.f32 %v526_v55, 0.0  ;;  %v528_v7 = vpop.f32.mrf.mxu3 }
 0x1d0   :  { %1617 = vrot.lane.b32.xlu0 %v1614_v52, %s5728_s24  ;;  %v529_v11 = vadd.f32 %v6873_v45, %v528_v7  ;;  %v1769_v52 = vld [vmem:[#allocation2 + $0xaa] ss:$2 sm:$0xff] }
 0x1d1   :  { %v1509_v0 = vpop.permute.xlu2 %1508  ;;  %v1207_v54 = vpop.permute.xlu1 %1206  ;;  %v4488_v35 = vld [vmem:[#allocation3 + $0x28] sm:$0xff]  ;;  %681 = vst.msk [vmem:[#allocation2 + $0x1d8] sm:$0xff] %vm8952_vm2, %v611_v47  ;;  %v1774_v44 = vrot.slane %v1769_v52, 6 }
 0x1d2   :  { %1211 = vst.msk [vmem:[#allocation3 + $0x48] sm:$0x3] %vm9024_vm7, %v1207_v54  ;;  %v1492_v17 = vpop.permute.xlu0 %1491  ;;  %4693 = vmatmul.f32.gmra.mxu2 %v4488_v35  ;;  %vm1448_vm7 = vcmask 256128   ;;  %v613_v18 = vmax.f32 %v529_v11, 0.0  ;;  %v6929_v54 = vld [vmem:[#allocation2 + $0xa9] ss:$2 sm:$0xff] }
 0x1d3   :  { %1498 = vst.msk [vmem:[#allocation3 + $0x40] sm:$0xfc] %vm1497_vm3, %v1492_v17  ;;  %v2066_v17 = vld [vmem:[#allocation2 + $0xbe] ss:$2 sm:$0xff]  ;;  %v1757_v31 = vrot.slane %v6929_v54, 6  ;;  %v432_v1 = vpop.f32.mrf.mxu0 }
 0x1d4   :  { %1515 = vst.msk [vmem:[#allocation3 + $0x40] sm:$0xfc] %vm8935_vm9, %v1509_v0  ;;  %vm9027_vm9 = vcmask 130051   ;;  %v2071_v38 = vrot.slane %v2066_v17, 5 }
 0x1d5   :  { %682 = vst.msk [vmem:[#allocation2 + $0x1e0] sm:$0xff] %vm8952_vm2, %v612_v62 }
 0x1d6   :  { %2208 = vst.msk [vmem:[#allocation3 + $0x78] sm:$0xf8] %vm9027_vm9, %v2203_v8  ;;  %vm9031_vm9 = vcmask 261249  }
 0x1d7   :  { %1662 = vrot.lane.b32.xlu2 %v1659_v48, %s5731_s10  ;;  %1647 = vrot.lane.b32.xlu1 %v1644_v50, %s5730_s30  ;;  %683 = vst.msk [vmem:[#allocation2 + $0x1e8] sm:$0xff] %vm8952_vm2, %v613_v18  ;;  %v531_v25 = vpop.f32.mrf.mxu3 }
 0x1d8   :  { %1709 = vrot.lane.b32.xlu0 %v1706_v15, %s5727_s21  ;;  %v532_v49 = vadd.f32 %v6873_v45, %v531_v25 }
 0x1d9   :  { %v6884_v51 = vpop.permute.xlu2 %1330  ;;  %v1443_v14 = vpop.permute.xlu1 %1442 }
 0x1da   :  { %1449 = vst.msk [vmem:[#allocation3 + $0x60] sm:$0x7] %vm1448_vm7, %v1443_v14  ;;  %v1222_v21 = vpop.permute.xlu0 %1221  ;;  %v614_v29 = vmax.f32 %v532_v49, 0.0 }
 0x1db   :  { %1226 = vst.msk [vmem:[#allocation3 + $0x48] sm:$0x3] %vm9025_vm14, %v1222_v21  ;;  %vm1465_vm14 = vcmask 387328   ;;  %v1786_v21 = vld [vmem:[#allocation2 + $0xab] ss:$2 sm:$0xff] }
 0x1dc   :  { %1241 = vst.msk [vmem:[#allocation3 + $0x48] sm:$0x3] %vm8933_vm10, %v6795_v37  ;;  %vm8937_vm10 = vcmask 518528   ;;  %v1791_v53 = vrot.slane %v1786_v21, 6 }
 0x1dd   :  { %684 = vst.msk [vmem:[#allocation2 + $0x1f0] sm:$0xff] %vm8952_vm2, %v614_v29 }
 0x1df   :  { %1726 = vrot.lane.b32.xlu2 %v1723_v57, %s5726_s20  ;;  %1692 = vrot.lane.b32.xlu1 %v1689_v58, %s5725_s17  ;;  %v534_v35 = vpop.f32.mrf.mxu3  ;;  %v1775_v58 = vrot.slane %v1771_v33, 6 }
 0x1e0   :  { %1664 = vrot.lane.b32.xlu0 %v1661_v2, %s5731_s10  ;;  %v535_v26 = vadd.f32 %v6873_v45, %v534_v35  ;;  %v433_v2 = vadd.f32 %v6873_v45, %v432_v1 }
 0x1e1   :  { %v1571_v43 = vpop.permute.xlu2 %1570  ;;  %v1252_v37 = vpop.permute.xlu1 %1251 }
 0x1e2   :  { %1576 = vst.msk [vmem:[#allocation3 + $0x48] sm:$0xfc] %vm8934_vm11, %v1571_v43  ;;  %v1460_v5 = vpop.permute.xlu0 %1459  ;;  %vm9026_vm11 = vmmov %vm9022_vm5  ;;  %v615_v34 = vmax.f32 %v535_v26, 0.0 }
 0x1e3   :  { %1256 = vst.msk [vmem:[#allocation3 + $0x48] sm:$0x3] %vm8936_vm13, %v1252_v37  ;;  %v1708_v22 = vsel %vm9026_vm11, %v1706_v15, %v1707_v6  ;;  %vm9028_vm13 = vmmov %vm9022_vm5  ;;  %vm9032_vm5 = vcmask 392449   ;;  %v1737_v15 = vld [vmem:[#allocation2 + $0xb8] ss:$2 sm:$0x1] }
 0x1e4   :  { %1466 = vst.msk [vmem:[#allocation3 + $0x60] sm:$0x7] %vm1465_vm14, %v1460_v5  ;;  %v1725_v13 = vsel %vm9028_vm13, %v1723_v57, %v1724_v23  ;;  %vm9029_vm13 = vcmask 1042432   ;;  %v4099_v48 = vld [vmem:[#allocation2 + $0x1e7] ss:$2 sm:$0xff]  ;;  %v1741_v4 = vrot.slane %v1737_v15, 6 }
 0x1e5   :  { %1483 = vst.msk [vmem:[#allocation3 + $0x60] sm:$0x7] %vm8937_vm10, %v6820_v24  ;;  %vm8939_vm10 = vcmask 649728   ;;  %v1846_v24 = vld [vmem:[#allocation2 + $0x90] ss:$2 sm:$0x1]  ;;  %v1868_v12 = vsel %vm9029_vm13, %v1866_v27, %v1867_v40  ;;  %vm9030_vm11 = vmmov %vm9029_vm13 }
 0x1e6   :  { %v1850_v28 = vrot.slane %v1846_v24, 5  ;;  %vm9033_vm13 = vcmask 523649   ;;  %v4101_v47 = vld [vmem:[#allocation2 + $0x1f7] ss:$2 sm:$0x1]  ;;  %4102 = vst.msk [vmem:[#allocation3 + $0x138] sm:$0xff] %vm8952_vm2, %v4099_v48 }
 0x1e7   :  { %1694 = vrot.lane.b32.xlu2 %v1691_v19, %s5725_s17  ;;  %1711 = vrot.lane.b32.xlu1 %v1708_v22, %s5727_s21  ;;  %685 = vst.msk [vmem:[#allocation2 + $0x1f8] sm:$0xff] %vm8952_vm2, %v615_v34  ;;  %v537_v20 = vpop.f32.mrf.mxu3  ;;  %v2211_v57 = vld [vmem:[#allocation2 + $0xb8] ss:$2 sm:$0x1]  ;;  %v2215_v37 = vrot.slane %v2210_v10, 4  ;;  %v581_v6 = vmax.f32 %v433_v2, 0.0 }
 0x1e8   :  { %1728 = vrot.lane.b32.xlu0 %v1725_v13, %s5726_s20  ;;  %v1851_v16 = vsel %vm9030_vm11, %v1849_v61, %v1850_v28  ;;  %v2068_v61 = vld [vmem:[#allocation2 + $0xce] ss:$2 sm:$0x1]  ;;  %vm1531_vm11 = vcmask 917250   ;;  %v538_v62 = vadd.f32 %v6873_v45, %v537_v20  ;;  %v2216_v5 = vrot.slane %v2211_v57, 4  ;;  %v67_v57 = vld [vmem:[%s8891_s0 + $0x110] sm:$0xff] }
 0x1e9   :  { %v1299_v56 = vpop.permute.xlu2 %1298  ;;  %v1494_v9 = vpop.permute.xlu1 %1493  ;;  %v2072_v50 = vrot.slane %v2068_v61, 5  ;;  %v1754_v23 = vld [vmem:[#allocation2 + $0xb9] ss:$2 sm:$0x1]  ;;  %651 = vst.msk [vmem:[#allocation2 + $0xe8] sm:$0xff] %vm8952_vm2, %v581_v6  ;;  %5602 = vmatmul.msk.f32.gmra.mxu0 %vm116_vm1, %v67_v57 }
 0x1ea   :  { %1303 = vst.msk [vmem:[#allocation3 + $0x50] sm:$0x3] %vm8938_vm0, %v1299_v56  ;;  %v1314_v60 = vpop.permute.xlu0 %1313  ;;  %v616_v43 = vmax.f32 %v538_v62, 0.0  ;;  %vm9037_vm0 = vcmask 1041408   ;;  %v1758_v46 = vrot.slane %v1754_v23, 6 }
 0x1eb   :  { %1500 = vst.msk [vmem:[#allocation3 + $0x60] sm:$0x7] %vm8939_vm10, %v1494_v9  ;;  %v1742_v42 = vsel %vm9037_vm0, %v1740_v41, %v1741_v4  ;;  %vm9038_vm10 = vcmask 130051   ;;  %v1879_v56 = vld [vmem:[#allocation2 + $0x82] ss:$2 sm:$0xff] }
 0x1ec   :  { %2076 = vst.msk [vmem:[#allocation3 + $0x70] sm:$0xf8] %vm9038_vm10, %v2071_v38  ;;  %vm9040_vm10 = vcmask 517504   ;;  %v1883_v49 = vrot.slane %v1879_v56, 5  ;;  %v1930_v10 = vld [vmem:[#allocation2 + $0x95] ss:$2 sm:$0xff] }
 0x1ed   :  { %686 = vst.msk [vmem:[#allocation2 + $0x200] sm:$0xff] %vm8952_vm2, %v616_v43  ;;  %v1934_v62 = vrot.slane %v1930_v10, 5  ;;  %v1959_v43 = vld [vmem:[#allocation2 + $0xa7] ss:$2 sm:$0x1] }
 0x1ee   :  { %v1963_v23 = vrot.slane %v1959_v43, 5 }
 0x1ef   :  { %1871 = vrot.lane.b32.xlu2 %v1868_v12, %s5726_s20  ;;  %1869 = vrot.lane.b32.xlu1 %v1866_v27, %s5726_s20  ;;  %v540_v24 = vpop.f32.mrf.mxu3  ;;  %v1896_v12 = vld [vmem:[#allocation2 + $0x93] ss:$2 sm:$0xff] }
 0x1f0   :  { %1854 = vrot.lane.b32.xlu0 %v1851_v16, %s5727_s21  ;;  %v541_v9 = vadd.f32 %v6873_v45, %v540_v24  ;;  %v1880_v16 = vld [vmem:[#allocation2 + $0x92] ss:$2 sm:$0x1]  ;;  %v1900_v17 = vrot.slane %v1896_v12, 5  ;;  %v1988_v12 = vld [vmem:[#allocation2 + $0xa9] ss:$2 sm:$0xff] }
 0x1f1   :  { %v6926_v63 = vpop.permute.xlu2 %1527  ;;  %v1297_v30 = vpop.permute.xlu1 %1296  ;;  %v1884_v54 = vrot.slane %v1880_v16, 5 }
 0x1f2   :  { %1302 = vst.msk [vmem:[#allocation3 + $0x30] sm:$0xfe] %vm9031_vm9, %v1297_v30  ;;  %v1543_v0 = vpop.permute.xlu0 %1542  ;;  %vm8940_vm9 = vcmask 1048450   ;;  %v617_v40 = vmax.f32 %v541_v9, 0.0 }
 0x1f3   :  { %1319 = vst.msk [vmem:[#allocation3 + $0x30] sm:$0xfe] %vm9032_vm5, %v1314_v60  ;;  %vm9034_vm5 = vcmask 122880   ;;  %v435_v60 = vpop.f32.mrf.mxu0  ;;  %v1897_v30 = vld [vmem:[#allocation2 + $0xa3] ss:$2 sm:$0x1] }
 0x1f4   :  { %1336 = vst.msk [vmem:[#allocation3 + $0x30] sm:$0xfe] %vm9033_vm13, %v6884_v51  ;;  %vm9035_vm13 = vcmask 1042432   ;;  %v436_v27 = vadd.f32 %v6873_v45, %v435_v60  ;;  %v1901_v26 = vrot.slane %v1897_v30, 5 }
 0x1f5   :  { %4103 = vst.msk [vmem:[#allocation3 + $0x158] sm:$0x1] %vm9034_vm5, %v4101_v47  ;;  %v2073_v55 = vsel %vm9035_vm13, %v2071_v38, %v2072_v50  ;;  %vm9036_vm5 = vcmask 125952   ;;  %vm2214_vm13 = vcmask 1043456   ;;  %v1913_v47 = vld [vmem:[#allocation2 + $0x94] ss:$2 sm:$0xff] }
 0x1f6   :  { %2077 = vst.msk [vmem:[#allocation3 + $0x90] sm:$0xf] %vm9036_vm5, %v2073_v55  ;;  %v2217_v19 = vsel %vm2214_vm13, %v2215_v37, %v2216_v5  ;;  %v582_v29 = vmax.f32 %v436_v27, 0.0  ;;  %v1914_v50 = vld [vmem:[#allocation2 + $0xa4] ss:$2 sm:$0x1] }
 0x1f7   :  { %1777 = vrot.lane.b32.xlu2 %v1774_v44, %s5730_s30  ;;  %1743 = vrot.lane.b32.xlu1 %v1740_v41, %s5728_s24  ;;  %687 = vst.msk [vmem:[#allocation2 + $0x208] sm:$0xff] %vm8952_vm2, %v617_v40  ;;  %v543_v35 = vpop.f32.mrf.mxu3  ;;  %v1918_v21 = vrot.slane %v1914_v50, 5  ;;  %v1974_v9 = vld [vmem:[#allocation2 + $0xb8] ss:$2 sm:$0x1] }
 0x1f8   :  { %1760 = vrot.lane.b32.xlu0 %v1757_v31, %s5729_s27  ;;  %652 = vst.msk [vmem:[#allocation2 + $0xf0] sm:$0xff] %vm8952_vm2, %v582_v29  ;;  %v544_v61 = vadd.f32 %v6873_v45, %v543_v35  ;;  %v2200_v29 = vld [vmem:[#allocation2 + $0xe6] ss:$2 sm:$0x1] }
 0x1f9   :  { %v6943_v51 = vpop.permute.xlu2 %1381  ;;  %v1526_v14 = vpop.permute.xlu1 %1525  ;;  %v2204_v16 = vrot.slane %v2200_v29, 5  ;;  %v1989_v35 = vld [vmem:[#allocation2 + $0xb9] ss:$2 sm:$0x1] }
 0x1fa   :  { %1532 = vst.msk [vmem:[#allocation3 + $0x40] sm:$0xfc] %vm1531_vm11, %v1526_v14  ;;  %v1269_v36 = vpop.permute.xlu0 %1268  ;;  %v1917_v14 = vrot.slane %v1913_v47, 5 }
 0x1fb   :  { %1549 = vst.msk [vmem:[#allocation3 + $0x40] sm:$0xfc] %vm8940_vm9, %v1543_v0  ;;  %vm8947_vm9 = vcmask 130052  }
 0x1fc   :  { %1273 = vst.msk [vmem:[#allocation3 + $0x48] sm:$0x3] %vm8941_vm4, %v1269_v36  ;;  %vm9039_vm4 = vmmov %vm9037_vm0  ;;  %vm2222_vm0 = vcmask 126976  }
 0x1fd   :  { %v1776_v7 = vsel %vm9039_vm4, %v1774_v44, %v1775_v58  ;;  %2221 = vst.msk [vmem:[#allocation3 + $0x80] sm:$0xf0] %vm8947_vm9, %v2215_v37  ;;  %v1793_v25 = vsel %vm9039_vm4, %v1791_v53, %v1792_v59  ;;  %vm9041_vm5 = vmmov %vm9039_vm4  ;;  %vm1533_vm4 = vcmask 912128   ;;  %v438_v44 = vpop.f32.mrf.mxu0 }
 0x1fe   :  { %2223 = vst.msk [vmem:[#allocation3 + $0xa0] sm:$0x1f] %vm2222_vm0, %v2217_v19  ;;  %v1759_v28 = vsel %vm9041_vm5, %v1757_v31, %v1758_v46  ;;  %vm8944_vm5 = vcmask 1043328   ;;  %v439_v41 = vadd.f32 %v6873_v45, %v438_v44  ;;  %v618_v31 = vmax.f32 %v544_v61, 0.0  ;;  %v1973_v46 = vld [vmem:[#allocation2 + $0xa8] ss:$2 sm:$0xff] }
 0x1ff   :  { %1745 = vrot.lane.b32.xlu2 %v1742_v42, %s5728_s24  ;;  %1794 = vrot.lane.b32.xlu1 %v1791_v53, %s5731_s10  ;;  %v1931_v53 = vld [vmem:[#allocation2 + $0xa5] ss:$2 sm:$0x1]  ;;  %v1977_v40 = vrot.slane %v1973_v46, 5 }
 0x200   :  { %1779 = vrot.lane.b32.xlu0 %v1776_v7, %s5730_s30  ;;  %v583_v38 = vmax.f32 %v439_v41, 0.0  ;;  %688 = vst.msk [vmem:[#allocation2 + $0x210] sm:$0xff] %vm8952_vm2, %v618_v31  ;;  %v546_v36 = vpop.f32.mrf.mxu3  ;;  %v1935_v6 = vrot.slane %v1931_v53, 5  ;;  %v1962_v7 = vrot.slane %v1958_v3, 5  ;;  %v1993_v31 = vrot.slane %v1989_v35, 5 }
 0x201   :  { %v6961_v11 = vpop.permute.xlu2 %1615  ;;  %v1316_v18 = vpop.permute.xlu1 %1315  ;;  %v547_v20 = vadd.f32 %v6873_v45, %v546_v36  ;;  %v2344_v44 = vld [vmem:[#allocation2 + $0xd0] ss:$2 sm:$0x1]  ;;  %v2132_v35 = vld [vmem:[#allocation2 + $0xe2] ss:$2 sm:$0x1] }
 0x202   :  { %1320 = vst.msk [vmem:[#allocation3 + $0x50] sm:$0x3] %vm8942_vm12, %v1316_v18  ;;  %v1333_v22 = vpop.permute.xlu0 %1332  ;;  %v4491_v13 = vld [vmem:[#allocation3 + $0x40] sm:$0xff]  ;;  %vm9042_vm12 = vcmask 1042432  }
 0x203   :  { %1337 = vst.msk [vmem:[#allocation3 + $0x50] sm:$0x3] %vm9040_vm10, %v1333_v22  ;;  %4643 = vmatmul.f32.gmra.mxu1 %v4491_v13  ;;  %vm8943_vm10 = vcmask 780928   ;;  %v1885_v34 = vsel %vm9042_vm12, %v1883_v49, %v1884_v54  ;;  %v619_v1 = vmax.f32 %v547_v20, 0.0  ;;  %v1992_v54 = vrot.slane %v1988_v12, 5 }
 0x204   :  { %653 = vst.msk [vmem:[#allocation2 + $0xf8] sm:$0xff] %vm8952_vm2, %v583_v38  ;;  %v2348_v38 = vrot.slane %v2344_v44, 4  ;;  %v2033_v20 = vld [vmem:[#allocation2 + $0xac] ss:$2 sm:$0xff]  ;;  %v2147_v44 = vld [vmem:[#allocation2 + $0xd3] ss:$2 sm:$0xff] }
 0x205   :  { %v441_v4 = vpop.f32.mrf.mxu0  ;;  %689 = vst.msk [vmem:[#allocation2 + $0x218] sm:$0xff] %vm8952_vm2, %v619_v1  ;;  %v2037_v57 = vrot.slane %v2033_v20, 5  ;;  %v2051_v1 = vld [vmem:[#allocation2 + $0xcd] ss:$2 sm:$0x1] }
 0x206   :  { %v442_v55 = vadd.f32 %v6873_v45, %v441_v4 }
 0x207   :  { %1796 = vrot.lane.b32.xlu2 %v1793_v25, %s5731_s10  ;;  %1762 = vrot.lane.b32.xlu1 %v1759_v28, %s5729_s27 }
 0x208   :  { %1886 = vrot.lane.b32.xlu0 %v1883_v49, %s5728_s24  ;;  %v584_v2 = vmax.f32 %v442_v55, 0.0  ;;  %v549_v19 = vpop.f32.mrf.mxu3  ;;  %v1978_v49 = vrot.slane %v1974_v9, 5  ;;  %v2096_v9 = vld [vmem:[#allocation2 + $0xc0] ss:$2 sm:$0xff] }
 0x209   :  { %v6979_v52 = vpop.permute.xlu2 %1852  ;;  %v1545_v32 = vpop.permute.xlu1 %1544  ;;  %v550_v13 = vadd.f32 %v6873_v45, %v549_v19 }
 0x20a   :  { %v1511_v0 = vpop.permute.xlu0 %1510  ;;  %654 = vst.msk [vmem:[#allocation2 + $0x100] sm:$0xff] %vm8952_vm2, %v584_v2 }
 0x20b   :  { %1517 = vst.msk [vmem:[#allocation3 + $0x60] sm:$0x7] %vm8943_vm10, %v1511_v0  ;;  %vm9043_vm10 = vmmov %vm9042_vm12  ;;  %vm9045_vm12 = vcmask 654849  }
 0x20c   :  { %1534 = vst.msk [vmem:[#allocation3 + $0x60] sm:$0x7] %vm1533_vm4, %v6926_v63  ;;  %v1902_v48 = vsel %vm9043_vm10, %v1900_v17, %v1901_v26  ;;  %v1919_v58 = vsel %vm9043_vm10, %v1917_v14, %v1918_v21  ;;  %v1964_v56 = vsel %vm9043_vm10, %v1962_v7, %v1963_v23  ;;  %v7020_v60 = vld [vmem:[#allocation2 + $0x211] ss:$2 sm:$0xff]  ;;  %v2343_v26 = vld [vmem:[#allocation2 + $0xc0] ss:$2 sm:$0xff] }
 0x20d   :  { %1551 = vst.msk [vmem:[#allocation3 + $0x60] sm:$0x7] %vm8944_vm5, %v1545_v32  ;;  %vm9044_vm5 = vcmask 648704   ;;  %v444_v18 = vpop.f32.mrf.mxu0  ;;  %v4476_v25 = vrot.slane %v7020_v60, 7  ;;  %v4339_v60 = vld [vmem:[#allocation2 + $0x1f9] ss:$2 sm:$0xff] }
 0x20e   :  { %v445_v22 = vadd.f32 %v6873_v45, %v444_v18  ;;  %v2079_v18 = vld [vmem:[#allocation2 + $0xbf] ss:$2 sm:$0xff] }
 0x20f   :  { %1903 = vrot.lane.b32.xlu2 %v1900_v17, %s5729_s27  ;;  %1888 = vrot.lane.b32.xlu1 %v1885_v34, %s5728_s24  ;;  %v2004_v17 = vld [vmem:[#allocation2 + $0xba] ss:$2 sm:$0x1] }
 0x210   :  { %1905 = vrot.lane.b32.xlu0 %v1902_v48, %s5729_s27  ;;  %v585_v24 = vmax.f32 %v445_v22, 0.0  ;;  %v68_v34 = vld [vmem:[%s8891_s0 + $0x118] sm:$0xff]  ;;  %v2008_v47 = vrot.slane %v2004_v17, 5  ;;  %v2081_v22 = vld [vmem:[#allocation2 + $0xcf] ss:$2 sm:$0x1] }
 0x211   :  { %v1350_v63 = vpop.permute.xlu2 %1349  ;;  %v1348_v15 = vpop.permute.xlu1 %1347  ;;  %5603 = vmatmul.msk.f32.gmra.mxu0 %vm116_vm1, %v68_v34  ;;  %vm9056_vm1 = vcmask 779904   ;;  %v2149_v34 = vld [vmem:[#allocation2 + $0xe3] ss:$2 sm:$0x1] }
 0x212   :  { %1354 = vst.msk [vmem:[#allocation3 + $0x50] sm:$0x3] %vm9044_vm5, %v1350_v63  ;;  %v1573_v33 = vpop.permute.xlu0 %1572  ;;  %vm9046_vm5 = vcmask 786049  }
 0x213   :  { %1353 = vst.msk [vmem:[#allocation3 + $0x30] sm:$0xfe] %vm9045_vm12, %v1348_v15  ;;  %vm9047_vm12 = vmmov %vm9043_vm10  ;;  %vm9050_vm10 = vcmask 130049  }
 0x214   :  { %1577 = vst.msk [vmem:[#allocation3 + $0x68] sm:$0x7] %vm1448_vm7, %v1573_v33  ;;  %v1936_v59 = vsel %vm9047_vm12, %v1934_v62, %v1935_v6  ;;  %vm9049_vm12 = vcmask 523650   ;;  %v2018_v33 = vld [vmem:[#allocation2 + $0xab] ss:$2 sm:$0xff] }
 0x215   :  { %655 = vst.msk [vmem:[#allocation2 + $0x108] sm:$0xff] %vm8952_vm2, %v585_v24  ;;  %v2022_v36 = vrot.slane %v2018_v33, 5  ;;  %v2084_v24 = vrot.slane %v2079_v18, 5 }
 0x216   :  { %4481 = vst.msk [vmem:[#allocation3 + $0x158] sm:$0xfe] %vm9050_vm10, %v4476_v25  ;;  %vm1858_vm10 = vcmask 392451  }
 0x217   :  { %1922 = vrot.lane.b32.xlu2 %v1919_v58, %s5730_s30  ;;  %1920 = vrot.lane.b32.xlu1 %v1917_v14, %s5730_s30  ;;  %v2019_v14 = vld [vmem:[#allocation2 + $0xbb] ss:$2 sm:$0x1]  ;;  %v2034_v58 = vld [vmem:[#allocation2 + $0xbc] ss:$2 sm:$0x1] }
 0x218   :  { %1937 = vrot.lane.b32.xlu0 %v1934_v62, %s5731_s10  ;;  %v2023_v4 = vrot.slane %v2019_v14, 5  ;;  %v2049_v62 = vld [vmem:[#allocation2 + $0xbd] ss:$2 sm:$0xff]  ;;  %v2038_v43 = vrot.slane %v2034_v58, 5 }
 0x219   :  { %v1588_v37 = vpop.permute.xlu2 %1587  ;;  %v1399_v5 = vpop.permute.xlu1 %1398 }
 0x21a   :  { %1592 = vst.msk [vmem:[#allocation3 + $0x68] sm:$0x7] %vm1465_vm14, %v1588_v37  ;;  %v1365_v42 = vpop.permute.xlu0 %1364 }
 0x21b   :  { %1370 = vst.msk [vmem:[#allocation3 + $0x30] sm:$0xfe] %vm9046_vm5, %v1365_v42  ;;  %vm9048_vm5 = vcmask 123904   ;;  %v2055_v42 = vrot.slane %v2051_v1, 5 }
 0x21c   :  { %1387 = vst.msk [vmem:[#allocation3 + $0x30] sm:$0xfe] %vm8946_vm6, %v6943_v51  ;;  %v620_v51 = vmax.f32 %v550_v13, 0.0  ;;  %vm9053_vm6 = vcmask 125952   ;;  %v7072_v6 = vld [vmem:[#allocation2 + $0x100] ss:$2 sm:$0xff] }
 0x21d   :  { %1404 = vst.msk [vmem:[#allocation3 + $0x30] sm:$0xfe] %vm8945_vm15, %v1399_v5  ;;  %v2054_v5 = vrot.slane %v2049_v62, 5  ;;  %v2224_v62 = vld [vmem:[#allocation2 + $0xa9] ss:$2 sm:$0xff] }
 0x21e   :  { %691 = vst.msk [vmem:[#allocation2 + $0x220] sm:$0x3] %vm9048_vm5, %v620_v51  ;;  %vm9051_vm5 = vcmask 1042432  }
 0x21f   :  { %1965 = vrot.lane.b32.xlu2 %v1962_v7, %s5725_s17  ;;  %1939 = vrot.lane.b32.xlu1 %v1936_v59, %s5731_s10  ;;  %v2205_v32 = vsel %vm9051_vm5, %v2203_v8, %v2204_v16  ;;  %vm9052_vm15 = vmmov %vm9051_vm5  ;;  %v2347_v8 = vrot.slane %v2343_v26, 4  ;;  %v2599_v7 = vrot.slane %v7072_v6, 4  ;;  %v2509_v6 = vld [vmem:[#allocation2 + $0xeb] ss:$2 sm:$0xff] }
 0x220   :  { %1967 = vrot.lane.b32.xlu0 %v1964_v56, %s5725_s17  ;;  %v1979_v0 = vsel %vm9052_vm15, %v1977_v40, %v1978_v49  ;;  %2209 = vst.msk [vmem:[#allocation3 + $0x98] sm:$0xf] %vm9053_vm6, %v2205_v32  ;;  %vm9054_vm15 = vcmask 786050   ;;  %vm9055_vm6 = vmmov %vm9051_vm5  ;;  %v2085_v56 = vrot.slane %v2081_v22, 5 }
 0x221   :  { %v7024_v27 = vpop.permute.xlu2 %1400  ;;  %v1586_v45 = vpop.permute.xlu1 %1585  ;;  %v2349_v50 = vsel %vm2214_vm13, %v2347_v8, %v2348_v38  ;;  %2352 = vst.msk [vmem:[#allocation3 + $0x88] sm:$0xf0] %vm8947_vm9, %v2347_v8  ;;  %v1994_v63 = vsel %vm9055_vm6, %v1992_v54, %v1993_v31  ;;  %vm9058_vm6 = vmmov %vm9051_vm5  ;;  %v2136_v8 = vrot.slane %v2132_v35, 5  ;;  %v2152_v31 = vrot.slane %v2147_v44, 5  ;;  %v2164_v38 = vld [vmem:[#allocation2 + $0xd4] ss:$2 sm:$0xff] }
 0x222   :  { %1591 = vst.msk [vmem:[#allocation3 + $0x48] sm:$0xfc] %vm1463_vm8, %v1586_v45  ;;  %v1601_v28 = vpop.permute.xlu0 %1600  ;;  %v2024_v55 = vsel %vm9058_vm6, %v2022_v36, %v2023_v4  ;;  %v2039_v23 = vsel %vm9058_vm6, %v2037_v57, %v2038_v43  ;;  %v2098_v45 = vld [vmem:[#allocation2 + $0xd0] ss:$2 sm:$0x1]  ;;  %v2169_v33 = vrot.slane %v2164_v38, 5 }
 0x223   :  { %1606 = vst.msk [vmem:[#allocation3 + $0x48] sm:$0xfc] %vm9049_vm12, %v1601_v28  ;;  %vm8948_vm12 = vcmask 261251   ;;  %v2115_v28 = vld [vmem:[#allocation2 + $0xd1] ss:$2 sm:$0x1] }
 0x224   :  { %1621 = vst.msk [vmem:[#allocation3 + $0x48] sm:$0xfc] %vm1497_vm3, %v6961_v11  ;;  %v4489_v30 = vld [vmem:[#allocation3 + $0x30] sm:$0xff]  ;;  %v2102_v16 = vrot.slane %v2098_v45, 5  ;;  %v2119_v32 = vrot.slane %v2115_v28, 5 }
 0x225   :  { %4746 = vmatmul.f32.gmra.mxu3 %v4489_v30  ;;  %v2003_v11 = vld [vmem:[#allocation2 + $0xaa] ss:$2 sm:$0xff]  ;;  %2353 = vst.msk [vmem:[#allocation3 + $0xa8] sm:$0x1f] %vm2222_vm0, %v2349_v50  ;;  %v2326_v38 = vld [vmem:[#allocation2 + $0xbf] ss:$2 sm:$0xff] }
 0x226   :  { %v2007_v48 = vrot.slane %v2003_v11, 5  ;;  %2604 = vst.msk [vmem:[#allocation3 + $0x98] sm:$0xf0] %vm8947_vm9, %v2599_v7  ;;  %v2130_v11 = vld [vmem:[#allocation2 + $0xd2] ss:$2 sm:$0xff] }
 0x227   :  { %1982 = vrot.lane.b32.xlu2 %v1979_v0, %s5727_s21  ;;  %1980 = vrot.lane.b32.xlu1 %v1977_v40, %s5727_s21  ;;  %v2113_v40 = vld [vmem:[#allocation2 + $0xc1] ss:$2 sm:$0xff]  ;;  %v2242_v43 = vld [vmem:[#allocation2 + $0xba] ss:$2 sm:$0x1] }
 0x228   :  { %1995 = vrot.lane.b32.xlu0 %v1992_v54, %s5726_s20  ;;  %v2009_v15 = vsel %vm9051_vm5, %v2007_v48, %v2008_v47  ;;  %vm9059_vm5 = vcmask 518528   ;;  %v2118_v30 = vrot.slane %v2113_v40, 5  ;;  %v2275_v45 = vld [vmem:[#allocation2 + $0xac] ss:$2 sm:$0xff] }
 0x229   :  { %v7043_v61 = vpop.permute.xlu2 %1632  ;;  %v1631_v39 = vpop.permute.xlu1 %1630  ;;  %v2279_v28 = vrot.slane %v2275_v45, 4 }
 0x22a   :  { %1636 = vst.msk [vmem:[#allocation3 + $0x48] sm:$0xfc] %vm9054_vm15, %v1631_v39  ;;  %v1836_v41 = vpop.permute.xlu0 %1835  ;;  %vm9057_vm15 = vcmask 1048450   ;;  %v2135_v39 = vrot.slane %v2130_v11, 5 }
 0x22b   :  { %1842 = vst.msk [vmem:[#allocation3 + $0x60] sm:$0xf8] %vm8948_vm12, %v1836_v41 }
 0x22c   :  { %1859 = vst.msk [vmem:[#allocation3 + $0x60] sm:$0xf8] %vm1858_vm10, %v6979_v52 }
 0x22f   :  { %2010 = vrot.lane.b32.xlu2 %v2007_v48, %s5728_s24  ;;  %1997 = vrot.lane.b32.xlu1 %v1994_v63, %s5726_s20  ;;  %v2166_v48 = vld [vmem:[#allocation2 + $0xe4] ss:$2 sm:$0x1] }
 0x230   :  { %2012 = vrot.lane.b32.xlu0 %v2009_v15, %s5728_s24  ;;  %v2153_v15 = vrot.slane %v2149_v34, 5  ;;  %v2170_v14 = vrot.slane %v2166_v48, 5 }
 0x231   :  { %v1663_v21 = vpop.permute.xlu2 %1662  ;;  %v1367_v52 = vpop.permute.xlu1 %1366 }
 0x232   :  { %1371 = vst.msk [vmem:[#allocation3 + $0x50] sm:$0x3] %vm9056_vm1, %v1367_v52  ;;  %v1646_v10 = vpop.permute.xlu0 %1645  ;;  %vm9060_vm1 = vcmask 911104  }
 0x233   :  { %1651 = vst.msk [vmem:[#allocation3 + $0x48] sm:$0xfc] %vm1531_vm11, %v1646_v10  ;;  %v2181_v10 = vld [vmem:[#allocation2 + $0xd5] ss:$2 sm:$0xff] }
 0x234   :  { %1668 = vst.msk [vmem:[#allocation3 + $0x48] sm:$0xfc] %vm9057_vm15, %v1663_v21  ;;  %vm9061_vm15 = vcmask 1042304  }
 0x237   :  { %2027 = vrot.lane.b32.xlu2 %v2024_v55, %s5729_s27  ;;  %2025 = vrot.lane.b32.xlu1 %v2022_v36, %s5729_s27  ;;  %v2183_v36 = vld [vmem:[#allocation2 + $0xe5] ss:$2 sm:$0x1] }
 0x238   :  { %2040 = vrot.lane.b32.xlu0 %v2037_v57, %s5730_s30  ;;  %v2186_v57 = vrot.slane %v2181_v10, 5  ;;  %v2187_v58 = vrot.slane %v2183_v36, 5 }
 0x239   :  { %v1727_v2 = vpop.permute.xlu2 %1726  ;;  %v1603_v53 = vpop.permute.xlu1 %1602 }
 0x23a   :  { %1607 = vst.msk [vmem:[#allocation3 + $0x68] sm:$0x7] %vm9059_vm5, %v1603_v53  ;;  %v1384_v3 = vpop.permute.xlu0 %1383  ;;  %vm9062_vm5 = vmmov %vm9058_vm6  ;;  %vm9064_vm6 = vcmask 780928   ;;  %v2225_v53 = vld [vmem:[#allocation2 + $0xb9] ss:$2 sm:$0x1] }
 0x23b   :  { %1388 = vst.msk [vmem:[#allocation3 + $0x50] sm:$0x3] %vm9060_vm1, %v1384_v3  ;;  %v4492_v37 = vld [vmem:[#allocation3 + $0x48] sm:$0xff]  ;;  %v2056_v19 = vsel %vm9062_vm5, %v2054_v5, %v2055_v42  ;;  %vm1843_vm1 = vcmask 257152   ;;  %v2086_v51 = vsel %vm9062_vm5, %v2084_v24, %v2085_v56 }
 0x23c   :  { %1405 = vst.msk [vmem:[#allocation3 + $0x50] sm:$0x3] %vm9061_vm15, %v7024_v27  ;;  %4696 = vmatmul.f32.gmra.mxu2 %v4492_v37  ;;  %vm9063_vm15 = vcmask 649728   ;;  %v2101_v27 = vrot.slane %v2096_v9, 5  ;;  %v2241_v3 = vld [vmem:[#allocation2 + $0xaa] ss:$2 sm:$0xff] }
 0x23d   :  { %v2245_v18 = vrot.slane %v2241_v3, 4 }
 0x23f   :  { %2057 = vrot.lane.b32.xlu2 %v2054_v5, %s5731_s10  ;;  %2042 = vrot.lane.b32.xlu1 %v2039_v23, %s5730_s30  ;;  %v2229_v23 = vrot.slane %v2225_v53, 4 }
 0x240   :  { %2059 = vrot.lane.b32.xlu0 %v2056_v19, %s5731_s10  ;;  %v2246_v19 = vrot.slane %v2242_v43, 4 }
 0x241   :  { %v1695_v13 = vpop.permute.xlu2 %1694  ;;  %v1838_v59 = vpop.permute.xlu1 %1837 }
 0x242   :  { %1699 = vst.msk [vmem:[#allocation3 + $0x70] sm:$0x7] %vm1448_vm7, %v1695_v13  ;;  %v1618_v46 = vpop.permute.xlu0 %1617  ;;  %vm9065_vm7 = vmmov %vm9062_vm5  ;;  %v2247_v13 = vsel %vm2214_vm13, %v2245_v18, %v2246_v19 }
 0x243   :  { %1844 = vst.msk [vmem:[#allocation3 + $0x80] sm:$0xf] %vm1843_vm1, %v1838_v59  ;;  %v2103_v0 = vsel %vm9065_vm7, %v2101_v27, %v2102_v16  ;;  %vm9069_vm7 = vcmask 1043328   ;;  %v2258_v59 = vld [vmem:[#allocation2 + $0xab] ss:$2 sm:$0xff] }
 0x244   :  { %1622 = vst.msk [vmem:[#allocation3 + $0x68] sm:$0x7] %vm9063_vm15, %v1618_v46  ;;  %vm9066_vm15 = vmmov %vm9062_vm5  ;;  %vm9068_vm5 = vcmask 523650   ;;  %v2259_v46 = vld [vmem:[#allocation2 + $0xbb] ss:$2 sm:$0x1] }
 0x245   :  { %1637 = vst.msk [vmem:[#allocation3 + $0x68] sm:$0x7] %vm9064_vm6, %v7043_v61  ;;  %v2120_v54 = vsel %vm9066_vm15, %v2118_v30, %v2119_v32  ;;  %vm9067_vm6 = vcmask 261250   ;;  %vm9070_vm9 = vmmov %vm9066_vm15  ;;  %v2154_v21 = vsel %vm9066_vm15, %v2152_v31, %v2153_v15  ;;  %v2355_v15 = vld [vmem:[#allocation2 + $0xd1] ss:$2 sm:$0x1] }
 0x246   :  { %v2137_v41 = vsel %vm9070_vm9, %v2135_v39, %v2136_v8  ;;  %vm9072_vm9 = vcmask 649728   ;;  %v2359_v36 = vrot.slane %v2355_v15, 4 }
 0x247   :  { %2089 = vrot.lane.b32.xlu2 %v2086_v51, %s5725_s17  ;;  %2087 = vrot.lane.b32.xlu1 %v2084_v24, %s5725_s17  ;;  %v2262_v51 = vrot.slane %v2258_v59, 4  ;;  %v2400_v59 = vld [vmem:[#allocation2 + $0xe4] ss:$2 sm:$0x1] }
 0x248   :  { %2104 = vrot.lane.b32.xlu0 %v2101_v27, %s5727_s21  ;;  %v2263_v27 = vrot.slane %v2259_v46, 4  ;;  %v2462_v46 = vld [vmem:[#allocation2 + $0xe8] ss:$2 sm:$0xff] }
 0x249   :  { %v1872_v49 = vpop.permute.xlu2 %1871  ;;  %v1648_v29 = vpop.permute.xlu1 %1647 }
 0x24a   :  { %1652 = vst.msk [vmem:[#allocation3 + $0x68] sm:$0x7] %vm1533_vm4, %v1648_v29  ;;  %v1710_v12 = vpop.permute.xlu0 %1709  ;;  %v2264_v40 = vsel %vm2214_vm13, %v2262_v51, %v2263_v27  ;;  %v2292_v29 = vld [vmem:[#allocation2 + $0xbd] ss:$2 sm:$0xff] }
 0x24b   :  { %v2296_v11 = vrot.slane %v2292_v29, 4 }
 0x24f   :  { %2121 = vrot.lane.b32.xlu2 %v2118_v30, %s5726_s20  ;;  %2106 = vrot.lane.b32.xlu1 %v2103_v0, %s5727_s21 }
 0x250   :  { %2123 = vrot.lane.b32.xlu0 %v2120_v54, %s5726_s20 }
 0x251   :  { %v1778_v17 = vpop.permute.xlu2 %1777  ;;  %v1693_v26 = vpop.permute.xlu1 %1692 }
 0x252   :  { %1698 = vst.msk [vmem:[#allocation3 + $0x50] sm:$0xfc] %vm9067_vm6, %v1693_v26  ;;  %v1665_v61 = vpop.permute.xlu0 %1664  ;;  %vm9073_vm6 = vmmov %vm9066_vm15  ;;  %vm1892_vm15 = vcmask 654851   ;;  %v2309_v26 = vld [vmem:[#allocation2 + $0xbe] ss:$2 sm:$0xff] }
 0x253   :  { %1715 = vst.msk [vmem:[#allocation3 + $0x50] sm:$0xfc] %vm1463_vm8, %v1710_v12  ;;  %vm9071_vm8 = vcmask 518528   ;;  %v2171_v52 = vsel %vm9073_vm6, %v2169_v33, %v2170_v14  ;;  %v2293_v12 = vld [vmem:[#allocation2 + $0xcd] ss:$2 sm:$0x1] }
 0x254   :  { %1732 = vst.msk [vmem:[#allocation3 + $0x50] sm:$0xfc] %vm9068_vm5, %v1727_v2  ;;  %vm1875_vm5 = vcmask 523651   ;;  %v2228_v2 = vrot.slane %v2224_v62, 4  ;;  %v2297_v35 = vrot.slane %v2293_v12, 4 }
 0x255   :  { %1669 = vst.msk [vmem:[#allocation3 + $0x68] sm:$0x7] %vm9069_vm7, %v1665_v61  ;;  %vm1877_vm7 = vcmask 519552  }
 0x256   :  { %v2230_v22 = vsel %vm2214_vm13, %v2228_v2, %v2229_v23  ;;  %v2298_v61 = vsel %vm2214_vm13, %v2296_v11, %v2297_v35 }
 0x257   :  { %2140 = vrot.lane.b32.xlu2 %v2137_v41, %s5728_s24  ;;  %2138 = vrot.lane.b32.xlu1 %v2135_v39, %s5728_s24  ;;  %v2310_v39 = vld [vmem:[#allocation2 + $0xce] ss:$2 sm:$0x1] }
 0x258   :  { %2155 = vrot.lane.b32.xlu0 %v2152_v31, %s5729_s27  ;;  %v2313_v31 = vrot.slane %v2309_v26, 4  ;;  %v2314_v34 = vrot.slane %v2310_v39, 4  ;;  %v2429_v26 = vld [vmem:[#allocation2 + $0xd6] ss:$2 sm:$0xff] }
 0x259   :  { %v1746_v47 = vpop.permute.xlu2 %1745  ;;  %v1712_v50 = vpop.permute.xlu1 %1711  ;;  %v2433_v39 = vrot.slane %v2429_v26, 4 }
 0x25a   :  { %1716 = vst.msk [vmem:[#allocation3 + $0x70] sm:$0x7] %vm1465_vm14, %v1712_v50  ;;  %v1729_v63 = vpop.permute.xlu0 %1728  ;;  %vm8949_vm14 = vcmask 388352   ;;  %v2315_v48 = vsel %vm2214_vm13, %v2313_v31, %v2314_v34  ;;  %v2327_v50 = vld [vmem:[#allocation2 + $0xcf] ss:$2 sm:$0x1] }
 0x25b   :  { %1733 = vst.msk [vmem:[#allocation3 + $0x70] sm:$0x7] %vm9071_vm8, %v1729_v63  ;;  %vm9074_vm8 = vmmov %vm9073_vm6  ;;  %vm1909_vm6 = vcmask 786051   ;;  %v2354_v63 = vld [vmem:[#allocation2 + $0xc1] ss:$2 sm:$0xff] }
 0x25c   :  { %1750 = vst.msk [vmem:[#allocation3 + $0x70] sm:$0x7] %vm9072_vm9, %v1746_v47  ;;  %v2188_v1 = vsel %vm9074_vm8, %v2186_v57, %v2187_v58  ;;  %vm9075_vm9 = vcmask 786050   ;;  %vm9078_vm8 = vcmask 1043328   ;;  %v2330_v47 = vrot.slane %v2326_v38, 4 }
 0x25d   :  { %v2358_v10 = vrot.slane %v2354_v63, 4 }
 0x25f   :  { %2172 = vrot.lane.b32.xlu2 %v2169_v33, %s5730_s30  ;;  %2157 = vrot.lane.b32.xlu1 %v2154_v21, %s5729_s27 }
 0x260   :  { %2174 = vrot.lane.b32.xlu0 %v2171_v52, %s5730_s30  ;;  %v2331_v52 = vrot.slane %v2327_v50, 4 }
 0x261   :  { %v1797_v4 = vpop.permute.xlu2 %1796  ;;  %v1870_v20 = vpop.permute.xlu1 %1869 }
 0x262   :  { %1876 = vst.msk [vmem:[#allocation3 + $0x60] sm:$0xf8] %vm1875_vm5, %v1870_v20  ;;  %v1855_v55 = vpop.permute.xlu0 %1854  ;;  %v2360_v20 = vsel %vm2214_vm13, %v2358_v10, %v2359_v36 }
 0x263   :  { %1861 = vst.msk [vmem:[#allocation3 + $0x80] sm:$0xf] %vm8949_vm14, %v1855_v55  ;;  %v2369_v55 = vld [vmem:[#allocation2 + $0xd2] ss:$2 sm:$0xff] }
 0x264   :  { %1878 = vst.msk [vmem:[#allocation3 + $0x80] sm:$0xf] %vm1877_vm7, %v1872_v49  ;;  %v2276_v49 = vld [vmem:[#allocation2 + $0xbc] ss:$2 sm:$0x1]  ;;  %v2373_v53 = vrot.slane %v2369_v55, 4 }
 0x265   :  { %v2280_v54 = vrot.slane %v2276_v49, 4  ;;  %v2404_v49 = vrot.slane %v2400_v59, 4 }
 0x266   :  { %v447_v43 = vpop.f32.mrf.mxu0 }
 0x267   :  { %2191 = vrot.lane.b32.xlu2 %v2188_v1, %s5731_s10  ;;  %2189 = vrot.lane.b32.xlu1 %v2186_v57, %s5731_s10  ;;  %v2370_v57 = vld [vmem:[#allocation2 + $0xe2] ss:$2 sm:$0x1] }
 0x268   :  { %2231 = vrot.lane.b32.xlu0 %v2228_v2, %s5725_s17  ;;  %v2374_v3 = vrot.slane %v2370_v57, 4  ;;  %v7198_v57 = vld [vmem:[#allocation2 + $0x169] ss:$2 sm:$0xff] }
 0x269   :  { %v1904_v37 = vpop.permute.xlu2 %1903  ;;  %v1744_v5 = vpop.permute.xlu1 %1743 }
 0x26a   :  { %1749 = vst.msk [vmem:[#allocation3 + $0x50] sm:$0xfc] %vm1497_vm3, %v1744_v5  ;;  %v1761_v42 = vpop.permute.xlu0 %1760  ;;  %vm9076_vm3 = vcmask 1048450   ;;  %v5697_v5 = vld [vmem:[%s8893_s2] ss:$0 sm:$0xff] }
 0x26b   :  { %1766 = vst.msk [vmem:[#allocation3 + $0x50] sm:$0xfc] %vm9075_vm9, %v1761_v42  ;;  %vm1894_vm9 = vcmask 650752   ;;  %v448_v42 = vadd.f32 %v5697_v5, %v447_v43 }
 0x26c   :  { %1783 = vst.msk [vmem:[#allocation3 + $0x50] sm:$0xfc] %vm1531_vm11, %v1778_v17  ;;  %vm9077_vm11 = vcmask 780928   ;;  %v2281_v17 = vsel %vm2214_vm13, %v2279_v28, %v2280_v54 }
 0x26d   :  { %v586_v23 = vmax.f32 %v448_v42, 0.0  ;;  %v2494_v42 = vld [vmem:[#allocation2 + $0xfa] ss:$2 sm:$0x1] }
 0x26f   :  { %2248 = vrot.lane.b32.xlu2 %v2245_v18, %s5727_s21  ;;  %2233 = vrot.lane.b32.xlu1 %v2230_v22, %s5725_s17  ;;  %v2375_v18 = vsel %vm2214_vm13, %v2373_v53, %v2374_v3  ;;  %v2385_v22 = vld [vmem:[#allocation2 + $0xe3] ss:$2 sm:$0x1]  ;;  %656 = vst.msk [vmem:[#allocation2 + $0x110] sm:$0xff] %vm8952_vm2, %v586_v23  ;;  %v2492_v3 = vld [vmem:[#allocation2 + $0xea] ss:$2 sm:$0xff] }
 0x270   :  { %2250 = vrot.lane.b32.xlu0 %v2247_v13, %s5727_s21  ;;  %v2399_v13 = vld [vmem:[#allocation2 + $0xd4] ss:$2 sm:$0xff] }
 0x271   :  { %v1923_v24 = vpop.permute.xlu2 %1922  ;;  %v1795_v56 = vpop.permute.xlu1 %1794 }
 0x272   :  { %1800 = vst.msk [vmem:[#allocation3 + $0x50] sm:$0xfc] %vm9076_vm3, %v1795_v56  ;;  %v1780_v9 = vpop.permute.xlu0 %1779  ;;  %vm1928_vm3 = vcmask 913152  }
 0x276   :  { %v2596_v36 = vld [vmem:[#allocation2 + $0x110] ss:$2 sm:$0x1] }
 0x277   :  { %2267 = vrot.lane.b32.xlu2 %v2264_v40, %s5726_s20  ;;  %2265 = vrot.lane.b32.xlu1 %v2262_v51, %s5726_s20  ;;  %v2467_v51 = vrot.slane %v2462_v46, 4  ;;  %v2389_v40 = vrot.slane %v2385_v22, 4  ;;  %v2600_v55 = vrot.slane %v2596_v36, 4  ;;  %v2498_v22 = vrot.slane %v2494_v42, 4 }
 0x278   :  { %2282 = vrot.lane.b32.xlu0 %v2279_v28, %s5728_s24  ;;  %v2403_v28 = vrot.slane %v2399_v13, 4  ;;  %v2514_v13 = vrot.slane %v2509_v6, 4 }
 0x279   :  { %v1966_v16 = vpop.permute.xlu2 %1965  ;;  %v1763_v30 = vpop.permute.xlu1 %1762  ;;  %v4493_v32 = vld [vmem:[#allocation3 + $0x50] sm:$0xff]  ;;  %v2601_v43 = vsel %vm2214_vm13, %v2599_v7, %v2600_v55 }
 0x27a   :  { %1971 = vst.msk [vmem:[#allocation3 + $0x68] sm:$0xf8] %vm8948_vm12, %v1966_v16  ;;  %v1887_v0 = vpop.permute.xlu0 %1886  ;;  %4749 = vmatmul.f32.gmra.mxu3 %v4493_v32  ;;  %vm1945_vm12 = vcmask 1044352   ;;  %v2405_v16 = vsel %vm2214_vm13, %v2403_v28, %v2404_v49  ;;  %v2415_v32 = vld [vmem:[#allocation2 + $0xe5] ss:$2 sm:$0x1] }
 0x27b   :  { %1767 = vst.msk [vmem:[#allocation3 + $0x70] sm:$0x7] %vm9077_vm11, %v1763_v30  ;;  %vm1926_vm11 = vcmask 917251   ;;  %v2414_v30 = vld [vmem:[#allocation2 + $0xd5] ss:$2 sm:$0xff] }
 0x27c   :  { %1784 = vst.msk [vmem:[#allocation3 + $0x70] sm:$0x7] %vm1533_vm4, %v1780_v9  ;;  %vm1911_vm4 = vcmask 781952   ;;  %v2418_v35 = vrot.slane %v2414_v30, 4  ;;  %v2543_v49 = vld [vmem:[#allocation2 + $0xfd] ss:$2 sm:$0xff] }
 0x27d   :  { %1801 = vst.msk [vmem:[#allocation3 + $0x70] sm:$0x7] %vm9078_vm8, %v1797_v4  ;;  %vm1943_vm8 = vcmask 1048451   ;;  %v2332_v4 = vsel %vm2214_vm13, %v2330_v47, %v2331_v52  ;;  %v2475_v52 = vld [vmem:[#allocation2 + $0xe9] ss:$2 sm:$0xff] }
 0x27e   :  { %1893 = vst.msk [vmem:[#allocation3 + $0x60] sm:$0xf8] %vm1892_vm15, %v1887_v0  ;;  %v2511_v7 = vld [vmem:[#allocation2 + $0xfb] ss:$2 sm:$0x1] }
 0x27f   :  { %2299 = vrot.lane.b32.xlu2 %v2296_v11, %s5729_s27  ;;  %2284 = vrot.lane.b32.xlu1 %v2281_v17, %s5728_s24  ;;  %1910 = vst.msk [vmem:[#allocation3 + $0x60] sm:$0xf8] %vm1909_vm6, %v1904_v37  ;;  %v2384_v37 = vld [vmem:[#allocation2 + $0xd3] ss:$2 sm:$0xff]  ;;  %v2419_v17 = vrot.slane %v2415_v32, 4  ;;  %v2515_v59 = vrot.slane %v2511_v7, 4 }
 0x280   :  { %2301 = vrot.lane.b32.xlu0 %v2298_v61, %s5729_s27  ;;  %v2388_v19 = vrot.slane %v2384_v37, 4  ;;  %2605 = vst.msk [vmem:[#allocation3 + $0xb8] sm:$0x1f] %vm2222_vm0, %v2601_v43  ;;  %v2545_v30 = vld [vmem:[#allocation2 + $0x10d] ss:$2 sm:$0x1] }
 0x281   :  { %v1983_v8 = vpop.permute.xlu2 %1982  ;;  %v1889_v44 = vpop.permute.xlu1 %1888  ;;  %v2420_v61 = vsel %vm2214_vm13, %v2418_v35, %v2419_v17  ;;  %v2562_v32 = vld [vmem:[#allocation2 + $0x10e] ss:$2 sm:$0x1]  ;;  %v2609_v17 = vld [vmem:[#allocation2 + $0x121] ss:$2 sm:$0x1] }
 0x282   :  { %1895 = vst.msk [vmem:[#allocation3 + $0x80] sm:$0xf] %vm1894_vm9, %v1889_v44  ;;  %v1906_v41 = vpop.permute.xlu0 %1905  ;;  %v2390_v12 = vsel %vm2214_vm13, %v2388_v19, %v2389_v40  ;;  %v2445_v44 = vld [vmem:[#allocation2 + $0xe7] ss:$2 sm:$0xff] }
 0x283   :  { %1912 = vst.msk [vmem:[#allocation3 + $0x80] sm:$0xf] %vm1911_vm4, %v1906_v41  ;;  %v2447_v41 = vld [vmem:[#allocation2 + $0xf7] ss:$2 sm:$0x1]  ;;  %v2450_v63 = vrot.slane %v2445_v44, 4 }
 0x284   :  { %1929 = vst.msk [vmem:[#allocation3 + $0x80] sm:$0xf] %vm1928_vm3, %v1923_v24  ;;  %v2464_v24 = vld [vmem:[#allocation2 + $0xf8] ss:$2 sm:$0x1]  ;;  %v2451_v15 = vrot.slane %v2447_v41, 4 }
 0x285   :  { %v2468_v27 = vrot.slane %v2464_v24, 4  ;;  %v2516_v24 = vsel %vm2214_vm13, %v2514_v13, %v2515_v59  ;;  %v2566_v44 = vrot.slane %v2562_v32, 4 }
 0x287   :  { %2318 = vrot.lane.b32.xlu2 %v2315_v48, %s5730_s30  ;;  %2316 = vrot.lane.b32.xlu1 %v2313_v31, %s5730_s30  ;;  %v2469_v29 = vsel %vm2214_vm13, %v2467_v51, %v2468_v27 }
 0x288   :  { %2333 = vrot.lane.b32.xlu0 %v2330_v47, %s5731_s10  ;;  %2473 = vst.msk [vmem:[#allocation3 + $0xb0] sm:$0x1f] %vm2222_vm0, %v2469_v29  ;;  %vm9081_vm0 = vcmask 388352  }
 0x289   :  { %v2011_v33 = vpop.permute.xlu2 %2010  ;;  %v1921_v14 = vpop.permute.xlu1 %1920 }
 0x28a   :  { %1927 = vst.msk [vmem:[#allocation3 + $0x60] sm:$0xf8] %vm1926_vm11, %v1921_v14  ;;  %v1938_v21 = vpop.permute.xlu0 %1937 }
 0x28b   :  { %1944 = vst.msk [vmem:[#allocation3 + $0x60] sm:$0xf8] %vm1943_vm8, %v1938_v21  ;;  %v2452_v21 = vsel %vm2214_vm13, %v2450_v63, %v2451_v15 }
 0x28e   :  { %v450_v31 = vpop.f32.mrf.mxu0 }
 0x28f   :  { %2361 = vrot.lane.b32.xlu2 %v2358_v10, %s5725_s17  ;;  %2335 = vrot.lane.b32.xlu1 %v2332_v4, %s5731_s10  ;;  %v451_v48 = vadd.f32 %v5697_v5, %v450_v31  ;;  %v2477_v10 = vld [vmem:[#allocation2 + $0xf9] ss:$2 sm:$0x1]  ;;  %v2497_v5 = vrot.slane %v2492_v3, 4 }
 0x290   :  { %2363 = vrot.lane.b32.xlu0 %v2360_v20, %s5725_s17 }
 0x291   :  { %v2028_v58 = vpop.permute.xlu2 %2027  ;;  %v1940_v62 = vpop.permute.xlu1 %1939  ;;  %v2499_v46 = vsel %vm2214_vm13, %v2497_v5, %v2498_v22 }
 0x292   :  { %1946 = vst.msk [vmem:[#allocation3 + $0x80] sm:$0xf] %vm1945_vm12, %v1940_v62  ;;  %v1968_v1 = vpop.permute.xlu0 %1967  ;;  %v4495_v2 = vld [vmem:[#allocation3 + $0x60] sm:$0xff]  ;;  %v2480_v62 = vrot.slane %v2475_v52, 4 }
 0x293   :  { %1972 = vst.msk [vmem:[#allocation3 + $0x88] sm:$0xf] %vm1843_vm1, %v1968_v1  ;;  %4646 = vmatmul.f32.gmra.mxu1 %v4495_v2  ;;  %v2481_v1 = vrot.slane %v2477_v10, 4  ;;  %v3025_v2 = vrot.slane %v7198_v57, 3 }
 0x294   :  { %1987 = vst.msk [vmem:[#allocation3 + $0x88] sm:$0xf] %vm8949_vm14, %v1983_v8  ;;  %vm9079_vm14 = vcmask 130052   ;;  %v2430_v8 = vld [vmem:[#allocation2 + $0xe6] ss:$2 sm:$0x1] }
 0x295   :  { %2472 = vst.msk [vmem:[#allocation3 + $0x90] sm:$0xf0] %vm9079_vm14, %v2467_v51  ;;  %v2434_v50 = vrot.slane %v2430_v8, 4  ;;  %v2482_v37 = vsel %vm2214_vm13, %v2480_v62, %v2481_v1  ;;  %vm9080_vm14 = vcmask 261251  }
 0x296   :  { %v2625_v10 = vld [vmem:[#allocation2 + $0x122] ss:$2 sm:$0x1]  ;;  %v3429_v57 = vld [vmem:[#allocation2 + $0x175] ss:$2 sm:$0x1] }
 0x297   :  { %2378 = vrot.lane.b32.xlu2 %v2375_v18, %s5727_s21  ;;  %2376 = vrot.lane.b32.xlu1 %v2373_v53, %s5727_s21  ;;  %v2435_v14 = vsel %vm2214_vm13, %v2433_v39, %v2434_v50  ;;  %v2629_v1 = vrot.slane %v2625_v10, 3 }
 0x298   :  { %2391 = vrot.lane.b32.xlu0 %v2388_v19, %s5726_s20 }
 0x299   :  { %v2058_v56 = vpop.permute.xlu2 %2057  ;;  %v1981_v9 = vpop.permute.xlu1 %1980 }
 0x29a   :  { %1986 = vst.msk [vmem:[#allocation3 + $0x68] sm:$0xf8] %vm1858_vm10, %v1981_v9  ;;  %v1996_v45 = vpop.permute.xlu0 %1995  ;;  %v2528_v9 = vld [vmem:[#allocation2 + $0x10c] ss:$2 sm:$0x1] }
 0x29b   :  { %2001 = vst.msk [vmem:[#allocation3 + $0x68] sm:$0xf8] %vm1875_vm5, %v1996_v45 }
 0x29c   :  { %2016 = vst.msk [vmem:[#allocation3 + $0x68] sm:$0xf8] %vm1892_vm15, %v2011_v33  ;;  %v587_v33 = vmax.f32 %v451_v48, 0.0  ;;  %v2579_v48 = vld [vmem:[#allocation2 + $0x10f] ss:$2 sm:$0x1] }
 0x29e   :  { %657 = vst.msk [vmem:[#allocation2 + $0x118] sm:$0xff] %vm8952_vm2, %v587_v33  ;;  %vm2322_vm2 = vcmask 917252  }
 0x29f   :  { %2406 = vrot.lane.b32.xlu2 %v2403_v28, %s5728_s24  ;;  %2393 = vrot.lane.b32.xlu1 %v2390_v12, %s5726_s20  ;;  %v2532_v28 = vrot.slane %v2528_v9, 4  ;;  %v2548_v12 = vrot.slane %v2543_v49, 4 }
 0x2a0   :  { %2408 = vrot.lane.b32.xlu0 %v2405_v16, %s5728_s24  ;;  %v2560_v16 = vld [vmem:[#allocation2 + $0xfe] ss:$2 sm:$0xff] }
 0x2a1   :  { %v2090_v0 = vpop.permute.xlu2 %2089  ;;  %v1998_v54 = vpop.permute.xlu1 %1997  ;;  %v2565_v8 = vrot.slane %v2560_v16, 4 }
 0x2a2   :  { %2094 = vst.msk [vmem:[#allocation3 + $0x90] sm:$0xf] %vm1843_vm1, %v2090_v0  ;;  %v2013_v11 = vpop.permute.xlu0 %2012  ;;  %vm8950_vm1 = vcmask 130053  }
 0x2a3   :  { %2002 = vst.msk [vmem:[#allocation3 + $0x88] sm:$0xf] %vm1877_vm7, %v1998_v54 }
 0x2a4   :  { %2017 = vst.msk [vmem:[#allocation3 + $0x88] sm:$0xf] %vm1894_vm9, %v2013_v11 }
 0x2a5   :  { %2032 = vst.msk [vmem:[#allocation3 + $0x88] sm:$0xf] %vm1911_vm4, %v2028_v58  ;;  %v2607_v0 = vld [vmem:[#allocation2 + $0x111] ss:$2 sm:$0xff]  ;;  %v2661_v7 = vld [vmem:[#allocation2 + $0x114] ss:$2 sm:$0xff] }
 0x2a6   :  { %3030 = vst.msk [vmem:[#allocation3 + $0xb8] sm:$0xe0] %vm8950_vm1, %v3025_v2  ;;  %v2642_v36 = vld [vmem:[#allocation2 + $0x113] ss:$2 sm:$0xff] }
 0x2a7   :  { %2423 = vrot.lane.b32.xlu2 %v2420_v61, %s5729_s27  ;;  %2421 = vrot.lane.b32.xlu1 %v2418_v35, %s5729_s27  ;;  %v2613_v35 = vrot.slane %v2607_v0, 3  ;;  %v2549_v61 = vrot.slane %v2545_v30, 4  ;;  %v2718_v0 = vld [vmem:[#allocation2 + $0x127] ss:$2 sm:$0xff] }
 0x2a8   :  { %2436 = vrot.lane.b32.xlu0 %v2433_v39, %s5730_s30  ;;  %v2614_v39 = vrot.slane %v2609_v17, 3 }
 0x2a9   :  { %v2122_v34 = vpop.permute.xlu2 %2121  ;;  %v2026_v38 = vpop.permute.xlu1 %2025  ;;  %2619 = vst.msk [vmem:[#allocation3 + $0xa0] sm:$0xe0] %vm8950_vm1, %v2613_v35  ;;  %v2550_v31 = vsel %vm2214_vm13, %v2548_v12, %v2549_v61  ;;  %v2723_v61 = vrot.slane %v2718_v0, 3 }
 0x2aa   :  { %2031 = vst.msk [vmem:[#allocation3 + $0x68] sm:$0xf8] %vm1909_vm6, %v2026_v38  ;;  %v2041_v47 = vpop.permute.xlu0 %2040  ;;  %v2577_v38 = vld [vmem:[#allocation2 + $0xff] ss:$2 sm:$0xff] }
 0x2ab   :  { %2046 = vst.msk [vmem:[#allocation3 + $0x68] sm:$0xf8] %vm1926_vm11, %v2041_v47  ;;  %v2582_v33 = vrot.slane %v2577_v38, 4 }
 0x2ac   :  { %2063 = vst.msk [vmem:[#allocation3 + $0x68] sm:$0xf8] %vm1943_vm8, %v2058_v56  ;;  %v2526_v56 = vld [vmem:[#allocation2 + $0xfc] ss:$2 sm:$0xff] }
 0x2ad   :  { %v2531_v40 = vrot.slane %v2526_v56, 4  ;;  %v2680_v56 = vld [vmem:[#allocation2 + $0x115] ss:$2 sm:$0xff] }
 0x2af   :  { %2453 = vrot.lane.b32.xlu2 %v2450_v63, %s5731_s10  ;;  %2438 = vrot.lane.b32.xlu1 %v2435_v14, %s5730_s30  ;;  %v2533_v29 = vsel %vm2214_vm13, %v2531_v40, %v2532_v28  ;;  %v2623_v63 = vld [vmem:[#allocation2 + $0x112] ss:$2 sm:$0xff]  ;;  %v2583_v14 = vrot.slane %v2579_v48, 4 }
 0x2b0   :  { %2455 = vrot.lane.b32.xlu0 %v2452_v21, %s5731_s10  ;;  %v2628_v21 = vrot.slane %v2623_v63, 3  ;;  %v2769_v63 = vld [vmem:[#allocation2 + $0x12a] ss:$2 sm:$0xff] }
 0x2b1   :  { %v2141_v4 = vpop.permute.xlu2 %2140  ;;  %v2043_v20 = vpop.permute.xlu1 %2042  ;;  %v2584_v52 = vsel %vm2214_vm13, %v2582_v33, %v2583_v14  ;;  %v2774_v10 = vrot.slane %v2769_v63, 3 }
 0x2b2   :  { %2047 = vst.msk [vmem:[#allocation3 + $0x88] sm:$0xf] %vm1928_vm3, %v2043_v20  ;;  %v2060_v58 = vpop.permute.xlu0 %2059 }
 0x2b3   :  { %2064 = vst.msk [vmem:[#allocation3 + $0x88] sm:$0xf] %vm1945_vm12, %v2060_v58  ;;  %v4496_v53 = vld [vmem:[#allocation3 + $0x68] sm:$0xff] }
 0x2b4   :  { %4699 = vmatmul.f32.gmra.mxu2 %v4496_v53  ;;  %v2756_v58 = vld [vmem:[#allocation2 + $0x129] ss:$2 sm:$0xff]  ;;  %v2647_v53 = vrot.slane %v2642_v36, 3 }
 0x2b5   :  { %v2761_v43 = vrot.slane %v2756_v58, 3  ;;  %v2788_v58 = vld [vmem:[#allocation2 + $0x14b] ss:$2 sm:$0x1] }
 0x2b7   :  { %2485 = vrot.lane.b32.xlu2 %v2482_v37, %s5725_s17  ;;  %2483 = vrot.lane.b32.xlu1 %v2480_v62, %s5725_s17  ;;  %v2758_v37 = vld [vmem:[#allocation2 + $0x139] ss:$2 sm:$0x1]  ;;  %2766 = vst.msk [vmem:[#allocation3 + $0xa8] sm:$0xe0] %vm8950_vm1, %v2761_v43  ;;  %vm3036_vm1 = vcmask 1045504  }
 0x2b8   :  { %2500 = vrot.lane.b32.xlu0 %v2497_v5, %s5727_s21  ;;  %v2762_v5 = vrot.slane %v2758_v37, 3  ;;  %v2792_v37 = vrot.slane %v2788_v58, 3 }
 0x2b9   :  { %v2173_v23 = vpop.permute.xlu2 %2172  ;;  %v2088_v18 = vpop.permute.xlu1 %2087 }
 0x2ba   :  { %2093 = vst.msk [vmem:[#allocation3 + $0x70] sm:$0xf8] %vm9080_vm14, %v2088_v18  ;;  %v2105_v19 = vpop.permute.xlu0 %2104  ;;  %vm8953_vm14 = vcmask 914176  }
 0x2bb   :  { %2110 = vst.msk [vmem:[#allocation3 + $0x70] sm:$0xf8] %vm1858_vm10, %v2105_v19  ;;  %vm8957_vm10 = vcmask 1044480  }
 0x2bc   :  { %2127 = vst.msk [vmem:[#allocation3 + $0x70] sm:$0xf8] %vm1875_vm5, %v2122_v34  ;;  %vm8956_vm5 = vcmask 128000   ;;  %v2615_v41 = vsel %vm8957_vm10, %v2613_v35, %v2614_v39  ;;  %v2567_v34 = vsel %vm2214_vm13, %v2565_v8, %v2566_v44  ;;  %v2630_v42 = vsel %vm8957_vm10, %v2628_v21, %v2629_v1  ;;  %v3032_v35 = vld [vmem:[#allocation2 + $0x13b] ss:$2 sm:$0xff] }
 0x2bd   :  { %2621 = vst.msk [vmem:[#allocation3 + $0xc0] sm:$0x3f] %vm8956_vm5, %v2615_v41  ;;  %vm2239_vm13 = vcmask 258176   ;;  %v2763_v18 = vsel %vm8957_vm10, %v2761_v43, %v2762_v5  ;;  %v3037_v39 = vrot.slane %v3032_v35, 2  ;;  %v2737_v41 = vld [vmem:[#allocation2 + $0x128] ss:$2 sm:$0xff] }
 0x2be   :  { %2767 = vst.msk [vmem:[#allocation3 + $0xc8] sm:$0x3f] %vm8956_vm5, %v2763_v18  ;;  %v2742_v48 = vrot.slane %v2737_v41, 3  ;;  %v2803_v5 = vld [vmem:[#allocation2 + $0x13c] ss:$2 sm:$0xff] }
 0x2bf   :  { %2517 = vrot.lane.b32.xlu2 %v2514_v13, %s5726_s20  ;;  %2502 = vrot.lane.b32.xlu1 %v2499_v46, %s5727_s21  ;;  %v2666_v46 = vrot.slane %v2661_v7, 3  ;;  %v2805_v7 = vld [vmem:[#allocation2 + $0x14c] ss:$2 sm:$0x1] }
 0x2c0   :  { %2519 = vrot.lane.b32.xlu0 %v2516_v24, %s5726_s20  ;;  %v2822_v18 = vld [vmem:[#allocation2 + $0x14d] ss:$2 sm:$0x1] }
 0x2c1   :  { %v2192_v51 = vpop.permute.xlu2 %2191  ;;  %v2107_v27 = vpop.permute.xlu1 %2106 }
 0x2c2   :  { %2111 = vst.msk [vmem:[#allocation3 + $0x90] sm:$0xf] %vm9081_vm0, %v2107_v27  ;;  %v2124_v45 = vpop.permute.xlu0 %2123  ;;  %v2682_v27 = vld [vmem:[#allocation2 + $0x125] ss:$2 sm:$0x1]  ;;  %vm3042_vm0 = vcmask 130054  }
 0x2c3   :  { %2128 = vst.msk [vmem:[#allocation3 + $0x90] sm:$0xf] %vm1877_vm7, %v2124_v45  ;;  %vm8951_vm7 = vcmask 261252   ;;  %v2699_v45 = vld [vmem:[#allocation2 + $0x126] ss:$2 sm:$0xff] }
 0x2c4   :  { %2145 = vst.msk [vmem:[#allocation3 + $0x90] sm:$0xf] %vm1894_vm9, %v2141_v4  ;;  %v2644_v4 = vld [vmem:[#allocation2 + $0x123] ss:$2 sm:$0x1]  ;;  %vm2271_vm9 = vcmask 523652  }
 0x2c5   :  { %v2648_v3 = vrot.slane %v2644_v4, 3  ;;  %v2704_v16 = vrot.slane %v2699_v45, 3  ;;  %3043 = vst.msk [vmem:[#allocation3 + $0xc0] sm:$0xc0] %vm3042_vm0, %v3037_v39 }
 0x2c7   :  { %2536 = vrot.lane.b32.xlu2 %v2533_v29, %s5728_s24  ;;  %2534 = vrot.lane.b32.xlu1 %v2531_v40, %s5728_s24  ;;  %v2649_v6 = vsel %vm8957_vm10, %v2647_v53, %v2648_v3  ;;  %v2701_v40 = vld [vmem:[#allocation2 + $0x136] ss:$2 sm:$0x1] }
 0x2c8   :  { %2551 = vrot.lane.b32.xlu0 %v2548_v12, %s5729_s27  ;;  %v2686_v12 = vrot.slane %v2682_v27, 3  ;;  %v2705_v30 = vrot.slane %v2701_v40, 3  ;;  %v2839_v27 = vld [vmem:[#allocation2 + $0x14e] ss:$2 sm:$0x1] }
 0x2c9   :  { %v2249_v54 = vpop.permute.xlu2 %2248  ;;  %v2139_v11 = vpop.permute.xlu1 %2138 }
 0x2ca   :  { %2144 = vst.msk [vmem:[#allocation3 + $0x70] sm:$0xf8] %vm1892_vm15, %v2139_v11  ;;  %v2156_v26 = vpop.permute.xlu0 %2155  ;;  %vm2254_vm15 = vcmask 392452   ;;  %v2720_v11 = vld [vmem:[#allocation2 + $0x137] ss:$2 sm:$0x1] }
 0x2cb   :  { %2161 = vst.msk [vmem:[#allocation3 + $0x70] sm:$0xf8] %vm1909_vm6, %v2156_v26  ;;  %vm2273_vm6 = vcmask 520576   ;;  %v2724_v44 = vrot.slane %v2720_v11, 3 }
 0x2cc   :  { %2178 = vst.msk [vmem:[#allocation3 + $0x70] sm:$0xf8] %vm1926_vm11, %v2173_v23  ;;  %v2663_v23 = vld [vmem:[#allocation2 + $0x124] ss:$2 sm:$0x1]  ;;  %vm2290_vm11 = vcmask 651776  }
 0x2cd   :  { %v2667_v24 = vrot.slane %v2663_v23, 3  ;;  %v2725_v38 = vsel %vm8957_vm10, %v2723_v61, %v2724_v44  ;;  %v2820_v23 = vld [vmem:[#allocation2 + $0x13d] ss:$2 sm:$0xff] }
 0x2ce   :  { %v7324_v44 = vld [vmem:[#allocation2 + $0x13f] ss:$2 sm:$0xff] }
 0x2cf   :  { %2568 = vrot.lane.b32.xlu2 %v2565_v8, %s5730_s30  ;;  %2553 = vrot.lane.b32.xlu1 %v2550_v31, %s5729_s27  ;;  %v2668_v9 = vsel %vm8957_vm10, %v2666_v46, %v2667_v24  ;;  %v3033_v31 = vld [vmem:[#allocation2 + $0x14b] ss:$2 sm:$0x1]  ;;  %v2826_v24 = vrot.slane %v2822_v18, 3 }
 0x2d0   :  { %2570 = vrot.lane.b32.xlu0 %v2567_v34, %s5730_s30  ;;  %v3038_v34 = vrot.slane %v3033_v31, 2 }
 0x2d1   :  { %v2268_v47 = vpop.permute.xlu2 %2267  ;;  %v2158_v50 = vpop.permute.xlu1 %2157 }
 0x2d2   :  { %2162 = vst.msk [vmem:[#allocation3 + $0x90] sm:$0xf] %vm1911_vm4, %v2158_v50  ;;  %v2175_v15 = vpop.permute.xlu0 %2174  ;;  %vm8955_vm4 = vcmask 654852   ;;  %v2739_v50 = vld [vmem:[#allocation2 + $0x138] ss:$2 sm:$0x1] }
 0x2d3   :  { %2179 = vst.msk [vmem:[#allocation3 + $0x90] sm:$0xf] %vm1928_vm3, %v2175_v15  ;;  %vm2305_vm3 = vcmask 786052   ;;  %v2771_v15 = vld [vmem:[#allocation2 + $0x13a] ss:$2 sm:$0x1] }
 0x2d4   :  { %2196 = vst.msk [vmem:[#allocation3 + $0x90] sm:$0xf] %vm1945_vm12, %v2192_v51  ;;  %vm2256_vm12 = vcmask 389376   ;;  %v2685_v51 = vrot.slane %v2680_v56, 3  ;;  %v2775_v36 = vrot.slane %v2771_v15, 3 }
 0x2d5   :  { %v7343_v15 = vld [vmem:[#allocation2 + $0x151] ss:$2 sm:$0xff] }
 0x2d6   :  { %v2687_v32 = vsel %vm8957_vm10, %v2685_v51, %v2686_v12  ;;  %v7308_v12 = vld [vmem:[#allocation2 + $0x13c] ss:$2 sm:$0xff] }
 0x2d7   :  { %2587 = vrot.lane.b32.xlu2 %v2584_v52, %s5731_s10  ;;  %2585 = vrot.lane.b32.xlu1 %v2582_v33, %s5731_s10  ;;  %v2743_v52 = vrot.slane %v2739_v50, 3  ;;  %v3050_v0 = vrot.slane %v7308_v12, 2 }
 0x2d8   :  { %2631 = vrot.lane.b32.xlu0 %v2628_v21, %s5725_s17 }
 0x2d9   :  { %v2300_v20 = vpop.permute.xlu2 %2299  ;;  %v2190_v55 = vpop.permute.xlu1 %2189  ;;  %v2744_v4 = vsel %vm8957_vm10, %v2742_v48, %v2743_v52  ;;  %v7349_v52 = vld [vmem:[#allocation2 + $0x152] ss:$2 sm:$0xff] }
 0x2da   :  { %2195 = vst.msk [vmem:[#allocation3 + $0x70] sm:$0xf8] %vm1943_vm8, %v2190_v55  ;;  %v2232_v62 = vpop.permute.xlu0 %2231  ;;  %vm2307_vm8 = vcmask 782976   ;;  %v2786_v55 = vld [vmem:[#allocation2 + $0x13b] ss:$2 sm:$0xff] }
 0x2db   :  { %2238 = vst.msk [vmem:[#allocation3 + $0x80] sm:$0xf0] %vm8951_vm7, %v2232_v62  ;;  %v2791_v43 = vrot.slane %v2786_v55, 3  ;;  %v3064_v55 = vld [vmem:[#allocation2 + $0x14d] ss:$2 sm:$0x1] }
 0x2dc   :  { %2255 = vst.msk [vmem:[#allocation3 + $0x80] sm:$0xf0] %vm2254_vm15, %v2249_v54  ;;  %v2706_v54 = vsel %vm8957_vm10, %v2704_v16, %v2705_v30 }
 0x2df   :  { %2650 = vrot.lane.b32.xlu2 %v2647_v53, %s5727_s21  ;;  %2633 = vrot.lane.b32.xlu1 %v2630_v42, %s5725_s17  ;;  %v2793_v42 = vsel %vm8957_vm10, %v2791_v43, %v2792_v37 }
 0x2e0   :  { %2652 = vrot.lane.b32.xlu0 %v2649_v6, %s5727_s21  ;;  %v2808_v6 = vrot.slane %v2803_v5, 3 }
 0x2e1   :  { %v2319_v19 = vpop.permute.xlu2 %2318  ;;  %v2234_v22 = vpop.permute.xlu1 %2233  ;;  %v4497_v13 = vld [vmem:[#allocation3 + $0x70] sm:$0xff] }
 0x2e2   :  { %2240 = vst.msk [vmem:[#allocation3 + $0xa0] sm:$0x1f] %vm2239_vm13, %v2234_v22  ;;  %v2251_v59 = vpop.permute.xlu0 %2250  ;;  %4752 = vmatmul.f32.gmra.mxu3 %v4497_v13 }
 0x2e3   :  { %2257 = vst.msk [vmem:[#allocation3 + $0xa0] sm:$0x1f] %vm2256_vm12, %v2251_v59  ;;  %v2809_v59 = vrot.slane %v2805_v7, 3 }
 0x2e4   :  { %2274 = vst.msk [vmem:[#allocation3 + $0xa0] sm:$0x1f] %vm2273_vm6, %v2268_v47  ;;  %v3039_v47 = vsel %vm3036_vm1, %v3037_v39, %v3038_v34  ;;  %v7321_v39 = vld [vmem:[#allocation2 + $0x13e] ss:$2 sm:$0xff] }
 0x2e5   :  { %v2810_v56 = vsel %vm8957_vm10, %v2808_v6, %v2809_v59  ;;  %v3084_v34 = vrot.slane %v7321_v39, 2  ;;  %v7382_v59 = vld [vmem:[#allocation2 + $0x151] ss:$2 sm:$0xff] }
 0x2e7   :  { %2671 = vrot.lane.b32.xlu2 %v2668_v9, %s5726_s20  ;;  %2669 = vrot.lane.b32.xlu1 %v2666_v46, %s5726_s20  ;;  %v2825_v46 = vrot.slane %v2820_v23, 3 }
 0x2e8   :  { %2688 = vrot.lane.b32.xlu0 %v2685_v51, %s5728_s24  ;;  %v2837_v51 = vld [vmem:[#allocation2 + $0x13e] ss:$2 sm:$0xff] }
 0x2e9   :  { %v2362_v28 = vpop.permute.xlu2 %2361  ;;  %v2266_v49 = vpop.permute.xlu1 %2265  ;;  %v2827_v9 = vsel %vm8957_vm10, %v2825_v46, %v2826_v24  ;;  %v2893_v24 = vrot.slane %v7382_v59, 3 }
 0x2ea   :  { %2367 = vst.msk [vmem:[#allocation3 + $0x88] sm:$0xf0] %vm8951_vm7, %v2362_v28  ;;  %v2283_v29 = vpop.permute.xlu0 %2282  ;;  %vm8954_vm7 = vcmask 129024  }
 0x2eb   :  { %2272 = vst.msk [vmem:[#allocation3 + $0x80] sm:$0xf0] %vm2271_vm9, %v2266_v49  ;;  %v2842_v49 = vrot.slane %v2837_v51, 3 }
 0x2ec   :  { %2289 = vst.msk [vmem:[#allocation3 + $0x80] sm:$0xf0] %vm8955_vm4, %v2283_v29  ;;  %v2843_v29 = vrot.slane %v2839_v27, 3  ;;  %v3098_v27 = vld [vmem:[#allocation2 + $0x14f] ss:$2 sm:$0x1] }
 0x2ed   :  { %2306 = vst.msk [vmem:[#allocation3 + $0x80] sm:$0xf0] %vm2305_vm3, %v2300_v20  ;;  %v2776_v20 = vsel %vm8957_vm10, %v2774_v10, %v2775_v36 }
 0x2ee   :  { %3045 = vst.msk [vmem:[#allocation3 + $0xe0] sm:$0x7f] %vm8954_vm7, %v3039_v47  ;;  %vm2341_vm7 = vcmask 1045376  }
 0x2ef   :  { %2707 = vrot.lane.b32.xlu2 %v2704_v16, %s5729_s27  ;;  %2690 = vrot.lane.b32.xlu1 %v2687_v32, %s5728_s24  ;;  %v3428_v16 = vld [vmem:[#allocation2 + $0x165] ss:$2 sm:$0xff]  ;;  %v2844_v32 = vsel %vm8957_vm10, %v2842_v49, %v2843_v29 }
 0x2f0   :  { %2709 = vrot.lane.b32.xlu0 %v2706_v54, %s5729_s27  ;;  %v3433_v30 = vrot.slane %v3428_v16, 1  ;;  %v3022_v54 = vld [vmem:[#allocation2 + $0x179] ss:$2 sm:$0x1]  ;;  %v7406_v16 = vld [vmem:[#allocation2 + $0x169] ss:$2 sm:$0xff] }
 0x2f1   :  { %v2379_v17 = vpop.permute.xlu2 %2378  ;;  %v2285_v26 = vpop.permute.xlu1 %2284 }
 0x2f2   :  { %2291 = vst.msk [vmem:[#allocation3 + $0xa0] sm:$0x1f] %vm2290_vm11, %v2285_v26  ;;  %v2302_v8 = vpop.permute.xlu0 %2301  ;;  %v7318_v26 = vld [vmem:[#allocation2 + $0x193] ss:$2 sm:$0xff] }
 0x2f3   :  { %2308 = vst.msk [vmem:[#allocation3 + $0xa0] sm:$0x1f] %vm2307_vm8, %v2302_v8  ;;  %v3063_v8 = vld [vmem:[#allocation2 + $0x13d] ss:$2 sm:$0xff]  ;;  %v3421_v31 = vrot.slane %v7318_v26, 2 }
 0x2f4   :  { %2325 = vst.msk [vmem:[#allocation3 + $0xa0] sm:$0x1f] %vm8953_vm14, %v2319_v19  ;;  %vm2339_vm14 = vcmask 1048452   ;;  %v3817_v26 = vld [vmem:[#allocation2 + $0x19f] ss:$2 sm:$0x1] }
 0x2f5   :  { %3426 = vst.msk [vmem:[#allocation3 + $0xd8] sm:$0xc0] %vm3042_vm0, %v3421_v31 }
 0x2f7   :  { %2728 = vrot.lane.b32.xlu2 %v2725_v38, %s5730_s30  ;;  %2726 = vrot.lane.b32.xlu1 %v2723_v61, %s5730_s30  ;;  %v3067_v38 = vrot.slane %v3063_v8, 2 }
 0x2f8   :  { %2745 = vrot.lane.b32.xlu0 %v2742_v48, %s5731_s10  ;;  %v3101_v48 = vrot.slane %v7324_v44, 2  ;;  %v3418_v44 = vld [vmem:[#allocation2 + $0x1a3] ss:$2 sm:$0x1] }
 0x2f9   :  { %v2407_v33 = vpop.permute.xlu2 %2406  ;;  %v2317_v14 = vpop.permute.xlu1 %2316 }
 0x2fa   :  { %2323 = vst.msk [vmem:[#allocation3 + $0x80] sm:$0xf0] %vm2322_vm2, %v2317_v14  ;;  %v2334_v21 = vpop.permute.xlu0 %2333 }
 0x2fb   :  { %2340 = vst.msk [vmem:[#allocation3 + $0x80] sm:$0xf0] %vm2339_vm14, %v2334_v21 }
 0x2ff   :  { %2777 = vrot.lane.b32.xlu2 %v2774_v10, %s5725_s17  ;;  %2747 = vrot.lane.b32.xlu1 %v2744_v4, %s5731_s10  ;;  %v3135_v10 = vrot.slane %v7343_v15, 2  ;;  %v3152_v4 = vrot.slane %v7349_v52, 2  ;;  %v3490_v52 = vld [vmem:[#allocation2 + $0x179] ss:$2 sm:$0x1] }
 0x300   :  { %2779 = vrot.lane.b32.xlu0 %v2776_v20, %s5725_s17  ;;  %v3047_v20 = vld [vmem:[#allocation2 + $0x14c] ss:$2 sm:$0x1] }
 0x301   :  { %v2424_v62 = vpop.permute.xlu2 %2423  ;;  %v2336_v1 = vpop.permute.xlu1 %2335 }
 0x302   :  { %2342 = vst.msk [vmem:[#allocation3 + $0xa0] sm:$0x1f] %vm2341_vm7, %v2336_v1  ;;  %v2364_v53 = vpop.permute.xlu0 %2363  ;;  %v4499_v3 = vld [vmem:[#allocation3 + $0x80] sm:$0xff] }
 0x303   :  { %2368 = vst.msk [vmem:[#allocation3 + $0xa8] sm:$0x1f] %vm2239_vm13, %v2364_v53  ;;  %4649 = vmatmul.f32.gmra.mxu1 %v4499_v3  ;;  %v7363_v53 = vld [vmem:[#allocation2 + $0x166] ss:$2 sm:$0xff]  ;;  %v3051_v3 = vrot.slane %v3047_v20, 2 }
 0x304   :  { %2383 = vst.msk [vmem:[#allocation3 + $0xa8] sm:$0x1f] %vm2256_vm12, %v2379_v17  ;;  %v3026_v17 = vrot.slane %v3022_v54, 3  ;;  %v3445_v37 = vrot.slane %v7363_v53, 1  ;;  %v7457_v20 = vld [vmem:[#allocation2 + $0x17b] ss:$2 sm:$0xff] }
 0x305   :  { %v3052_v5 = vsel %vm3036_vm1, %v3050_v0, %v3051_v3 }
 0x306   :  { %v3027_v41 = vsel %vm8957_vm10, %v3025_v2, %v3026_v17  ;;  %v3434_v2 = vrot.slane %v3429_v57, 1  ;;  %vm9083_vm10 = vcmask 130048   ;;  %v7420_v17 = vld [vmem:[#allocation2 + $0x1bd] ss:$2 sm:$0xff] }
 0x307   :  { %2796 = vrot.lane.b32.xlu2 %v2793_v42, %s5727_s21  ;;  %2794 = vrot.lane.b32.xlu1 %v2791_v43, %s5727_s21  ;;  %3031 = vst.msk [vmem:[#allocation3 + $0xd8] sm:$0x3f] %vm8956_vm5, %v3027_v41  ;;  %vm9082_vm5 = vcmask 914176   ;;  %v3068_v43 = vrot.slane %v3064_v55, 2  ;;  %v3809_v8 = vrot.slane %v7420_v17, 1 }
 0x308   :  { %2811 = vrot.lane.b32.xlu0 %v2808_v6, %s5726_s20  ;;  %v3081_v6 = vld [vmem:[#allocation2 + $0x14e] ss:$2 sm:$0x1]  ;;  %v7429_v57 = vld [vmem:[#allocation2 + $0x17b] ss:$2 sm:$0xff] }
 0x309   :  { %v2454_v19 = vpop.permute.xlu2 %2453  ;;  %v2377_v22 = vpop.permute.xlu1 %2376  ;;  %v3069_v42 = vsel %vm3036_vm1, %v3067_v38, %v3068_v43  ;;  %v3458_v43 = vld [vmem:[#allocation2 + $0x177] ss:$2 sm:$0x1] }
 0x30a   :  { %2382 = vst.msk [vmem:[#allocation3 + $0x88] sm:$0xf0] %vm2254_vm15, %v2377_v22  ;;  %v2392_v13 = vpop.permute.xlu0 %2391  ;;  %v7376_v22 = vld [vmem:[#allocation2 + $0x167] ss:$2 sm:$0xff]  ;;  %v3462_v53 = vrot.slane %v3458_v43, 1 }
 0x30b   :  { %2397 = vst.msk [vmem:[#allocation3 + $0x88] sm:$0xf0] %vm2271_vm9, %v2392_v13  ;;  %v7379_v13 = vld [vmem:[#allocation2 + $0x168] ss:$2 sm:$0xff] }
 0x30c   :  { %2412 = vst.msk [vmem:[#allocation3 + $0x88] sm:$0xf0] %vm8955_vm4, %v2407_v33  ;;  %vm3438_vm4 = vcmask 130055   ;;  %v7345_v33 = vld [vmem:[#allocation2 + $0x150] ss:$2 sm:$0xff]  ;;  %v3477_v51 = vrot.slane %v7379_v13, 1 }
 0x30d   :  { %3439 = vst.msk [vmem:[#allocation3 + $0xe0] sm:$0x80] %vm3438_vm4, %v3433_v30  ;;  %v3118_v36 = vrot.slane %v7345_v33, 2  ;;  %v3149_v33 = vld [vmem:[#allocation2 + $0x162] ss:$2 sm:$0x1] }
 0x30e   :  { %3814 = vst.msk [vmem:[#allocation3 + $0xf8] sm:$0x80] %vm3438_vm4, %v3809_v8 }
 0x30f   :  { %2828 = vrot.lane.b32.xlu2 %v2825_v46, %s5728_s24  ;;  %2813 = vrot.lane.b32.xlu1 %v2810_v56, %s5726_s20  ;;  %v3461_v46 = vrot.slane %v7376_v22, 1  ;;  %v7386_v56 = vld [vmem:[#allocation2 + $0x153] ss:$2 sm:$0xff] }
 0x310   :  { %2830 = vrot.lane.b32.xlu0 %v2827_v9, %s5728_s24 }
 0x311   :  { %v2486_v45 = vpop.permute.xlu2 %2485  ;;  %v2394_v40 = vpop.permute.xlu1 %2393 }
 0x312   :  { %2490 = vst.msk [vmem:[#allocation3 + $0xb0] sm:$0x1f] %vm2239_vm13, %v2486_v45  ;;  %v2409_v28 = vpop.permute.xlu0 %2408  ;;  %vm8966_vm13 = vcmask 1046528   ;;  %v3169_v45 = vrot.slane %v7386_v56, 2 }
 0x313   :  { %2398 = vst.msk [vmem:[#allocation3 + $0xa8] sm:$0x1f] %vm2273_vm6, %v2394_v40  ;;  %v3435_v14 = vsel %vm8966_vm13, %v3433_v30, %v3434_v2  ;;  %v3816_v40 = vld [vmem:[#allocation2 + $0x18f] ss:$2 sm:$0xff]  ;;  %v3102_v30 = vrot.slane %v3098_v27, 2  ;;  %v3463_v59 = vsel %vm8966_vm13, %v3461_v46, %v3462_v53 }
 0x314   :  { %2413 = vst.msk [vmem:[#allocation3 + $0xa8] sm:$0x1f] %vm2290_vm11, %v2409_v28  ;;  %v3115_v28 = vld [vmem:[#allocation2 + $0x160] ss:$2 sm:$0x1] }
 0x315   :  { %2428 = vst.msk [vmem:[#allocation3 + $0xa8] sm:$0x1f] %vm2307_vm8, %v2424_v62  ;;  %v3103_v54 = vsel %vm3036_vm1, %v3101_v48, %v3102_v30 }
 0x316   :  { %3440 = vst.msk [vmem:[#allocation3 + $0x100] sm:$0xff] %vm9083_vm10, %v3435_v14  ;;  %vm9084_vm10 = vcmask 261252  }
 0x317   :  { %2847 = vrot.lane.b32.xlu2 %v2844_v32, %s5729_s27  ;;  %2845 = vrot.lane.b32.xlu1 %v2842_v49, %s5729_s27  ;;  %3174 = vst.msk [vmem:[#allocation3 + $0xc8] sm:$0xc0] %vm3042_vm0, %v3169_v45  ;;  %v3119_v32 = vrot.slane %v3115_v28, 2  ;;  %v3166_v28 = vld [vmem:[#allocation2 + $0x163] ss:$2 sm:$0x1] }
 0x318   :  { %3053 = vrot.lane.b32.xlu0 %v3050_v0, %s5725_s17  ;;  %v3493_v0 = vrot.slane %v7406_v16, 1 }
 0x319   :  { %v2518_v11 = vpop.permute.xlu2 %2517  ;;  %v2422_v35 = vpop.permute.xlu1 %2421 }
 0x31a   :  { %2427 = vst.msk [vmem:[#allocation3 + $0x88] sm:$0xf0] %vm2305_vm3, %v2422_v35  ;;  %v2437_v61 = vpop.permute.xlu0 %2436  ;;  %v3132_v35 = vld [vmem:[#allocation2 + $0x161] ss:$2 sm:$0x1] }
 0x31b   :  { %2442 = vst.msk [vmem:[#allocation3 + $0x88] sm:$0xf0] %vm2322_vm2, %v2437_v61 }
 0x31c   :  { %2459 = vst.msk [vmem:[#allocation3 + $0x88] sm:$0xf0] %vm2339_vm14, %v2454_v19  ;;  %v3085_v19 = vrot.slane %v3081_v6, 2  ;;  %v3474_v6 = vld [vmem:[#allocation2 + $0x178] ss:$2 sm:$0x1] }
 0x31e   :  { %v3086_v9 = vsel %vm3036_vm1, %v3084_v34, %v3085_v19 }
 0x31f   :  { %3087 = vrot.lane.b32.xlu2 %v3084_v34, %s5726_s20  ;;  %3070 = vrot.lane.b32.xlu1 %v3067_v38, %s5727_s21  ;;  %v3136_v34 = vrot.slane %v3132_v35, 2  ;;  %v7426_v38 = vld [vmem:[#allocation2 + $0x17a] ss:$2 sm:$0xff] }
 0x320   :  { %3104 = vrot.lane.b32.xlu0 %v3101_v48, %s5728_s24  ;;  %v3422_v48 = vrot.slane %v3418_v44, 2 }
 0x321   :  { %v2537_v47 = vpop.permute.xlu2 %2536  ;;  %v2439_v50 = vpop.permute.xlu1 %2438 }
 0x322   :  { %2443 = vst.msk [vmem:[#allocation3 + $0xa8] sm:$0x1f] %vm9082_vm5, %v2439_v50  ;;  %v2456_v63 = vpop.permute.xlu0 %2455  ;;  %vm9085_vm5 = vcmask 130053   ;;  %v3423_v2 = vsel %vm3036_vm1, %v3421_v31, %v3422_v48  ;;  %v3137_v50 = vsel %vm3036_vm1, %v3135_v10, %v3136_v34  ;;  %v3442_v31 = vld [vmem:[#allocation2 + $0x176] ss:$2 sm:$0x1] }
 0x323   :  { %2460 = vst.msk [vmem:[#allocation3 + $0xa8] sm:$0x1f] %vm2341_vm7, %v2456_v63  ;;  %v4500_v21 = vld [vmem:[#allocation3 + $0x88] sm:$0xff]  ;;  %v3525_v63 = vrot.slane %v7429_v57, 1  ;;  %v3446_v55 = vrot.slane %v3442_v31, 1 }
 0x324   :  { %4702 = vmatmul.f32.gmra.mxu2 %v4500_v21  ;;  %2898 = vst.msk [vmem:[#allocation3 + $0xb0] sm:$0xe0] %vm9085_vm5, %v2893_v24  ;;  %v3153_v21 = vrot.slane %v3149_v33, 2  ;;  %v3806_v33 = vld [vmem:[#allocation2 + $0x1cd] ss:$2 sm:$0x1] }
 0x326   :  { %v3154_v3 = vsel %vm3036_vm1, %v3152_v4, %v3153_v21 }
 0x327   :  { %3138 = vrot.lane.b32.xlu2 %v3135_v10, %s5730_s30  ;;  %3121 = vrot.lane.b32.xlu1 %v3118_v36, %s5729_s27 }
 0x328   :  { %3155 = vrot.lane.b32.xlu0 %v3152_v4, %s5731_s10 }
 0x329   :  { %v2569_v58 = vpop.permute.xlu2 %2568  ;;  %v2484_v62 = vpop.permute.xlu1 %2483 }
 0x32a   :  { %2489 = vst.msk [vmem:[#allocation3 + $0x90] sm:$0xf0] %vm9084_vm10, %v2484_v62  ;;  %v2501_v1 = vpop.permute.xlu0 %2500  ;;  %vm9092_vm10 = vcmask 128000  }
 0x32b   :  { %2506 = vst.msk [vmem:[#allocation3 + $0x90] sm:$0xf0] %vm2254_vm15, %v2501_v1  ;;  %vm9086_vm15 = vcmask 130048   ;;  %v2890_v1 = vld [vmem:[#allocation2 + $0x161] ss:$2 sm:$0x1] }
 0x32c   :  { %2523 = vst.msk [vmem:[#allocation3 + $0x90] sm:$0xf0] %vm2271_vm9, %v2518_v11  ;;  %v3120_v11 = vsel %vm3036_vm1, %v3118_v36, %v3119_v32  ;;  %vm9090_vm9 = vcmask 122880   ;;  %v7455_v36 = vld [vmem:[#allocation2 + $0x17c] ss:$2 sm:$0xff] }
 0x32d   :  { %3818 = vst.msk [vmem:[#allocation3 + $0x120] sm:$0xff] %vm9086_vm15, %v3816_v40  ;;  %v3541_v62 = vrot.slane %v7455_v36, 1  ;;  %v3494_v40 = vrot.slane %v3490_v52, 1  ;;  %v3554_v32 = vld [vmem:[#allocation2 + $0x18d] ss:$2 sm:$0x1] }
 0x32e   :  { %3819 = vst.msk [vmem:[#allocation3 + $0x140] sm:$0x1] %vm9090_vm9, %v3817_v26  ;;  %vm2675_vm15 = vcmask 523653   ;;  %vm8964_vm9 = vcmask 652800   ;;  %v3868_v36 = vld [vmem:[#allocation2 + $0x1a4] ss:$2 sm:$0xff] }
 0x32f   :  { %3448 = vrot.lane.b32.xlu2 %v3445_v37, %s5725_s17  ;;  %3055 = vrot.lane.b32.xlu1 %v3052_v5, %s5725_s17  ;;  %v2894_v5 = vrot.slane %v2890_v1, 3  ;;  %v3495_v13 = vsel %vm8966_vm13, %v3493_v0, %v3494_v40  ;;  %v3672_v52 = vld [vmem:[#allocation2 + $0x1a5] ss:$2 sm:$0xff] }
 0x330   :  { %3072 = vrot.lane.b32.xlu0 %v3069_v42, %s5727_s21  ;;  %v3447_v42 = vsel %vm8966_vm13, %v3445_v37, %v3446_v55  ;;  %v4105_v55 = vld [vmem:[#allocation2 + $0x1c9] ss:$2 sm:$0x1] }
 0x331   :  { %v2588_v7 = vpop.permute.xlu2 %2587  ;;  %v2503_v23 = vpop.permute.xlu1 %2502 }
 0x332   :  { %2507 = vst.msk [vmem:[#allocation3 + $0xb0] sm:$0x1f] %vm2256_vm12, %v2503_v23  ;;  %v2520_v18 = vpop.permute.xlu0 %2519  ;;  %vm9087_vm12 = vcmask 654852  }
 0x333   :  { %2524 = vst.msk [vmem:[#allocation3 + $0xb0] sm:$0x1f] %vm2273_vm6, %v2520_v18  ;;  %vm9089_vm6 = vcmask 129024  }
 0x334   :  { %2541 = vst.msk [vmem:[#allocation3 + $0xb0] sm:$0x1f] %vm2290_vm11, %v2537_v47  ;;  %v3509_v47 = vrot.slane %v7426_v38, 1  ;;  %vm8968_vm11 = vcmask 259200   ;;  %vm9093_vm5 = vmmov %vm9089_vm6 }
 0x335   :  { %3427 = vst.msk [vmem:[#allocation3 + $0xf8] sm:$0x7f] %vm9089_vm6, %v3423_v2  ;;  %vm9094_vm6 = vmmov %vm9093_vm5  ;;  %v3832_v2 = vld [vmem:[#allocation2 + $0x191] ss:$2 sm:$0xff] }
 0x337   :  { %3089 = vrot.lane.b32.xlu2 %v3086_v9, %s5726_s20  ;;  %3464 = vrot.lane.b32.xlu1 %v3461_v46, %s5727_s21  ;;  %v3478_v9 = vrot.slane %v3474_v6, 1  ;;  %v3538_v46 = vld [vmem:[#allocation2 + $0x18c] ss:$2 sm:$0x1] }
 0x338   :  { %3480 = vrot.lane.b32.xlu0 %v3477_v51, %s5726_s20  ;;  %v3542_v16 = vrot.slane %v3538_v46, 1 }
 0x339   :  { %v2651_v49 = vpop.permute.xlu2 %2650  ;;  %v2535_v29 = vpop.permute.xlu1 %2534  ;;  %v3479_v30 = vsel %vm8966_vm13, %v3477_v51, %v3478_v9  ;;  %v3506_v51 = vld [vmem:[#allocation2 + $0x18a] ss:$2 sm:$0x1] }
 0x33a   :  { %2540 = vst.msk [vmem:[#allocation3 + $0x90] sm:$0xf0] %vm9087_vm12, %v2535_v29  ;;  %v2552_v12 = vpop.permute.xlu0 %2551  ;;  %v3286_v29 = vld [vmem:[#allocation2 + $0x18b] ss:$2 sm:$0x1]  ;;  %vm2694_vm12 = vcmask 654853   ;;  %v3543_v34 = vsel %vm8966_vm13, %v3541_v62, %v3542_v16 }
 0x33b   :  { %2557 = vst.msk [vmem:[#allocation3 + $0x90] sm:$0xf0] %vm2305_vm3, %v2552_v12  ;;  %vm2656_vm3 = vcmask 392453   ;;  %v3522_v12 = vld [vmem:[#allocation2 + $0x18b] ss:$2 sm:$0x1] }
 0x33c   :  { %2574 = vst.msk [vmem:[#allocation3 + $0x90] sm:$0xf0] %vm2322_vm2, %v2569_v58  ;;  %vm9088_vm2 = vcmask 914176   ;;  %v3289_v58 = vrot.slane %v7457_v20, 2  ;;  %v3290_v22 = vrot.slane %v3286_v29, 2  ;;  %v3526_v35 = vrot.slane %v3522_v12, 1 }
 0x33d   :  { %v3856_v20 = vld [vmem:[#allocation2 + $0x193] ss:$2 sm:$0xff]  ;;  %v3845_v29 = vld [vmem:[#allocation2 + $0x1a2] ss:$2 sm:$0x1] }
 0x33e   :  { %3294 = vst.msk [vmem:[#allocation3 + $0xd0] sm:$0xc0] %vm3042_vm0, %v3289_v58  ;;  %vm9091_vm0 = vcmask 1044480   ;;  %v3527_v44 = vsel %vm8966_vm13, %v3525_v63, %v3526_v35  ;;  %v3881_v16 = vld [vmem:[#allocation2 + $0x1b5] ss:$2 sm:$0x1] }
 0x33f   :  { %3496 = vrot.lane.b32.xlu2 %v3493_v0, %s5728_s24  ;;  %3106 = vrot.lane.b32.xlu1 %v3103_v54, %s5728_s24  ;;  %v2895_v37 = vsel %vm9091_vm0, %v2893_v24, %v2894_v5  ;;  %v3291_v0 = vsel %vm3036_vm1, %v3289_v58, %v3290_v22  ;;  %vm8961_vm0 = vcmask 784000   ;;  %v3880_v58 = vld [vmem:[#allocation2 + $0x1a5] ss:$2 sm:$0xff]  ;;  %v3857_v22 = vld [vmem:[#allocation2 + $0x1a3] ss:$2 sm:$0x1] }
 0x340   :  { %3123 = vrot.lane.b32.xlu0 %v3120_v11, %s5729_s27  ;;  %2899 = vst.msk [vmem:[#allocation3 + $0xd0] sm:$0x3f] %vm9092_vm10, %v2895_v37  ;;  %vm9095_vm10 = vcmask 130048  }
 0x341   :  { %v7422_v61 = vpop.permute.xlu2 %2671  ;;  %v2554_v39 = vpop.permute.xlu1 %2553  ;;  %3295 = vst.msk [vmem:[#allocation3 + $0xf0] sm:$0x7f] %vm9094_vm6, %v3291_v0  ;;  %vm8960_vm6 = vcmask 917253  }
 0x342   :  { %2558 = vst.msk [vmem:[#allocation3 + $0xb0] sm:$0x1f] %vm2307_vm8, %v2554_v39  ;;  %v2571_v41 = vpop.permute.xlu0 %2570  ;;  %vm8967_vm8 = vcmask 390400  }
 0x343   :  { %2575 = vst.msk [vmem:[#allocation3 + $0xb0] sm:$0x1f] %vm9088_vm2, %v2571_v41  ;;  %vm2713_vm2 = vcmask 786053  }
 0x344   :  { %2592 = vst.msk [vmem:[#allocation3 + $0xb0] sm:$0x1f] %vm2341_vm7, %v2588_v7  ;;  %vm8959_vm7 = vcmask 261253   ;;  %v3553_v7 = vld [vmem:[#allocation2 + $0x17d] ss:$2 sm:$0xff] }
 0x345   :  { %v3557_v27 = vrot.slane %v3553_v7, 1  ;;  %v3892_v7 = vld [vmem:[#allocation2 + $0x1a6] ss:$2 sm:$0xff] }
 0x347   :  { %3140 = vrot.lane.b32.xlu2 %v3137_v50, %s5730_s30  ;;  %3512 = vrot.lane.b32.xlu1 %v3509_v47, %s5729_s27  ;;  %3562 = vst.msk [vmem:[#allocation3 + $0xe8] sm:$0x80] %vm3438_vm4, %v3557_v27  ;;  %v3844_v50 = vld [vmem:[#allocation2 + $0x192] ss:$2 sm:$0xff] }
 0x348   :  { %3528 = vrot.lane.b32.xlu0 %v3525_v63, %s5730_s30  ;;  %v4104_v63 = vld [vmem:[#allocation2 + $0x1b9] ss:$2 sm:$0xff] }
 0x349   :  { %v7452_v15 = vpop.permute.xlu2 %2707  ;;  %v2586_v14 = vpop.permute.xlu1 %2585  ;;  %v4108_v21 = vrot.slane %v4104_v63, 7  ;;  %v4146_v63 = vld [vmem:[#allocation2 + $0x1cc] ss:$2 sm:$0x1] }
 0x34a   :  { %2591 = vst.msk [vmem:[#allocation3 + $0x90] sm:$0xf0] %vm2339_vm14, %v2586_v14  ;;  %v2632_v10 = vpop.permute.xlu0 %2631  ;;  %vm8965_vm14 = vcmask 521600  }
 0x34b   :  { %2638 = vst.msk [vmem:[#allocation3 + $0xa0] sm:$0xe0] %vm8959_vm7, %v2632_v10 }
 0x34c   :  { %2657 = vst.msk [vmem:[#allocation3 + $0xa0] sm:$0xe0] %vm2656_vm3, %v2651_v49  ;;  %v3170_v49 = vrot.slane %v3166_v28, 2 }
 0x34e   :  { %v3171_v24 = vsel %vm3036_vm1, %v3169_v45, %v3170_v49  ;;  %v3558_v45 = vrot.slane %v3554_v32, 1  ;;  %v3833_v49 = vld [vmem:[#allocation2 + $0x1a1] ss:$2 sm:$0x1] }
 0x34f   :  { %3544 = vrot.lane.b32.xlu2 %v3541_v62, %s5731_s10  ;;  %3157 = vrot.lane.b32.xlu1 %v3154_v3, %s5731_s10  ;;  %3175 = vst.msk [vmem:[#allocation3 + $0xe8] sm:$0x7f] %vm9093_vm5, %v3171_v24  ;;  %vm8958_vm5 = vcmask 915200   ;;  %v4109_v62 = vrot.slane %v4105_v55, 7  ;;  %v7540_v3 = vld [vmem:[#allocation2 + $0x1ba] ss:$2 sm:$0xff] }
 0x350   :  { %3450 = vrot.lane.b32.xlu0 %v3447_v42, %s5725_s17  ;;  %v3559_v39 = vsel %vm8966_vm13, %v3557_v27, %v3558_v45  ;;  %v3821_v42 = vld [vmem:[#allocation2 + $0x1a0] ss:$2 sm:$0x1]  ;;  %v4119_v6 = vrot.slane %v7540_v3, 7  ;;  %v7556_v27 = vld [vmem:[#allocation2 + $0x1bb] ss:$2 sm:$0xff] }
 0x351   :  { %v7475_v4 = vpop.permute.xlu2 %2728  ;;  %v2634_v23 = vpop.permute.xlu1 %2633  ;;  %v4501_v18 = vld [vmem:[#allocation3 + $0x90] sm:$0xff]  ;;  %3563 = vst.msk [vmem:[#allocation3 + $0x108] sm:$0xff] %vm9095_vm10, %v3559_v39  ;;  %vm2751_vm10 = vcmask 1048453   ;;  %v4134_v28 = vrot.slane %v7556_v27, 7 }
 0x352   :  { %2640 = vst.msk [vmem:[#allocation3 + $0xc0] sm:$0x3f] %vm8968_vm11, %v2634_v23  ;;  %v2653_v19 = vpop.permute.xlu0 %2652  ;;  %4755 = vmatmul.f32.gmra.mxu3 %v4501_v18  ;;  %v3677_v23 = vrot.slane %v3672_v52, 1  ;;  %v7569_v24 = vld [vmem:[#allocation2 + $0x1bc] ss:$2 sm:$0xff] }
 0x353   :  { %2659 = vst.msk [vmem:[#allocation3 + $0xc0] sm:$0x3f] %vm8967_vm8, %v2653_v19  ;;  %v3904_v19 = vld [vmem:[#allocation2 + $0x1a7] ss:$2 sm:$0xff] }
 0x354   :  { %2678 = vst.msk [vmem:[#allocation3 + $0xc0] sm:$0x3f] %vm8965_vm14, %v7422_v61  ;;  %v3510_v61 = vrot.slane %v3506_v51, 1  ;;  %v7571_v32 = vld [vmem:[#allocation2 + $0x1bd] ss:$2 sm:$0xff]  ;;  %v4149_v51 = vrot.slane %v7569_v24, 7 }
 0x355   :  { %3682 = vst.msk [vmem:[#allocation3 + $0xf0] sm:$0x80] %vm3438_vm4, %v3677_v23  ;;  %vm9102_vm4 = vcmask 122880   ;;  %v4164_v46 = vrot.slane %v7571_v32, 7 }
 0x356   :  { %v3511_v41 = vsel %vm8966_vm13, %v3509_v47, %v3510_v61  ;;  %v3820_v47 = vld [vmem:[#allocation2 + $0x190] ss:$2 sm:$0xff] }
 0x357   :  { %3482 = vrot.lane.b32.xlu2 %v3479_v30, %s5726_s20  ;;  %3466 = vrot.lane.b32.xlu1 %v3463_v59, %s5727_s21  ;;  %v3869_v61 = vld [vmem:[#allocation2 + $0x1b4] ss:$2 sm:$0x1] }
 0x358   :  { %3498 = vrot.lane.b32.xlu0 %v3495_v13, %s5728_s24  ;;  %v3905_v13 = vld [vmem:[#allocation2 + $0x1b7] ss:$2 sm:$0x1] }
 0x359   :  { %v2778_v56 = vpop.permute.xlu2 %2777  ;;  %v2670_v54 = vpop.permute.xlu1 %2669  ;;  %3907 = vst.msk [vmem:[#allocation3 + $0x148] sm:$0x1] %vm9102_vm4, %v3905_v13  ;;  %vm3076_vm4 = vcmask 392454  }
 0x35a   :  { %2783 = vst.msk [vmem:[#allocation3 + $0xa8] sm:$0xe0] %vm8959_vm7, %v2778_v56  ;;  %v2689_v11 = vpop.permute.xlu0 %2688  ;;  %vm9097_vm7 = vcmask 130049  }
 0x35b   :  { %2676 = vst.msk [vmem:[#allocation3 + $0xa0] sm:$0xe0] %vm2675_vm15, %v2670_v54 }
 0x35c   :  { %2695 = vst.msk [vmem:[#allocation3 + $0xa0] sm:$0xe0] %vm2694_vm12, %v2689_v11  ;;  %v7584_v11 = vld [vmem:[#allocation2 + $0x1ce] ss:$2 sm:$0xff] }
 0x35d   :  { %2714 = vst.msk [vmem:[#allocation3 + $0xa0] sm:$0xe0] %vm2713_vm2, %v7452_v15  ;;  %v3810_v15 = vrot.slane %v3806_v33, 1  ;;  %v4179_v35 = vrot.slane %v7584_v11, 7 }
 0x35e   :  { %4113 = vst.msk [vmem:[#allocation3 + $0x140] sm:$0xfe] %vm9097_vm7, %v4108_v21  ;;  %vm9099_vm7 = vcmask 123904  }
 0x35f   :  { %3530 = vrot.lane.b32.xlu2 %v3527_v44, %s5730_s30  ;;  %3514 = vrot.lane.b32.xlu1 %v3511_v41, %s5729_s27  ;;  %v3811_v10 = vsel %vm8966_vm13, %v3809_v8, %v3810_v15  ;;  %v4190_v41 = vld [vmem:[#allocation2 + $0x1cf] ss:$2 sm:$0xff] }
 0x360   :  { %3546 = vrot.lane.b32.xlu0 %v3543_v34, %s5731_s10  ;;  %v7596_v34 = vld [vmem:[#allocation2 + $0x1d0] ss:$2 sm:$0xff] }
 0x361   :  { %v2797_v48 = vpop.permute.xlu2 %2796  ;;  %v2691_v38 = vpop.permute.xlu1 %2690 }
 0x362   :  { %2697 = vst.msk [vmem:[#allocation3 + $0xc0] sm:$0x3f] %vm8964_vm9, %v2691_v38  ;;  %v2710_v57 = vpop.permute.xlu0 %2709  ;;  %v3893_v38 = vld [vmem:[#allocation2 + $0x1b6] ss:$2 sm:$0x1] }
 0x363   :  { %2716 = vst.msk [vmem:[#allocation3 + $0xc0] sm:$0x3f] %vm8961_vm0, %v2710_v57  ;;  %v4194_v57 = vrot.slane %v4190_v41, 7 }
 0x364   :  { %2735 = vst.msk [vmem:[#allocation3 + $0xc0] sm:$0x3f] %vm8958_vm5, %v7475_v4  ;;  %vm9096_vm5 = vcmask 130048   ;;  %v3674_v4 = vld [vmem:[#allocation2 + $0x1b5] ss:$2 sm:$0x1] }
 0x365   :  { %3815 = vst.msk [vmem:[#allocation3 + $0x118] sm:$0xff] %vm9096_vm5, %v3811_v10  ;;  %vm9098_vm5 = vcmask 1040384   ;;  %v3678_v18 = vrot.slane %v3674_v4, 1  ;;  %v4206_v4 = vld [vmem:[#allocation2 + $0x1e0] ss:$2 sm:$0x1] }
 0x366   :  { %v4110_v5 = vsel %vm9098_vm5, %v4108_v21, %v4109_v62  ;;  %vm9100_vm5 = vcmask 130048   ;;  %v4150_v21 = vrot.slane %v4146_v63, 7  ;;  %v4191_v62 = vld [vmem:[#allocation2 + $0x1df] ss:$2 sm:$0x1] }
 0x367   :  { %3836 = vrot.lane.b32.xlu2 %v3832_v2, %s5727_s21  ;;  %3824 = vrot.lane.b32.xlu1 %v3820_v47, %s5725_s17  ;;  %4114 = vst.msk [vmem:[#allocation3 + $0x160] sm:$0x3] %vm9099_vm7, %v4110_v5  ;;  %v3679_v40 = vsel %vm8966_vm13, %v3677_v23, %v3678_v18  ;;  %vm9101_vm7 = vmmov %vm9100_vm5  ;;  %v4209_v2 = vrot.slane %v7596_v34, 7  ;;  %v4131_v47 = vld [vmem:[#allocation2 + $0x1cb] ss:$2 sm:$0x1] }
 0x368   :  { %3848 = vrot.lane.b32.xlu0 %v3844_v50, %s5726_s20  ;;  %3906 = vst.msk [vmem:[#allocation3 + $0x128] sm:$0xff] %vm9100_vm5, %v3904_v19  ;;  %vm8962_vm5 = vcmask 261255   ;;  %v4116_v50 = vld [vmem:[#allocation2 + $0x1ca] ss:$2 sm:$0x1]  ;;  %vm8970_vm13 = vcmask 1048454  }
 0x369   :  { %v2829_v26 = vpop.permute.xlu2 %2828  ;;  %v2727_v31 = vpop.permute.xlu1 %2726  ;;  %3683 = vst.msk [vmem:[#allocation3 + $0x110] sm:$0xff] %vm9101_vm7, %v3679_v40  ;;  %vm3059_vm7 = vcmask 261254   ;;  %v4135_v15 = vrot.slane %v4131_v47, 7  ;;  %v4221_v19 = vld [vmem:[#allocation2 + $0x1e1] ss:$2 sm:$0x1] }
 0x36a   :  { %2733 = vst.msk [vmem:[#allocation3 + $0xa0] sm:$0xe0] %vm8960_vm6, %v2727_v31  ;;  %v2746_v14 = vpop.permute.xlu0 %2745  ;;  %vm8963_vm6 = vcmask 1046400   ;;  %v7634_v40 = vld [vmem:[#allocation2 + $0x152] ss:$2 sm:$0xff] }
 0x36b   :  { %2752 = vst.msk [vmem:[#allocation3 + $0xa0] sm:$0xe0] %vm2751_vm10, %v2746_v14  ;;  %v4120_v14 = vrot.slane %v4116_v50, 7  ;;  %v7698_v47 = vld [vmem:[#allocation2 + $0x154] ss:$2 sm:$0xff] }
 0x36c   :  { %v7700_v50 = vld [vmem:[#allocation2 + $0x168] ss:$2 sm:$0xff]  ;;  %v7703_v63 = vld [vmem:[#allocation2 + $0x165] ss:$2 sm:$0xff] }
 0x36f   :  { %3872 = vrot.lane.b32.xlu2 %v3868_v36, %s5729_s27  ;;  %3860 = vrot.lane.b32.xlu1 %v3856_v20, %s5728_s24  ;;  %v4161_v20 = vld [vmem:[#allocation2 + $0x1cd] ss:$2 sm:$0x1] }
 0x370   :  { %3884 = vrot.lane.b32.xlu0 %v3880_v58, %s5730_s30  ;;  %v4176_v58 = vld [vmem:[#allocation2 + $0x1de] ss:$2 sm:$0x1] }
 0x371   :  { %v2848_v1 = vpop.permute.xlu2 %2847  ;;  %v2748_v17 = vpop.permute.xlu1 %2747 }
 0x372   :  { %2754 = vst.msk [vmem:[#allocation3 + $0xc0] sm:$0x3f] %vm8963_vm6, %v2748_v17  ;;  %v2780_v8 = vpop.permute.xlu0 %2779  ;;  %v4503_v43 = vld [vmem:[#allocation3 + $0xa0] sm:$0xff]  ;;  %vm9103_vm6 = vcmask 130048  }
 0x373   :  { %2784 = vst.msk [vmem:[#allocation3 + $0xc8] sm:$0x3f] %vm8968_vm11, %v2780_v8  ;;  %4652 = vmatmul.f32.gmra.mxu1 %v4503_v43  ;;  %v4180_v8 = vrot.slane %v4176_v58, 7  ;;  %v4165_v43 = vrot.slane %v4161_v20, 7  ;;  %v7718_v20 = vld [vmem:[#allocation2 + $0x166] ss:$2 sm:$0xff] }
 0x374   :  { %2801 = vst.msk [vmem:[#allocation3 + $0xc8] sm:$0x3f] %vm8967_vm8, %v2797_v48  ;;  %v3995_v48 = vld [vmem:[#allocation2 + $0x1cf] ss:$2 sm:$0xff]  ;;  %v7721_v58 = vld [vmem:[#allocation2 + $0x17c] ss:$2 sm:$0xff] }
 0x375   :  { %3998 = vst.msk [vmem:[#allocation3 + $0x130] sm:$0xff] %vm9103_vm6, %v3995_v48  ;;  %vm9104_vm6 = vcmask 1040384  }
 0x376   :  { %v4136_v10 = vsel %vm9104_vm6, %v4134_v28, %v4135_v15  ;;  %vm9105_vm8 = vmmov %vm9104_vm6  ;;  %v2903_v15 = vld [vmem:[#allocation2 + $0x162] ss:$2 sm:$0x1] }
 0x377   :  { %3826 = vrot.lane.b32.xlu2 %v3821_v42, %s5725_s17  ;;  %3896 = vrot.lane.b32.xlu1 %v3892_v7, %s5731_s10  ;;  %v4121_v36 = vsel %vm9105_vm8, %v4119_v6, %v4120_v14  ;;  %vm9106_vm11 = vmmov %vm9104_vm6  ;;  %vm8973_vm6 = vcmask 522624   ;;  %v4195_v42 = vrot.slane %v4191_v62, 7  ;;  %v4166_v52 = vsel %vm9105_vm8, %v4164_v46, %v4165_v43 }
 0x378   :  { %4122 = vrot.lane.b32.xlu0 %v4119_v6, %s5725_s17  ;;  %v4151_v55 = vsel %vm9106_vm11, %v4149_v51, %v4150_v21  ;;  %v4220_v6 = vld [vmem:[#allocation2 + $0x1d1] ss:$2 sm:$0xff]  ;;  %vm9107_vm11 = vmmov %vm9105_vm8  ;;  %v3210_v62 = vrot.slane %v7718_v20, 2 }
 0x379   :  { %v3088_v9 = vpop.permute.xlu2 %3087  ;;  %v2795_v53 = vpop.permute.xlu1 %2794  ;;  %v4181_v7 = vsel %vm9107_vm11, %v4179_v35, %v4180_v8  ;;  %v4224_v23 = vrot.slane %v4220_v6, 7  ;;  %vm8976_vm11 = vcmask 654855  }
 0x37a   :  { %2800 = vst.msk [vmem:[#allocation3 + $0xa8] sm:$0xe0] %vm2656_vm3, %v2795_v53  ;;  %v2812_v37 = vpop.permute.xlu0 %2811 }
 0x37b   :  { %2817 = vst.msk [vmem:[#allocation3 + $0xa8] sm:$0xe0] %vm2675_vm15, %v2812_v37 }
 0x37c   :  { %2834 = vst.msk [vmem:[#allocation3 + $0xa8] sm:$0xe0] %vm2694_vm12, %v2829_v26 }
 0x37f   :  { %4137 = vrot.lane.b32.xlu2 %v4134_v28, %s5727_s21  ;;  %3838 = vrot.lane.b32.xlu1 %v3833_v49, %s5727_s21  ;;  %v4210_v28 = vrot.slane %v4206_v4, 7 }
 0x380   :  { %3850 = vrot.lane.b32.xlu0 %v3845_v29, %s5726_s20  ;;  %v7638_v29 = vld [vmem:[#allocation2 + $0x153] ss:$2 sm:$0xff] }
 0x381   :  { %v3139_v12 = vpop.permute.xlu2 %3138  ;;  %v2814_v30 = vpop.permute.xlu1 %2813  ;;  %v2923_v24 = vrot.slane %v7638_v29, 3 }
 0x382   :  { %2818 = vst.msk [vmem:[#allocation3 + $0xc8] sm:$0x3f] %vm8965_vm14, %v2814_v30  ;;  %v2831_v59 = vpop.permute.xlu0 %2830  ;;  %vm8974_vm14 = vcmask 917254   ;;  %v3997_v30 = vld [vmem:[#allocation2 + $0x1df] ss:$2 sm:$0x1] }
 0x383   :  { %2835 = vst.msk [vmem:[#allocation3 + $0xc8] sm:$0x3f] %vm8964_vm9, %v2831_v59  ;;  %vm8969_vm9 = vcmask 786054  }
 0x384   :  { %2852 = vst.msk [vmem:[#allocation3 + $0xc8] sm:$0x3f] %vm8961_vm0, %v2848_v1  ;;  %vm3093_vm0 = vcmask 523654  }
 0x387   :  { %3862 = vrot.lane.b32.xlu2 %v3857_v22, %s5728_s24  ;;  %4152 = vrot.lane.b32.xlu1 %v4149_v51, %s5726_s20  ;;  %v7656_v22 = vld [vmem:[#allocation2 + $0x13f] ss:$2 sm:$0xff] }
 0x388   :  { %4167 = vrot.lane.b32.xlu0 %v4164_v46, %s5728_s24  ;;  %v7658_v46 = vld [vmem:[#allocation2 + $0x154] ss:$2 sm:$0xff] }
 0x389   :  { %v3449_v56 = vpop.permute.xlu2 %3448  ;;  %v2846_v54 = vpop.permute.xlu1 %2845 }
 0x38a   :  { %3455 = vst.msk [vmem:[#allocation3 + $0xe0] sm:$0x80] %vm8962_vm5, %v3449_v56  ;;  %v3054_v45 = vpop.permute.xlu0 %3053  ;;  %vm3110_vm5 = vcmask 654854   ;;  %v7661_v56 = vld [vmem:[#allocation2 + $0x165] ss:$2 sm:$0xff] }
 0x38b   :  { %2851 = vst.msk [vmem:[#allocation3 + $0xa8] sm:$0xe0] %vm2713_vm2, %v2846_v54  ;;  %v2859_v54 = vrot.slane %v7656_v22, 3  ;;  %v2957_v11 = vrot.slane %v7661_v56, 3 }
 0x38c   :  { %3060 = vst.msk [vmem:[#allocation3 + $0xc0] sm:$0xc0] %vm3059_vm7, %v3054_v45  ;;  %v2940_v45 = vrot.slane %v7658_v46, 3 }
 0x38f   :  { %4182 = vrot.lane.b32.xlu2 %v4179_v35, %s5729_s27  ;;  %3874 = vrot.lane.b32.xlu1 %v3869_v61, %s5729_s27 }
 0x390   :  { %3886 = vrot.lane.b32.xlu0 %v3881_v16, %s5730_s30 }
 0x391   :  { %v3090_v0 = vpop.permute.xlu2 %3089  ;;  %v3071_v39 = vpop.permute.xlu1 %3070 }
 0x392   :  { %3077 = vst.msk [vmem:[#allocation3 + $0xc0] sm:$0xc0] %vm3076_vm4, %v3071_v39  ;;  %v3105_v44 = vpop.permute.xlu0 %3104  ;;  %v7679_v39 = vld [vmem:[#allocation2 + $0x150] ss:$2 sm:$0xff] }
 0x393   :  { %3094 = vst.msk [vmem:[#allocation3 + $0xc0] sm:$0xc0] %vm3093_vm0, %v3088_v9  ;;  %v4225_v9 = vrot.slane %v4221_v19, 7  ;;  %v2876_v34 = vrot.slane %v7679_v39, 3 }
 0x394   :  { %3111 = vst.msk [vmem:[#allocation3 + $0xc0] sm:$0xc0] %vm3110_vm5, %v3105_v44  ;;  %v7682_v44 = vld [vmem:[#allocation2 + $0x167] ss:$2 sm:$0xff] }
 0x395   :  { %v4226_v49 = vsel %vm9105_vm8, %v4224_v23, %v4225_v9  ;;  %v2991_v48 = vrot.slane %v7682_v44, 3 }
 0x397   :  { %3898 = vrot.lane.b32.xlu2 %v3893_v38, %s5731_s10  ;;  %4197 = vrot.lane.b32.xlu1 %v4194_v57, %s5730_s30 }
 0x398   :  { %4212 = vrot.lane.b32.xlu0 %v4209_v2, %s5731_s10 }
 0x399   :  { %v3497_v33 = vpop.permute.xlu2 %3496  ;;  %v3122_v26 = vpop.permute.xlu1 %3121 }
 0x39a   :  { %3128 = vst.msk [vmem:[#allocation3 + $0xc0] sm:$0xc0] %vm8969_vm9, %v3122_v26  ;;  %v3156_v31 = vpop.permute.xlu0 %3155  ;;  %vm8972_vm9 = vcmask 260224   ;;  %v3008_v26 = vrot.slane %v7700_v50, 3 }
 0x39b   :  { %3145 = vst.msk [vmem:[#allocation3 + $0xc0] sm:$0xc0] %vm8974_vm14, %v3139_v12  ;;  %vm9109_vm14 = vcmask 130049   ;;  %v2906_v12 = vrot.slane %v7634_v40, 3  ;;  %v7760_v40 = vld [vmem:[#allocation2 + $0x17e] ss:$2 sm:$0xff] }
 0x39c   :  { %3162 = vst.msk [vmem:[#allocation3 + $0xc0] sm:$0xc0] %vm8970_vm13, %v3156_v31  ;;  %vm8971_vm13 = vcmask 391424   ;;  %v3195_v31 = vrot.slane %v7703_v63, 2  ;;  %v4580_v63 = vld [vmem:[%s8894_s3 + $0x188] sm:$0xff] }
 0x39d   :  { %4229 = vst.msk [vmem:[#allocation3 + $0x148] sm:$0xfe] %vm9109_vm14, %v4224_v23  ;;  %vm9111_vm14 = vmmov %vm9105_vm8  ;;  %4794 = vmatpush.msra.mxu1 %v4580_v63 }
 0x39e   :  { %v4211_v59 = vsel %vm9111_vm14, %v4209_v2, %v4210_v28  ;;  %vm8981_vm14 = vcmask 917255  }
 0x39f   :  { %4139 = vrot.lane.b32.xlu2 %v4136_v10, %s5727_s21  ;;  %4124 = vrot.lane.b32.xlu1 %v4121_v36, %s5725_s17 }
 0x3a0   :  { %4154 = vrot.lane.b32.xlu0 %v4151_v55, %s5726_s20  ;;  %v2907_v55 = vrot.slane %v2903_v15, 3  ;;  %v7793_v15 = vld [vmem:[#allocation2 + $0x18f] ss:$2 sm:$0xff] }
 0x3a1   :  { %v3141_v1 = vpop.permute.xlu2 %3140  ;;  %v3056_v17 = vpop.permute.xlu1 %3055 }
 0x3a2   :  { %3062 = vst.msk [vmem:[#allocation3 + $0xe0] sm:$0x7f] %vm8972_vm9, %v3056_v17  ;;  %v3073_v3 = vpop.permute.xlu0 %3072  ;;  %vm8975_vm9 = vcmask 392455   ;;  %v3302_v17 = vrot.slane %v7721_v58, 2 }
 0x3a3   :  { %3079 = vst.msk [vmem:[#allocation3 + $0xe0] sm:$0x7f] %vm8971_vm13, %v3073_v3  ;;  %v4507_v5 = vld [vmem:[#allocation3 + $0xc0] sm:$0xff]  ;;  %vm9108_vm13 = vmmov %vm9105_vm8  ;;  %vm8983_vm8 = vcmask 653824  }
 0x3a4   :  { %4655 = vmatmul.f32.gmra.mxu1 %v4507_v5  ;;  %3096 = vst.msk [vmem:[#allocation3 + $0xe0] sm:$0x7f] %vm8973_vm6, %v3090_v0  ;;  %v4196_v18 = vsel %vm9108_vm13, %v4194_v57, %v4195_v42  ;;  %vm3486_vm6 = vcmask 523655   ;;  %vm9110_vm13 = vcmask 123904   ;;  %v7677_v0 = vld [vmem:[#allocation2 + $0x166] ss:$2 sm:$0xff] }
 0x3a5   :  { %4230 = vst.msk [vmem:[#allocation3 + $0x168] sm:$0x3] %vm9110_vm13, %v4226_v49  ;;  %vm8982_vm13 = vcmask 785024   ;;  %v2974_v41 = vrot.slane %v7677_v0, 3  ;;  %v7737_v42 = vld [vmem:[#allocation2 + $0x167] ss:$2 sm:$0xff] }
 0x3a6   :  { %v2920_v3 = vld [vmem:[#allocation2 + $0x163] ss:$2 sm:$0x1] }
 0x3a7   :  { %4184 = vrot.lane.b32.xlu2 %v4181_v7, %s5729_s27  ;;  %4169 = vrot.lane.b32.xlu1 %v4166_v52, %s5728_s24  ;;  %v2924_v6 = vrot.slane %v2920_v3, 3  ;;  %v7740_v7 = vld [vmem:[#allocation2 + $0x17d] ss:$2 sm:$0xff]  ;;  %v3225_v52 = vrot.slane %v7737_v42, 2 }
 0x3a8   :  { %4199 = vrot.lane.b32.xlu0 %v4196_v18, %s5730_s30  ;;  %v3319_v23 = vrot.slane %v7740_v7, 2  ;;  %v2937_v18 = vld [vmem:[#allocation2 + $0x164] ss:$2 sm:$0x1] }
 0x3a9   :  { %v3545_v53 = vpop.permute.xlu2 %3544  ;;  %v3465_v37 = vpop.permute.xlu1 %3464 }
 0x3aa   :  { %3471 = vst.msk [vmem:[#allocation3 + $0xe0] sm:$0x80] %vm8975_vm9, %v3465_v37  ;;  %v3481_v27 = vpop.permute.xlu0 %3480  ;;  %vm9112_vm9 = vcmask 122880   ;;  %v7757_v37 = vld [vmem:[#allocation2 + $0x168] ss:$2 sm:$0xff] }
 0x3ab   :  { %3487 = vst.msk [vmem:[#allocation3 + $0xe0] sm:$0x80] %vm3486_vm6, %v3481_v27  ;;  %v2941_v27 = vrot.slane %v2937_v18, 3  ;;  %v3240_v49 = vrot.slane %v7757_v37, 2 }
 0x3ac   :  { %3503 = vst.msk [vmem:[#allocation3 + $0xe0] sm:$0x80] %vm8976_vm11, %v3497_v33  ;;  %vm8977_vm11 = vcmask 916224   ;;  %v3180_v33 = vrot.slane %v7698_v47, 2 }
 0x3ad   :  { %3999 = vst.msk [vmem:[#allocation3 + $0x150] sm:$0x1] %vm9112_vm9, %v3997_v30  ;;  %vm8978_vm9 = vcmask 786055   ;;  %v2954_v30 = vld [vmem:[#allocation2 + $0x175] ss:$2 sm:$0x1] }
 0x3af   :  { %2909 = vrot.lane.b32.xlu2 %v2906_v12, %s5725_s17  ;;  %4214 = vrot.lane.b32.xlu1 %v4211_v59, %s5731_s10  ;;  %v2856_v59 = vld [vmem:[#allocation2 + $0x14f] ss:$2 sm:$0x1] }
 0x3b0   :  { %2926 = vrot.lane.b32.xlu0 %v2923_v24, %s5727_s21  ;;  %v2860_v46 = vrot.slane %v2856_v59, 3 }
 0x3b1   :  { %v3483_v32 = vpop.permute.xlu2 %3482  ;;  %v3107_v13 = vpop.permute.xlu1 %3106 }
 0x3b2   :  { %3113 = vst.msk [vmem:[#allocation3 + $0xe0] sm:$0x7f] %vm8983_vm8, %v3107_v13  ;;  %v3124_v51 = vpop.permute.xlu0 %3123  ;;  %vm9122_vm8 = vcmask 1044480  }
 0x3b3   :  { %3130 = vst.msk [vmem:[#allocation3 + $0xe0] sm:$0x7f] %vm8982_vm13, %v3124_v51  ;;  %vm9117_vm13 = vcmask 1044480   ;;  %v2925_v4 = vsel %vm9122_vm8, %v2923_v24, %v2924_v6  ;;  %vm9124_vm8 = vcmask 392448   ;;  %v2958_v51 = vrot.slane %v2954_v30, 3 }
 0x3b4   :  { %3147 = vst.msk [vmem:[#allocation3 + $0xe0] sm:$0x7f] %vm8977_vm11, %v3141_v1  ;;  %vm8979_vm11 = vcmask 1048455   ;;  %v2908_v1 = vsel %vm9117_vm13, %v2906_v12, %v2907_v55  ;;  %vm9119_vm13 = vcmask 786048   ;;  %v3336_v12 = vrot.slane %v7760_v40, 2 }
 0x3b5   :  { %v3005_v6 = vld [vmem:[#allocation2 + $0x178] ss:$2 sm:$0x1]  ;;  %v3192_v30 = vld [vmem:[#allocation2 + $0x175] ss:$2 sm:$0x1] }
 0x3b7   :  { %2862 = vrot.lane.b32.xlu2 %v2859_v54, %s5730_s30  ;;  %2943 = vrot.lane.b32.xlu1 %v2940_v45, %s5726_s20 }
 0x3b8   :  { %2960 = vrot.lane.b32.xlu0 %v2957_v11, %s5728_s24 }
 0x3b9   :  { %v3531_v35 = vpop.permute.xlu2 %3530  ;;  %v3513_v61 = vpop.permute.xlu1 %3512 }
 0x3ba   :  { %3519 = vst.msk [vmem:[#allocation3 + $0xe0] sm:$0x80] %vm8978_vm9, %v3513_v61  ;;  %v3529_v16 = vpop.permute.xlu0 %3528  ;;  %vm8980_vm9 = vcmask 1047424  }
 0x3bb   :  { %3535 = vst.msk [vmem:[#allocation3 + $0xe0] sm:$0x80] %vm8981_vm14, %v3529_v16  ;;  %vm9116_vm14 = vcmask 654848  }
 0x3bc   :  { %3551 = vst.msk [vmem:[#allocation3 + $0xe0] sm:$0x80] %vm8979_vm11, %v3545_v53  ;;  %vm9113_vm11 = vcmask 261248  }
 0x3bf   :  { %2977 = vrot.lane.b32.xlu2 %v2974_v41, %s5729_s27  ;;  %2879 = vrot.lane.b32.xlu1 %v2876_v34, %s5731_s10 }
 0x3c0   :  { %2994 = vrot.lane.b32.xlu0 %v2991_v48, %s5730_s30 }
 0x3c1   :  { %v3837_v38 = vpop.permute.xlu2 %3836  ;;  %v3158_v57 = vpop.permute.xlu1 %3157 }
 0x3c2   :  { %3164 = vst.msk [vmem:[#allocation3 + $0xe0] sm:$0x7f] %vm8980_vm9, %v3158_v57  ;;  %v3451_v2 = vpop.permute.xlu0 %3450  ;;  %vm9115_vm9 = vcmask 523648   ;;  %v2971_v57 = vld [vmem:[#allocation2 + $0x176] ss:$2 sm:$0x1] }
 0x3c3   :  { %3456 = vst.msk [vmem:[#allocation3 + $0x100] sm:$0xff] %vm9113_vm11, %v3451_v2  ;;  %vm9114_vm11 = vcmask 392448  }
 0x3c7   :  { %3183 = vrot.lane.b32.xlu2 %v3180_v33, %s5725_s17  ;;  %3011 = vrot.lane.b32.xlu1 %v3008_v26, %s5731_s10 }
 0x3c8   :  { %3198 = vrot.lane.b32.xlu0 %v3195_v31, %s5727_s21 }
 0x3c9   :  { %v3873_v14 = vpop.permute.xlu2 %3872  ;;  %v3467_v21 = vpop.permute.xlu1 %3466  ;;  %v4511_v10 = vld [vmem:[#allocation3 + $0xe0] sm:$0xff] }
 0x3ca   :  { %3472 = vst.msk [vmem:[#allocation3 + $0x100] sm:$0xff] %vm9114_vm11, %v3467_v21  ;;  %v3499_v36 = vpop.permute.xlu0 %3498  ;;  %4658 = vmatmul.f32.gmra.mxu1 %v4511_v10  ;;  %vm9121_vm11 = vcmask 1048448  }
 0x3cb   :  { %3488 = vst.msk [vmem:[#allocation3 + $0x100] sm:$0xff] %vm9115_vm9, %v3483_v32  ;;  %vm9118_vm9 = vcmask 254080  }
 0x3cc   :  { %3504 = vst.msk [vmem:[#allocation3 + $0x100] sm:$0xff] %vm9116_vm14, %v3499_v36  ;;  %vm9120_vm14 = vcmask 917248   ;;  %v2988_v36 = vld [vmem:[#allocation2 + $0x177] ss:$2 sm:$0x1] }
 0x3cf   :  { %3213 = vrot.lane.b32.xlu2 %v3210_v62, %s5726_s20  ;;  %2911 = vrot.lane.b32.xlu1 %v2908_v1, %s5725_s17 }
 0x3d0   :  { %3305 = vrot.lane.b32.xlu0 %v3302_v17, %s5725_s17 }
 0x3d1   :  { %v3827_v8 = vpop.permute.xlu2 %3826  ;;  %v3515_v43 = vpop.permute.xlu1 %3514 }
 0x3d2   :  { %3831 = vst.msk [vmem:[#allocation3 + $0x140] sm:$0x1] %vm9118_vm9, %v3827_v8  ;;  %v3547_v5 = vpop.permute.xlu0 %3546  ;;  %vm9123_vm9 = vcmask 261248   ;;  %v7812_v8 = vld [vmem:[#allocation2 + $0x17a] ss:$2 sm:$0xff] }
 0x3d3   :  { %3520 = vst.msk [vmem:[#allocation3 + $0x100] sm:$0xff] %vm9119_vm13, %v3515_v43  ;;  %vm9125_vm13 = vcmask 523648   ;;  %v2992_v43 = vrot.slane %v2988_v36, 3 }
 0x3d4   :  { %3536 = vst.msk [vmem:[#allocation3 + $0x100] sm:$0xff] %vm9120_vm14, %v3531_v35  ;;  %vm9126_vm14 = vcmask 1044480  }
 0x3d5   :  { %3552 = vst.msk [vmem:[#allocation3 + $0x100] sm:$0xff] %vm9121_vm11, %v3547_v5  ;;  %v2942_v29 = vsel %vm9126_vm14, %v2940_v45, %v2941_v27  ;;  %vm9127_vm11 = vcmask 654848   ;;  %v7777_v45 = vld [vmem:[#allocation2 + $0x169] ss:$2 sm:$0xff] }
 0x3d6   :  { %v3255_v16 = vrot.slane %v7777_v45, 2  ;;  %v7829_v27 = vld [vmem:[#allocation2 + $0x191] ss:$2 sm:$0xff] }
 0x3d7   :  { %3228 = vrot.lane.b32.xlu2 %v3225_v52, %s5728_s24  ;;  %2928 = vrot.lane.b32.xlu1 %v2925_v4, %s5727_s21  ;;  %v3177_v4 = vld [vmem:[#allocation2 + $0x164] ss:$2 sm:$0x1]  ;;  %v3387_v44 = vrot.slane %v7829_v27, 2 }
 0x3d8   :  { %3322 = vrot.lane.b32.xlu0 %v3319_v23, %s5727_s21 }
 0x3d9   :  { %v4138_v19 = vpop.permute.xlu2 %4137  ;;  %v3825_v9 = vpop.permute.xlu1 %3824 }
 0x3da   :  { %3830 = vst.msk [vmem:[#allocation3 + $0x120] sm:$0xff] %vm9123_vm9, %v3825_v9  ;;  %v3849_v53 = vpop.permute.xlu0 %3848  ;;  %vm9128_vm9 = vcmask 786048  }
 0x3db   :  { %3842 = vst.msk [vmem:[#allocation3 + $0x120] sm:$0xff] %vm9124_vm8, %v3837_v38  ;;  %vm9129_vm8 = vcmask 917248   ;;  %v2873_v38 = vld [vmem:[#allocation2 + $0x160] ss:$2 sm:$0x1] }
 0x3dc   :  { %3854 = vst.msk [vmem:[#allocation3 + $0x120] sm:$0xff] %vm9125_vm13, %v3849_v53  ;;  %v4515_v28 = vld [vmem:[#allocation3 + $0x100] sm:$0xff]  ;;  %vm9130_vm13 = vmmov %vm9126_vm14  ;;  %v2877_v22 = vrot.slane %v2873_v38, 3  ;;  %v3009_v53 = vrot.slane %v3005_v6, 3 }
 0x3dd   :  { %4661 = vmatmul.f32.gmra.mxu1 %v4515_v28  ;;  %v2959_v35 = vsel %vm9130_vm13, %v2957_v11, %v2958_v51  ;;  %vm9131_vm14 = vmmov %vm9130_vm13  ;;  %v2993_v5 = vsel %vm9130_vm13, %v2991_v48, %v2992_v43  ;;  %v3181_v28 = vrot.slane %v3177_v4, 2 }
 0x3de   :  { %v2861_v61 = vsel %vm9131_vm14, %v2859_v54, %v2860_v46  ;;  %v2975_v54 = vrot.slane %v2971_v57, 3  ;;  %v2878_v21 = vsel %vm9130_vm13, %v2876_v34, %v2877_v22  ;;  %vm9135_vm14 = vmmov %vm9130_vm13  ;;  %v7810_v34 = vld [vmem:[#allocation2 + $0x190] ss:$2 sm:$0xff] }
 0x3df   :  { %3243 = vrot.lane.b32.xlu2 %v3240_v49, %s5729_s27  ;;  %2945 = vrot.lane.b32.xlu1 %v2942_v29, %s5726_s20  ;;  %v3370_v0 = vrot.slane %v7810_v34, 2  ;;  %v3182_v29 = vsel %vm3036_vm1, %v3180_v33, %v3181_v28  ;;  %v3207_v46 = vld [vmem:[#allocation2 + $0x176] ss:$2 sm:$0x1] }
 0x3e0   :  { %3339 = vrot.lane.b32.xlu0 %v3336_v12, %s5726_s20  ;;  %v2976_v10 = vsel %vm9135_vm14, %v2974_v41, %v2975_v54  ;;  %v3272_v41 = vrot.slane %v7812_v8, 2  ;;  %vm9139_vm14 = vcmask 523649   ;;  %v7984_v8 = vld [vmem:[#allocation2 + $0x1ba] ss:$2 sm:$0xff] }
 0x3e1   :  { %v3863_v24 = vpop.permute.xlu2 %3862  ;;  %v3861_v32 = vpop.permute.xlu1 %3860 }
 0x3e2   :  { %3866 = vst.msk [vmem:[#allocation3 + $0x120] sm:$0xff] %vm9127_vm11, %v3861_v32  ;;  %v3885_v13 = vpop.permute.xlu0 %3884  ;;  %vm9132_vm11 = vcmask 1048448   ;;  %v7846_v32 = vld [vmem:[#allocation2 + $0x17e] ss:$2 sm:$0xff] }
 0x3e3   :  { %3878 = vst.msk [vmem:[#allocation3 + $0x120] sm:$0xff] %vm9128_vm9, %v3873_v14  ;;  %vm9133_vm9 = vcmask 261249   ;;  %v3353_v14 = vrot.slane %v7793_v15, 2  ;;  %v3568_v47 = vrot.slane %v7846_v32, 1 }
 0x3e4   :  { %3890 = vst.msk [vmem:[#allocation3 + $0x120] sm:$0xff] %vm9129_vm8, %v3885_v13  ;;  %vm9134_vm8 = vcmask 392449   ;;  %v3196_v13 = vrot.slane %v3192_v30, 2 }
 0x3e6   :  { %v3197_v51 = vsel %vm3036_vm1, %v3195_v31, %v3196_v13 }
 0x3e7   :  { %2962 = vrot.lane.b32.xlu2 %v2959_v35, %s5728_s24  ;;  %2864 = vrot.lane.b32.xlu1 %v2861_v61, %s5730_s30  ;;  %v3299_v35 = vld [vmem:[#allocation2 + $0x18c] ss:$2 sm:$0x1] }
 0x3e8   :  { %3258 = vrot.lane.b32.xlu0 %v3255_v16, %s5730_s30 }
 0x3e9   :  { %v4183_v2 = vpop.permute.xlu2 %4182  ;;  %v3897_v56 = vpop.permute.xlu1 %3896 }
 0x3ea   :  { %3902 = vst.msk [vmem:[#allocation3 + $0x120] sm:$0xff] %vm9132_vm11, %v3897_v56  ;;  %v4123_v11 = vpop.permute.xlu0 %4122  ;;  %vm9136_vm11 = vcmask 385280   ;;  %v7865_v56 = vld [vmem:[#allocation2 + $0x18f] ss:$2 sm:$0xff] }
 0x3eb   :  { %4128 = vst.msk [vmem:[#allocation3 + $0x140] sm:$0xfe] %vm9133_vm9, %v4123_v11  ;;  %vm9137_vm9 = vcmask 516480   ;;  %v3303_v11 = vrot.slane %v3299_v35, 2  ;;  %v3583_v31 = vrot.slane %v7865_v56, 1 }
 0x3ec   :  { %4143 = vst.msk [vmem:[#allocation3 + $0x140] sm:$0xfe] %vm9134_vm8, %v4138_v19  ;;  %vm9138_vm8 = vcmask 647680   ;;  %v3252_v35 = vld [vmem:[#allocation2 + $0x179] ss:$2 sm:$0x1] }
 0x3ed   :  { %v3304_v54 = vsel %vm3036_vm1, %v3302_v17, %v3303_v11 }
 0x3ef   :  { %2881 = vrot.lane.b32.xlu2 %v2878_v21, %s5731_s10  ;;  %3356 = vrot.lane.b32.xlu1 %v3353_v14, %s5728_s24  ;;  %v3222_v21 = vld [vmem:[#allocation2 + $0x177] ss:$2 sm:$0x1] }
 0x3f0   :  { %2979 = vrot.lane.b32.xlu0 %v2976_v10, %s5729_s27  ;;  %v4579_v10 = vld [vmem:[%s8894_s3 + $0x180] sm:$0xff]  ;;  %v3226_v17 = vrot.slane %v3222_v21, 2 }
 0x3f1   :  { %v3899_v55 = vpop.permute.xlu2 %3898  ;;  %v3839_v1 = vpop.permute.xlu1 %3838  ;;  %v4519_v3 = vld [vmem:[#allocation3 + $0x120] sm:$0xff]  ;;  %4795 = vmatpush.msra.mxu1 %v4579_v10 }
 0x3f2   :  { %3843 = vst.msk [vmem:[#allocation3 + $0x140] sm:$0x1] %vm9136_vm11, %v3839_v1  ;;  %v3851_v39 = vpop.permute.xlu0 %3850  ;;  %4664 = vmatmul.f32.gmra.mxu1 %v4519_v3  ;;  %vm9140_vm11 = vcmask 654849   ;;  %v7890_v1 = vld [vmem:[#allocation2 + $0x190] ss:$2 sm:$0xff]  ;;  %v3227_v43 = vsel %vm3036_vm1, %v3225_v52, %v3226_v17 }
 0x3f3   :  { %3855 = vst.msk [vmem:[#allocation3 + $0x140] sm:$0x1] %vm9137_vm9, %v3851_v39  ;;  %vm9141_vm9 = vcmask 786049   ;;  %v3598_v39 = vrot.slane %v7890_v1, 1 }
 0x3f4   :  { %3867 = vst.msk [vmem:[#allocation3 + $0x140] sm:$0x1] %vm9138_vm8, %v3863_v24  ;;  %vm9142_vm8 = vmmov %vm9130_vm13  ;;  %vm9143_vm13 = vcmask 778880   ;;  %v3367_v17 = vld [vmem:[#allocation2 + $0x1a0] ss:$2 sm:$0x1] }
 0x3f5   :  { %v3010_v48 = vsel %vm9142_vm8, %v3008_v26, %v3009_v53  ;;  %v7848_v26 = vld [vmem:[#allocation2 + $0x192] ss:$2 sm:$0xff]  ;;  %vm9147_vm8 = vcmask 917249   ;;  %v7911_v53 = vld [vmem:[#allocation2 + $0x1a7] ss:$2 sm:$0xff] }
 0x3f6   :  { %v3404_v33 = vrot.slane %v7848_v26, 2  ;;  %v3707_v28 = vrot.slane %v7911_v53, 1 }
 0x3f7   :  { %3373 = vrot.lane.b32.xlu2 %v3370_v0, %s5729_s27  ;;  %3275 = vrot.lane.b32.xlu1 %v3272_v41, %s5731_s10 }
 0x3f8   :  { %2996 = vrot.lane.b32.xlu0 %v2993_v5, %s5730_s30  ;;  %v3316_v5 = vld [vmem:[#allocation2 + $0x18d] ss:$2 sm:$0x1] }
 0x3f9   :  { %v4140_v18 = vpop.permute.xlu2 %4139  ;;  %v4153_v19 = vpop.permute.xlu1 %4152 }
 0x3fa   :  { %4158 = vst.msk [vmem:[#allocation3 + $0x140] sm:$0xfe] %vm9139_vm14, %v4153_v19  ;;  %v4168_v9 = vpop.permute.xlu0 %4167  ;;  %vm9144_vm14 = vcmask 910080   ;;  %v7908_v19 = vld [vmem:[#allocation2 + $0x191] ss:$2 sm:$0xff] }
 0x3fb   :  { %4173 = vst.msk [vmem:[#allocation3 + $0x140] sm:$0xfe] %vm9140_vm11, %v4168_v9  ;;  %vm9145_vm11 = vcmask 1041280   ;;  %v3320_v9 = vrot.slane %v3316_v5, 2  ;;  %v3613_v42 = vrot.slane %v7908_v19, 1 }
 0x3fc   :  { %4188 = vst.msk [vmem:[#allocation3 + $0x140] sm:$0xfe] %vm9141_vm9, %v4183_v2  ;;  %vm9146_vm9 = vcmask 261253   ;;  %v3211_v2 = vrot.slane %v3207_v46, 2 }
 0x3fd   :  { %v3321_v52 = vsel %vm3036_vm1, %v3319_v23, %v3320_v9  ;;  %v7980_v9 = vld [vmem:[#allocation2 + $0x1a4] ss:$2 sm:$0xff] }
 0x3fe   :  { %v3212_v22 = vsel %vm3036_vm1, %v3210_v62, %v3211_v2 }
 0x3ff   :  { %3013 = vrot.lane.b32.xlu2 %v3010_v48, %s5731_s10  ;;  %3390 = vrot.lane.b32.xlu1 %v3387_v44, %s5730_s30  ;;  %v3333_v48 = vld [vmem:[#allocation2 + $0x18e] ss:$2 sm:$0x1] }
 0x400   :  { %3185 = vrot.lane.b32.xlu0 %v3182_v29, %s5725_s17  ;;  %v3237_v29 = vld [vmem:[#allocation2 + $0x178] ss:$2 sm:$0x1]  ;;  %v3337_v23 = vrot.slane %v3333_v48, 2 }
 0x401   :  { %v4185_v59 = vpop.permute.xlu2 %4184  ;;  %v3875_v24 = vpop.permute.xlu1 %3874 }
 0x402   :  { %3879 = vst.msk [vmem:[#allocation3 + $0x140] sm:$0x1] %vm9143_vm13, %v3875_v24  ;;  %v3887_v50 = vpop.permute.xlu0 %3886  ;;  %vm9148_vm13 = vcmask 1048449   ;;  %v3241_v24 = vrot.slane %v3237_v29, 2  ;;  %v3338_v13 = vsel %vm3036_vm1, %v3336_v12, %v3337_v23  ;;  %v3758_v29 = vrot.slane %v7984_v8, 1 }
 0x403   :  { %3891 = vst.msk [vmem:[#allocation3 + $0x140] sm:$0x1] %vm9144_vm14, %v3887_v50  ;;  %vm9149_vm14 = vcmask 917253   ;;  %v7928_v50 = vld [vmem:[#allocation2 + $0x192] ss:$2 sm:$0xff] }
 0x404   :  { %3903 = vst.msk [vmem:[#allocation3 + $0x140] sm:$0x1] %vm9145_vm11, %v3899_v55  ;;  %v7888_v55 = vld [vmem:[#allocation2 + $0x1a6] ss:$2 sm:$0xff]  ;;  %vm9150_vm11 = vcmask 255104   ;;  %v3628_v46 = vrot.slane %v7928_v50, 1 }
 0x405   :  { %v3690_v3 = vrot.slane %v7888_v55, 1  ;;  %v3721_v55 = vld [vmem:[#allocation2 + $0x1b8] ss:$2 sm:$0x1] }
 0x406   :  { %v3725_v19 = vrot.slane %v3721_v55, 1  ;;  %v3657_v50 = vld [vmem:[#allocation2 + $0x1b4] ss:$2 sm:$0x1] }
 0x407   :  { %3571 = vrot.lane.b32.xlu2 %v3568_v47, %s5725_s17  ;;  %3407 = vrot.lane.b32.xlu1 %v3404_v33, %s5731_s10 }
 0x408   :  { %3200 = vrot.lane.b32.xlu0 %v3197_v51, %s5727_s21  ;;  %v3242_v51 = vsel %vm3036_vm1, %v3240_v49, %v3241_v24  ;;  %v7944_v49 = vld [vmem:[#allocation2 + $0x1a8] ss:$2 sm:$0xff] }
 0x409   :  { %v2910_v61 = vpop.permute.xlu2 %2909  ;;  %v4198_v38 = vpop.permute.xlu1 %4197  ;;  %v3724_v11 = vrot.slane %v7944_v49, 1  ;;  %v3661_v49 = vrot.slane %v3657_v50, 1 }
 0x40a   :  { %2915 = vst.msk [vmem:[#allocation3 + $0xb0] sm:$0xe0] %vm9146_vm9, %v2910_v61  ;;  %v4213_v57 = vpop.permute.xlu0 %4212  ;;  %vm9151_vm9 = vcmask 386304   ;;  %v3350_v61 = vld [vmem:[#allocation2 + $0x19f] ss:$2 sm:$0x1] }
 0x40b   :  { %4203 = vst.msk [vmem:[#allocation3 + $0x140] sm:$0xfe] %vm9147_vm8, %v4198_v38  ;;  %vm9152_vm8 = vcmask 517504   ;;  %v3354_v2 = vrot.slane %v3350_v61, 2 }
 0x40c   :  { %4218 = vst.msk [vmem:[#allocation3 + $0x140] sm:$0xfe] %vm9148_vm13, %v4213_v57  ;;  %vm9153_vm13 = vcmask 648704   ;;  %v3256_v57 = vrot.slane %v3252_v35, 2 }
 0x40e   :  { %v3257_v63 = vsel %vm3036_vm1, %v3255_v16, %v3256_v57  ;;  %v7961_v16 = vld [vmem:[#allocation2 + $0x1b9] ss:$2 sm:$0xff]  ;;  %v3565_v57 = vld [vmem:[#allocation2 + $0x18e] ss:$2 sm:$0x1] }
 0x40f   :  { %3215 = vrot.lane.b32.xlu2 %v3212_v22, %s5726_s20  ;;  %3586 = vrot.lane.b32.xlu1 %v3583_v31, %s5727_s21  ;;  %v3355_v22 = vsel %vm3036_vm1, %v3353_v14, %v3354_v2  ;;  %v3741_v14 = vrot.slane %v7961_v16, 1  ;;  %v3789_v16 = vld [vmem:[#allocation2 + $0x1cc] ss:$2 sm:$0x1] }
 0x410   :  { %3307 = vrot.lane.b32.xlu0 %v3304_v54, %s5725_s17  ;;  %v3269_v54 = vld [vmem:[#allocation2 + $0x18a] ss:$2 sm:$0x1] }
 0x411   :  { %v2863_v20 = vpop.permute.xlu2 %2862  ;;  %v4125_v36 = vpop.permute.xlu1 %4124  ;;  %v3273_v15 = vrot.slane %v3269_v54, 2 }
 0x412   :  { %2868 = vst.msk [vmem:[#allocation3 + $0xa8] sm:$0xe0] %vm9149_vm14, %v2863_v20  ;;  %v4155_v62 = vpop.permute.xlu0 %4154  ;;  %vm9154_vm14 = vcmask 779904   ;;  %v4486_v20 = vld [vmem:[#allocation3 + $0x18] sm:$0xff] }
 0x413   :  { %4129 = vst.msk [vmem:[#allocation3 + $0x160] sm:$0x3] %vm9150_vm11, %v4125_v36  ;;  %v4523_v58 = vld [vmem:[#allocation3 + $0x140] sm:$0xff]  ;;  %vm9155_vm11 = vcmask 911104   ;;  %v7963_v36 = vld [vmem:[#allocation2 + $0x193] ss:$2 sm:$0xff] }
 0x414   :  { %4144 = vst.msk [vmem:[#allocation3 + $0x160] sm:$0x3] %vm9151_vm9, %v4140_v18  ;;  %4667 = vmatmul.f32.gmra.mxu1 %v4523_v58  ;;  %vm9156_vm9 = vcmask 1042304   ;;  %v3274_v58 = vsel %vm3036_vm1, %v3272_v41, %v3273_v15  ;;  %v3660_v41 = vrot.slane %v7980_v9, 1  ;;  %v3793_v9 = vrot.slane %v3789_v16, 1 }
 0x415   :  { %4159 = vst.msk [vmem:[#allocation3 + $0x160] sm:$0x3] %vm9152_vm8, %v4155_v62  ;;  %v3643_v62 = vrot.slane %v7963_v36, 1  ;;  %v3610_v15 = vld [vmem:[#allocation2 + $0x1a1] ss:$2 sm:$0x1] }
 0x416   :  { %v3614_v56 = vrot.slane %v3610_v15, 1  ;;  %v3921_v16 = vld [vmem:[#allocation2 + $0x1c9] ss:$2 sm:$0x1] }
 0x417   :  { %3693 = vrot.lane.b32.xlu2 %v3690_v3, %s5725_s17  ;;  %3601 = vrot.lane.b32.xlu1 %v3598_v39, %s5726_s20 }
 0x418   :  { %3230 = vrot.lane.b32.xlu0 %v3227_v43, %s5728_s24 }
 0x419   :  { %v2978_v6 = vpop.permute.xlu2 %2977  ;;  %v4170_v4 = vpop.permute.xlu1 %4169 }
 0x41a   :  { %4174 = vst.msk [vmem:[#allocation3 + $0x160] sm:$0x3] %vm9153_vm13, %v4170_v4  ;;  %v4200_v18 = vpop.permute.xlu0 %4199 }
 0x41b   :  { %4189 = vst.msk [vmem:[#allocation3 + $0x160] sm:$0x3] %vm9154_vm14, %v4185_v59 }
 0x41c   :  { %4204 = vst.msk [vmem:[#allocation3 + $0x160] sm:$0x3] %vm9155_vm11, %v4200_v18  ;;  %v4490_v18 = vld [vmem:[#allocation3 + $0x38] sm:$0xff]  ;;  %vm9168_vm11 = vcmask 652800  }
 0x41f   :  { %3616 = vrot.lane.b32.xlu2 %v3613_v42, %s5728_s24  ;;  %3324 = vrot.lane.b32.xlu1 %v3321_v52, %s5727_s21  ;;  %v3371_v52 = vrot.slane %v3367_v17, 2  ;;  %v4502_v17 = vld [vmem:[#allocation3 + $0x98] sm:$0xff] }
 0x420   :  { %3710 = vrot.lane.b32.xlu0 %v3707_v28, %s5727_s21 }
 0x421   :  { %v3184_v30 = vpop.permute.xlu2 %3183  ;;  %v4215_v59 = vpop.permute.xlu1 %4214  ;;  %v3372_v48 = vsel %vm3036_vm1, %v3370_v0, %v3371_v52  ;;  %v4494_v0 = vld [vmem:[#allocation3 + $0x58] sm:$0xff]  ;;  %v3704_v52 = vld [vmem:[#allocation2 + $0x1b7] ss:$2 sm:$0x1] }
 0x422   :  { %3189 = vst.msk [vmem:[#allocation3 + $0xc8] sm:$0xc0] %vm3059_vm7, %v3184_v30  ;;  %v2927_v7 = vpop.permute.xlu0 %2926  ;;  %v3384_v30 = vld [vmem:[#allocation2 + $0x1a1] ss:$2 sm:$0x1] }
 0x423   :  { %4219 = vst.msk [vmem:[#allocation3 + $0x160] sm:$0x3] %vm9156_vm9, %v4215_v59  ;;  %v3401_v59 = vld [vmem:[#allocation2 + $0x1a2] ss:$2 sm:$0x1] }
 0x424   :  { %2932 = vst.msk [vmem:[#allocation3 + $0xb0] sm:$0xe0] %vm2656_vm3, %v2927_v7  ;;  %vm9157_vm3 = vcmask 917253   ;;  %v3405_v35 = vrot.slane %v3401_v59, 2 }
 0x427   :  { %3341 = vrot.lane.b32.xlu2 %v3338_v13, %s5726_s20  ;;  %3245 = vrot.lane.b32.xlu1 %v3242_v51, %s5729_s27  ;;  %v8002_v13 = vld [vmem:[#allocation2 + $0x1bb] ss:$2 sm:$0xff]  ;;  %v3388_v51 = vrot.slane %v3384_v30, 2 }
 0x428   :  { %3631 = vrot.lane.b32.xlu0 %v3628_v46, %s5729_s27  ;;  %v3775_v61 = vrot.slane %v8002_v13, 1 }
 0x429   :  { %v3214_v38 = vpop.permute.xlu2 %3213  ;;  %v2944_v40 = vpop.permute.xlu1 %2943 }
 0x42a   :  { %2949 = vst.msk [vmem:[#allocation3 + $0xb0] sm:$0xe0] %vm2675_vm15, %v2944_v40  ;;  %v2961_v37 = vpop.permute.xlu0 %2960  ;;  %v4527_v12 = vld [vmem:[#allocation3 + $0x160] sm:$0x3]  ;;  %vm9158_vm15 = vcmask 130048   ;;  %v3406_v40 = vsel %vm3036_vm1, %v3404_v33, %v3405_v35 }
 0x42b   :  { %2966 = vst.msk [vmem:[#allocation3 + $0xb0] sm:$0xe0] %vm2694_vm12, %v2961_v37  ;;  %4670 = vmatmul.f32.gmra.mxu1 %v4527_v12  ;;  %vm9159_vm12 = vmmov %vm9158_vm15  ;;  %v3580_v37 = vld [vmem:[#allocation2 + $0x19f] ss:$2 sm:$0x1] }
 0x42c   :  { %2983 = vst.msk [vmem:[#allocation3 + $0xb0] sm:$0xe0] %vm2713_vm2, %v2978_v6  ;;  %vm9160_vm2 = vcmask 786054   ;;  %vm9162_vm8 = vmmov %vm9159_vm12  ;;  %v3584_v26 = vrot.slane %v3580_v37, 1 }
 0x42d   :  { %vm9164_vm13 = vmmov %vm9162_vm8 }
 0x42e   :  { %vm9169_vm9 = vmmov %vm9162_vm8 }
 0x42f   :  { %3260 = vrot.lane.b32.xlu2 %v3257_v63, %s5730_s30  ;;  %3727 = vrot.lane.b32.xlu1 %v3724_v11, %s5726_s20  ;;  %v3569_v63 = vrot.slane %v3565_v57, 1 }
 0x430   :  { %3358 = vrot.lane.b32.xlu0 %v3355_v22, %s5728_s24  ;;  %v8019_v22 = vld [vmem:[#allocation2 + $0x1bc] ss:$2 sm:$0xff] }
 0x431   :  { %v3229_v21 = vpop.permute.xlu2 %3228  ;;  %v2880_v10 = vpop.permute.xlu1 %2879  ;;  %v3792_v33 = vrot.slane %v8019_v22, 1  ;;  %v3908_v22 = vld [vmem:[#allocation2 + $0x1a8] ss:$2 sm:$0xff] }
 0x432   :  { %2885 = vst.msk [vmem:[#allocation3 + $0xa8] sm:$0xe0] %vm2751_vm10, %v2880_v10  ;;  %v2995_v45 = vpop.permute.xlu0 %2994  ;;  %v3687_v10 = vld [vmem:[#allocation2 + $0x1b6] ss:$2 sm:$0x1] }
 0x433   :  { %3000 = vst.msk [vmem:[#allocation3 + $0xb0] sm:$0xe0] %vm9157_vm3, %v2995_v45  ;;  %5637 = vmatmul.msk.f32.vlgmr.msra.gmra.mxu1 %vm9158_vm15, %v4486_v20  ;;  %v3595_v20 = vld [vmem:[#allocation2 + $0x1a0] ss:$2 sm:$0x1]  ;;  %v8034_v45 = vpop.f32.mrf.mxu1 }
 0x437   :  { %3744 = vrot.lane.b32.xlu2 %v3741_v14, %s5728_s24  ;;  %3646 = vrot.lane.b32.xlu1 %v3643_v62, %s5730_s30 }
 0x438   :  { %3277 = vrot.lane.b32.xlu0 %v3274_v58, %s5731_s10 }
 0x439   :  { %v3244_v43 = vpop.permute.xlu2 %3243  ;;  %v3012_v5 = vpop.permute.xlu1 %3011  ;;  %v4504_v6 = vld [vmem:[#allocation3 + $0xa8] sm:$0xff] }
 0x43a   :  { %3017 = vst.msk [vmem:[#allocation3 + $0xb0] sm:$0xe0] %vm2751_vm10, %v3012_v5  ;;  %v3199_v4 = vpop.permute.xlu0 %3198  ;;  %4705 = vmatmul.f32.gmra.mxu2 %v4504_v6  ;;  %vm9161_vm10 = vcmask 259200   ;;  %v3599_v5 = vrot.slane %v3595_v20, 1 }
 0x43b   :  { %3204 = vst.msk [vmem:[#allocation3 + $0xc8] sm:$0xc0] %vm3076_vm4, %v3199_v4  ;;  %5638 = vmatmul.msk.f32.gmra.mxu1 %vm9159_vm12, %v4490_v18  ;;  %v3625_v18 = vld [vmem:[#allocation2 + $0x1a2] ss:$2 sm:$0x1] }
 0x43c   :  { %3219 = vst.msk [vmem:[#allocation3 + $0xc8] sm:$0xc0] %vm3093_vm0, %v3214_v38  ;;  %v3389_v38 = vsel %vm3036_vm1, %v3387_v44, %v3388_v51  ;;  %v4498_v44 = vld [vmem:[#allocation3 + $0x78] sm:$0xff]  ;;  %vm9165_vm1 = vcmask 1046528   ;;  %v3629_v59 = vrot.slane %v3625_v18, 1 }
 0x43d   :  { %3234 = vst.msk [vmem:[#allocation3 + $0xc8] sm:$0xc0] %vm3110_vm5, %v3229_v21  ;;  %v3570_v54 = vsel %vm9165_vm1, %v3568_v47, %v3569_v63  ;;  %vm9166_vm14 = vmmov %vm9165_vm1 }
 0x43e   :  { %3249 = vst.msk [vmem:[#allocation3 + $0xc8] sm:$0xc0] %vm9160_vm2, %v3244_v43  ;;  %v3585_v21 = vsel %vm9166_vm14, %v3583_v31, %v3584_v26  ;;  %v3691_v43 = vrot.slane %v3687_v10, 1  ;;  %vm9170_vm3 = vmmov %vm9165_vm1  ;;  %vm9174_vm2 = vcmask 1046400   ;;  %vm9179_vm14 = vcmask 261255  }
 0x43f   :  { %3663 = vrot.lane.b32.xlu2 %v3660_v41, %s5731_s10  ;;  %3375 = vrot.lane.b32.xlu1 %v3372_v48, %s5729_s27  ;;  %vm9171_vm15 = vmmov %vm9165_vm1  ;;  %v8052_v48 = vpop.f32.mrf.mxu1 }
 0x440   :  { %3761 = vrot.lane.b32.xlu0 %v3758_v29, %s5729_s27  ;;  %v3692_v31 = vsel %vm9170_vm3, %v3690_v3, %v3691_v43  ;;  %v3600_v6 = vsel %vm9171_vm15, %v3598_v39, %v3599_v5  ;;  %vm9172_vm12 = vmmov %vm9165_vm1  ;;  %v4506_v39 = vld [vmem:[#allocation3 + $0xb8] sm:$0xff] }
 0x441   :  { %v2963_v7 = vpop.permute.xlu2 %2962  ;;  %v2912_v23 = vpop.permute.xlu1 %2911  ;;  %v4505_v24 = vld [vmem:[#allocation3 + $0xb0] sm:$0xff]  ;;  %v3615_v4 = vsel %vm9172_vm12, %v3613_v42, %v3614_v56  ;;  %vm9183_vm3 = vmmov %vm9165_vm1  ;;  %vm9186_vm12 = vcmask 1048454   ;;  %v4522_v43 = vld [vmem:[#allocation3 + $0x138] sm:$0xff] }
 0x442   :  { %2916 = vst.msk [vmem:[#allocation3 + $0xd0] sm:$0x3f] %vm9161_vm10, %v2912_v23  ;;  %v3306_v34 = vpop.permute.xlu0 %3305  ;;  %4758 = vmatmul.f32.gmra.mxu3 %v4505_v24  ;;  %vm9175_vm10 = vmmov %vm9162_vm8  ;;  %v3726_v24 = vsel %vm9165_vm1, %v3724_v11, %v3725_v19  ;;  %v3944_v5 = vld [vmem:[#allocation2 + $0x1bb] ss:$2 sm:$0xff]  ;;  %v4001_v56 = vld [vmem:[#allocation2 + $0x1d0] ss:$2 sm:$0xff] }
 0x443   :  { %3311 = vst.msk [vmem:[#allocation3 + $0xd0] sm:$0xc0] %vm3059_vm7, %v3306_v34  ;;  %5639 = vmatmul.msk.f32.gmra.mxu1 %vm9162_vm8, %v4494_v0  ;;  %vm9163_vm7 = vcmask 390400   ;;  %vm9176_vm8 = vcmask 917254   ;;  %vm9184_vm15 = vmmov %vm9165_vm1 }
 0x444   :  { %v3738_v34 = vld [vmem:[#allocation2 + $0x1c9] ss:$2 sm:$0x1]  ;;  %v3640_v0 = vld [vmem:[#allocation2 + $0x1a3] ss:$2 sm:$0x1] }
 0x447   :  { %3778 = vrot.lane.b32.xlu2 %v3775_v61, %s5730_s30  ;;  %3392 = vrot.lane.b32.xlu1 %v3389_v38, %s5730_s30  ;;  %v8070_v51 = vpop.f32.mrf.mxu1  ;;  %v3742_v38 = vrot.slane %v3738_v34, 1  ;;  %v4057_v34 = vld [vmem:[#allocation2 + $0x1e4] ss:$2 sm:$0xff] }
 0x448   :  { %3409 = vrot.lane.b32.xlu0 %v3406_v40, %s5731_s10  ;;  %v3644_v40 = vrot.slane %v3640_v0, 1 }
 0x449   :  { %v2882_v12 = vpop.permute.xlu2 %2881  ;;  %v2929_v2 = vpop.permute.xlu1 %2928  ;;  %v3743_v11 = vsel %vm9183_vm3, %v3741_v14, %v3742_v38  ;;  %vm9197_vm3 = vcmask 391424   ;;  %v4085_v38 = vld [vmem:[#allocation2 + $0x1e6] ss:$2 sm:$0xff] }
 0x44a   :  { %2933 = vst.msk [vmem:[#allocation3 + $0xd0] sm:$0x3f] %vm9163_vm7, %v2929_v2  ;;  %v3323_v27 = vpop.permute.xlu0 %3322  ;;  %vm9177_vm7 = vmmov %vm9165_vm1  ;;  %v3645_v57 = vsel %vm9184_vm15, %v3643_v62, %v3644_v40  ;;  %v3755_v2 = vld [vmem:[#allocation2 + $0x1ca] ss:$2 sm:$0x1]  ;;  %v4514_v62 = vld [vmem:[#allocation3 + $0xf8] sm:$0xff] }
 0x44b   :  { %3328 = vst.msk [vmem:[#allocation3 + $0xd0] sm:$0xc0] %vm3076_vm4, %v3323_v27  ;;  %5640 = vmatmul.msk.f32.gmra.mxu1 %vm9164_vm13, %v4498_v44  ;;  %vm9167_vm4 = vcmask 521600   ;;  %v3630_v42 = vsel %vm9177_vm7, %v3628_v46, %v3629_v59  ;;  %vm9178_vm13 = vmmov %vm9165_vm1  ;;  %v3759_v26 = vrot.slane %v3755_v2, 1 }
 0x44c   :  { %vm9190_vm7 = vmmov %vm9165_vm1 }
 0x44f   :  { %3573 = vrot.lane.b32.xlu2 %v3570_v54, %s5725_s17  ;;  %3795 = vrot.lane.b32.xlu1 %v3792_v33, %s5731_s10  ;;  %v8089_v27 = vpop.f32.mrf.mxu1  ;;  %v3760_v54 = vsel %vm9190_vm7, %v3758_v29, %v3759_v26  ;;  %v4518_v29 = vld [vmem:[#allocation3 + $0x118] sm:$0xff]  ;;  %vm9204_vm7 = vmmov %vm9197_vm3 }
 0x450   :  { %3588 = vrot.lane.b32.xlu0 %v3585_v21, %s5727_s21  ;;  %v8171_v26 = vld [vmem:[#allocation2 + $0x1e4] ss:$2 sm:$0xff] }
 0x451   :  { %v3374_v32 = vpop.permute.xlu2 %3373  ;;  %v2946_v58 = vpop.permute.xlu1 %2945 }
 0x452   :  { %2950 = vst.msk [vmem:[#allocation3 + $0xd0] sm:$0x3f] %vm9167_vm4, %v2946_v58  ;;  %v3340_v47 = vpop.permute.xlu0 %3339  ;;  %vm9180_vm4 = vmmov %vm9169_vm9 }
 0x453   :  { %2967 = vst.msk [vmem:[#allocation3 + $0xd0] sm:$0x3f] %vm9168_vm11, %v2963_v7  ;;  %5641 = vmatmul.msk.f32.gmra.mxu1 %vm9169_vm9, %v4502_v17  ;;  %v3708_v7 = vrot.slane %v3704_v52, 1  ;;  %vm9181_vm11 = vcmask 786054   ;;  %vm9182_vm9 = vcmask 784000  }
 0x454   :  { %3345 = vst.msk [vmem:[#allocation3 + $0xd0] sm:$0xc0] %vm3093_vm0, %v3340_v47  ;;  %vm9173_vm0 = vcmask 915200  }
 0x455   :  { %v3709_v23 = vsel %vm9178_vm13, %v3707_v28, %v3708_v7  ;;  %v4510_v28 = vld [vmem:[#allocation3 + $0xd8] sm:$0xff]  ;;  %vm9191_vm13 = vmmov %vm9165_vm1 }
 0x456   :  { %v3794_v21 = vsel %vm9191_vm13, %v3792_v33, %v3793_v9  ;;  %v3932_v33 = vld [vmem:[#allocation2 + $0x1ba] ss:$2 sm:$0xff]  ;;  %v3933_v9 = vld [vmem:[#allocation2 + $0x1ca] ss:$2 sm:$0x1] }
 0x457   :  { %3695 = vrot.lane.b32.xlu2 %v3692_v31, %s5725_s17  ;;  %3603 = vrot.lane.b32.xlu1 %v3600_v6, %s5726_s20  ;;  %v8107_v10 = vpop.f32.mrf.mxu1  ;;  %v4015_v31 = vld [vmem:[#allocation2 + $0x1d1] ss:$2 sm:$0xff] }
 0x458   :  { %3618 = vrot.lane.b32.xlu0 %v3615_v4, %s5728_s24  ;;  %v4526_v4 = vld [vmem:[#allocation3 + $0x158] sm:$0xff] }
 0x459   :  { %v3014_v3 = vpop.permute.xlu2 %3013  ;;  %v2865_v30 = vpop.permute.xlu1 %2864 }
 0x45a   :  { %2869 = vst.msk [vmem:[#allocation3 + $0xc8] sm:$0x3f] %vm9173_vm0, %v2865_v30  ;;  %v3259_v1 = vpop.permute.xlu0 %3258  ;;  %v4029_v30 = vld [vmem:[#allocation2 + $0x1d2] ss:$2 sm:$0xff] }
 0x45b   :  { %2886 = vst.msk [vmem:[#allocation3 + $0xc8] sm:$0x3f] %vm9174_vm2, %v2882_v12  ;;  %5642 = vmatmul.msk.f32.gmra.mxu1 %vm9175_vm10, %v4506_v39  ;;  %v3772_v12 = vld [vmem:[#allocation2 + $0x1cb] ss:$2 sm:$0x1]  ;;  %vm9187_vm2 = vmmov %vm9180_vm4  ;;  %vm9188_vm10 = vcmask 1046400  }
 0x45c   :  { %3264 = vst.msk [vmem:[#allocation3 + $0xc8] sm:$0xc0] %vm9176_vm8, %v3259_v1  ;;  %v3776_v63 = vrot.slane %v3772_v12, 1  ;;  %vm9189_vm8 = vmmov %vm9165_vm1  ;;  %v3956_v1 = vld [vmem:[#allocation2 + $0x1bc] ss:$2 sm:$0xff] }
 0x45d   :  { %vm9198_vm15 = vmmov %vm9187_vm2  ;;  %v3968_v39 = vld [vmem:[#allocation2 + $0x1bd] ss:$2 sm:$0xff] }
 0x45e   :  { %v8155_v12 = vld [vmem:[#allocation2 + $0x1e3] ss:$2 sm:$0xff] }
 0x45f   :  { %3633 = vrot.lane.b32.xlu2 %v3630_v42, %s5729_s27  ;;  %3712 = vrot.lane.b32.xlu1 %v3709_v23, %s5727_s21  ;;  %v3981_v23 = vld [vmem:[#allocation2 + $0x1ce] ss:$2 sm:$0xff] }
 0x460   :  { %3729 = vrot.lane.b32.xlu0 %v3726_v24, %s5726_s20  ;;  %v4043_v24 = vld [vmem:[#allocation2 + $0x1e3] ss:$2 sm:$0xff] }
 0x461   :  { %v3572_v46 = vpop.permute.xlu2 %3571  ;;  %v3357_v35 = vpop.permute.xlu1 %3356 }
 0x462   :  { %3577 = vst.msk [vmem:[#allocation3 + $0xe8] sm:$0x80] %vm9179_vm14, %v3572_v46  ;;  %v2980_v53 = vpop.permute.xlu0 %2979 }
 0x463   :  { %3362 = vst.msk [vmem:[#allocation3 + $0xd0] sm:$0xc0] %vm3110_vm5, %v3357_v35  ;;  %5643 = vmatmul.msk.f32.gmra.mxu1 %vm9180_vm4, %v4510_v28  ;;  %vm9185_vm5 = vmmov %vm9165_vm1  ;;  %v4071_v28 = vld [vmem:[#allocation2 + $0x1e5] ss:$2 sm:$0xff] }
 0x464   :  { %3379 = vst.msk [vmem:[#allocation3 + $0xd0] sm:$0xc0] %vm9181_vm11, %v3374_v32  ;;  %v3662_v37 = vsel %vm9185_vm5, %v3660_v41, %v3661_v49  ;;  %v3777_v41 = vsel %vm9189_vm8, %v3775_v61, %v3776_v63  ;;  %vm9192_vm1 = vmmov %vm9179_vm14  ;;  %vm9193_vm14 = vcmask 917254   ;;  %vm9195_vm11 = vcmask 260224   ;;  %v3920_v61 = vld [vmem:[#allocation2 + $0x1b9] ss:$2 sm:$0xff]  ;;  %v8116_v32 = vpop.f32.mrf.mxu1 }
 0x465   :  { %2984 = vst.msk [vmem:[#allocation3 + $0xd0] sm:$0x3f] %vm9182_vm9, %v2980_v53  ;;  %vm9194_vm4 = vmmov %vm9187_vm2  ;;  %vm9199_vm5 = vcmask 522624   ;;  %vm9203_vm8 = vcmask 653824  }
 0x466   :  { %vm9196_vm9 = vmmov %vm9186_vm12  ;;  %v3909_v53 = vld [vmem:[#allocation2 + $0x1b8] ss:$2 sm:$0x1] }
 0x467   :  { %3746 = vrot.lane.b32.xlu2 %v3743_v11, %s5728_s24  ;;  %3648 = vrot.lane.b32.xlu1 %v3645_v57, %s5730_s30  ;;  %vm9205_vm13 = vmmov %vm9199_vm5 }
 0x468   :  { %3665 = vrot.lane.b32.xlu0 %v3662_v37, %s5731_s10  ;;  %v8152_v37 = vld [vmem:[#allocation2 + $0x1d2] ss:$2 sm:$0xff] }
 0x469   :  { %v3216_v14 = vpop.permute.xlu2 %3215  ;;  %v3276_v44 = vpop.permute.xlu1 %3275  ;;  %v4235_v2 = vrot.slane %v8152_v37, 7 }
 0x46a   :  { %3281 = vst.msk [vmem:[#allocation3 + $0xc8] sm:$0xc0] %vm9186_vm12, %v3276_v44  ;;  %v2997_v36 = vpop.permute.xlu0 %2996  ;;  %vm9200_vm12 = vcmask 392455  }
 0x46b   :  { %3001 = vst.msk [vmem:[#allocation3 + $0xd0] sm:$0x3f] %vm9173_vm0, %v2997_v36  ;;  %5644 = vmatmul.msk.f32.gmra.mxu1 %vm9187_vm2, %v4514_v62  ;;  %vm9201_vm0 = vmmov %vm9195_vm11 }
 0x46c   :  { %3018 = vst.msk [vmem:[#allocation3 + $0xd0] sm:$0x3f] %vm9188_vm10, %v3014_v3  ;;  %v8125_v6 = vpop.f32.mrf.mxu1  ;;  %vm9202_vm10 = vcmask 654855  }
 0x46f   :  { %3780 = vrot.lane.b32.xlu2 %v3777_v41, %s5730_s30  ;;  %3763 = vrot.lane.b32.xlu1 %v3760_v54, %s5729_s27  ;;  %v4003_v41 = vld [vmem:[#allocation2 + $0x1e0] ss:$2 sm:$0x1]  ;;  %v4265_v54 = vrot.slane %v8171_v26, 7 }
 0x470   :  { %3797 = vrot.lane.b32.xlu0 %v3794_v21, %s5731_s10  ;;  %v8179_v21 = vld [vmem:[%s8895_s4] ss:$0 sm:$0xff] }
 0x471   :  { %v3694_v20 = vpop.permute.xlu2 %3693  ;;  %v3391_v13 = vpop.permute.xlu1 %3390  ;;  %v4508_v15 = vld [vmem:[#allocation3 + $0xc8] sm:$0xff] }
 0x472   :  { %3699 = vst.msk [vmem:[#allocation3 + $0xf0] sm:$0x80] %vm9192_vm1, %v3694_v20  ;;  %v3186_v8 = vpop.permute.xlu0 %3185  ;;  %4708 = vmatmul.f32.gmra.mxu2 %v4508_v15  ;;  %vm9206_vm1 = vmmov %vm9200_vm12 }
 0x473   :  { %3396 = vst.msk [vmem:[#allocation3 + $0xd0] sm:$0xc0] %vm9193_vm14, %v3391_v13  ;;  %5645 = vmatmul.msk.f32.gmra.mxu1 %vm9194_vm4, %v4518_v29  ;;  %vm9207_vm14 = vcmask 785024   ;;  %vm9208_vm4 = vcmask 916224   ;;  %v4691_v13 = vpop.f32.mrf.mxu2 }
 0x474   :  { %3190 = vst.msk [vmem:[#allocation3 + $0xe8] sm:$0x7f] %vm9195_vm11, %v3186_v8  ;;  %v8133_v59 = vpop.f32.mrf.mxu1  ;;  %vm9209_vm11 = vcmask 786055  }
 0x477   :  { %3924 = vrot.lane.b32.xlu2 %v3920_v61, %s5727_s21  ;;  %3912 = vrot.lane.b32.xlu1 %v3908_v22, %s5725_s17  ;;  %v8189_v61 = vld [vmem:[#allocation2 + $0x1fa] ss:$2 sm:$0xff]  ;;  %v4639_v22 = vadd.f32 %v8179_v21, %v8034_v45  ;;  %v4017_v45 = vld [vmem:[#allocation2 + $0x1e1] ss:$2 sm:$0x1] }
 0x478   :  { %3936 = vrot.lane.b32.xlu0 %v3932_v33, %s5726_s20  ;;  %v4744_v33 = vpop.f32.mrf.mxu3 }
 0x479   :  { %v3617_v58 = vpop.permute.xlu2 %3616  ;;  %v3408_v47 = vpop.permute.xlu1 %3407 }
 0x47a   :  { %3413 = vst.msk [vmem:[#allocation3 + $0xd0] sm:$0xc0] %vm9196_vm9, %v3408_v47  ;;  %v3201_v17 = vpop.permute.xlu0 %3200  ;;  %vm9210_vm9 = vmmov %vm9202_vm10  ;;  %v4357_v47 = vrot.slane %v8189_v61, 7 }
 0x47b   :  { %3205 = vst.msk [vmem:[#allocation3 + $0xe8] sm:$0x7f] %vm9197_vm3, %v3201_v17  ;;  %5646 = vmatmul.msk.f32.gmra.mxu1 %vm9198_vm15, %v4522_v43  ;;  %vm9211_vm3 = vmmov %vm9203_vm8  ;;  %vm9213_vm15 = vcmask 917255   ;;  %v4473_v17 = vld [vmem:[#allocation2 + $0x221] ss:$2 sm:$0x1] }
 0x47c   :  { %3220 = vst.msk [vmem:[#allocation3 + $0xe8] sm:$0x7f] %vm9199_vm5, %v3216_v14  ;;  %v8141_v0 = vpop.f32.mrf.mxu1  ;;  %v4250_v14 = vrot.slane %v8155_v12, 7  ;;  %vm9214_vm5 = vcmask 1048455  }
 0x47d   :  { %v3945_v43 = vld [vmem:[#allocation2 + $0x1cb] ss:$2 sm:$0x1] }
 0x47e   :  { %v4371_v12 = vld [vmem:[#allocation2 + $0x20b] ss:$2 sm:$0x1] }
 0x47f   :  { %3948 = vrot.lane.b32.xlu2 %v3944_v5, %s5728_s24  ;;  %4006 = vrot.lane.b32.xlu1 %v4001_v56, %s5725_s17 }
 0x480   :  { %4020 = vrot.lane.b32.xlu0 %v4015_v31, %s5727_s21  ;;  %v4477_v31 = vrot.slane %v4473_v17, 7 }
 0x481   :  { %v3342_v18 = vpop.permute.xlu2 %3341  ;;  %v3587_v52 = vpop.permute.xlu1 %3586  ;;  %v4509_v55 = vld [vmem:[#allocation3 + $0xd0] sm:$0xff] }
 0x482   :  { %3592 = vst.msk [vmem:[#allocation3 + $0xe8] sm:$0x80] %vm9200_vm12, %v3587_v52  ;;  %v3308_v3 = vpop.permute.xlu0 %3307  ;;  %4761 = vmatmul.f32.gmra.mxu3 %v4509_v55  ;;  %vm9215_vm12 = vcmask 1047424  }
 0x483   :  { %3312 = vst.msk [vmem:[#allocation3 + $0xf0] sm:$0x7f] %vm9201_vm0, %v3308_v3  ;;  %5647 = vmatmul.msk.f32.gmra.mxu1 %vm9187_vm2, %v4526_v4  ;;  %v4694_v4 = vpop.f32.mrf.mxu2  ;;  %vm4845_vm0 = vcmask 261120  }
 0x484   :  { %v8149_v40 = vpop.f32.mrf.mxu1 }
 0x487   :  { %4034 = vrot.lane.b32.xlu2 %v4029_v30, %s5726_s20  ;;  %3960 = vrot.lane.b32.xlu1 %v3956_v1, %s5729_s27  ;;  %v8203_v30 = vld [vmem:[#allocation2 + $0x1fb] ss:$2 sm:$0xff] }
 0x488   :  { %3972 = vrot.lane.b32.xlu0 %v3968_v39, %s5730_s30  ;;  %v8205_v1 = vld [vmem:[#allocation2 + $0x1e5] ss:$2 sm:$0xff]  ;;  %v4642_v39 = vadd.f32 %v8179_v21, %v8052_v48 }
 0x489   :  { %v3261_v7 = vpop.permute.xlu2 %3260  ;;  %v3602_v19 = vpop.permute.xlu1 %3601 }
 0x48a   :  { %3607 = vst.msk [vmem:[#allocation3 + $0xe8] sm:$0x80] %vm3486_vm6, %v3602_v19  ;;  %v3231_v42 = vpop.permute.xlu0 %3230  ;;  %v4747_v19 = vpop.f32.mrf.mxu3 }
 0x48b   :  { %3622 = vst.msk [vmem:[#allocation3 + $0xe8] sm:$0x80] %vm9202_vm10, %v3617_v58  ;;  %v4692_v58 = vadd.f32 %v4691_v13, %v4639_v22  ;;  %vm9217_vm10 = vmmov %vm9207_vm14 }
 0x48c   :  { %3235 = vst.msk [vmem:[#allocation3 + $0xe8] sm:$0x7f] %vm9203_vm8, %v3231_v42  ;;  %vm9218_vm8 = vmmov %vm9209_vm11 }
 0x48d   :  { %v4745_v5 = vadd.f32 %v4744_v33, %v4692_v58 }
 0x48f   :  { %3986 = vrot.lane.b32.xlu2 %v3981_v23, %s5731_s10  ;;  %4048 = vrot.lane.b32.xlu1 %v4043_v24, %s5728_s24  ;;  %v4695_v23 = vadd.f32 %v4694_v4, %v4642_v39  ;;  %v4374_v24 = vrot.slane %v8203_v30, 7  ;;  %v4045_v39 = vld [vmem:[#allocation2 + $0x1f3] ss:$2 sm:$0x1] }
 0x490   :  { %4062 = vrot.lane.b32.xlu0 %v4057_v34, %s5729_s27  ;;  %v4280_v34 = vrot.slane %v8205_v1, 7  ;;  %v4307_v1 = vld [vmem:[#allocation2 + $0x1f7] ss:$2 sm:$0x1] }
 0x491   :  { %v3745_v50 = vpop.permute.xlu2 %3744  ;;  %v3325_v46 = vpop.permute.xlu1 %3324  ;;  %v4748_v48 = vadd.f32 %v4747_v19, %v4695_v23 }
 0x492   :  { %v3711_v35 = vpop.permute.xlu0 %3710  ;;  %3329 = vst.msk [vmem:[#allocation3 + $0xf0] sm:$0x7f] %vm9204_vm7, %v3325_v46  ;;  %v8165_v44 = vpop.f32.mrf.mxu1  ;;  %vm9219_vm7 = vcmask 1040384   ;;  %v3957_v46 = vld [vmem:[#allocation2 + $0x1cc] ss:$2 sm:$0x1] }
 0x493   :  { %3346 = vst.msk [vmem:[#allocation3 + $0xf0] sm:$0x7f] %vm9205_vm13, %v3342_v18  ;;  %vm9220_vm13 = vmmov %vm9213_vm15 }
 0x494   :  { %3716 = vst.msk [vmem:[#allocation3 + $0xf0] sm:$0x80] %vm9206_vm1, %v3711_v35  ;;  %vm9221_vm1 = vcmask 123904  }
 0x497   :  { %3914 = vrot.lane.b32.xlu2 %v3909_v53, %s5725_s17  ;;  %4076 = vrot.lane.b32.xlu1 %v4071_v28, %s5730_s30  ;;  %v4697_v53 = vpop.f32.mrf.mxu2 }
 0x498   :  { %4090 = vrot.lane.b32.xlu0 %v4085_v38, %s5731_s10  ;;  %v4344_v38 = vrot.slane %v4339_v60, 7  ;;  %v8265_v60 = vld [vmem:[#allocation2 + $0x20d] ss:$2 sm:$0xff] }
 0x499   :  { %v3664_v49 = vpop.permute.xlu2 %3663  ;;  %v3246_v11 = vpop.permute.xlu1 %3245 }
 0x49a   :  { %v3632_v57 = vpop.permute.xlu0 %3631  ;;  %3250 = vst.msk [vmem:[#allocation3 + $0xe8] sm:$0x7f] %vm9207_vm14, %v3246_v11  ;;  %vm9222_vm14 = vmmov %vm9208_vm4 }
 0x49b   :  { %3265 = vst.msk [vmem:[#allocation3 + $0xe8] sm:$0x7f] %vm9208_vm4, %v3261_v7  ;;  %vm9223_vm4 = vmmov %vm9215_vm12 }
 0x49c   :  { %3637 = vst.msk [vmem:[#allocation3 + $0xe8] sm:$0x80] %vm9209_vm11, %v3632_v57  ;;  %v8228_v57 = vld [vmem:[#allocation2 + $0x1e6] ss:$2 sm:$0xff]  ;;  %vm9224_vm11 = vmmov %vm9219_vm7 }
 0x49f   :  { %3926 = vrot.lane.b32.xlu2 %v3921_v16, %s5727_s21  ;;  %4238 = vrot.lane.b32.xlu1 %v4235_v2, %s5725_s17  ;;  %v4341_v16 = vld [vmem:[#allocation2 + $0x209] ss:$2 sm:$0x1]  ;;  %v4700_v17 = vpop.f32.mrf.mxu2 }
 0x4a0   :  { %4253 = vrot.lane.b32.xlu0 %v4250_v14, %s5727_s21 }
 0x4a1   :  { %v3779_v36 = vpop.permute.xlu2 %3778  ;;  %v3728_v62 = vpop.permute.xlu1 %3727 }
 0x4a2   :  { %v3359_v63 = vpop.permute.xlu0 %3358  ;;  %3733 = vst.msk [vmem:[#allocation3 + $0xf0] sm:$0x80] %vm3486_vm6, %v3728_v62  ;;  %vm9212_vm6 = vcmask 261248  }
 0x4a3   :  { %3750 = vst.msk [vmem:[#allocation3 + $0xf0] sm:$0x80] %vm9210_vm9, %v3745_v50  ;;  %vm9216_vm2 = vmmov %vm9212_vm6  ;;  %v4478_v50 = vsel %vm9219_vm7, %v4476_v25, %v4477_v31  ;;  %vm9225_vm9 = vcmask 130049   ;;  %v4648_v31 = vadd.f32 %v8179_v21, %v8089_v27 }
 0x4a4   :  { %3363 = vst.msk [vmem:[#allocation3 + $0xf0] sm:$0x7f] %vm9211_vm3, %v3359_v63  ;;  %v8233_v63 = vld [vmem:[#allocation2 + $0x1fc] ss:$2 sm:$0xff]  ;;  %vm9226_vm3 = vmmov %vm9221_vm1 }
 0x4a5   :  { %4482 = vst.msk [vmem:[#allocation3 + $0x178] sm:$0x3] %vm9221_vm1, %v4478_v50  ;;  %v4391_v22 = vrot.slane %v8233_v63, 7  ;;  %v4422_v63 = vld [vmem:[#allocation2 + $0x21e] ss:$2 sm:$0x1] }
 0x4a6   :  { %4349 = vst.msk [vmem:[#allocation3 + $0x150] sm:$0xfe] %vm9225_vm9, %v4344_v38 }
 0x4a7   :  { %4008 = vrot.lane.b32.xlu2 %v4003_v41, %s5725_s17  ;;  %3938 = vrot.lane.b32.xlu1 %v3933_v9, %s5726_s20  ;;  %v4345_v9 = vrot.slane %v4341_v16, 7  ;;  %v4750_v41 = vpop.f32.mrf.mxu3  ;;  %v3983_v16 = vld [vmem:[#allocation2 + $0x1de] ss:$2 sm:$0x1] }
 0x4a8   :  { %4268 = vrot.lane.b32.xlu0 %v4265_v54, %s5726_s20  ;;  %v8186_v20 = vpop.f32.mrf.mxu1 }
 0x4a9   :  { %v3574_v15 = vpop.permute.xlu2 %3573  ;;  %v3647_v8 = vpop.permute.xlu1 %3646 }
 0x4aa   :  { %3578 = vst.msk [vmem:[#allocation3 + $0x108] sm:$0xff] %vm9212_vm6, %v3574_v15  ;;  %v3278_v29 = vpop.permute.xlu0 %3277  ;;  %v4295_v15 = vrot.slane %v8228_v57, 7  ;;  %vm9227_vm6 = vcmask 130048  }
 0x4ab   :  { %3652 = vst.msk [vmem:[#allocation3 + $0xe8] sm:$0x80] %vm9213_vm15, %v3647_v8  ;;  %v4031_v8 = vld [vmem:[#allocation2 + $0x1e2] ss:$2 sm:$0x1]  ;;  %vm9228_vm15 = vmmov %vm9214_vm5 }
 0x4ac   :  { %3669 = vst.msk [vmem:[#allocation3 + $0xe8] sm:$0x80] %vm9214_vm5, %v3664_v49  ;;  %vm9229_vm5 = vcmask 392448  }
 0x4ad   :  { %3282 = vst.msk [vmem:[#allocation3 + $0xe8] sm:$0x7f] %vm9215_vm12, %v3278_v29  ;;  %v4346_v29 = vsel %vm9224_vm11, %v4344_v38, %v4345_v9  ;;  %vm9230_vm12 = vcmask 523648  }
 0x4ae   :  { %4350 = vst.msk [vmem:[#allocation3 + $0x170] sm:$0x3] %vm9226_vm3, %v4346_v29  ;;  %vm9234_vm7 = vmmov %vm9230_vm12 }
 0x4af   :  { %3950 = vrot.lane.b32.xlu2 %v3945_v43, %s5728_s24  ;;  %4360 = vrot.lane.b32.xlu1 %v4357_v47, %s5725_s17 }
 0x4b0   :  { %4022 = vrot.lane.b32.xlu0 %v4017_v45, %s5727_s21  ;;  %v4797_v56 = vpop.f32.mrf.mxu1 }
 0x4b1   :  { %v4798_v18 = vadd.f32 %v4797_v56, %v4745_v5  ;;  %v3696_v52 = vpop.permute.xlu2 %3695  ;;  %v3376_v55 = vpop.permute.xlu1 %3375 }
 0x4b2   :  { %3700 = vst.msk [vmem:[#allocation3 + $0x110] sm:$0xff] %vm9216_vm2, %v3696_v52  ;;  %v3762_v3 = vpop.permute.xlu0 %3761  ;;  %v4753_v52 = vpop.f32.mrf.mxu3  ;;  %vm9231_vm2 = vcmask 654848  }
 0x4b3   :  { %v4833_v7 = vmax.f32 %v4798_v18, 0.0  ;;  %3380 = vst.msk [vmem:[#allocation3 + $0xf0] sm:$0x7f] %vm9217_vm10, %v3376_v55  ;;  %v8253_v18 = vld [vmem:[#allocation2 + $0x1e7] ss:$2 sm:$0xff]  ;;  %v4701_v55 = vadd.f32 %v4700_v17, %v4648_v31  ;;  %vm9232_vm10 = vcmask 786048   ;;  %vm9235_vm1 = vmmov %vm9231_vm2 }
 0x4b4   :  { %3767 = vst.msk [vmem:[#allocation3 + $0xf0] sm:$0x80] %vm9218_vm8, %v3762_v3  ;;  %v4512_v42 = vld [vmem:[#allocation3 + $0xe8] sm:$0xff]  ;;  %v3969_v3 = vld [vmem:[#allocation2 + $0x1cd] ss:$2 sm:$0x1]  ;;  %vm9233_vm8 = vmmov %vm9229_vm5 }
 0x4b5   :  { %4846 = vst.msk [vmem:[#allocation4] sm:$0xff] %vm4845_vm0, %v4833_v7  ;;  %4711 = vmatmul.f32.gmra.mxu2 %v4512_v42  ;;  %v4310_v7 = vrot.slane %v8253_v18, 7  ;;  %v4754_v19 = vadd.f32 %v4753_v52, %v4701_v55  ;;  %v4703_v42 = vpop.f32.mrf.mxu2  ;;  %v4232_v55 = vld [vmem:[#allocation2 + $0x1e2] ss:$2 sm:$0x1]  ;;  %vm9238_vm9 = vmmov %vm9232_vm10 }
 0x4b6   :  { %3784 = vst.msk [vmem:[#allocation3 + $0xf0] sm:$0x80] %vm9220_vm13, %v3779_v36  ;;  %v4645_v36 = vadd.f32 %v8179_v21, %v8070_v51  ;;  %v4530_v51 = vld [vmem:[#allocation3 + $0x178] sm:$0x3]  ;;  %vm4860_vm13 = vcmask 256000  }
 0x4b7   :  { %4377 = vrot.lane.b32.xlu2 %v4374_v24, %s5727_s21  ;;  %4283 = vrot.lane.b32.xlu1 %v4280_v34, %s5728_s24 }
 0x4b8   :  { %3962 = vrot.lane.b32.xlu0 %v3957_v46, %s5729_s27  ;;  %v4800_v35 = vpop.f32.mrf.mxu1  ;;  %v4698_v13 = vadd.f32 %v4697_v53, %v4645_v36  ;;  %5648 = vmatmul.msk.f32.gmra.mxu1 %vm9227_vm6, %v4530_v51  ;;  %v4651_v53 = vadd.f32 %v8179_v21, %v8107_v10  ;;  %v4059_v10 = vld [vmem:[#allocation2 + $0x1f4] ss:$2 sm:$0x1] }
 0x4b9   :  { %v4801_v25 = vadd.f32 %v4800_v35, %v4748_v48  ;;  %v8226_v28 = vpop.permute.xlu2 %3633  ;;  %v3393_v49 = vpop.permute.xlu1 %3392  ;;  %v8282_v51 = vld [vmem:[#allocation2 + $0x20e] ss:$2 sm:$0xff] }
 0x4ba   :  { %v3410_v11 = vpop.permute.xlu0 %3409  ;;  %3397 = vst.msk [vmem:[#allocation3 + $0xf0] sm:$0x7f] %vm9222_vm14, %v3393_v49  ;;  %v4751_v33 = vadd.f32 %v4750_v41, %v4698_v13  ;;  %v4756_v38 = vpop.f32.mrf.mxu3  ;;  %v4704_v49 = vadd.f32 %v4703_v42, %v4651_v53  ;;  %vm9236_vm14 = vcmask 917248  }
 0x4bb   :  { %v4834_v62 = vmax.f32 %v4801_v25, 0.0  ;;  %3414 = vst.msk [vmem:[#allocation3 + $0xf0] sm:$0x7f] %vm9223_vm4, %v3410_v11  ;;  %v4408_v11 = vrot.slane %v8265_v60, 7  ;;  %vm9237_vm4 = vcmask 1048448   ;;  %vm9239_vm3 = vmmov %vm9236_vm14 }
 0x4bc   :  { %v4757_v36 = vadd.f32 %v4756_v38, %v4704_v49  ;;  %v4859_v31 = vld [vmem:[#allocation4] ss:$2 sm:$0x7]  ;;  %v4262_v38 = vld [vmem:[#allocation2 + $0x1f4] ss:$2 sm:$0x1]  ;;  %vm9240_vm6 = vmmov %vm9237_vm4 }
 0x4bd   :  { %4847 = vst.msk [vmem:[#allocation4 + $0x8] sm:$0xff] %vm4845_vm0, %v4834_v62  ;;  %v4706_v9 = vpop.f32.mrf.mxu2 }
 0x4be   :  { %4861 = vst.msk [vmem:[#allocation5] sm:$0x7] %vm4860_vm13, %v4859_v31 }
 0x4bf   :  { %4298 = vrot.lane.b32.xlu2 %v4295_v15, %s5729_s27  ;;  %4036 = vrot.lane.b32.xlu1 %v4031_v8, %s5726_s20 }
 0x4c0   :  { %4394 = vrot.lane.b32.xlu0 %v4391_v22, %s5726_s20  ;;  %v4803_v58 = vpop.f32.mrf.mxu1 }
 0x4c1   :  { %v4804_v43 = vadd.f32 %v4803_v58, %v4751_v33  ;;  %v3747_v5 = vpop.permute.xlu2 %3746  ;;  %v3796_v45 = vpop.permute.xlu1 %3795  ;;  %v4654_v33 = vadd.f32 %v8179_v21, %v8116_v32  ;;  %v4073_v32 = vld [vmem:[#allocation2 + $0x1f5] ss:$2 sm:$0x1] }
 0x4c2   :  { %v3589_v56 = vpop.permute.xlu0 %3588  ;;  %3801 = vst.msk [vmem:[#allocation3 + $0xf0] sm:$0x80] %vm9228_vm15, %v3796_v45  ;;  %v4425_v45 = vrot.slane %v8282_v51, 7  ;;  %vm9241_vm15 = vmmov %vm9224_vm11 }
 0x4c3   :  { %v4835_v4 = vmax.f32 %v4804_v43, 0.0  ;;  %3593 = vst.msk [vmem:[#allocation3 + $0x108] sm:$0xff] %vm9229_vm5, %v3589_v56  ;;  %v4707_v43 = vadd.f32 %v4706_v9, %v4654_v33  ;;  %vm9242_vm5 = vmmov %vm9224_vm11  ;;  %v4354_v33 = vld [vmem:[#allocation2 + $0x20a] ss:$2 sm:$0x1] }
 0x4c4   :  { %v4358_v31 = vrot.slane %v4354_v33, 7 }
 0x4c5   :  { %4848 = vst.msk [vmem:[#allocation4 + $0x10] sm:$0xff] %vm4845_vm0, %v4835_v4  ;;  %v4759_v17 = vpop.f32.mrf.mxu3 }
 0x4c6   :  { %v4760_v4 = vadd.f32 %v4759_v17, %v4707_v43 }
 0x4c7   :  { %4050 = vrot.lane.b32.xlu2 %v4045_v39, %s5728_s24  ;;  %3974 = vrot.lane.b32.xlu1 %v3969_v3, %s5730_s30 }
 0x4c8   :  { %4313 = vrot.lane.b32.xlu0 %v4310_v7, %s5730_s30  ;;  %v4806_v27 = vpop.f32.mrf.mxu1 }
 0x4c9   :  { %v4807_v23 = vadd.f32 %v4806_v27, %v4754_v19  ;;  %v8263_v50 = vpop.permute.xlu2 %3780  ;;  %v3604_v48 = vpop.permute.xlu1 %3603  ;;  %v4513_v35 = vld [vmem:[#allocation3 + $0xf0] sm:$0xff] }
 0x4ca   :  { %v3619_v46 = vpop.permute.xlu0 %3618  ;;  %3608 = vst.msk [vmem:[#allocation3 + $0x108] sm:$0xff] %vm9230_vm12, %v3604_v48  ;;  %4764 = vmatmul.f32.gmra.mxu3 %v4513_v35  ;;  %v8302_v27 = vld [vmem:[#allocation2 + $0x20f] ss:$2 sm:$0xff]  ;;  %v4887_v35 = vld [vmem:[#allocation4 + $0x4] ss:$2 sm:$0x7] }
 0x4cb   :  { %v4836_v25 = vmax.f32 %v4807_v23, 0.0  ;;  %3623 = vst.msk [vmem:[#allocation3 + $0x108] sm:$0xff] %vm9231_vm2, %v3619_v46  ;;  %v4236_v23 = vrot.slane %v4232_v55, 7  ;;  %v4442_v48 = vrot.slane %v8302_v27, 7  ;;  %vm9243_vm12 = vcmask 261248   ;;  %vm9244_vm2 = vmmov %vm9233_vm8 }
 0x4cc   :  { %3638 = vst.msk [vmem:[#allocation3 + $0x108] sm:$0xff] %vm9232_vm10, %v8226_v28  ;;  %v8284_v28 = vld [vmem:[#allocation2 + $0x1f8] ss:$2 sm:$0xff]  ;;  %v4087_v46 = vld [vmem:[#allocation2 + $0x1f6] ss:$2 sm:$0x1]  ;;  %vm9245_vm10 = vmmov %vm9234_vm7 }
 0x4cd   :  { %4849 = vst.msk [vmem:[#allocation4 + $0x18] sm:$0xff] %vm4845_vm0, %v4836_v25  ;;  %v4327_v56 = vrot.slane %v8284_v28, 7  ;;  %v4237_v53 = vsel %vm9224_vm11, %v4235_v2, %v4236_v23  ;;  %v4247_v25 = vld [vmem:[#allocation2 + $0x1f3] ss:$2 sm:$0x1]  ;;  %vm9251_vm11 = vmmov %vm9243_vm12 }
 0x4ce   :  { %4888 = vst.msk [vmem:[#allocation5 + $0x8] sm:$0x7] %vm4860_vm13, %v4887_v35  ;;  %v4405_v35 = vld [vmem:[#allocation2 + $0x21d] ss:$2 sm:$0x1] }
 0x4cf   :  { %3988 = vrot.lane.b32.xlu2 %v3983_v16, %s5731_s10  ;;  %4411 = vrot.lane.b32.xlu1 %v4408_v11, %s5728_s24  ;;  %v4871_v27 = vld [vmem:[#allocation4 + $0x2] ss:$2 sm:$0x7] }
 0x4d0   :  { %4064 = vrot.lane.b32.xlu0 %v4059_v10, %s5729_s27  ;;  %v4809_v62 = vpop.f32.mrf.mxu1  ;;  %v4251_v10 = vrot.slane %v4247_v25, 7  ;;  %v4409_v25 = vrot.slane %v4405_v35, 7 }
 0x4d1   :  { %v4810_v41 = vadd.f32 %v4809_v62, %v4757_v36  ;;  %v8280_v13 = vpop.permute.xlu2 %3924  ;;  %v3713_v8 = vpop.permute.xlu1 %3712  ;;  %v8317_v62 = vld [vmem:[#allocation2 + $0x210] ss:$2 sm:$0xff] }
 0x4d2   :  { %v3730_v29 = vpop.permute.xlu0 %3729  ;;  %3717 = vst.msk [vmem:[#allocation3 + $0x110] sm:$0xff] %vm9233_vm8, %v3713_v8  ;;  %v4459_v37 = vrot.slane %v8317_v62, 7  ;;  %v4252_v2 = vsel %vm9241_vm15, %v4250_v14, %v4251_v10  ;;  %v4277_v8 = vld [vmem:[#allocation2 + $0x1f5] ss:$2 sm:$0x1]  ;;  %vm9246_vm8 = vmmov %vm9235_vm1 }
 0x4d3   :  { %v4837_v58 = vmax.f32 %v4810_v41, 0.0  ;;  %3734 = vst.msk [vmem:[#allocation3 + $0x110] sm:$0xff] %vm9234_vm7, %v3730_v29  ;;  %v4266_v41 = vrot.slane %v4262_v38, 7  ;;  %v4911_v29 = vld [vmem:[#allocation4 + $0xc] ss:$2 sm:$0x7]  ;;  %vm9247_vm7 = vmmov %vm9242_vm5 }
 0x4d4   :  { %3751 = vst.msk [vmem:[#allocation3 + $0x110] sm:$0xff] %vm9235_vm1, %v3747_v5  ;;  %v4281_v43 = vrot.slane %v4277_v8, 7  ;;  %vm9248_vm1 = vmmov %vm9242_vm5  ;;  %v4935_v55 = vld [vmem:[#allocation4 + $0x14] ss:$2 sm:$0x7]  ;;  %v4426_v38 = vrot.slane %v4422_v63, 7 }
 0x4d5   :  { %4850 = vst.msk [vmem:[#allocation4 + $0x20] sm:$0xff] %vm4845_vm0, %v4837_v58  ;;  %vm9255_vm15 = vmmov %vm9248_vm1  ;;  %v4456_v10 = vld [vmem:[#allocation2 + $0x220] ss:$2 sm:$0x1] }
 0x4d6   :  { %4912 = vst.msk [vmem:[#allocation5 + $0x10] sm:$0x7] %vm4860_vm13, %v4911_v29 }
 0x4d7   :  { %4428 = vrot.lane.b32.xlu2 %v4425_v45, %s5729_s27  ;;  %4330 = vrot.lane.b32.xlu1 %v4327_v56, %s5731_s10  ;;  %4936 = vst.msk [vmem:[#allocation5 + $0x18] sm:$0x7] %vm4860_vm13, %v4935_v55 }
 0x4d8   :  { %4078 = vrot.lane.b32.xlu0 %v4073_v32, %s5730_s30  ;;  %v4812_v52 = vpop.f32.mrf.mxu1  ;;  %v4282_v32 = vsel %vm9247_vm7, %v4280_v34, %v4281_v43  ;;  %vm9261_vm7 = vmmov %vm9248_vm1 }
 0x4d9   :  { %v4813_v3 = vadd.f32 %v4812_v52, %v4760_v4  ;;  %v3949_v39 = vpop.permute.xlu2 %3948  ;;  %v3649_v5 = vpop.permute.xlu1 %3648  ;;  %v4375_v4 = vrot.slane %v4371_v12, 7  ;;  %v4359_v52 = vsel %vm9248_vm1, %v4357_v47, %v4358_v31 }
 0x4da   :  { %v3666_v19 = vpop.permute.xlu0 %3665  ;;  %3653 = vst.msk [vmem:[#allocation3 + $0x108] sm:$0xff] %vm9236_vm14, %v3649_v5  ;;  %vm9249_vm14 = vmmov %vm9248_vm1 }
 0x4db   :  { %v4838_v42 = vmax.f32 %v4813_v3, 0.0  ;;  %3670 = vst.msk [vmem:[#allocation3 + $0x108] sm:$0xff] %vm9237_vm4, %v3666_v19  ;;  %v4388_v3 = vld [vmem:[#allocation2 + $0x20c] ss:$2 sm:$0x1]  ;;  %vm9250_vm4 = vcmask 254080  }
 0x4dc   :  { %v4311_v19 = vrot.slane %v4307_v1, 7  ;;  %v4959_v23 = vld [vmem:[#allocation4 + $0x1c] ss:$2 sm:$0x7] }
 0x4dd   :  { %4851 = vst.msk [vmem:[#allocation4 + $0x28] sm:$0xff] %vm4845_vm0, %v4838_v42  ;;  %v4324_v42 = vld [vmem:[#allocation2 + $0x208] ss:$2 sm:$0x1] }
 0x4de   :  { %4960 = vst.msk [vmem:[#allocation5 + $0x20] sm:$0x7] %vm4860_vm13, %v4959_v23 }
 0x4df   :  { %4092 = vrot.lane.b32.xlu2 %v4087_v46, %s5731_s10  ;;  %4445 = vrot.lane.b32.xlu1 %v4442_v48, %s5730_s30 }
 0x4e0   :  { %4240 = vrot.lane.b32.xlu0 %v4237_v53, %s5725_s17  ;;  %v4328_v53 = vrot.slane %v4324_v42, 7  ;;  %v4815_v12 = vpop.f32.mrf.mxu1 }
 0x4e1   :  { %v4035_v49 = vpop.permute.xlu2 %4034  ;;  %v3764_v16 = vpop.permute.xlu1 %3763 }
 0x4e2   :  { %v3798_v36 = vpop.permute.xlu0 %3797  ;;  %3768 = vst.msk [vmem:[#allocation3 + $0x110] sm:$0xff] %vm9238_vm9, %v3764_v16  ;;  %v4516_v9 = vld [vmem:[#allocation3 + $0x108] sm:$0xff]  ;;  %vm9252_vm9 = vmmov %vm9244_vm2  ;;  %v4329_v18 = vsel %vm9261_vm7, %v4327_v56, %v4328_v53  ;;  %v4439_v16 = vld [vmem:[#allocation2 + $0x21f] ss:$2 sm:$0x1] }
 0x4e3   :  { %3785 = vst.msk [vmem:[#allocation3 + $0x110] sm:$0xff] %vm9239_vm3, %v8263_v50  ;;  %4714 = vmatmul.f32.gmra.mxu2 %v4516_v9  ;;  %v4267_v50 = vsel %vm9242_vm5, %v4265_v54, %v4266_v41  ;;  %v4292_v54 = vld [vmem:[#allocation2 + $0x1f6] ss:$2 sm:$0x1]  ;;  %vm9253_vm3 = vmmov %vm9245_vm10  ;;  %v4443_v8 = vrot.slane %v4439_v16, 7 }
 0x4e4   :  { %3802 = vst.msk [vmem:[#allocation3 + $0x110] sm:$0xff] %vm9240_vm6, %v3798_v36  ;;  %v4296_v5 = vrot.slane %v4292_v54, 7  ;;  %vm9254_vm6 = vmmov %vm9248_vm1  ;;  %v4983_v9 = vld [vmem:[#allocation4 + $0x24] ss:$2 sm:$0x7] }
 0x4e5   :  { %vm9256_vm5 = vmmov %vm9248_vm1  ;;  %4984 = vst.msk [vmem:[#allocation5 + $0x28] sm:$0x7] %vm4860_vm13, %v4983_v9 }
 0x4e6   :  { %v4312_v46 = vsel %vm9256_vm5, %v4310_v7, %v4311_v19  ;;  %v4410_v7 = vsel %vm9248_vm1, %v4408_v11, %v4409_v25  ;;  %v4657_v11 = vadd.f32 %v8179_v21, %v8125_v6  ;;  %vm9269_vm5 = vcmask 261249  }
 0x4e7   :  { %4255 = vrot.lane.b32.xlu2 %v4252_v2, %s5727_s21  ;;  %4462 = vrot.lane.b32.xlu1 %v4459_v37, %s5731_s10  ;;  %v4460_v2 = vrot.slane %v4456_v10, 7  ;;  %vm9274_vm7 = vmmov %vm9269_vm5 }
 0x4e8   :  { %4270 = vrot.lane.b32.xlu0 %v4267_v50, %s5726_s20 }
 0x4e9   :  { %v3987_v58 = vpop.permute.xlu2 %3986  ;;  %v3913_v14 = vpop.permute.xlu1 %3912 }
 0x4ea   :  { %v3937_v17 = vpop.permute.xlu0 %3936  ;;  %3918 = vst.msk [vmem:[#allocation3 + $0x128] sm:$0xff] %vm9243_vm12, %v3913_v14  ;;  %vm9257_vm12 = vcmask 385280  }
 0x4eb   :  { %3930 = vst.msk [vmem:[#allocation3 + $0x128] sm:$0xff] %vm9244_vm2, %v8280_v13  ;;  %v4517_v26 = vld [vmem:[#allocation3 + $0x110] sm:$0xff]  ;;  %v4376_v13 = vsel %vm9249_vm14, %v4374_v24, %v4375_v4  ;;  %v4297_v24 = vsel %vm9255_vm15, %v4295_v15, %v4296_v5  ;;  %vm9258_vm2 = vcmask 786048   ;;  %vm9262_vm14 = vmmov %vm9248_vm1  ;;  %v4897_v5 = vld [vmem:[#allocation4 + $0xa] ss:$2 sm:$0x7] }
 0x4ec   :  { %3942 = vst.msk [vmem:[#allocation3 + $0x128] sm:$0xff] %vm9245_vm10, %v3937_v17  ;;  %4767 = vmatmul.f32.gmra.mxu3 %v4517_v26  ;;  %vm9259_vm10 = vcmask 917248   ;;  %v4427_v36 = vsel %vm9262_vm14, %v4425_v45, %v4426_v38  ;;  %vm9276_vm14 = vcmask 385280  }
 0x4ed   :  { %3954 = vst.msk [vmem:[#allocation3 + $0x128] sm:$0xff] %vm9246_vm8, %v3949_v39  ;;  %v4392_v39 = vrot.slane %v4388_v3, 7  ;;  %vm9260_vm8 = vcmask 1048448  }
 0x4ee   :  { %vm9268_vm15 = vmmov %vm9260_vm8 }
 0x4ef   :  { %4285 = vrot.lane.b32.xlu2 %v4282_v32, %s5728_s24  ;;  %4362 = vrot.lane.b32.xlu1 %v4359_v52, %s5725_s17  ;;  %v4393_v30 = vsel %vm9254_vm6, %v4391_v22, %v4392_v39  ;;  %vm9267_vm6 = vmmov %vm9259_vm10  ;;  %v4890_v39 = vld [vmem:[#allocation4 + $0x9] ss:$2 sm:$0x7] }
 0x4f0   :  { %4379 = vrot.lane.b32.xlu0 %v4376_v13, %s5727_s21 }
 0x4f1   :  { %v3915_v34 = vpop.permute.xlu2 %3914  ;;  %v4007_v61 = vpop.permute.xlu1 %4006 }
 0x4f2   :  { %3919 = vst.msk [vmem:[#allocation3 + $0x148] sm:$0x1] %vm9250_vm4, %v3915_v34  ;;  %v4021_v47 = vpop.permute.xlu0 %4020 }
 0x4f3   :  { %4012 = vst.msk [vmem:[#allocation3 + $0x130] sm:$0xff] %vm9251_vm11, %v4007_v61  ;;  %vm9263_vm11 = vcmask 654848  }
 0x4f4   :  { %4026 = vst.msk [vmem:[#allocation3 + $0x130] sm:$0xff] %vm9252_vm9, %v4021_v47  ;;  %vm9264_vm9 = vmmov %vm9258_vm2  ;;  %v4879_v47 = vld [vmem:[#allocation4 + $0x3] ss:$2 sm:$0x7] }
 0x4f5   :  { %4040 = vst.msk [vmem:[#allocation3 + $0x130] sm:$0xff] %vm9253_vm3, %v4035_v49  ;;  %v5007_v49 = vld [vmem:[#allocation4 + $0x28] ss:$2 sm:$0x7]  ;;  %v4709_v60 = vpop.f32.mrf.mxu2  ;;  %vm9266_vm3 = vmmov %vm9248_vm1 }
 0x4f6   :  { %5008 = vst.msk [vmem:[#allocation5 + $0x30] sm:$0x7] %vm4860_vm13, %v5007_v49  ;;  %v4710_v51 = vadd.f32 %v4709_v60, %v4657_v11  ;;  %vm9265_vm13 = vmmov %vm9248_vm1  ;;  %v4444_v6 = vsel %vm9266_vm3, %v4442_v48, %v4443_v8  ;;  %v4660_v60 = vadd.f32 %v8179_v21, %v8133_v59 }
 0x4f7   :  { %4396 = vrot.lane.b32.xlu2 %v4393_v30, %s5726_s20  ;;  %4300 = vrot.lane.b32.xlu1 %v4297_v24, %s5729_s27  ;;  %v4461_v33 = vsel %vm9265_vm13, %v4459_v37, %v4460_v2  ;;  %vm5014_vm13 = vcmask 259075   ;;  %v4818_v2 = vpop.f32.mrf.mxu1 }
 0x4f8   :  { %4315 = vrot.lane.b32.xlu0 %v4312_v46, %s5730_s30 }
 0x4f9   :  { %v3927_v22 = vpop.permute.xlu2 %3926  ;;  %v3961_v57 = vpop.permute.xlu1 %3960 }
 0x4fa   :  { %3931 = vst.msk [vmem:[#allocation3 + $0x148] sm:$0x1] %vm9257_vm12, %v3927_v22  ;;  %v3973_v15 = vpop.permute.xlu0 %3972  ;;  %vm9270_vm12 = vcmask 392449  }
 0x4fb   :  { %3966 = vst.msk [vmem:[#allocation3 + $0x128] sm:$0xff] %vm9258_vm2, %v3961_v57  ;;  %vm9271_vm2 = vcmask 516480   ;;  %vm9275_vm1 = vmmov %vm9270_vm12 }
 0x4fc   :  { %3978 = vst.msk [vmem:[#allocation3 + $0x128] sm:$0xff] %vm9259_vm10, %v3973_v15  ;;  %vm9272_vm10 = vcmask 647680   ;;  %vm9280_vm3 = vmmov %vm9271_vm2 }
 0x4fd   :  { %3992 = vst.msk [vmem:[#allocation3 + $0x128] sm:$0xff] %vm9260_vm8, %v3987_v58  ;;  %v4863_v58 = vld [vmem:[#allocation4 + $0x1] ss:$2 sm:$0x7]  ;;  %vm9273_vm8 = vcmask 523649  }
 0x4ff   :  { %4332 = vrot.lane.b32.xlu2 %v4329_v18, %s5731_s10  ;;  %4413 = vrot.lane.b32.xlu1 %v4410_v7, %s5728_s24 }
 0x500   :  { %4430 = vrot.lane.b32.xlu0 %v4427_v36, %s5729_s27 }
 0x501   :  { %v4009_v28 = vpop.permute.xlu2 %4008  ;;  %v4049_v56 = vpop.permute.xlu1 %4048 }
 0x502   :  { %4013 = vst.msk [vmem:[#allocation3 + $0x150] sm:$0x1] %vm9250_vm4, %v4009_v28  ;;  %v4063_v41 = vpop.permute.xlu0 %4062  ;;  %vm9277_vm4 = vcmask 654849  }
 0x503   :  { %4054 = vst.msk [vmem:[#allocation3 + $0x130] sm:$0xff] %vm9263_vm11, %v4049_v56  ;;  %vm9278_vm11 = vcmask 786049  }
 0x504   :  { %4068 = vst.msk [vmem:[#allocation3 + $0x130] sm:$0xff] %vm9264_vm9, %v4063_v41  ;;  %v4520_v45 = vld [vmem:[#allocation3 + $0x128] sm:$0xff]  ;;  %vm9279_vm9 = vcmask 778880  }
 0x505   :  { %4717 = vmatmul.f32.gmra.mxu2 %v4520_v45  ;;  %v4762_v29 = vpop.f32.mrf.mxu3 }
 0x506   :  { %v4763_v50 = vadd.f32 %v4762_v29, %v4710_v51 }
 0x507   :  { %4464 = vrot.lane.b32.xlu2 %v4461_v33, %s5731_s10  ;;  %4447 = vrot.lane.b32.xlu1 %v4444_v6, %s5730_s30 }
 0x508   :  { %v4816_v14 = vadd.f32 %v4815_v12, %v4763_v50  ;;  %4865 = vrot.lane.b32.xlu0 %v4863_v58, %s5727_s21 }
 0x509   :  { %v3951_v17 = vpop.permute.xlu2 %3950  ;;  %v4077_v31 = vpop.permute.xlu1 %4076 }
 0x50a   :  { %v4839_v43 = vmax.f32 %v4816_v14, 0.0  ;;  %v4091_v4 = vpop.permute.xlu0 %4090  ;;  %4082 = vst.msk [vmem:[#allocation3 + $0x130] sm:$0xff] %vm9267_vm6, %v4077_v31  ;;  %vm9281_vm6 = vmmov %vm9272_vm10  ;;  %v5221_v31 = vld [vmem:[%s8896_s5 + $0x78] sm:$0xff] }
 0x50b   :  { %4096 = vst.msk [vmem:[#allocation3 + $0x130] sm:$0xff] %vm9268_vm15, %v4091_v4  ;;  %vm9282_vm15 = vmmov %vm9273_vm8  ;;  %v5220_v4 = vld [vmem:[%s8896_s5 + $0x70] sm:$0xff]  ;;  %5313 = vmatpush.msra.mxu2 %v5221_v31 }
 0x50c   :  { %4852 = vst.msk [vmem:[#allocation4 + $0x30] sm:$0xff] %vm4845_vm0, %v4839_v43 }
 0x50d   :  { %5314 = vmatpush.msra.mxu2 %v5220_v4  ;;  %v4962_v4 = vld [vmem:[#allocation4 + $0x1d] ss:$2 sm:$0x7] }
 0x50f   :  { %4873 = vrot.lane.b32.xlu2 %v4871_v27, %s5728_s24 }
 0x511   :  { %v4378_v48 = vpop.permute.xlu2 %4377  ;;  %v4239_v62 = vpop.permute.xlu1 %4238 }
 0x512   :  { %v4254_v37 = vpop.permute.xlu0 %4253  ;;  %4244 = vst.msk [vmem:[#allocation3 + $0x148] sm:$0xfe] %vm9269_vm5, %v4239_v62  ;;  %v4521_v54 = vld [vmem:[#allocation3 + $0x130] sm:$0xff]  ;;  %vm9283_vm5 = vcmask 910080  }
 0x513   :  { %v5017_v26 = vld [vmem:[#allocation4 + $0x2e] ss:$2 sm:$0x7]  ;;  %4259 = vst.msk [vmem:[#allocation3 + $0x148] sm:$0xfe] %vm9270_vm12, %v4254_v37  ;;  %4770 = vmatmul.f32.gmra.mxu3 %v4521_v54  ;;  %vm9284_vm12 = vcmask 1041280  }
 0x514   :  { %v5019_v32 = vrot.slane %v5017_v26, 5  ;;  %v5026_v52 = vld [vmem:[#allocation4 + $0x2f] ss:$2 sm:$0x7] }
 0x515   :  { %v5035_v55 = vld [vmem:[#allocation4 + $0x30] ss:$2 sm:$0x7]  ;;  %v5028_v13 = vrot.slane %v5026_v52, 5 }
 0x516   :  { %5020 = vrot.lane.b32.xlu1 %v5019_v32, %s5727_s21  ;;  %v5037_v3 = vrot.slane %v5035_v55, 5  ;;  %v5010_v46 = vld [vmem:[#allocation4 + $0x2d] ss:$2 sm:$0x7]  ;;  %v5218_v32 = vld [vmem:[%s8896_s5 + $0x60] sm:$0xff] }
 0x517   :  { %5029 = vrot.lane.b32.xlu0 %v5028_v13, %s5728_s24  ;;  %v5012_v35 = vrot.slane %v5010_v46, 5  ;;  %v5044_v63 = vld [vmem:[#allocation4 + $0x31] ss:$2 sm:$0x7]  ;;  %v5216_v13 = vld [vmem:[%s8896_s5 + $0x50] sm:$0xff] }
 0x518   :  { %5038 = vrot.lane.b32.xlu2 %v5037_v3, %s5730_s30  ;;  %v5046_v22 = vrot.slane %v5044_v63, 5  ;;  %v5217_v52 = vld [vmem:[%s8896_s5 + $0x58] sm:$0xff]  ;;  %v4904_v55 = vld [vmem:[#allocation4 + $0xb] ss:$2 sm:$0x7] }
 0x519   :  { %v3939_v1 = vpop.permute.xlu1 %3938  ;;  %v4299_v61 = vpop.permute.xlu2 %4298  ;;  %5015 = vst.msk [vmem:[#allocation5] sm:$0x38] %vm5014_vm13, %v5012_v35  ;;  %v4921_v3 = vld [vmem:[#allocation4 + $0x12] ss:$2 sm:$0x7]  ;;  %v5212_v46 = vld [vmem:[%s8896_s5 + $0x30] sm:$0xff] }
 0x51a   :  { %v4269_v34 = vpop.permute.xlu0 %4268  ;;  %3943 = vst.msk [vmem:[#allocation3 + $0x148] sm:$0x1] %vm9271_vm2, %v3939_v1  ;;  %vm9285_vm2 = vcmask 917249   ;;  %v4914_v1 = vld [vmem:[#allocation4 + $0xd] ss:$2 sm:$0x7] }
 0x51b   :  { %3955 = vst.msk [vmem:[#allocation3 + $0x148] sm:$0x1] %vm9272_vm10, %v3951_v17  ;;  %vm9286_vm10 = vmmov %vm9277_vm4 }
 0x51c   :  { %4274 = vst.msk [vmem:[#allocation3 + $0x148] sm:$0xfe] %vm9273_vm8, %v4269_v34  ;;  %vm9287_vm8 = vmmov %vm9278_vm11  ;;  %v5215_v34 = vld [vmem:[%s8896_s5 + $0x48] sm:$0xff] }
 0x51d   :  { %5048 = vst.msk [vmem:[#allocation5 + $0x8] sm:$0x38] %vm5014_vm13, %v5046_v22  ;;  %v5211_v22 = vld [vmem:[%s8896_s5 + $0x28] sm:$0xff] }
 0x51e   :  { %4881 = vrot.lane.b32.xlu1 %v4879_v47, %s5730_s30 }
 0x51f   :  { %4892 = vrot.lane.b32.xlu0 %v4890_v39, %s5727_s21 }
 0x520   :  { %4899 = vrot.lane.b32.xlu2 %v4897_v5, %s5728_s24  ;;  %v5214_v5 = vld [vmem:[%s8896_s5 + $0x40] sm:$0xff] }
 0x521   :  { %v4361_v19 = vpop.permute.xlu1 %4360  ;;  %v4051_v24 = vpop.permute.xlu2 %4050 }
 0x522   :  { %v4023_v30 = vpop.permute.xlu0 %4022  ;;  %4366 = vst.msk [vmem:[#allocation3 + $0x150] sm:$0xfe] %vm9274_vm7, %v4361_v19  ;;  %vm9288_vm7 = vmmov %vm9279_vm9 }
 0x523   :  { %4383 = vst.msk [vmem:[#allocation3 + $0x150] sm:$0xfe] %vm9275_vm1, %v4378_v48  ;;  %vm9289_vm1 = vcmask 1048449   ;;  %v5219_v48 = vld [vmem:[%s8896_s5 + $0x68] sm:$0xff] }
 0x524   :  { %4027 = vst.msk [vmem:[#allocation3 + $0x150] sm:$0x1] %vm9276_vm14, %v4023_v30  ;;  %vm9290_vm14 = vmmov %vm9283_vm5  ;;  %5315 = vmatpush.msra.mxu2 %v5219_v48 }
 0x526   :  { %5316 = vmatpush.msra.mxu2 %v5218_v32 }
 0x528   :  { %5317 = vmatpush.msra.mxu2 %v5217_v52 }
 0x529   :  { %v4284_v42 = vpop.permute.xlu1 %4283  ;;  %v3989_v57 = vpop.permute.xlu2 %3988 }
 0x52a   :  { %v3963_v23 = vpop.permute.xlu0 %3962  ;;  %4289 = vst.msk [vmem:[#allocation3 + $0x148] sm:$0xfe] %vm9277_vm4, %v4284_v42  ;;  %vm9291_vm4 = vmmov %vm9284_vm12  ;;  %5318 = vmatpush.msra.mxu2 %v5216_v13  ;;  %v4663_v42 = vadd.f32 %v8179_v21, %v8141_v0  ;;  %v4969_v13 = vld [vmem:[#allocation4 + $0x1e] ss:$2 sm:$0x7] }
 0x52b   :  { %4304 = vst.msk [vmem:[#allocation3 + $0x148] sm:$0xfe] %vm9278_vm11, %v4299_v61  ;;  %vm9292_vm11 = vmmov %vm9285_vm2 }
 0x52c   :  { %3967 = vst.msk [vmem:[#allocation3 + $0x148] sm:$0x1] %vm9279_vm9, %v3963_v23  ;;  %vm9293_vm9 = vcmask 255104   ;;  %5319 = vmatpush.msra.mxu2 %v5215_v34 }
 0x52e   :  { %5320 = vmatpush.msra.mxu2 %v5214_v5  ;;  %v5236_v5 = vld [vmem:[%s8896_s5 + $0xf0] sm:$0xff] }
 0x531   :  { %v4037_v15 = vpop.permute.xlu1 %4036  ;;  %v4429_v25 = vpop.permute.xlu2 %4428 }
 0x532   :  { %v4395_v53 = vpop.permute.xlu0 %4394  ;;  %4041 = vst.msk [vmem:[#allocation3 + $0x150] sm:$0x1] %vm9280_vm3, %v4037_v15  ;;  %vm9294_vm3 = vcmask 386304  }
 0x533   :  { %4055 = vst.msk [vmem:[#allocation3 + $0x150] sm:$0x1] %vm9281_vm6, %v4051_v24  ;;  %vm9295_vm6 = vmmov %vm9289_vm1  ;;  %v5213_v24 = vld [vmem:[%s8896_s5 + $0x38] sm:$0xff] }
 0x534   :  { %4400 = vst.msk [vmem:[#allocation3 + $0x150] sm:$0xfe] %vm9282_vm15, %v4395_v53  ;;  %vm9296_vm15 = vcmask 517504   ;;  %5321 = vmatpush.msra.mxu2 %v5213_v24 }
 0x536   :  { %5322 = vmatpush.msra.mxu2 %v5212_v46  ;;  %v5234_v46 = vld [vmem:[%s8896_s5 + $0xe0] sm:$0xff] }
 0x538   :  { %v4712_v36 = vpop.f32.mrf.mxu2  ;;  %5323 = vmatpush.msra.mxu2 %v5211_v22 }
 0x539   :  { %v3975_v38 = vpop.permute.xlu1 %3974  ;;  %v4093_v16 = vpop.permute.xlu2 %4092  ;;  %v4713_v28 = vadd.f32 %v4712_v36, %v4660_v60 }
 0x53a   :  { %v4314_v49 = vpop.permute.xlu0 %4313  ;;  %3979 = vst.msk [vmem:[#allocation3 + $0x148] sm:$0x1] %vm9283_vm5, %v3975_v38  ;;  %vm9297_vm5 = vcmask 648704  }
 0x53b   :  { %3993 = vst.msk [vmem:[#allocation3 + $0x148] sm:$0x1] %vm9284_vm12, %v3989_v57  ;;  %vm9298_vm12 = vmmov %vm9293_vm9  ;;  %v4821_v57 = vpop.f32.mrf.mxu1 }
 0x53c   :  { %4319 = vst.msk [vmem:[#allocation3 + $0x148] sm:$0xfe] %vm9285_vm2, %v4314_v49  ;;  %vm9299_vm2 = vmmov %vm9294_vm3 }
 0x541   :  { %v4412_v18 = vpop.permute.xlu1 %4411  ;;  %v4256_v11 = vpop.permute.xlu2 %4255 }
 0x542   :  { %v4065_v7 = vpop.permute.xlu0 %4064  ;;  %4417 = vst.msk [vmem:[#allocation3 + $0x150] sm:$0xfe] %vm9286_vm10, %v4412_v18  ;;  %vm9300_vm10 = vmmov %vm9296_vm15 }
 0x543   :  { %4434 = vst.msk [vmem:[#allocation3 + $0x150] sm:$0xfe] %vm9287_vm8, %v4429_v25  ;;  %vm9301_vm8 = vcmask 779904   ;;  %v5210_v25 = vld [vmem:[%s8896_s5 + $0x20] sm:$0xff] }
 0x544   :  { %4069 = vst.msk [vmem:[#allocation3 + $0x150] sm:$0x1] %vm9288_vm7, %v4065_v7  ;;  %vm9302_vm7 = vcmask 911104   ;;  %5324 = vmatpush.msra.mxu2 %v5210_v25  ;;  %v5228_v25 = vld [vmem:[%s8896_s5 + $0xb0] sm:$0xff] }
 0x549   :  { %v4331_v10 = vpop.permute.xlu1 %4330  ;;  %v4286_v59 = vpop.permute.xlu2 %4285 }
 0x54a   :  { %v4079_v9 = vpop.permute.xlu0 %4078  ;;  %4336 = vst.msk [vmem:[#allocation3 + $0x148] sm:$0xfe] %vm9289_vm1, %v4331_v10  ;;  %vm9303_vm1 = vcmask 1042304   ;;  %v4928_v10 = vld [vmem:[#allocation4 + $0x13] ss:$2 sm:$0x7] }
 0x54b   :  { %4083 = vst.msk [vmem:[#allocation3 + $0x150] sm:$0x1] %vm9290_vm14, %v4079_v9  ;;  %vm9304_vm14 = vmmov %vm9297_vm5  ;;  %v5208_v9 = vld [vmem:[%s8896_s5 + $0x10] sm:$0xff] }
 0x54c   :  { %4097 = vst.msk [vmem:[#allocation3 + $0x150] sm:$0x1] %vm9291_vm4, %v4093_v16  ;;  %vm9305_vm4 = vmmov %vm9301_vm8  ;;  %v5209_v16 = vld [vmem:[%s8896_s5 + $0x18] sm:$0xff] }
 0x54d   :  { %v4765_v56 = vpop.f32.mrf.mxu3  ;;  %5325 = vmatpush.msra.mxu2 %v5209_v16  ;;  %v5225_v16 = vld [vmem:[%s8896_s5 + $0x98] sm:$0xff] }
 0x54e   :  { %v4766_v41 = vadd.f32 %v4765_v56, %v4713_v28 }
 0x54f   :  { %5326 = vmatpush.msra.mxu2 %v5208_v9 }
 0x550   :  { %v4819_v8 = vadd.f32 %v4818_v2, %v4766_v41 }
 0x551   :  { %v4446_v51 = vpop.permute.xlu1 %4445  ;;  %v4524_v29 = vld [vmem:[#allocation3 + $0x148] sm:$0xff]  ;;  %v4397_v62 = vpop.permute.xlu2 %4396 }
 0x552   :  { %v4241_v45 = vpop.permute.xlu0 %4240  ;;  %v4840_v50 = vmax.f32 %v4819_v8, 0.0  ;;  %4451 = vst.msk [vmem:[#allocation3 + $0x150] sm:$0xfe] %vm9292_vm11, %v4446_v51  ;;  %4720 = vmatmul.f32.gmra.mxu2 %v4524_v29  ;;  %vm4868_vm11 = vcmask 518400  }
 0x553   :  { %4245 = vst.msk [vmem:[#allocation3 + $0x168] sm:$0x3] %vm9293_vm9, %v4241_v45  ;;  %vm9306_vm9 = vmmov %vm9302_vm7  ;;  %v5207_v45 = vld [vmem:[%s8896_s5 + $0x8] sm:$0xff] }
 0x554   :  { %4853 = vst.msk [vmem:[#allocation4 + $0x38] sm:$0xff] %vm4845_vm0, %v4840_v50  ;;  %5327 = vmatpush.msra.mxu2 %v5207_v45  ;;  %v5206_v50 = vld [vmem:[%s8896_s5] sm:$0xff]  ;;  %v5247_v45 = vld [vmem:[%s8896_s5 + $0x148] sm:$0xff] }
 0x555   :  { %4260 = vst.msk [vmem:[#allocation3 + $0x168] sm:$0x3] %vm9294_vm3, %v4256_v11  ;;  %vm9307_vm3 = vmmov %vm9303_vm1 }
 0x556   :  { %5328 = vmatpush.msra.mxu2 %v5206_v50  ;;  %v5246_v50 = vld [vmem:[%s8896_s5 + $0x140] sm:$0xff] }
 0x559   :  { %v4463_v33 = vpop.permute.xlu1 %4462  ;;  %v4333_v19 = vpop.permute.xlu2 %4332 }
 0x55a   :  { %v4271_v6 = vpop.permute.xlu0 %4270  ;;  %4468 = vst.msk [vmem:[#allocation3 + $0x150] sm:$0xfe] %vm9295_vm6, %v4463_v33  ;;  %vm4876_vm6 = vcmask 780800   ;;  %v4952_v33 = vld [vmem:[#allocation4 + $0x1b] ss:$2 sm:$0x7] }
 0x55b   :  { %4275 = vst.msk [vmem:[#allocation3 + $0x168] sm:$0x3] %vm9296_vm15, %v4271_v6  ;;  %v5050_v12 = vld [vmem:[#allocation4 + $0x36] ss:$2 sm:$0x7]  ;;  %vm5023_vm15 = vcmask 521475  }
 0x55c   :  { %4290 = vst.msk [vmem:[#allocation3 + $0x168] sm:$0x3] %vm9297_vm5, %v4286_v59  ;;  %v5052_v58 = vrot.slane %v5050_v12, 5  ;;  %v5066_v14 = vld [vmem:[#allocation4 + $0x38] ss:$2 sm:$0x7] }
 0x55d   :  { %v5068_v17 = vrot.slane %v5066_v14, 5  ;;  %v5058_v43 = vld [vmem:[#allocation4 + $0x37] ss:$2 sm:$0x7]  ;;  %vm5032_vm5 = vcmask 783875  }
 0x55e   :  { %5053 = vrot.lane.b32.xlu1 %v5052_v58, %s5727_s21  ;;  %v5060_v27 = vrot.slane %v5058_v43, 5  ;;  %v5080_v39 = vld [vmem:[#allocation4 + $0x3a] ss:$2 sm:$0x7] }
 0x55f   :  { %5069 = vrot.lane.b32.xlu2 %v5068_v17, %s5730_s30  ;;  %v5082_v23 = vrot.slane %v5080_v39, 5  ;;  %v5074_v38 = vld [vmem:[#allocation4 + $0x39] ss:$2 sm:$0x7] }
 0x560   :  { %5061 = vrot.lane.b32.xlu0 %v5060_v27, %s5728_s24  ;;  %v5076_v36 = vrot.slane %v5074_v38, 5  ;;  %v4945_v12 = vld [vmem:[#allocation4 + $0x16] ss:$2 sm:$0x7]  ;;  %v5227_v38 = vld [vmem:[%s8896_s5 + $0xa8] sm:$0xff] }
 0x561   :  { %v4363_v37 = vpop.permute.xlu1 %4362  ;;  %v4525_v54 = vld [vmem:[#allocation3 + $0x150] sm:$0xff]  ;;  %v4465_v18 = vpop.permute.xlu2 %4464 }
 0x562   :  { %v4380_v26 = vpop.permute.xlu0 %4379  ;;  %4367 = vst.msk [vmem:[#allocation3 + $0x170] sm:$0x3] %vm9298_vm12, %v4363_v37  ;;  %4773 = vmatmul.f32.gmra.mxu3 %v4525_v54  ;;  %v4938_v14 = vld [vmem:[#allocation4 + $0x15] ss:$2 sm:$0x7]  ;;  %vm5041_vm12 = vcmask 1046275  }
 0x563   :  { %4384 = vst.msk [vmem:[#allocation3 + $0x170] sm:$0x3] %vm9299_vm2, %v4380_v26  ;;  %vm4884_vm2 = vcmask 1043200   ;;  %v8536_v26 = vld [vmem:[%s8895_s4] ss:$0 sm:$0xff] }
 0x564   :  { %4401 = vst.msk [vmem:[#allocation3 + $0x170] sm:$0x3] %vm9300_vm10, %v4397_v62  ;;  %v4666_v54 = vadd.f32 %v8536_v26, %v8149_v40  ;;  %v5237_v40 = vld [vmem:[%s8896_s5 + $0xf8] sm:$0xff]  ;;  %vm4857_vm10 = vcmask 254976  }
 0x565   :  { %5078 = vst.msk [vmem:[#allocation5 + $0x10] sm:$0x38] %vm5014_vm13, %v5076_v36  ;;  %5333 = vmatpush.msra.mxu3 %v5237_v40  ;;  %v5224_v36 = vld [vmem:[%s8896_s5 + $0x90] sm:$0xff] }
 0x566   :  { %4906 = vrot.lane.b32.xlu1 %v4904_v55, %s5730_s30  ;;  %v4715_v30 = vpop.f32.mrf.mxu2 }
 0x567   :  { %4923 = vrot.lane.b32.xlu2 %v4921_v3, %s5728_s24  ;;  %v4716_v35 = vadd.f32 %v4715_v30, %v4663_v42  ;;  %5334 = vmatpush.msra.mxu3 %v5236_v5 }
 0x568   :  { %4916 = vrot.lane.b32.xlu0 %v4914_v1, %s5727_s21 }
 0x569   :  { %v4301_v61 = vpop.permute.xlu1 %4300  ;;  %v4874_v41 = vpop.permute.xlu2 %4873 }
 0x56a   :  { %v4316_v47 = vpop.permute.xlu0 %4315  ;;  %4305 = vst.msk [vmem:[#allocation3 + $0x168] sm:$0x3] %vm9301_vm8, %v4301_v61  ;;  %v4824_v61 = vpop.f32.mrf.mxu1  ;;  %vm5549_vm8 = vcmask 9216  }
 0x56b   :  { %4320 = vst.msk [vmem:[#allocation3 + $0x168] sm:$0x3] %vm9302_vm7, %v4316_v47 }
 0x56c   :  { %4337 = vst.msk [vmem:[#allocation3 + $0x168] sm:$0x3] %vm9303_vm1, %v4333_v19  ;;  %v5235_v19 = vld [vmem:[%s8896_s5 + $0xe8] sm:$0xff] }
 0x56d   :  { %5335 = vmatpush.msra.mxu3 %v5235_v19 }
 0x56e   :  { %5083 = vrot.lane.b32.xlu1 %v5082_v23, %s5727_s21 }
 0x56f   :  { %v4768_v63 = vpop.f32.mrf.mxu3  ;;  %5336 = vmatpush.msra.mxu3 %v5234_v46 }
 0x570   :  { %v4769_v15 = vadd.f32 %v4768_v63, %v4716_v35  ;;  %v5233_v35 = vld [vmem:[%s8896_s5 + $0xd8] sm:$0xff]  ;;  %v5232_v63 = vld [vmem:[%s8896_s5 + $0xd0] sm:$0xff] }
 0x571   :  { %v4414_v0 = vpop.permute.xlu1 %4413  ;;  %5337 = vmatpush.msra.mxu3 %v5233_v35 }
 0x572   :  { %v4431_v21 = vpop.permute.xlu0 %4430  ;;  %v4822_v53 = vadd.f32 %v4821_v57, %v4769_v15  ;;  %4418 = vst.msk [vmem:[#allocation3 + $0x170] sm:$0x3] %vm9304_vm14, %v4414_v0  ;;  %v5039_v58 = vpop.permute.xlu2 %5038  ;;  %v5231_v57 = vld [vmem:[%s8896_s5 + $0xc8] sm:$0xff]  ;;  %v5230_v0 = vld [vmem:[%s8896_s5 + $0xc0] sm:$0xff] }
 0x573   :  { %4435 = vst.msk [vmem:[#allocation3 + $0x170] sm:$0x3] %vm9305_vm4, %v4431_v21  ;;  %v4528_v49 = vld [vmem:[#allocation3 + $0x168] sm:$0x3]  ;;  %5338 = vmatpush.msra.mxu3 %v5232_v63 }
 0x574   :  { %v4841_v7 = vmax.f32 %v4822_v53, 0.0  ;;  %4723 = vmatmul.f32.gmra.mxu2 %v4528_v49  ;;  %v4976_v21 = vld [vmem:[#allocation4 + $0x1f] ss:$2 sm:$0x7]  ;;  %v5229_v53 = vld [vmem:[%s8896_s5 + $0xb8] sm:$0xff] }
 0x575   :  { %5339 = vmatpush.msra.mxu3 %v5231_v57  ;;  %v4986_v49 = vld [vmem:[#allocation4 + $0x25] ss:$2 sm:$0x7] }
 0x576   :  { %4854 = vst.msk [vmem:[#allocation4 + $0x40] sm:$0xff] %vm4845_vm0, %v4841_v7  ;;  %4930 = vrot.lane.b32.xlu1 %v4928_v10, %s5730_s30  ;;  %v5253_v10 = vld [vmem:[%s8896_s5 + $0x178] sm:$0xff]  ;;  %v5267_v57 = vld [vmem:[%s8896_s5 + $0x1e8] sm:$0xff] }
 0x577   :  { %5340 = vmatpush.msra.mxu3 %v5230_v0  ;;  %5353 = vmatpush.msrb.mxu2 %v5253_v10  ;;  %v5265_v0 = vld [vmem:[%s8896_s5 + $0x1d8] sm:$0xff] }
 0x578   :  { %v5261_v10 = vld [vmem:[%s8896_s5 + $0x1b8] sm:$0xff] }
 0x579   :  { %v4448_v60 = vpop.permute.xlu1 %4447  ;;  %5341 = vmatpush.msra.mxu3 %v5229_v53  ;;  %v5000_v53 = vld [vmem:[#allocation4 + $0x27] ss:$2 sm:$0x7] }
 0x57a   :  { %v4866_v28 = vpop.permute.xlu0 %4865  ;;  %4452 = vst.msk [vmem:[#allocation3 + $0x170] sm:$0x3] %vm9306_vm9, %v4448_v60  ;;  %v4900_v62 = vpop.permute.xlu2 %4899  ;;  %v5252_v60 = vld [vmem:[%s8896_s5 + $0x170] sm:$0xff] }
 0x57b   :  { %4469 = vst.msk [vmem:[#allocation3 + $0x170] sm:$0x3] %vm9307_vm3, %v4465_v18  ;;  %5342 = vmatpush.msra.mxu3 %v5228_v25  ;;  %v5226_v18 = vld [vmem:[%s8896_s5 + $0xa0] sm:$0xff]  ;;  %5354 = vmatpush.msrb.mxu2 %v5252_v60  ;;  %v5264_v25 = vld [vmem:[%s8896_s5 + $0x1d0] sm:$0xff] }
 0x57c   :  { %4869 = vst.msk [vmem:[#allocation5] sm:$0x7] %vm4868_vm11, %v4866_v28  ;;  %v5223_v28 = vld [vmem:[%s8896_s5 + $0x88] sm:$0xff] }
 0x57d   :  { %v5110_v11 = vld [vmem:[#allocation4 + $0x42] ss:$2 sm:$0x7]  ;;  %v5088_v51 = vld [vmem:[#allocation4 + $0x3f] ss:$2 sm:$0x7]  ;;  %5343 = vmatpush.msra.mxu3 %v5227_v38 }
 0x57e   :  { %v5096_v56 = vld [vmem:[#allocation4 + $0x40] ss:$2 sm:$0x7]  ;;  %v5112_v2 = vrot.slane %v5110_v11, 5  ;;  %v5090_v29 = vrot.slane %v5088_v51, 5  ;;  %v5222_v11 = vld [vmem:[%s8896_s5 + $0x80] sm:$0xff] }
 0x57f   :  { %v5098_v8 = vrot.slane %v5096_v56, 5  ;;  %4877 = vst.msk [vmem:[#allocation5] sm:$0x7] %vm4876_vm6, %v4874_v41  ;;  %v5118_v43 = vld [vmem:[#allocation4 + $0x43] ss:$2 sm:$0x7]  ;;  %5344 = vmatpush.msra.mxu3 %v5226_v18 }
 0x580   :  { %5113 = vrot.lane.b32.xlu1 %v5112_v2, %s5727_s21  ;;  %5091 = vrot.lane.b32.xlu0 %v5090_v29, %s5728_s24  ;;  %v5120_v27 = vrot.slane %v5118_v43, 5  ;;  %v5104_v32 = vld [vmem:[#allocation4 + $0x41] ss:$2 sm:$0x7]  ;;  %v5250_v41 = vld [vmem:[%s8896_s5 + $0x160] sm:$0xff]  ;;  %v5248_v51 = vld [vmem:[%s8896_s5 + $0x150] sm:$0xff] }
 0x581   :  { %5099 = vrot.lane.b32.xlu2 %v5098_v8, %s5730_s30  ;;  %v5106_v52 = vrot.slane %v5104_v32, 5  ;;  %5345 = vmatpush.msra.mxu3 %v5225_v16  ;;  %v5251_v56 = vld [vmem:[%s8896_s5 + $0x168] sm:$0xff]  ;;  %v5249_v8 = vld [vmem:[%s8896_s5 + $0x158] sm:$0xff]  ;;  %v5262_v16 = vld [vmem:[%s8896_s5 + $0x1c0] sm:$0xff] }
 0x582   :  { %v4529_v59 = vld [vmem:[#allocation3 + $0x170] sm:$0x3]  ;;  %5355 = vmatpush.msrb.mxu2 %v5251_v56  ;;  %v4993_v18 = vld [vmem:[#allocation4 + $0x26] ss:$2 sm:$0x7] }
 0x583   :  { %4776 = vmatmul.f32.gmra.mxu3 %v4529_v59  ;;  %5108 = vst.msk [vmem:[#allocation5 + $0x18] sm:$0x38] %vm5014_vm13, %v5106_v52  ;;  %v4669_v52 = vadd.f32 %v8536_v26, %v8165_v44 }
 0x584   :  { %5346 = vmatpush.msra.mxu3 %v5224_v36  ;;  %5356 = vmatpush.msrb.mxu2 %v5250_v41  ;;  %v5259_v41 = vld [vmem:[%s8896_s5 + $0x1a8] sm:$0xff] }
 0x586   :  { %5347 = vmatpush.msra.mxu3 %v5223_v28  ;;  %5357 = vmatpush.msrb.mxu2 %v5249_v8  ;;  %v5260_v28 = vld [vmem:[%s8896_s5 + $0x1b0] sm:$0xff] }
 0x588   :  { %v5021_v6 = vpop.permute.xlu1 %5020  ;;  %4954 = vrot.lane.b32.xlu1 %v4952_v33, %s5730_s30  ;;  %4940 = vrot.lane.b32.xlu0 %v4938_v14, %s5727_s21  ;;  %v4718_v37 = vpop.f32.mrf.mxu2 }
 0x589   :  { %5024 = vst.msk [vmem:[#allocation5] sm:$0x38] %vm5023_vm15, %v5021_v6  ;;  %4947 = vrot.lane.b32.xlu2 %v4945_v12, %s5728_s24  ;;  %v5030_v17 = vpop.permute.xlu0 %5029  ;;  %v4719_v55 = vadd.f32 %v4718_v37, %v4666_v54  ;;  %5348 = vmatpush.msra.mxu3 %v5222_v11  ;;  %v5245_v6 = vld [vmem:[%s8896_s5 + $0x138] sm:$0xff]  ;;  %v5244_v12 = vld [vmem:[%s8896_s5 + $0x130] sm:$0xff]  ;;  %v5238_v54 = vld [vmem:[%s8896_s5 + $0x100] sm:$0xff] }
 0x58a   :  { %5033 = vst.msk [vmem:[#allocation5] sm:$0x38] %vm5032_vm5, %v5030_v17  ;;  %5358 = vmatpush.msrb.mxu2 %v5248_v51  ;;  %v5242_v17 = vld [vmem:[%s8896_s5 + $0x120] sm:$0xff]  ;;  %v5257_v51 = vld [vmem:[%s8896_s5 + $0x198] sm:$0xff] }
 0x58b   :  { %5042 = vst.msk [vmem:[#allocation5] sm:$0x38] %vm5041_vm12, %v5039_v58  ;;  %v5243_v58 = vld [vmem:[%s8896_s5 + $0x128] sm:$0xff] }
 0x58c   :  { %5359 = vmatpush.msrb.mxu2 %v5247_v45 }
 0x58e   :  { %5360 = vmatpush.msrb.mxu2 %v5246_v50  ;;  %v5285_v50 = vld [vmem:[%s8896_s5 + $0x278] sm:$0xff] }
 0x590   :  { %v4882_v31 = vpop.permute.xlu1 %4881  ;;  %5121 = vrot.lane.b32.xlu0 %v5120_v27, %s5728_s24  ;;  %5361 = vmatpush.msrb.mxu2 %v5245_v6  ;;  %v5240_v27 = vld [vmem:[%s8896_s5 + $0x110] sm:$0xff] }
 0x591   :  { %4885 = vst.msk [vmem:[#allocation5] sm:$0x7] %vm4884_vm2, %v4882_v31  ;;  %4964 = vrot.lane.b32.xlu2 %v4962_v4, %s5727_s21  ;;  %v4893_v48 = vpop.permute.xlu0 %4892  ;;  %v5241_v4 = vld [vmem:[%s8896_s5 + $0x118] sm:$0xff]  ;;  %v5256_v6 = vld [vmem:[%s8896_s5 + $0x190] sm:$0xff] }
 0x592   :  { %4895 = vst.msk [vmem:[#allocation5 + $0x8] sm:$0x7] %vm4868_vm11, %v4893_v48  ;;  %5362 = vmatpush.msrb.mxu2 %v5244_v12  ;;  %v5239_v48 = vld [vmem:[%s8896_s5 + $0x108] sm:$0xff] }
 0x593   :  { %4902 = vst.msk [vmem:[#allocation5 + $0x8] sm:$0x7] %vm4876_vm6, %v4900_v62  ;;  %v5283_v12 = vld [vmem:[%s8896_s5 + $0x268] sm:$0xff] }
 0x594   :  { %5363 = vmatpush.msrb.mxu2 %v5243_v58  ;;  %v5255_v58 = vld [vmem:[%s8896_s5 + $0x188] sm:$0xff] }
 0x596   :  { %v4771_v3 = vpop.f32.mrf.mxu3  ;;  %5364 = vmatpush.msrb.mxu2 %v5242_v17  ;;  %v5254_v17 = vld [vmem:[%s8896_s5 + $0x180] sm:$0xff] }
 0x597   :  { %v4772_v34 = vadd.f32 %v4771_v3, %v4719_v55  ;;  %v5269_v3 = vld [vmem:[%s8896_s5 + $0x1f8] sm:$0xff] }
 0x598   :  { %v5199_v1 = vld [vmem:[#allocation5] sm:$0x3f]  ;;  %5365 = vmatpush.msrb.mxu2 %v5241_v4  ;;  %5373 = vmatpush.msrb.mxu3 %v5269_v3 }
 0x599   :  { %4971 = vrot.lane.b32.xlu2 %v4969_v13, %s5728_s24  ;;  %5329 = vmatmul.f32.vlgmr.msra.gmra.mxu2 %v5199_v1  ;;  %v4825_v47 = vadd.f32 %v4824_v61, %v4772_v34  ;;  %v5268_v1 = vld [vmem:[%s8896_s5 + $0x1f0] sm:$0xff]  ;;  %v5275_v3 = vld [vmem:[%s8896_s5 + $0x228] sm:$0xff] }
 0x59a   :  { %5366 = vmatpush.msrb.mxu2 %v5240_v27  ;;  %5374 = vmatpush.msrb.mxu3 %v5268_v1 }
 0x59b   :  { %v4842_v39 = vmax.f32 %v4825_v47, 0.0  ;;  %v4827_v47 = vpop.f32.mrf.mxu1 }
 0x59c   :  { %5367 = vmatpush.msrb.mxu2 %v5239_v48  ;;  %5375 = vmatpush.msrb.mxu3 %v5267_v57  ;;  %v5297_v57 = vld [vmem:[%s8896_s5 + $0x2d8] sm:$0xff] }
 0x59d   :  { %4855 = vst.msk [vmem:[#allocation4 + $0x48] sm:$0xff] %vm4845_vm0, %v4842_v39 }
 0x59e   :  { %5368 = vmatpush.msrb.mxu2 %v5238_v54  ;;  %v5278_v54 = vld [vmem:[%s8896_s5 + $0x240] sm:$0xff] }
 0x5a0   :  { %5393 = vmatpush.msra.mxu2 %v5285_v50  ;;  %v5462_v50 = vld [vmem:[%s8898_s7 + $0x8] sm:$0xff] }
 0x5a3   :  { %v4830_v8 = vpop.f32.mrf.mxu1 }
 0x5a4   :  { %v5140_v30 = vld [vmem:[#allocation4 + $0x4a] ss:$2 sm:$0x7]  ;;  %v5148_v22 = vld [vmem:[#allocation4 + $0x4b] ss:$2 sm:$0x7] }
 0x5a5   :  { %v5126_v24 = vld [vmem:[#allocation4 + $0x48] ss:$2 sm:$0x7]  ;;  %v5142_v42 = vrot.slane %v5140_v30, 5  ;;  %v5150_v15 = vrot.slane %v5148_v22, 5 }
 0x5a6   :  { %v5128_v23 = vrot.slane %v5126_v24, 5  ;;  %v5134_v7 = vld [vmem:[#allocation4 + $0x49] ss:$2 sm:$0x7] }
 0x5a7   :  { %5143 = vrot.lane.b32.xlu1 %v5142_v42, %s5727_s21  ;;  %v5136_v9 = vrot.slane %v5134_v7, 5  ;;  %v5263_v7 = vld [vmem:[%s8896_s5 + $0x1c8] sm:$0xff] }
 0x5a8   :  { %5129 = vrot.lane.b32.xlu0 %v5128_v23, %s5730_s30 }
 0x5a9   :  { %5138 = vst.msk [vmem:[#allocation5 + $0x20] sm:$0x38] %vm5014_vm13, %v5136_v9  ;;  %v4672_v9 = vadd.f32 %v8536_v26, %v8186_v20  ;;  %v5258_v20 = vld [vmem:[%s8896_s5 + $0x1a0] sm:$0xff] }
 0x5af   :  { %4978 = vrot.lane.b32.xlu1 %v4976_v21, %s5730_s30 }
 0x5b0   :  { %5151 = vrot.lane.b32.xlu0 %v5150_v15, %s5728_s24  ;;  %v5266_v15 = vld [vmem:[%s8896_s5 + $0x1e0] sm:$0xff] }
 0x5b1   :  { %5376 = vmatpush.msrb.mxu3 %v5266_v15  ;;  %v5296_v15 = vld [vmem:[%s8896_s5 + $0x2d0] sm:$0xff] }
 0x5b3   :  { %5377 = vmatpush.msrb.mxu3 %v5265_v0  ;;  %v5295_v0 = vld [vmem:[%s8896_s5 + $0x2c8] sm:$0xff] }
 0x5b5   :  { %5378 = vmatpush.msrb.mxu3 %v5264_v25  ;;  %v5292_v25 = vld [vmem:[%s8896_s5 + $0x2b0] sm:$0xff] }
 0x5b7   :  { %5379 = vmatpush.msrb.mxu3 %v5263_v7  ;;  %v5289_v7 = vld [vmem:[%s8896_s5 + $0x298] sm:$0xff] }
 0x5b8   :  { %4988 = vrot.lane.b32.xlu0 %v4986_v49, %s5727_s21 }
 0x5b9   :  { %v5070_v2 = vpop.permute.xlu2 %5069  ;;  %5380 = vmatpush.msrb.mxu3 %v5262_v16  ;;  %v5288_v16 = vld [vmem:[%s8896_s5 + $0x290] sm:$0xff] }
 0x5bb   :  { %5381 = vmatpush.msrb.mxu3 %v5261_v10 }
 0x5bd   :  { %5382 = vmatpush.msrb.mxu3 %v5260_v28 }
 0x5bf   :  { %5383 = vmatpush.msrb.mxu3 %v5259_v41 }
 0x5c1   :  { %v4924_v59 = vpop.permute.xlu2 %4923  ;;  %5384 = vmatpush.msrb.mxu3 %v5258_v20  ;;  %v5464_v20 = vld [vmem:[%s8898_s7 + $0x18] sm:$0xff] }
 0x5c3   :  { %5385 = vmatpush.msrb.mxu3 %v5257_v51  ;;  %v5463_v51 = vld [vmem:[%s8898_s7 + $0x10] sm:$0xff] }
 0x5c5   :  { %5386 = vmatpush.msrb.mxu3 %v5256_v6  ;;  %v5491_v6 = vld [vmem:[%s8898_s7 + $0x20] sm:$0xff] }
 0x5c7   :  { %5387 = vmatpush.msrb.mxu3 %v5255_v58  ;;  %v5523_v58 = vld [vmem:[%s8898_s7 + $0x50] sm:$0xff] }
 0x5c9   :  { %5388 = vmatpush.msrb.mxu3 %v5254_v17 }
 0x5d0   :  { %v5054_v29 = vpop.permute.xlu1 %5053 }
 0x5d1   :  { %5056 = vst.msk [vmem:[#allocation5 + $0x8] sm:$0x38] %vm5023_vm15, %v5054_v29 }
 0x5d2   :  { %v5062_v33 = vpop.permute.xlu0 %5061 }
 0x5d3   :  { %5064 = vst.msk [vmem:[#allocation5 + $0x8] sm:$0x38] %vm5032_vm5, %v5062_v33 }
 0x5d4   :  { %5072 = vst.msk [vmem:[#allocation5 + $0x8] sm:$0x38] %vm5041_vm12, %v5070_v2 }
 0x5d5   :  { %v4721_v32 = vpop.f32.mrf.mxu2 }
 0x5d6   :  { %v4722_v13 = vadd.f32 %v4721_v32, %v4669_v52  ;;  %v5277_v32 = vld [vmem:[%s8896_s5 + $0x238] sm:$0xff] }
 0x5d8   :  { %v4907_v14 = vpop.permute.xlu1 %4906 }
 0x5d9   :  { %4909 = vst.msk [vmem:[#allocation5 + $0x8] sm:$0x7] %vm4884_vm2, %v4907_v14  ;;  %v5282_v14 = vld [vmem:[%s8896_s5 + $0x260] sm:$0xff] }
 0x5da   :  { %v4917_v43 = vpop.permute.xlu0 %4916 }
 0x5db   :  { %v5100_v31 = vpop.permute.xlu2 %5099  ;;  %4919 = vst.msk [vmem:[#allocation5 + $0x10] sm:$0x7] %vm4868_vm11, %v4917_v43  ;;  %v5281_v43 = vld [vmem:[%s8896_s5 + $0x258] sm:$0xff] }
 0x5dc   :  { %4926 = vst.msk [vmem:[#allocation5 + $0x10] sm:$0x7] %vm4876_vm6, %v4924_v59  ;;  %v5284_v59 = vld [vmem:[%s8896_s5 + $0x270] sm:$0xff] }
 0x5dd   :  { %5394 = vmatpush.msra.mxu2 %v5284_v59  ;;  %v5492_v59 = vld [vmem:[%s8898_s7 + $0x28] sm:$0xff] }
 0x5df   :  { %5395 = vmatpush.msra.mxu2 %v5283_v12  ;;  %v5524_v12 = vld [vmem:[%s8898_s7 + $0x58] sm:$0xff] }
 0x5e0   :  { %v5084_v62 = vpop.permute.xlu1 %5083  ;;  %v5200_v37 = vld [vmem:[#allocation5 + $0x8] sm:$0x3f] }
 0x5e1   :  { %5086 = vst.msk [vmem:[#allocation5 + $0x10] sm:$0x38] %vm5023_vm15, %v5084_v62  ;;  %5349 = vmatmul.f32.vlgmr.msra.gmra.mxu3 %v5200_v37  ;;  %5396 = vmatpush.msra.mxu2 %v5282_v14  ;;  %v5279_v37 = vld [vmem:[%s8896_s5 + $0x248] sm:$0xff] }
 0x5e3   :  { %v4948_v55 = vpop.permute.xlu2 %4947  ;;  %5397 = vmatpush.msra.mxu2 %v5281_v43  ;;  %v5522_v43 = vld [vmem:[%s8898_s7 + $0x48] sm:$0xff] }
 0x5e5   :  { %v4774_v34 = vpop.f32.mrf.mxu3 }
 0x5e6   :  { %v4775_v61 = vadd.f32 %v4774_v34, %v4722_v13  ;;  %v5276_v13 = vld [vmem:[%s8896_s5 + $0x230] sm:$0xff] }
 0x5e8   :  { %v4828_v39 = vadd.f32 %v4827_v47, %v4775_v61  ;;  %v4931_v40 = vpop.permute.xlu1 %4930 }
 0x5e9   :  { %4933 = vst.msk [vmem:[#allocation5 + $0x10] sm:$0x7] %vm4884_vm2, %v4931_v40  ;;  %v5273_v40 = vld [vmem:[%s8896_s5 + $0x218] sm:$0xff] }
 0x5ea   :  { %v4843_v44 = vmax.f32 %v4828_v39, 0.0  ;;  %v5274_v39 = vld [vmem:[%s8896_s5 + $0x220] sm:$0xff] }
 0x5eb   :  { %v4965_v5 = vpop.permute.xlu2 %4964 }
 0x5ec   :  { %4967 = vst.msk [vmem:[#allocation5 + $0x20] sm:$0x7] %vm4868_vm11, %v4965_v5  ;;  %v5271_v5 = vld [vmem:[%s8896_s5 + $0x208] sm:$0xff] }
 0x5ed   :  { %4856 = vst.msk [vmem:[#allocation4 + $0x50] sm:$0xff] %vm4845_vm0, %v4843_v44  ;;  %v5272_v44 = vld [vmem:[%s8896_s5 + $0x210] sm:$0xff] }
 0x5f2   :  { %v5114_v19 = vpop.permute.xlu1 %5113  ;;  %v5092_v24 = vpop.permute.xlu0 %5091 }
 0x5f3   :  { %v4972_v30 = vpop.permute.xlu2 %4971  ;;  %5116 = vst.msk [vmem:[#allocation5 + $0x18] sm:$0x38] %vm5023_vm15, %v5114_v19  ;;  %v5270_v19 = vld [vmem:[%s8896_s5 + $0x200] sm:$0xff] }
 0x5f4   :  { %v5170_v42 = vld [vmem:[#allocation4 + $0x52] ss:$2 sm:$0x7]  ;;  %4974 = vst.msk [vmem:[#allocation5 + $0x20] sm:$0x7] %vm4876_vm6, %v4972_v30 }
 0x5f5   :  { %v5172_v23 = vrot.slane %v5170_v42, 5  ;;  %v5156_v46 = vld [vmem:[#allocation4 + $0x4c] ss:$2 sm:$0x7]  ;;  %5094 = vst.msk [vmem:[#allocation5 + $0x10] sm:$0x38] %vm5032_vm5, %v5092_v24 }
 0x5f6   :  { %v5158_v35 = vrot.slane %v5156_v46, 5  ;;  %v5178_v63 = vld [vmem:[#allocation4 + $0x53] ss:$2 sm:$0x7]  ;;  %5102 = vst.msk [vmem:[#allocation5 + $0x10] sm:$0x38] %vm5041_vm12, %v5100_v31 }
 0x5f7   :  { %5173 = vrot.lane.b32.xlu1 %v5172_v23, %s5727_s21  ;;  %v5180_v22 = vrot.slane %v5178_v63, 5  ;;  %v4724_v36 = vpop.f32.mrf.mxu2  ;;  %v5164_v45 = vld [vmem:[#allocation4 + $0x51] ss:$2 sm:$0x7]  ;;  %v5280_v31 = vld [vmem:[%s8896_s5 + $0x250] sm:$0xff]  ;;  %v5299_v46 = vld [vmem:[%s8896_s5 + $0x2e8] sm:$0xff] }
 0x5f8   :  { %5159 = vrot.lane.b32.xlu2 %v5158_v35, %s5730_s30  ;;  %v4725_v11 = vadd.f32 %v4724_v36, %v4672_v9  ;;  %v5166_v33 = vrot.slane %v5164_v45, 5  ;;  %5398 = vmatpush.msra.mxu2 %v5280_v31  ;;  %v5305_v30 = vld [vmem:[%s8896_s5 + $0x318] sm:$0xff]  ;;  %v5304_v42 = vld [vmem:[%s8896_s5 + $0x310] sm:$0xff]  ;;  %v5303_v35 = vld [vmem:[%s8896_s5 + $0x308] sm:$0xff] }
 0x5f9   :  { %5181 = vrot.lane.b32.xlu0 %v5180_v22, %s5728_s24  ;;  %v5301_v24 = vld [vmem:[%s8896_s5 + $0x2f8] sm:$0xff]  ;;  %v5300_v23 = vld [vmem:[%s8896_s5 + $0x2f0] sm:$0xff]  ;;  %v5298_v63 = vld [vmem:[%s8896_s5 + $0x2e0] sm:$0xff] }
 0x5fa   :  { %v4941_v21 = vpop.permute.xlu0 %4940  ;;  %v4955_v38 = vpop.permute.xlu1 %4954  ;;  %5168 = vst.msk [vmem:[#allocation5 + $0x28] sm:$0x38] %vm5014_vm13, %v5166_v33  ;;  %5399 = vmatpush.msra.mxu2 %v5279_v37  ;;  %5413 = vmatpush.msra.mxu3 %v5301_v24  ;;  %v5302_v22 = vld [vmem:[%s8896_s5 + $0x300] sm:$0xff]  ;;  %v5287_v36 = vld [vmem:[%s8896_s5 + $0x288] sm:$0xff] }
 0x5fb   :  { %4943 = vst.msk [vmem:[#allocation5 + $0x18] sm:$0x7] %vm4868_vm11, %v4941_v21  ;;  %v5294_v21 = vld [vmem:[%s8896_s5 + $0x2c0] sm:$0xff] }
 0x5fc   :  { %4950 = vst.msk [vmem:[#allocation5 + $0x18] sm:$0x7] %vm4876_vm6, %v4948_v55  ;;  %5400 = vmatpush.msra.mxu2 %v5278_v54  ;;  %5414 = vmatpush.msra.mxu3 %v5300_v23  ;;  %v5461_v33 = vld [vmem:[%s8898_s7] sm:$0xff] }
 0x5fd   :  { %v5201_v49 = vld [vmem:[#allocation5 + $0x10] sm:$0x3f]  ;;  %4957 = vst.msk [vmem:[#allocation5 + $0x18] sm:$0x7] %vm4884_vm2, %v4955_v38  ;;  %v5291_v38 = vld [vmem:[%s8896_s5 + $0x2a8] sm:$0xff] }
 0x5fe   :  { %5369 = vmatmul.f32.vlgmr.msrb.gmra.mxu2 %v5201_v49  ;;  %5415 = vmatpush.msra.mxu3 %v5299_v46  ;;  %v5693_v31 = vld [vmem:[%s8897_s6] ss:$0 sm:$0xff] }
 0x5ff   :  { %5002 = vrot.lane.b32.xlu1 %v5000_v53, %s5730_s30  ;;  %5401 = vmatpush.msra.mxu2 %v5277_v32  ;;  %v5293_v53 = vld [vmem:[%s8896_s5 + $0x2b8] sm:$0xff] }
 0x600   :  { %4995 = vrot.lane.b32.xlu2 %v4993_v18, %s5728_s24  ;;  %5416 = vmatpush.msra.mxu3 %v5298_v63  ;;  %v5290_v18 = vld [vmem:[%s8896_s5 + $0x2a0] sm:$0xff] }
 0x601   :  { %5402 = vmatpush.msra.mxu2 %v5276_v13 }
 0x602   :  { %v5122_v60 = vpop.permute.xlu0 %5121  ;;  %5417 = vmatpush.msra.mxu3 %v5297_v57 }
 0x603   :  { %5124 = vst.msk [vmem:[#allocation5 + $0x18] sm:$0x38] %vm5032_vm5, %v5122_v60  ;;  %5403 = vmatpush.msra.mxu2 %v5275_v3  ;;  %v5286_v60 = vld [vmem:[%s8896_s5 + $0x280] sm:$0xff]  ;;  %s5556_s5 = sshll.u32 %s5732_s29, 4  ;;  %s5557_s5 = int_to_ptr.vmem [resolvable:$true] %s5556_s5 }
 0x604   :  { %5418 = vmatpush.msra.mxu3 %v5296_v15 }
 0x605   :  { %5404 = vmatpush.msra.mxu2 %v5274_v39 }
 0x606   :  { %v4777_v56 = vpop.f32.mrf.mxu3  ;;  %5419 = vmatpush.msra.mxu3 %v5295_v0 }
 0x607   :  { %v4778_v2 = vadd.f32 %v4777_v56, %v4725_v11  ;;  %5405 = vmatpush.msra.mxu2 %v5273_v40  ;;  %v5694_v40 = vld [vmem:[%s8899_s8] ss:$0 sm:$0xff] }
 0x608   :  { %5420 = vmatpush.msra.mxu3 %v5294_v21 }
 0x609   :  { %v4831_v26 = vadd.f32 %v4830_v8, %v4778_v2  ;;  %5406 = vmatpush.msra.mxu2 %v5272_v44 }
 0x60a   :  { %5421 = vmatpush.msra.mxu3 %v5293_v53 }
 0x60b   :  { %v4844_v29 = vmax.f32 %v4831_v26, 0.0  ;;  %5407 = vmatpush.msra.mxu2 %v5271_v5  ;;  %v5494_v26 = vld [vmem:[%s8898_s7 + $0x38] sm:$0xff] }
 0x60c   :  { %5422 = vmatpush.msra.mxu3 %v5292_v25 }
 0x60d   :  { %4858 = vst.msk [vmem:[#allocation4 + $0x58] sm:$0x3] %vm4857_vm10, %v4844_v29  ;;  %5408 = vmatpush.msra.mxu2 %v5270_v19  ;;  %v5493_v29 = vld [vmem:[%s8898_s7 + $0x30] sm:$0xff] }
 0x60e   :  { %5423 = vmatpush.msra.mxu3 %v5291_v38 }
 0x60f   :  { %5445 = vmatpush.msrb.mxu2 %v5305_v30 }
 0x610   :  { %5424 = vmatpush.msra.mxu3 %v5290_v18 }
 0x611   :  { %5446 = vmatpush.msrb.mxu2 %v5304_v42 }
 0x612   :  { %5425 = vmatpush.msra.mxu3 %v5289_v7 }
 0x613   :  { %5447 = vmatpush.msrb.mxu2 %v5303_v35 }
 0x614   :  { %v5194_v4 = vld [vmem:[#allocation4 + $0x55] ss:$2 sm:$0x7]  ;;  %v5186_v27 = vld [vmem:[#allocation4 + $0x54] ss:$2 sm:$0x7]  ;;  %5426 = vmatpush.msra.mxu3 %v5288_v16 }
 0x615   :  { %v5196_v48 = vrot.slane %v5194_v4, 5  ;;  %v5188_v62 = vrot.slane %v5186_v27, 5  ;;  %5448 = vmatpush.msrb.mxu2 %v5302_v22  ;;  %v5521_v4 = vld [vmem:[%s8898_s7 + $0x40] sm:$0xff] }
 0x616   :  { %5427 = vmatpush.msra.mxu3 %v5287_v36 }
 0x617   :  { %5198 = vst.msk [vmem:[#allocation5 + $0x30] sm:$0x38] %vm5014_vm13, %v5196_v48  ;;  %5189 = vrot.lane.b32.xlu2 %v5188_v62, %s5730_s30  ;;  %vm5454_vm13 = vcmask 259072  }
 0x618   :  { %5428 = vmatpush.msra.mxu3 %v5286_v60 }
 0x619   :  { %v5144_v52 = vpop.permute.xlu1 %5143 }
 0x61a   :  { %v5130_v55 = vpop.permute.xlu0 %5129  ;;  %5146 = vst.msk [vmem:[#allocation5 + $0x20] sm:$0x38] %vm5023_vm15, %v5144_v52 }
 0x61b   :  { %5132 = vst.msk [vmem:[#allocation5 + $0x18] sm:$0x38] %vm5041_vm12, %v5130_v55 }
 0x61c   :  { %v5330_v45 = vpop.f32.mrf.mxu2 }
 0x61d   :  { %v5331_v27 = vadd.f32 %v5693_v31, %v5330_v45 }
 0x61e   :  { %v5205_v28 = vld [vmem:[#allocation5 + $0x30] sm:$0x3f] }
 0x621   :  { %v4979_v1 = vpop.permute.xlu1 %4978 }
 0x622   :  { %v5152_v34 = vpop.permute.xlu0 %5151  ;;  %4981 = vst.msk [vmem:[#allocation5 + $0x20] sm:$0x7] %vm4884_vm2, %v4979_v1  ;;  %v5202_v61 = vld [vmem:[#allocation5 + $0x18] sm:$0x3f] }
 0x623   :  { %5154 = vst.msk [vmem:[#allocation5 + $0x20] sm:$0x38] %vm5032_vm5, %v5152_v34  ;;  %5389 = vmatmul.f32.vlgmr.msrb.gmra.mxu3 %v5202_v61 }
 0x624   :  { %5480 = vmatpush.msrb.mxu3 %v5464_v20 }
 0x626   :  { %5481 = vmatpush.msrb.mxu3 %v5463_v51 }
 0x628   :  { %5482 = vmatpush.msrb.mxu3 %v5462_v50 }
 0x62a   :  { %v4989_v47 = vpop.permute.xlu0 %4988  ;;  %5483 = vmatpush.msrb.mxu3 %v5461_v33 }
 0x62b   :  { %4991 = vst.msk [vmem:[#allocation5 + $0x28] sm:$0x7] %vm4868_vm11, %v4989_v47 }
 0x652   :  { %v5160_v49 = vpop.permute.xlu2 %5159 }
 0x653   :  { %5162 = vst.msk [vmem:[#allocation5 + $0x20] sm:$0x38] %vm5041_vm12, %v5160_v49 }
 0x65a   :  { %v4996_v10 = vpop.permute.xlu2 %4995  ;;  %v5203_v9 = vld [vmem:[#allocation5 + $0x20] sm:$0x3f] }
 0x65b   :  { %4998 = vst.msk [vmem:[#allocation5 + $0x28] sm:$0x7] %vm4876_vm6, %v4996_v10  ;;  %5409 = vmatmul.f32.vlgmr.msra.gmra.mxu2 %v5203_v9 }
 0x65c   :  { %5510 = vmatpush.msra.mxu2 %v5494_v26 }
 0x65e   :  { %5511 = vmatpush.msra.mxu2 %v5493_v29 }
 0x660   :  { %5512 = vmatpush.msra.mxu2 %v5492_v59 }
 0x662   :  { %5513 = vmatpush.msra.mxu2 %v5491_v6 }
 0x663   :  { %5649 = vmatmul.msk.f32.vlgmr.msrb.gmra.mxu2 %vm4845_vm0, %v5205_v28 }
 0x664   :  { %v5350_v14 = vpop.f32.mrf.mxu3 }
 0x665   :  { %v5351_v37 = vadd.f32 %v5350_v14, %v5331_v27 }
 0x669   :  { %v5174_v11 = vpop.permute.xlu1 %5173 }
 0x66a   :  { %5176 = vst.msk [vmem:[#allocation5 + $0x28] sm:$0x38] %vm5023_vm15, %v5174_v11 }
 0x66b   :  { %v5182_v56 = vpop.permute.xlu0 %5181 }
 0x66c   :  { %5184 = vst.msk [vmem:[#allocation5 + $0x28] sm:$0x38] %vm5032_vm5, %v5182_v56 }
 0x671   :  { %v5003_v41 = vpop.permute.xlu1 %5002  ;;  %v5190_v2 = vpop.permute.xlu2 %5189 }
 0x672   :  { %5005 = vst.msk [vmem:[#allocation5 + $0x28] sm:$0x7] %vm4884_vm2, %v5003_v41 }
 0x673   :  { %5192 = vst.msk [vmem:[#allocation5 + $0x28] sm:$0x38] %vm5041_vm12, %v5190_v2 }
 0x67a   :  { %v5204_v8 = vld [vmem:[#allocation5 + $0x28] sm:$0x3f] }
 0x67b   :  { %5429 = vmatmul.f32.vlgmr.msra.gmra.mxu3 %v5204_v8 }
 0x67c   :  { %5540 = vmatpush.msra.mxu3 %v5524_v12 }
 0x67e   :  { %5541 = vmatpush.msra.mxu3 %v5523_v58 }
 0x680   :  { %5542 = vmatpush.msra.mxu3 %v5522_v43 }
 0x681   :  { %v5370_v17 = vpop.f32.mrf.mxu2 }
 0x682   :  { %5543 = vmatpush.msra.mxu3 %v5521_v4  ;;  %v5371_v54 = vadd.f32 %v5370_v17, %v5351_v37 }
 0x6a6   :  { %v5390_v48 = vpop.f32.mrf.mxu3 }
 0x6a7   :  { %v5391_v32 = vadd.f32 %v5390_v48, %v5371_v54 }
 0x6de   :  { %v5410_v62 = vpop.f32.mrf.mxu2 }
 0x6df   :  { %v5411_v52 = vadd.f32 %v5410_v62, %v5391_v32 }
 0x6e6   :  { %v5450_v3 = vpop.f32.mrf.mxu2 }
 0x6fe   :  { %v5430_v55 = vpop.f32.mrf.mxu3 }
 0x6ff   :  { %v5431_v13 = vadd.f32 %v5430_v55, %v5411_v52 }
 0x701   :  { %v5451_v1 = vadd.f32 %v5450_v3, %v5431_v13 }
 0x703   :  { %v5453_v34 = vmax.f32 %v5451_v1, 0.0 }
 0x705   :  { %5455 = vst.msk [vmem:[#allocation6] sm:$0x3f] %vm5454_vm13, %v5453_v34 }
 0x70c   :  { %v5460_v61 = vld [vmem:[#allocation6] ss:$3 sm:$0x3]  ;;  %v5490_v47 = vld [vmem:[#allocation6 + $0x1] ss:$3 sm:$0x3] }
 0x70d   :  { %5650 = vmatmul.msk.f32.vlgmr.msrb.gmra.mxu3 %vm4845_vm0, %v5460_v61  ;;  %5651 = vmatmul.msk.f32.vlgmr.msra.gmra.mxu2 %vm4845_vm0, %v5490_v47  ;;  %v5520_v39 = vld [vmem:[#allocation6 + $0x2] ss:$3 sm:$0x3] }
 0x715   :  { %5652 = vmatmul.msk.f32.vlgmr.msra.gmra.mxu3 %vm4845_vm0, %v5520_v39 }
 0x790   :  { %v5485_v44 = vpop.f32.mrf.mxu3  ;;  %v5515_v19 = vpop.f32.mrf.mxu2 }
 0x791   :  { %v5488_v5 = vadd.f32 %v5694_v40, %v5485_v44 }
 0x793   :  { %v5518_v30 = vadd.f32 %v5515_v19, %v5488_v5 }
 0x798   :  { %v5545_v24 = vpop.f32.mrf.mxu3 }
 0x799   :  { %v5548_v42 = vadd.f32 %v5545_v24, %v5518_v30 }
 0x79b   :  { %5550 = vst.msk [vmem:[#allocation7] sm:$0x3] %vm5549_vm8, %v5548_v42 }
 0x79c   :  { %5561 = dma.vmem_to_hbm [thread:$0]  %s5557_s5, 32, %s5559_s1, [#allocation8]  }
 0x79d   :  { %5723 = dma.done.wait [#allocation8], 32  }
 0x79e   :  { %5724 = vsyncadd [#allocation8], 4294967264 }
 0x79f   :  { %5566 = vsyncpa [#allocation8], 1 }

</bundles_post_ra>
